<compile_context>
chip_gen: v6e
topology: v6e:2x2x1
jax: 0.10.0
libtpu: 0.0.40
codegen_flags: <defaults>
</compile_context>

<pallas_src>
import functools

import jax
import jax.numpy as jnp
import numpy as np
from jax import lax
from jax.experimental import pallas as pl
from jax.experimental.pallas import tpu as pltpu

C_FEAT = 512
KSIZE = 3
K27 = KSIZE ** 3          # 27 kernel offsets of a 3x3x3 conv
K27_PAD = 32              # sublane-pad the 27 offsets to a multiple of 8


# --------------------------------------------------------------------------- #
# Pallas kernel: conv1 (as matmul) + ReLU + pool + folded conv2/FC head, fused
# --------------------------------------------------------------------------- #
def _fused_conv_head_kernel(p_ref, w_ref, b_ref, a_ref, wh_ref, o_ref, acc_ref):
    """Grid (Cout-block j, K-block k): accumulate patches @ w1; on the last K step
    apply bias+ReLU, pool via the precomputed A matrix and emit this Cout block's
    partial contribution to the folded conv2+pool+Linear head."""
    k = pl.program_id(1)

    @pl.when(k == 0)
    def _():
        acc_ref[...] = jnp.zeros_like(acc_ref)

    acc_ref[...] += jnp.dot(p_ref[...], w_ref[...],
                            preferred_element_type=jnp.float32)

    @pl.when(k == pl.num_programs(1) - 1)
    def _():
        # conv1 output (post-ReLU) for this Cout block: [P1, tn] f32
        y = jnp.maximum(acc_ref[...] + b_ref[...], 0.0)
        # AdaptiveAvgPool3d((1,1,1)) commutes with the linear conv2: pooled patch
        # means are a fixed linear map A of the conv1 voxels.  [K27_PAD, tn]
        pooled = jnp.dot(a_ref[...], y, preferred_element_type=jnp.float32)
        # Compact folded head weight [n_pad, K27_PAD, tn]: VPU multiply + reduce
        # (no lane-padded MXU GEMV, no 92%-zero weight stream).
        prod = wh_ref[...].astype(jnp.float32) * pooled[None, :, :]
        t = jnp.sum(prod, axis=-1)                       # [n_pad, K27_PAD]
        partial = jnp.sum(t, axis=-1, keepdims=True)     # [n_pad, 1]
        o_ref[...] = partial[None].astype(o_ref.dtype)   # [1, n_pad, 1]


def fused_conv_head(patches, w1, b1, a_mat, wh3, *, tn, tk):
    """relu(patches @ w1 + b1) -> pool(A) -> folded head, one pallas_call."""
    P, K = patches.shape
    Kw, Cout = w1.shape
    n_pad, k27p, cin_w = wh3.shape
    assert K == Kw and K % tk == 0 and Cout % tn == 0
    assert a_mat.shape == (k27p, P) and cin_w == Cout
    nj, nk = Cout // tn, K // tk
    return pl.pallas_call(
        _fused_conv_head_kernel,
        out_shape=jax.ShapeDtypeStruct((nj, n_pad, 1), jnp.float32),
        grid_spec=pltpu.PrefetchScalarGridSpec(
            num_scalar_prefetch=0,
            grid=(nj, nk),
            in_specs=[
                pl.BlockSpec((P, tk), lambda j, k: (0, k)),
                pl.BlockSpec((tk, tn), lambda j, k: (k, j)),
                pl.BlockSpec((1, tn), lambda j, k: (0, j)),
                pl.BlockSpec((k27p, P), lambda j, k: (0, 0)),
                pl.BlockSpec((n_pad, k27p, tn), lambda j, k: (0, 0, j)),
            ],
            out_specs=pl.BlockSpec((1, n_pad, 1), lambda j, k: (j, 0, 0)),
            scratch_shapes=[pltpu.VMEM((P, tn), jnp.float32)],
        ),
        compiler_params=pltpu.CompilerParams(
            dimension_semantics=("parallel", "arbitrary"),
            vmem_limit_bytes=32 * 1024 * 1024),
    )(patches, w1, b1, a_mat, wh3)


def _select_tiles(cout, k_total):
    """Generation-dependent tiles: v7x gets 2 parallel Cout blocks (one per TC) and a
    single K step; single-TC chips get one Cout block (v6e 2 K steps, v5e 3)."""
    kind = jax.devices()[0].device_kind.lower()
    if "v7" in kind or "7x" in kind:
        tn, tk = min(256, cout), k_total            # grid (2, 1): ~18 MB VMEM/TC
    elif "v6" in kind:
        tn, tk = cout, k_total // 2                 # grid (1, 2): ~18 MB VMEM
    else:                                            # v5e / unknown
        tn, tk = cout, k_total // 3                 # grid (1, 3): ~13 MB VMEM
    assert cout % tn == 0 and k_total % tk == 0 and tk % 128 == 0
    return tn, tk


# --------------------------------------------------------------------------- #
# Glue (plain JAX): parameter re-layout/fold and the forward wrapper
# --------------------------------------------------------------------------- #
def prepare_params(w1, b1, w2, b2, w_fc, b_fc, *, slices, feat_hw=14):
    """Re-layout / fold the PyTorch-style parameters ONCE, outside jit.

    * conv1 weight -> [Cin*27, Cout] bf16 (patch-matrix layout, half the HBM bytes).
    * conv2 + AdaptiveAvgPool3d((1,1,1)) + Linear are all linear with no ReLU between
      them: W_head = W2_mat @ W_fc.T, b_head = b2 @ W_fc.T + b_fc.  The head weight is
      stored COMPACT as [n_pad, 27_pad, Cin] bf16 (not lane-padded to 128 columns).
    * A[k27, voxel] is the fixed pooling matrix (mean over conv2 output voxels of the
      stride-3 patch selection of the conv1 output).
    """
    cout, cin = int(w1.shape[0]), int(w1.shape[1])
    n_out = int(w_fc.shape[0])
    k_total = cin * K27

    wm1 = jnp.asarray(w1, jnp.float32).reshape(cout, k_total).T           # [K, Cout]
    wm2 = jnp.asarray(w2, jnp.float32).reshape(cout, k_total).T           # [K, Cout]
    w_fc32 = jnp.asarray(w_fc, jnp.float32)
    w_folded = np.asarray(wm2 @ w_fc32.T)                                  # [K, n_out]
    b_folded = np.asarray(jnp.asarray(b2, jnp.float32) @ w_fc32.T
                          + jnp.asarray(b_fc, jnp.float32))                # [n_out]

    n_pad = max(8, ((n_out + 7) // 8) * 8)
    wh3 = np.zeros((n_pad, K27_PAD, cin), np.float32)
    wh3[:n_out, :K27, :] = w_folded.reshape(cin, K27, n_out).transpose(2, 1, 0)
    b_head = np.zeros((n_pad,), np.float32)
    b_head[:n_out] = b_folded

    # Pooling matrix over conv1-output voxels.
    d1 = (slices - KSIZE) // KSIZE + 1
    h1 = (feat_hw - KSIZE) // KSIZE + 1
    w1s = h1
    assert d1 >= KSIZE and h1 >= KSIZE, "need slices >= 9 for the two stride-3 convs"
    do2 = (d1 - KSIZE) // KSIZE + 1
    ho2 = (h1 - KSIZE) // KSIZE + 1
    wo2 = (w1s - KSIZE) // KSIZE + 1
    p2 = do2 * ho2 * wo2
    a_mat = np.zeros((K27_PAD, d1 * h1 * w1s), np.float32)
    for od in range(do2):
        for oh in range(ho2):
            for ow in range(wo2):
                for kd in range(KSIZE):
                    for kh in range(KSIZE):
                        for kw in range(KSIZE):
                            row = ((KSIZE * od + kd) * h1 + (KSIZE * oh + kh)) * w1s \
                                  + (KSIZE * ow + kw)
                            a_mat[kd * 9 + kh * 3 + kw, row] += 1.0 / p2

    return dict(
        w1=wm1.astype(jnp.bfloat16),
        b1=jnp.asarray(b1, jnp.float32).reshape(1, cout),
        a_mat=jnp.asarray(a_mat, jnp.float32),
        wh3=jnp.asarray(wh3, jnp.bfloat16),
        b_head=jnp.asarray(b_head, jnp.float32),
    )


@functools.partial(jax.jit, static_argnames=("n_out",))
def body_conv_bigger_forward(feats, prep, *, n_out):
    """reducingconvs -> AdaptiveAvgPool3d((1,1,1)) -> flatten -> Linear.

    feats: [S, 512, 14, 14] ResNet18 per-slice feature maps (x after self.features)."""
    S, C, H, W = feats.shape
    k = KSIZE
    do, ho, wo = (S - k) // k + 1, (H - k) // k + 1, (W - k) // k + 1

    # Build the conv1 patch matrix with ONE transpose directly from [S, C, H, W]
    # (the PyTorch NCDHW volume is vol[c, d, h, w] = feats[d, c, h, w]); bf16 for MXU.
    x = feats.astype(jnp.bfloat16)[:do * k, :, :ho * k, :wo * k]
    x = x.reshape(do, k, C, ho, k, wo, k).transpose(0, 3, 5, 2, 1, 4, 6)
    patches = x.reshape(do * ho * wo, C * K27)                    # [P1, Cin*27]

    cout = prep["w1"].shape[1]
    tn, tk = _select_tiles(cout, C * K27)

    # conv1+ReLU+pool+folded head, fused in one kernel. partials: [nj, n_pad, 1]
    partials = fused_conv_head(patches, prep["w1"], prep["b1"],
                               prep["a_mat"], prep["wh3"], tn=tn, tk=tk)
    head = jnp.sum(partials[:, :, 0], axis=0) + prep["b_head"]    # [n_pad]
    return head[None, :n_out]                                     # [1, n_out]


def reference_forward(feats, params):
    """Pure-JAX f32 reference for correctness checking."""
    w1, b1, w2, b2, w_fc, b_fc = params
    dn = ("NCDHW", "OIDHW", "NCDHW")
    x = jnp.transpose(feats, (1, 0, 2, 3))[None]    # [1, 512, S, 14, 14]
    y = lax.conv_general_dilated(x, w1, (3, 3, 3), "VALID", dimension_numbers=dn)
    y = jnp.maximum(y + b1[None, :, None, None, None], 0.0)
    y = lax.conv_general_dilated(y, w2, (3, 3, 3), "VALID", dimension_numbers=dn)
    y = y + b2[None, :, None, None, None]
    pooled = jnp.mean(y, axis=(2, 3, 4))            # [1, 512]
    return pooled @ w_fc.T + b_fc[None, :]


# --------------------------------------------------------------------------- #
if __name__ == "__main__":
    S = 9            # slices; reducingconvs (two k=3, s=3 convs on depth) need S >= 9
    n_outputs = 10

    key = jax.random.PRNGKey(0)
    kf, k1, k2, k3, k4, k5, k6 = jax.random.split(key, 7)

    # TODO(synk): the pretrained torchvision ResNet18 backbone (self.features) is not
    # reproduced (checkpoint loading is disallowed); `feats` stands in for its
    # [S, 512, 14, 14] output on the nominal [1, S, 3, 420, 420] input.
    feats = jax.random.normal(kf, (S, C_FEAT, 14, 14), jnp.float32)

    w1 = 0.02 * jax.random.normal(k1, (C_FEAT, C_FEAT, 3, 3, 3), jnp.float32)
    b1 = 0.02 * jax.random.normal(k2, (C_FEAT,), jnp.float32)
    w2 = 0.02 * jax.random.normal(k3, (C_FEAT, C_FEAT, 3, 3, 3), jnp.float32)
    b2 = 0.02 * jax.random.normal(k4, (C_FEAT,), jnp.float32)
    w_fc = 0.02 * jax.random.normal(k5, (n_outputs, C_FEAT), jnp.float32)
    b_fc = 0.02 * jax.random.normal(k6, (n_outputs,), jnp.float32)
    raw_params = (w1, b1, w2, b2, w_fc, b_fc)

    # One-time parameter re-layout / folding (outside jit).
    prep = prepare_params(*raw_params, slices=S, feat_hw=14)

    out = jax.block_until_ready(
        body_conv_bigger_forward(feats, prep, n_out=n_outputs))
    assert out.shape == (1, n_outputs)

    ref = jax.block_until_ready(reference_forward(feats, raw_params))
    np.testing.assert_allclose(np.asarray(out), np.asarray(ref), rtol=5e-2, atol=5e-2)

    print("KERNEL_OK")
</pallas_src>

<mosaic_0001>
module attributes {stable_mosaic.version = 11 : i64} {
  func.func @_fused_conv_head_kernel(%arg0: i32, %arg1: i32, %arg2: memref<48x4608xbf16, #tpu.memory_space<vmem>>, %arg3: memref<4608x512xbf16, #tpu.memory_space<vmem>>, %arg4: memref<1x512xf32, #tpu.memory_space<vmem>>, %arg5: memref<32x48xf32, #tpu.memory_space<vmem>>, %arg6: memref<16x32x512xbf16, #tpu.memory_space<vmem>>, %arg7: memref<1x16x1xf32, #tpu.memory_space<vmem>>, %arg8: memref<48x512xf32, #tpu.memory_space<vmem>>) attributes {dimension_semantics = [#tpu.dimension_semantics<parallel>, #tpu.dimension_semantics<arbitrary>], iteration_bounds = array<i64: 1, 3>, scalar_prefetch = 0 : i64, scratch_operands = 1 : i64, tpu.core_type = #tpu.core_type<tc>, window_params = [{transform_indices = @transform_0, window_bounds = array<i64: 48, 4608>}, {transform_indices = @transform_1, window_bounds = array<i64: 4608, 512>}, {transform_indices = @transform_2, window_bounds = array<i64: 1, 512>}, {pipeline_mode = #tpu.pipeline_mode<synchronous>, transform_indices = @transform_3, window_bounds = array<i64: 32, 48>}, {transform_indices = @transform_4, window_bounds = array<i64: 16, 32, 512>}, {transform_indices = @transform_5, window_bounds = array<i64: 1, 16, 1>}]} {
    %c0_i32 = arith.constant 0 : i32
    %0 = arith.cmpi eq, %arg1, %c0_i32 : i32
    %1 = arith.extui %0 : i1 to i32
    %c0_i32_0 = arith.constant 0 : i32
    %2 = arith.cmpi ne, %1, %c0_i32_0 : i32
    scf.if %2 {
      %cst_9 = arith.constant 0.000000e+00 : f32
      %12 = vector.broadcast %cst_9 : f32 to vector<48x512xf32>
      %c0_10 = arith.constant 0 : index
      %c0_11 = arith.constant 0 : index
      %13 = vector.load %arg8[%c0_10, %c0_11] : memref<48x512xf32, #tpu.memory_space<vmem>>, vector<48x512xf32>
      tpu.vector_store %arg8[%c0_10, %c0_11], %12 {strides = array<i32>} : memref<48x512xf32, #tpu.memory_space<vmem>>, vector<48x512xf32>,
    } else {
    }
    %c0 = arith.constant 0 : index
    %c0_1 = arith.constant 0 : index
    %3 = vector.load %arg8[%c0, %c0_1] : memref<48x512xf32, #tpu.memory_space<vmem>>, vector<48x512xf32>
    %c0_2 = arith.constant 0 : index
    %c0_3 = arith.constant 0 : index
    %4 = vector.load %arg2[%c0_2, %c0_3] : memref<48x4608xbf16, #tpu.memory_space<vmem>>, vector<48x4608xbf16>
    %c0_4 = arith.constant 0 : index
    %c0_5 = arith.constant 0 : index
    %5 = vector.load %arg3[%c0_4, %c0_5] : memref<4608x512xbf16, #tpu.memory_space<vmem>>, vector<4608x512xbf16>
    %cst = arith.constant dense<0.000000e+00> : vector<48x512xf32>
    %6 = tpu.matmul %4, %5, %cst {dimension_numbers = #tpu.dot_dimension_numbers<[1], [0], [0], [1], [0, 0, 1, 1], [], []>} : vector<48x4608xbf16>, vector<4608x512xbf16>, vector<48x512xf32> -> vector<48x512xf32>
    %7 = arith.addf %3, %6 : vector<48x512xf32>
    %c0_6 = arith.constant 0 : index
    %c0_7 = arith.constant 0 : index
    %8 = vector.load %arg8[%c0_6, %c0_7] : memref<48x512xf32, #tpu.memory_space<vmem>>, vector<48x512xf32>
    tpu.vector_store %arg8[%c0_6, %c0_7], %7 {strides = array<i32>} : memref<48x512xf32, #tpu.memory_space<vmem>>, vector<48x512xf32>,
    %c2_i32 = arith.constant 2 : i32
    %9 = arith.cmpi eq, %arg1, %c2_i32 : i32
    %10 = arith.extui %9 : i1 to i32
    %c0_i32_8 = arith.constant 0 : i32
    %11 = arith.cmpi ne, %10, %c0_i32_8 : i32
    scf.if %11 {
      %c0_9 = arith.constant 0 : index
      %c0_10 = arith.constant 0 : index
      %12 = vector.load %arg8[%c0_9, %c0_10] : memref<48x512xf32, #tpu.memory_space<vmem>>, vector<48x512xf32>
      %c0_11 = arith.constant 0 : index
      %c0_12 = arith.constant 0 : index
      %13 = vector.load %arg4[%c0_11, %c0_12] : memref<1x512xf32, #tpu.memory_space<vmem>>, vector<1x512xf32>
      %14 = vector.broadcast %13 : vector<1x512xf32> to vector<48x512xf32>
      %15 = arith.addf %12, %14 : vector<48x512xf32>
      %cst_13 = arith.constant 0.000000e+00 : f32
      %16 = vector.broadcast %cst_13 : f32 to vector<48x512xf32>
      %17 = arith.maximumf %15, %16 : vector<48x512xf32>
      %c0_14 = arith.constant 0 : index
      %c0_15 = arith.constant 0 : index
      %18 = vector.load %arg5[%c0_14, %c0_15] : memref<32x48xf32, #tpu.memory_space<vmem>>, vector<32x48xf32>
      %cst_16 = arith.constant dense<0.000000e+00> : vector<32x512xf32>
      %19 = tpu.matmul %18, %17, %cst_16 {dimension_numbers = #tpu.dot_dimension_numbers<[1], [0], [0], [1], [0, 0, 1, 1], [], []>} : vector<32x48xf32>, vector<48x512xf32>, vector<32x512xf32> -> vector<32x512xf32>
      %c0_17 = arith.constant 0 : index
      %c0_18 = arith.constant 0 : index
      %c0_19 = arith.constant 0 : index
      %20 = vector.load %arg6[%c0_17, %c0_18, %c0_19] : memref<16x32x512xbf16, #tpu.memory_space<vmem>>, vector<16x32x512xbf16>
      %21 = arith.extf %20 : vector<16x32x512xbf16> to vector<16x32x512xf32>
      %22 = vector.shape_cast %19 : vector<32x512xf32> to vector<1x32x512xf32>
      %23 = vector.broadcast %22 : vector<1x32x512xf32> to vector<16x32x512xf32>
      %24 = arith.mulf %21, %23 : vector<16x32x512xf32>
      %cst_20 = arith.constant dense<0.000000e+00> : vector<16x32xf32>
      %25 = vector.multi_reduction <add>, %24, %cst_20 [2] : vector<16x32x512xf32> to vector<16x32xf32>
      %cst_21 = arith.constant dense<0.000000e+00> : vector<16xf32>
      %26 = vector.multi_reduction <add>, %25, %cst_21 [1] : vector<16x32xf32> to vector<16xf32>
      %27 = vector.shape_cast %26 : vector<16xf32> to vector<16x1xf32>
      %28 = vector.shape_cast %27 : vector<16x1xf32> to vector<1x16x1xf32>
      %c0_22 = arith.constant 0 : index
      %c0_23 = arith.constant 0 : index
      %c0_24 = arith.constant 0 : index
      %29 = vector.load %arg7[%c0_22, %c0_23, %c0_24] : memref<1x16x1xf32, #tpu.memory_space<vmem>>, vector<1x16x1xf32>
      tpu.vector_store %arg7[%c0_22, %c0_23, %c0_24], %28 {strides = array<i32>} : memref<1x16x1xf32, #tpu.memory_space<vmem>>, vector<1x16x1xf32>,
    } else {
    }
    return
  }
  func.func @transform_0(%arg0: i32, %arg1: i32) -> (i32, i32) {
    %c0_i32 = arith.constant 0 : i32
    %c0_i32_0 = arith.constant 0 : i32
    return %c0_i32, %arg1 : i32, i32
  }
  func.func @transform_1(%arg0: i32, %arg1: i32) -> (i32, i32) {
    %c0_i32 = arith.constant 0 : i32
    return %arg1, %arg0 : i32, i32
  }
  func.func @transform_2(%arg0: i32, %arg1: i32) -> (i32, i32) {
    %c0_i32 = arith.constant 0 : i32
    %c0_i32_0 = arith.constant 0 : i32
    return %c0_i32, %arg0 : i32, i32
  }
  func.func @transform_3(%arg0: i32, %arg1: i32) -> (i32, i32) {
    %c0_i32 = arith.constant 0 : i32
    %c0_i32_0 = arith.constant 0 : i32
    %c0_i32_1 = arith.constant 0 : i32
    return %c0_i32, %c0_i32_0 : i32, i32
  }
  func.func @transform_4(%arg0: i32, %arg1: i32) -> (i32, i32, i32) {
    %c0_i32 = arith.constant 0 : i32
    %c0_i32_0 = arith.constant 0 : i32
    %c0_i32_1 = arith.constant 0 : i32
    return %c0_i32, %c0_i32_0, %arg0 : i32, i32, i32
  }
  func.func @transform_5(%arg0: i32, %arg1: i32) -> (i32, i32, i32) {
    %c0_i32 = arith.constant 0 : i32
    %c0_i32_0 = arith.constant 0 : i32
    %c0_i32_1 = arith.constant 0 : i32
    return %arg0, %c0_i32, %c0_i32_0 : i32, i32, i32
  }
}

</mosaic_0001>

<bundles_post_ra>
// kernel: body_conv_bigger_forward.1
= control target key start
LH: loop header
LB: loop body
LE: loop exit
PB: predicated region body
PF: predicated region fallthrough
CT: control target
= control target key end

     0   :  { %s15654_s18 = smov 0   ;;  %s15656_s19 = smov 0   ;;  %s20058_s0 = inlined_call_operand.vmem [shape: bf16[48,13824], index: 0, kind: input, shape index: {}]   ;;  %s20059_s1 = inlined_call_operand.vmem [shape: bf16[13824,512], index: 1, kind: input, shape index: {}]   ;;  %s20060_s2 = inlined_call_operand.vmem [shape: f32[1,512], index: 2, kind: input, shape index: {}]   ;;  %s20061_s3 = inlined_call_operand.vmem [shape: f32[32,48], index: 3, kind: input, shape index: {}]   ;;  %s20062_s4 = inlined_call_operand.vmem [shape: bf16[16,32,512], index: 4, kind: input, shape index: {}]   ;;  %s20063_s5 = inlined_call_operand.vmem [shape: f32[1,16,1], index: 5, kind: output, shape index: {}]  }
   0x1   :  { %s15658_s20 = smov 0   ;;  %s15660_s21 = smov 0  }
   0x2   :  { %s15662_s22 = smov 0  }
   0x3 LB: > { %s24_s23 = sadd.s32 1, %s15616_s21  ;;  %p41_p1 = scmp.ne.s32.totalorder %s15608_s19, %s15604_s18  ;;  %s15620_s22 = sphi %s15662_s22, %s15_s22   ;;  %s15616_s21 = sphi %s15660_s21, %s20688_s21   ;;  %s15612_s20 = sphi %s15658_s20, %s20687_s20   ;;  %s15608_s19 = sphi %s15656_s19, %s20686_s19   ;;  %s15604_s18 = sphi %s15654_s18, %s20685_s18  }
   0x4   : > { %p25_p0 = scmp.ge.s32.totalorder %s24_s23, 3  ;;  %p42_p2 = scmp.eq.s32.totalorder %s15620_s22, 0 }
   0x5   : > { %s34_s25 = sadd.s32 1, %s15608_s19  ;;  %p12260_p5 = scmp.ge.s32.totalorder %s15620_s22, 3 }
   0x6   : > { %s20690_s23 = smov (%p25_p0, %s24_s23), 0  ;;  %p43_p3 = por %p42_p2, %p41_p1 }
   0x7   : > { %s31_s24 = ssub.s32 %s15616_s21, %s20690_s23  ;;  %214 = sbr.rel (%p12260_p5) target bundleno = 71 (0x47), region = 28 }
   0x8   : > { %p32_p4 = scmp.eq.s32.totalorder %s31_s24, 0 }
   0xa   : > { %s15689_s26 = scalar_select %p32_p4, %s15608_s19, %s34_s25  }
   0xc   : > { %217 = sbr.rel (!%p43_p3) target bundleno = 71 (0x47), region = 32  ;;  %s219_s27 = sand.u32 (%p43_p3), 1, %s15608_s19  }
   0xd   : > { %s13538_s28 = smul.u32 (%p43_p3), 144, %s15616_s21 }
   0xe   : > { %s13540_s29 = smul.u32 (%p43_p3), 864, %s219_s27 }
   0xf   : > { %s15697_s7 = scalar_lea.vmem (%p43_p3), %s20058_s0, %s13538_s28 }
  0x10   : > { %v237_v0 = vld [vmem:[%s15697_s7] sm:$0xff] (%p43_p3)  ;;  %v239_v1 = vld [vmem:[%s15697_s7 + $0x8] sm:$0xff] (%p43_p3)  ;;  %v241_v2 = vld [vmem:[%s15697_s7 + $0x10] sm:$0xff] (%p43_p3)  ;;  %s15702_s8 = scalar_lea.vmem (%p43_p3), [#allocation3], %s13540_s29 }
  0x11   : > { %238 = vst [vmem:[%s15702_s8] sm:$0xff] %v237_v0  ;;  %240 = vst [vmem:[%s15702_s8 + $0x8] sm:$0xff] %v239_v1  ;;  %v243_v3 = vld [vmem:[%s15697_s7 + $0x18] sm:$0xff]  ;;  %v245_v4 = vld [vmem:[%s15697_s7 + $0x20] sm:$0xff] }
  0x12   : > { %242 = vst [vmem:[%s15702_s8 + $0x10] sm:$0xff] %v241_v2  ;;  %v247_v5 = vld [vmem:[%s15697_s7 + $0x28] sm:$0xff]  ;;  %244 = vst [vmem:[%s15702_s8 + $0x18] sm:$0xff] %v243_v3  ;;  %v249_v6 = vld [vmem:[%s15697_s7 + $0x30] sm:$0xff] }
  0x13   : > { %246 = vst [vmem:[%s15702_s8 + $0x20] sm:$0xff] %v245_v4  ;;  %248 = vst [vmem:[%s15702_s8 + $0x28] sm:$0xff] %v247_v5  ;;  %v251_v7 = vld [vmem:[%s15697_s7 + $0x38] sm:$0xff]  ;;  %v253_v8 = vld [vmem:[%s15697_s7 + $0x40] sm:$0xff] }
  0x14   : > { %250 = vst [vmem:[%s15702_s8 + $0x30] sm:$0xff] %v249_v6  ;;  %252 = vst [vmem:[%s15702_s8 + $0x38] sm:$0xff] %v251_v7  ;;  %v255_v9 = vld [vmem:[%s15697_s7 + $0x48] sm:$0xff]  ;;  %v257_v10 = vld [vmem:[%s15697_s7 + $0x50] sm:$0xff] }
  0x15   : > { %254 = vst [vmem:[%s15702_s8 + $0x40] sm:$0xff] %v253_v8  ;;  %v259_v11 = vld [vmem:[%s15697_s7 + $0x58] sm:$0xff]  ;;  %256 = vst [vmem:[%s15702_s8 + $0x48] sm:$0xff] %v255_v9  ;;  %v261_v12 = vld [vmem:[%s15697_s7 + $0x60] sm:$0xff] }
  0x16   : > { %258 = vst [vmem:[%s15702_s8 + $0x50] sm:$0xff] %v257_v10  ;;  %260 = vst [vmem:[%s15702_s8 + $0x58] sm:$0xff] %v259_v11  ;;  %v263_v13 = vld [vmem:[%s15697_s7 + $0x68] sm:$0xff]  ;;  %v265_v14 = vld [vmem:[%s15697_s7 + $0x70] sm:$0xff] }
  0x17   : > { %262 = vst [vmem:[%s15702_s8 + $0x60] sm:$0xff] %v261_v12  ;;  %264 = vst [vmem:[%s15702_s8 + $0x68] sm:$0xff] %v263_v13  ;;  %v267_v15 = vld [vmem:[%s15697_s7 + $0x78] sm:$0xff]  ;;  %v269_v16 = vld [vmem:[%s15697_s7 + $0x80] sm:$0xff] }
  0x18   : > { %266 = vst [vmem:[%s15702_s8 + $0x70] sm:$0xff] %v265_v14  ;;  %v271_v17 = vld [vmem:[%s15697_s7 + $0x88] sm:$0xff]  ;;  %268 = vst [vmem:[%s15702_s8 + $0x78] sm:$0xff] %v267_v15  ;;  %v273_v18 = vld [vmem:[%s15697_s7 + $0x1b0] sm:$0xff] }
  0x19   : > { %270 = vst [vmem:[%s15702_s8 + $0x80] sm:$0xff] %v269_v16  ;;  %272 = vst [vmem:[%s15702_s8 + $0x88] sm:$0xff] %v271_v17  ;;  %v275_v19 = vld [vmem:[%s15697_s7 + $0x1b8] sm:$0xff]  ;;  %v277_v20 = vld [vmem:[%s15697_s7 + $0x1c0] sm:$0xff] }
  0x1a   : > { %274 = vst [vmem:[%s15702_s8 + $0x90] sm:$0xff] %v273_v18  ;;  %276 = vst [vmem:[%s15702_s8 + $0x98] sm:$0xff] %v275_v19  ;;  %v279_v21 = vld [vmem:[%s15697_s7 + $0x1c8] sm:$0xff]  ;;  %v281_v22 = vld [vmem:[%s15697_s7 + $0x1d0] sm:$0xff] }
  0x1b   : > { %278 = vst [vmem:[%s15702_s8 + $0xa0] sm:$0xff] %v277_v20  ;;  %v283_v23 = vld [vmem:[%s15697_s7 + $0x1d8] sm:$0xff]  ;;  %280 = vst [vmem:[%s15702_s8 + $0xa8] sm:$0xff] %v279_v21  ;;  %v285_v24 = vld [vmem:[%s15697_s7 + $0x1e0] sm:$0xff] }
  0x1c   : > { %282 = vst [vmem:[%s15702_s8 + $0xb0] sm:$0xff] %v281_v22  ;;  %284 = vst [vmem:[%s15702_s8 + $0xb8] sm:$0xff] %v283_v23  ;;  %v287_v25 = vld [vmem:[%s15697_s7 + $0x1e8] sm:$0xff]  ;;  %v289_v26 = vld [vmem:[%s15697_s7 + $0x1f0] sm:$0xff] }
  0x1d   : > { %286 = vst [vmem:[%s15702_s8 + $0xc0] sm:$0xff] %v285_v24  ;;  %288 = vst [vmem:[%s15702_s8 + $0xc8] sm:$0xff] %v287_v25  ;;  %v291_v27 = vld [vmem:[%s15697_s7 + $0x1f8] sm:$0xff]  ;;  %v293_v28 = vld [vmem:[%s15697_s7 + $0x200] sm:$0xff] }
  0x1e   : > { %290 = vst [vmem:[%s15702_s8 + $0xd0] sm:$0xff] %v289_v26  ;;  %v295_v29 = vld [vmem:[%s15697_s7 + $0x208] sm:$0xff]  ;;  %292 = vst [vmem:[%s15702_s8 + $0xd8] sm:$0xff] %v291_v27  ;;  %v297_v30 = vld [vmem:[%s15697_s7 + $0x210] sm:$0xff] }
  0x1f   : > { %294 = vst [vmem:[%s15702_s8 + $0xe0] sm:$0xff] %v293_v28  ;;  %296 = vst [vmem:[%s15702_s8 + $0xe8] sm:$0xff] %v295_v29  ;;  %v299_v31 = vld [vmem:[%s15697_s7 + $0x218] sm:$0xff]  ;;  %v301_v32 = vld [vmem:[%s15697_s7 + $0x220] sm:$0xff] }
  0x20   : > { %298 = vst [vmem:[%s15702_s8 + $0xf0] sm:$0xff] %v297_v30  ;;  %300 = vst [vmem:[%s15702_s8 + $0xf8] sm:$0xff] %v299_v31  ;;  %v303_v33 = vld [vmem:[%s15697_s7 + $0x228] sm:$0xff]  ;;  %v305_v34 = vld [vmem:[%s15697_s7 + $0x230] sm:$0xff] }
  0x21   : > { %302 = vst [vmem:[%s15702_s8 + $0x100] sm:$0xff] %v301_v32  ;;  %v307_v35 = vld [vmem:[%s15697_s7 + $0x238] sm:$0xff]  ;;  %304 = vst [vmem:[%s15702_s8 + $0x108] sm:$0xff] %v303_v33  ;;  %v309_v36 = vld [vmem:[%s15697_s7 + $0x360] sm:$0xff] }
  0x22   : > { %306 = vst [vmem:[%s15702_s8 + $0x110] sm:$0xff] %v305_v34  ;;  %308 = vst [vmem:[%s15702_s8 + $0x118] sm:$0xff] %v307_v35  ;;  %v311_v37 = vld [vmem:[%s15697_s7 + $0x368] sm:$0xff]  ;;  %v313_v38 = vld [vmem:[%s15697_s7 + $0x370] sm:$0xff] }
  0x23   : > { %310 = vst [vmem:[%s15702_s8 + $0x120] sm:$0xff] %v309_v36  ;;  %312 = vst [vmem:[%s15702_s8 + $0x128] sm:$0xff] %v311_v37  ;;  %v315_v39 = vld [vmem:[%s15697_s7 + $0x378] sm:$0xff]  ;;  %v317_v40 = vld [vmem:[%s15697_s7 + $0x380] sm:$0xff] }
  0x24   : > { %314 = vst [vmem:[%s15702_s8 + $0x130] sm:$0xff] %v313_v38  ;;  %v319_v41 = vld [vmem:[%s15697_s7 + $0x388] sm:$0xff]  ;;  %316 = vst [vmem:[%s15702_s8 + $0x138] sm:$0xff] %v315_v39  ;;  %v321_v42 = vld [vmem:[%s15697_s7 + $0x390] sm:$0xff] }
  0x25   : > { %318 = vst [vmem:[%s15702_s8 + $0x140] sm:$0xff] %v317_v40  ;;  %320 = vst [vmem:[%s15702_s8 + $0x148] sm:$0xff] %v319_v41  ;;  %v323_v43 = vld [vmem:[%s15697_s7 + $0x398] sm:$0xff]  ;;  %v325_v44 = vld [vmem:[%s15697_s7 + $0x3a0] sm:$0xff] }
  0x26   : > { %322 = vst [vmem:[%s15702_s8 + $0x150] sm:$0xff] %v321_v42  ;;  %324 = vst [vmem:[%s15702_s8 + $0x158] sm:$0xff] %v323_v43  ;;  %v327_v45 = vld [vmem:[%s15697_s7 + $0x3a8] sm:$0xff]  ;;  %v329_v46 = vld [vmem:[%s15697_s7 + $0x3b0] sm:$0xff] }
  0x27   : > { %326 = vst [vmem:[%s15702_s8 + $0x160] sm:$0xff] %v325_v44  ;;  %v331_v47 = vld [vmem:[%s15697_s7 + $0x3b8] sm:$0xff]  ;;  %328 = vst [vmem:[%s15702_s8 + $0x168] sm:$0xff] %v327_v45  ;;  %v333_v48 = vld [vmem:[%s15697_s7 + $0x3c0] sm:$0xff] }
  0x28   : > { %330 = vst [vmem:[%s15702_s8 + $0x170] sm:$0xff] %v329_v46  ;;  %332 = vst [vmem:[%s15702_s8 + $0x178] sm:$0xff] %v331_v47  ;;  %v335_v49 = vld [vmem:[%s15697_s7 + $0x3c8] sm:$0xff]  ;;  %v337_v50 = vld [vmem:[%s15697_s7 + $0x3d0] sm:$0xff] }
  0x29   : > { %334 = vst [vmem:[%s15702_s8 + $0x180] sm:$0xff] %v333_v48  ;;  %336 = vst [vmem:[%s15702_s8 + $0x188] sm:$0xff] %v335_v49  ;;  %v339_v51 = vld [vmem:[%s15697_s7 + $0x3d8] sm:$0xff]  ;;  %v341_v52 = vld [vmem:[%s15697_s7 + $0x3e0] sm:$0xff] }
  0x2a   : > { %338 = vst [vmem:[%s15702_s8 + $0x190] sm:$0xff] %v337_v50  ;;  %v343_v53 = vld [vmem:[%s15697_s7 + $0x3e8] sm:$0xff]  ;;  %340 = vst [vmem:[%s15702_s8 + $0x198] sm:$0xff] %v339_v51  ;;  %v345_v54 = vld [vmem:[%s15697_s7 + $0x510] sm:$0xff] }
  0x2b   : > { %342 = vst [vmem:[%s15702_s8 + $0x1a0] sm:$0xff] %v341_v52  ;;  %344 = vst [vmem:[%s15702_s8 + $0x1a8] sm:$0xff] %v343_v53  ;;  %v347_v55 = vld [vmem:[%s15697_s7 + $0x518] sm:$0xff]  ;;  %v349_v56 = vld [vmem:[%s15697_s7 + $0x520] sm:$0xff] }
  0x2c   : > { %346 = vst [vmem:[%s15702_s8 + $0x1b0] sm:$0xff] %v345_v54  ;;  %348 = vst [vmem:[%s15702_s8 + $0x1b8] sm:$0xff] %v347_v55  ;;  %v351_v57 = vld [vmem:[%s15697_s7 + $0x528] sm:$0xff]  ;;  %v353_v58 = vld [vmem:[%s15697_s7 + $0x530] sm:$0xff] }
  0x2d   : > { %350 = vst [vmem:[%s15702_s8 + $0x1c0] sm:$0xff] %v349_v56  ;;  %v355_v59 = vld [vmem:[%s15697_s7 + $0x538] sm:$0xff]  ;;  %352 = vst [vmem:[%s15702_s8 + $0x1c8] sm:$0xff] %v351_v57  ;;  %v357_v60 = vld [vmem:[%s15697_s7 + $0x540] sm:$0xff] }
  0x2e   : > { %354 = vst [vmem:[%s15702_s8 + $0x1d0] sm:$0xff] %v353_v58  ;;  %356 = vst [vmem:[%s15702_s8 + $0x1d8] sm:$0xff] %v355_v59  ;;  %v359_v61 = vld [vmem:[%s15697_s7 + $0x548] sm:$0xff]  ;;  %v361_v62 = vld [vmem:[%s15697_s7 + $0x550] sm:$0xff] }
  0x2f   : > { %358 = vst [vmem:[%s15702_s8 + $0x1e0] sm:$0xff] %v357_v60  ;;  %360 = vst [vmem:[%s15702_s8 + $0x1e8] sm:$0xff] %v359_v61  ;;  %v363_v63 = vld [vmem:[%s15697_s7 + $0x558] sm:$0xff]  ;;  %v365_v0 = vld [vmem:[%s15697_s7 + $0x560] sm:$0xff] }
  0x30   : > { %362 = vst [vmem:[%s15702_s8 + $0x1f0] sm:$0xff] %v361_v62  ;;  %v367_v1 = vld [vmem:[%s15697_s7 + $0x568] sm:$0xff]  ;;  %364 = vst [vmem:[%s15702_s8 + $0x1f8] sm:$0xff] %v363_v63  ;;  %v369_v2 = vld [vmem:[%s15697_s7 + $0x570] sm:$0xff] }
  0x31   : > { %366 = vst [vmem:[%s15702_s8 + $0x200] sm:$0xff] %v365_v0  ;;  %368 = vst [vmem:[%s15702_s8 + $0x208] sm:$0xff] %v367_v1  ;;  %v371_v3 = vld [vmem:[%s15697_s7 + $0x578] sm:$0xff]  ;;  %v373_v4 = vld [vmem:[%s15697_s7 + $0x580] sm:$0xff] }
  0x32   : > { %370 = vst [vmem:[%s15702_s8 + $0x210] sm:$0xff] %v369_v2  ;;  %372 = vst [vmem:[%s15702_s8 + $0x218] sm:$0xff] %v371_v3  ;;  %v375_v5 = vld [vmem:[%s15697_s7 + $0x588] sm:$0xff]  ;;  %v377_v6 = vld [vmem:[%s15697_s7 + $0x590] sm:$0xff] }
  0x33   : > { %374 = vst [vmem:[%s15702_s8 + $0x220] sm:$0xff] %v373_v4  ;;  %v379_v7 = vld [vmem:[%s15697_s7 + $0x598] sm:$0xff]  ;;  %376 = vst [vmem:[%s15702_s8 + $0x228] sm:$0xff] %v375_v5  ;;  %v381_v8 = vld [vmem:[%s15697_s7 + $0x6c0] sm:$0xff] }
  0x34   : > { %378 = vst [vmem:[%s15702_s8 + $0x230] sm:$0xff] %v377_v6  ;;  %380 = vst [vmem:[%s15702_s8 + $0x238] sm:$0xff] %v379_v7  ;;  %v383_v9 = vld [vmem:[%s15697_s7 + $0x6c8] sm:$0xff]  ;;  %v385_v10 = vld [vmem:[%s15697_s7 + $0x6d0] sm:$0xff] }
  0x35   : > { %382 = vst [vmem:[%s15702_s8 + $0x240] sm:$0xff] %v381_v8  ;;  %384 = vst [vmem:[%s15702_s8 + $0x248] sm:$0xff] %v383_v9  ;;  %v387_v11 = vld [vmem:[%s15697_s7 + $0x6d8] sm:$0xff]  ;;  %v389_v12 = vld [vmem:[%s15697_s7 + $0x6e0] sm:$0xff] }
  0x36   : > { %386 = vst [vmem:[%s15702_s8 + $0x250] sm:$0xff] %v385_v10  ;;  %v391_v13 = vld [vmem:[%s15697_s7 + $0x6e8] sm:$0xff]  ;;  %388 = vst [vmem:[%s15702_s8 + $0x258] sm:$0xff] %v387_v11  ;;  %v393_v14 = vld [vmem:[%s15697_s7 + $0x6f0] sm:$0xff] }
  0x37   : > { %390 = vst [vmem:[%s15702_s8 + $0x260] sm:$0xff] %v389_v12  ;;  %392 = vst [vmem:[%s15702_s8 + $0x268] sm:$0xff] %v391_v13  ;;  %v395_v15 = vld [vmem:[%s15697_s7 + $0x6f8] sm:$0xff]  ;;  %v397_v16 = vld [vmem:[%s15697_s7 + $0x700] sm:$0xff] }
  0x38   : > { %394 = vst [vmem:[%s15702_s8 + $0x270] sm:$0xff] %v393_v14  ;;  %396 = vst [vmem:[%s15702_s8 + $0x278] sm:$0xff] %v395_v15  ;;  %v399_v17 = vld [vmem:[%s15697_s7 + $0x708] sm:$0xff]  ;;  %v401_v18 = vld [vmem:[%s15697_s7 + $0x710] sm:$0xff] }
  0x39   : > { %398 = vst [vmem:[%s15702_s8 + $0x280] sm:$0xff] %v397_v16  ;;  %v403_v19 = vld [vmem:[%s15697_s7 + $0x718] sm:$0xff]  ;;  %400 = vst [vmem:[%s15702_s8 + $0x288] sm:$0xff] %v399_v17  ;;  %v405_v20 = vld [vmem:[%s15697_s7 + $0x720] sm:$0xff] }
  0x3a   : > { %402 = vst [vmem:[%s15702_s8 + $0x290] sm:$0xff] %v401_v18  ;;  %404 = vst [vmem:[%s15702_s8 + $0x298] sm:$0xff] %v403_v19  ;;  %v407_v21 = vld [vmem:[%s15697_s7 + $0x728] sm:$0xff]  ;;  %v409_v22 = vld [vmem:[%s15697_s7 + $0x730] sm:$0xff] }
  0x3b   : > { %406 = vst [vmem:[%s15702_s8 + $0x2a0] sm:$0xff] %v405_v20  ;;  %408 = vst [vmem:[%s15702_s8 + $0x2a8] sm:$0xff] %v407_v21  ;;  %v411_v23 = vld [vmem:[%s15697_s7 + $0x738] sm:$0xff]  ;;  %v413_v24 = vld [vmem:[%s15697_s7 + $0x740] sm:$0xff] }
  0x3c   : > { %410 = vst [vmem:[%s15702_s8 + $0x2b0] sm:$0xff] %v409_v22  ;;  %v415_v25 = vld [vmem:[%s15697_s7 + $0x748] sm:$0xff]  ;;  %412 = vst [vmem:[%s15702_s8 + $0x2b8] sm:$0xff] %v411_v23  ;;  %v417_v26 = vld [vmem:[%s15697_s7 + $0x870] sm:$0xff] }
  0x3d   : > { %414 = vst [vmem:[%s15702_s8 + $0x2c0] sm:$0xff] %v413_v24  ;;  %416 = vst [vmem:[%s15702_s8 + $0x2c8] sm:$0xff] %v415_v25  ;;  %v419_v27 = vld [vmem:[%s15697_s7 + $0x878] sm:$0xff]  ;;  %v421_v28 = vld [vmem:[%s15697_s7 + $0x880] sm:$0xff] }
  0x3e   : > { %418 = vst [vmem:[%s15702_s8 + $0x2d0] sm:$0xff] %v417_v26  ;;  %420 = vst [vmem:[%s15702_s8 + $0x2d8] sm:$0xff] %v419_v27  ;;  %v423_v29 = vld [vmem:[%s15697_s7 + $0x888] sm:$0xff]  ;;  %v425_v30 = vld [vmem:[%s15697_s7 + $0x890] sm:$0xff] }
  0x3f   : > { %422 = vst [vmem:[%s15702_s8 + $0x2e0] sm:$0xff] %v421_v28  ;;  %v427_v31 = vld [vmem:[%s15697_s7 + $0x898] sm:$0xff]  ;;  %424 = vst [vmem:[%s15702_s8 + $0x2e8] sm:$0xff] %v423_v29  ;;  %v429_v32 = vld [vmem:[%s15697_s7 + $0x8a0] sm:$0xff] }
  0x40   : > { %426 = vst [vmem:[%s15702_s8 + $0x2f0] sm:$0xff] %v425_v30  ;;  %428 = vst [vmem:[%s15702_s8 + $0x2f8] sm:$0xff] %v427_v31  ;;  %v431_v33 = vld [vmem:[%s15697_s7 + $0x8a8] sm:$0xff]  ;;  %v433_v34 = vld [vmem:[%s15697_s7 + $0x8b0] sm:$0xff] }
  0x41   : > { %430 = vst [vmem:[%s15702_s8 + $0x300] sm:$0xff] %v429_v32  ;;  %432 = vst [vmem:[%s15702_s8 + $0x308] sm:$0xff] %v431_v33  ;;  %v435_v35 = vld [vmem:[%s15697_s7 + $0x8b8] sm:$0xff]  ;;  %v437_v36 = vld [vmem:[%s15697_s7 + $0x8c0] sm:$0xff] }
  0x42   : > { %434 = vst [vmem:[%s15702_s8 + $0x310] sm:$0xff] %v433_v34  ;;  %v439_v37 = vld [vmem:[%s15697_s7 + $0x8c8] sm:$0xff]  ;;  %436 = vst [vmem:[%s15702_s8 + $0x318] sm:$0xff] %v435_v35  ;;  %v441_v38 = vld [vmem:[%s15697_s7 + $0x8d0] sm:$0xff] }
  0x43   : > { %438 = vst [vmem:[%s15702_s8 + $0x320] sm:$0xff] %v437_v36  ;;  %440 = vst [vmem:[%s15702_s8 + $0x328] sm:$0xff] %v439_v37  ;;  %v443_v39 = vld [vmem:[%s15697_s7 + $0x8d8] sm:$0xff]  ;;  %v445_v40 = vld [vmem:[%s15697_s7 + $0x8e0] sm:$0xff] }
  0x44   : > { %442 = vst [vmem:[%s15702_s8 + $0x330] sm:$0xff] %v441_v38  ;;  %444 = vst [vmem:[%s15702_s8 + $0x338] sm:$0xff] %v443_v39  ;;  %v447_v41 = vld [vmem:[%s15697_s7 + $0x8e8] sm:$0xff]  ;;  %v449_v42 = vld [vmem:[%s15697_s7 + $0x8f0] sm:$0xff] }
  0x45   : > { %446 = vst [vmem:[%s15702_s8 + $0x340] sm:$0xff] %v445_v40  ;;  %v451_v43 = vld [vmem:[%s15697_s7 + $0x8f8] sm:$0xff]  ;;  %448 = vst [vmem:[%s15702_s8 + $0x348] sm:$0xff] %v447_v41 }
  0x46   : > { %450 = vst [vmem:[%s15702_s8 + $0x350] sm:$0xff] %v449_v42  ;;  %452 = vst [vmem:[%s15702_s8 + $0x358] sm:$0xff] %v451_v43 }
  0x47 PF: > { %p12262_p6 = scmp.ge.s32.totalorder %s15620_s22, 1  ;;  %p472_p7 = scmp.lt.s32.totalorder %s15620_s22, 4 }
  0x49   : > { %p473_p8 = pnand %p12262_p6, %p472_p7 }
  0x4b   : > { %476 = sbr.rel (%p473_p8) target bundleno = 2157 (0x86d), region = 59 }
  0x50   : > { %s479_s9 = sand.u32 1, %s15604_s18   ;;  %s526_s10 = smul.u32 576, %s15612_s20 }
  0x51   : > { %s13541_s11 = smul.u32 864, %s479_s9  ;;  %p12265_p10 = scmp.ne.s32.totalorder %s15612_s20, 0 }
  0x52   : > { %p528_p9 = scmp.lt.s32.totalorder %s526_s10, 1727 }
  0x53   : > { %s15926_s16 = scalar_lea.vmem [#allocation3], %s13541_s11  ;;  %557 = sbr.rel (%p12265_p10) target bundleno = 101 (0x65), region = 67 }
  0x54   : > { %s20692_s10 = smov (!%p528_p9, %s526_s10), 1727 }
  0x55   : > { %s13539_s12 = sshll.u32 %s20692_s10, 4 }
  0x56   : > { %s15924_s15 = scalar_lea.vmem %s20059_s1, %s13539_s12 }
  0x58   : > { %v15622_v44 = vmov 0.0  }
  0x59   : > { %558 = vst [vmem:[#allocation2 + $0xb0] sm:$0xff] %v15622_v44  ;;  %559 = vst [vmem:[#allocation2] sm:$0xff] %v15622_v44 }
  0x5a   : > { %560 = vst [vmem:[#allocation2 + $0x10] sm:$0xff] %v15622_v44  ;;  %561 = vst [vmem:[#allocation2 + $0x48] sm:$0xff] %v15622_v44 }
  0x5b   : > { %562 = vst [vmem:[#allocation2 + $0x60] sm:$0xff] %v15622_v44  ;;  %563 = vst [vmem:[#allocation2 + $0x28] sm:$0xff] %v15622_v44 }
  0x5c   : > { %564 = vst [vmem:[#allocation2 + $0x40] sm:$0xff] %v15622_v44  ;;  %565 = vst [vmem:[#allocation2 + $0x78] sm:$0xff] %v15622_v44 }
  0x5d   : > { %566 = vst [vmem:[#allocation2 + $0x88] sm:$0xff] %v15622_v44  ;;  %567 = vst [vmem:[#allocation2 + $0x90] sm:$0xff] %v15622_v44 }
  0x5e   : > { %568 = vst [vmem:[#allocation2 + $0x18] sm:$0xff] %v15622_v44  ;;  %569 = vst [vmem:[#allocation2 + $0x98] sm:$0xff] %v15622_v44 }
  0x5f   : > { %570 = vst [vmem:[#allocation2 + $0x38] sm:$0xff] %v15622_v44  ;;  %571 = vst [vmem:[#allocation2 + $0x50] sm:$0xff] %v15622_v44 }
  0x60   : > { %572 = vst [vmem:[#allocation2 + $0x70] sm:$0xff] %v15622_v44  ;;  %573 = vst [vmem:[#allocation2 + $0xa0] sm:$0xff] %v15622_v44 }
  0x61   : > { %574 = vst [vmem:[#allocation2 + $0xa8] sm:$0xff] %v15622_v44  ;;  %575 = vst [vmem:[#allocation2 + $0x68] sm:$0xff] %v15622_v44 }
  0x62   : > { %576 = vst [vmem:[#allocation2 + $0x30] sm:$0xff] %v15622_v44  ;;  %577 = vst [vmem:[#allocation2 + $0x58] sm:$0xff] %v15622_v44 }
  0x63   : > { %578 = vst [vmem:[#allocation2 + $0x80] sm:$0xff] %v15622_v44  ;;  %579 = vst [vmem:[#allocation2 + $0xb8] sm:$0xff] %v15622_v44 }
  0x64   : > { %580 = vst [vmem:[#allocation2 + $0x20] sm:$0xff] %v15622_v44  ;;  %581 = vst [vmem:[#allocation2 + $0x8] sm:$0xff] %v15622_v44 }
  0x65 PF: > { %v13584_v45 = vld [vmem:[%s15924_s15 + $0xe4] ss:$16 sps:$4 sm:$0xff]   ;;  %v13588_v47 = vld [vmem:[%s15924_s15 + $0xe0] ss:$16 sps:$4 sm:$0xff]   ;;  %v13685_v32 = vld [vmem:[%s15926_s16 + $0xc] ss:$144 sps:$4 sm:$0xff]  }
  0x66   : > { %v13586_v46 = vld [vmem:[%s15924_s15 + $0x2e4] ss:$16 sps:$4 sm:$0xff]   ;;  %8166 = vmatprep.subr.bf16.mxu0 %v13584_v45  ;;  %v13589_v48 = vld [vmem:[%s15924_s15 + $0x2e0] ss:$16 sps:$4 sm:$0xff]   ;;  %8261 = vmatprep.mubr.bf16.mxu1 %v13685_v32  ;;  %p13526_p11 = scmp.ne.s32.totalorder %s15612_s20, 2 }
  0x67   : > { %8229 = vmatprep.subr.bf16.mxu1 %v13586_v46  ;;  %v13590_v49 = vld [vmem:[%s15924_s15 + $0xc4] ss:$16 sps:$4 sm:$0xff]   ;;  %8167 = vmatpush1.bf16.msra.mxu0 %v13588_v47  ;;  %v13594_v51 = vld [vmem:[%s15924_s15 + $0xc0] ss:$16 sps:$4 sm:$0xff]  }
  0x68   : > { %8230 = vmatpush1.bf16.msra.mxu1 %v13589_v48  ;;  %v13592_v50 = vld [vmem:[%s15924_s15 + $0x2c4] ss:$16 sps:$4 sm:$0xff]   ;;  %8168 = vmatprep.subr.bf16.mxu0 %v13590_v49  ;;  %v13595_v52 = vld [vmem:[%s15924_s15 + $0x2c0] ss:$16 sps:$4 sm:$0xff]  }
  0x69   : > { %8231 = vmatprep.subr.bf16.mxu1 %v13592_v50  ;;  %v13596_v53 = vld [vmem:[%s15924_s15 + $0xa4] ss:$16 sps:$4 sm:$0xff]   ;;  %v13600_v55 = vld [vmem:[%s15924_s15 + $0xa0] ss:$16 sps:$4 sm:$0xff]   ;;  %v13683_v50 = vld [vmem:[%s15926_s16 + $0x8] ss:$144 sps:$4 sm:$0xff]  }
  0x6a   : > { %v13598_v54 = vld [vmem:[%s15924_s15 + $0x2a4] ss:$16 sps:$4 sm:$0xff]   ;;  %v13601_v56 = vld [vmem:[%s15924_s15 + $0x2a0] ss:$16 sps:$4 sm:$0xff]  }
  0x6b   : > { %8169 = vmatpush1.bf16.msra.mxu0 %v13594_v51  ;;  %v13602_v57 = vld [vmem:[%s15924_s15 + $0x84] ss:$16 sps:$4 sm:$0xff]   ;;  %v13606_v59 = vld [vmem:[%s15924_s15 + $0x80] ss:$16 sps:$4 sm:$0xff]  }
  0x6c   : > { %8232 = vmatpush1.bf16.msra.mxu1 %v13595_v52  ;;  %8170 = vmatprep.subr.bf16.mxu0 %v13596_v53  ;;  %v13604_v58 = vld [vmem:[%s15924_s15 + $0x284] ss:$16 sps:$4 sm:$0xff]   ;;  %v13607_v60 = vld [vmem:[%s15924_s15 + $0x280] ss:$16 sps:$4 sm:$0xff]  }
  0x6d   : > { %8233 = vmatprep.subr.bf16.mxu1 %v13598_v54  ;;  %v13608_v61 = vld [vmem:[%s15924_s15 + $0x64] ss:$16 sps:$4 sm:$0xff]   ;;  %v13612_v63 = vld [vmem:[%s15924_s15 + $0x60] ss:$16 sps:$4 sm:$0xff]  }
  0x6e   : > { %v13610_v62 = vld [vmem:[%s15924_s15 + $0x264] ss:$16 sps:$4 sm:$0xff]   ;;  %v13613_v0 = vld [vmem:[%s15924_s15 + $0x260] ss:$16 sps:$4 sm:$0xff]  }
  0x6f   : > { %8171 = vmatpush1.bf16.msra.mxu0 %v13600_v55  ;;  %v13614_v1 = vld [vmem:[%s15924_s15 + $0x44] ss:$16 sps:$4 sm:$0xff]   ;;  %v13618_v3 = vld [vmem:[%s15924_s15 + $0x40] ss:$16 sps:$4 sm:$0xff]  }
  0x70   : > { %8234 = vmatpush1.bf16.msra.mxu1 %v13601_v56  ;;  %8172 = vmatprep.subr.bf16.mxu0 %v13602_v57  ;;  %v13616_v2 = vld [vmem:[%s15924_s15 + $0x244] ss:$16 sps:$4 sm:$0xff]   ;;  %v13619_v4 = vld [vmem:[%s15924_s15 + $0x240] ss:$16 sps:$4 sm:$0xff]  }
  0x71   : > { %8235 = vmatprep.subr.bf16.mxu1 %v13604_v58  ;;  %v13620_v5 = vld [vmem:[%s15924_s15 + $0x24] ss:$16 sps:$4 sm:$0xff]   ;;  %v13624_v7 = vld [vmem:[%s15924_s15 + $0x20] ss:$16 sps:$4 sm:$0xff]  }
  0x72   : > { %v13622_v6 = vld [vmem:[%s15924_s15 + $0x224] ss:$16 sps:$4 sm:$0xff]   ;;  %v13625_v8 = vld [vmem:[%s15924_s15 + $0x220] ss:$16 sps:$4 sm:$0xff]  }
  0x73   : > { %8173 = vmatpush1.bf16.msra.mxu0 %v13606_v59  ;;  %v13626_v9 = vld [vmem:[%s15924_s15 + $0x4] ss:$16 sps:$4 sm:$0xff]   ;;  %v13630_v11 = vld [vmem:[%s15924_s15] ss:$16 sps:$4 sm:$0xff]  }
  0x74   : > { %8236 = vmatpush1.bf16.msra.mxu1 %v13607_v60  ;;  %8174 = vmatprep.subr.bf16.mxu0 %v13608_v61  ;;  %v13628_v10 = vld [vmem:[%s15924_s15 + $0x204] ss:$16 sps:$4 sm:$0xff]   ;;  %v13631_v12 = vld [vmem:[%s15924_s15 + $0x200] ss:$16 sps:$4 sm:$0xff]  }
  0x75   : > { %8237 = vmatprep.subr.bf16.mxu1 %v13610_v62  ;;  %v13632_v13 = vld [vmem:[%s15924_s15 + $0x1e4] ss:$16 sps:$4 sm:$0xff]   ;;  %v13636_v15 = vld [vmem:[%s15924_s15 + $0x1e0] ss:$16 sps:$4 sm:$0xff]  }
  0x76   : > { %v13634_v14 = vld [vmem:[%s15924_s15 + $0x3e4] ss:$16 sps:$4 sm:$0xff]   ;;  %v13637_v16 = vld [vmem:[%s15924_s15 + $0x3e0] ss:$16 sps:$4 sm:$0xff]  }
  0x77   : > { %8175 = vmatpush1.bf16.msra.mxu0 %v13612_v63  ;;  %v13638_v17 = vld [vmem:[%s15924_s15 + $0x1c4] ss:$16 sps:$4 sm:$0xff]   ;;  %v13642_v19 = vld [vmem:[%s15924_s15 + $0x1c0] ss:$16 sps:$4 sm:$0xff]  }
  0x78   : > { %8238 = vmatpush1.bf16.msra.mxu1 %v13613_v0  ;;  %8176 = vmatprep.subr.bf16.mxu0 %v13614_v1  ;;  %v13640_v18 = vld [vmem:[%s15924_s15 + $0x3c4] ss:$16 sps:$4 sm:$0xff]   ;;  %v13643_v20 = vld [vmem:[%s15924_s15 + $0x3c0] ss:$16 sps:$4 sm:$0xff]  }
  0x79   : > { %8239 = vmatprep.subr.bf16.mxu1 %v13616_v2  ;;  %v13644_v21 = vld [vmem:[%s15924_s15 + $0x1a4] ss:$16 sps:$4 sm:$0xff]   ;;  %v13648_v23 = vld [vmem:[%s15924_s15 + $0x1a0] ss:$16 sps:$4 sm:$0xff]  }
  0x7a   : > { %v13646_v22 = vld [vmem:[%s15924_s15 + $0x3a4] ss:$16 sps:$4 sm:$0xff]   ;;  %v13649_v24 = vld [vmem:[%s15924_s15 + $0x3a0] ss:$16 sps:$4 sm:$0xff]  }
  0x7b   : > { %8177 = vmatpush1.bf16.msra.mxu0 %v13618_v3  ;;  %v13650_v25 = vld [vmem:[%s15924_s15 + $0x184] ss:$16 sps:$4 sm:$0xff]   ;;  %v13654_v27 = vld [vmem:[%s15924_s15 + $0x180] ss:$16 sps:$4 sm:$0xff]  }
  0x7c   : > { %8240 = vmatpush1.bf16.msra.mxu1 %v13619_v4  ;;  %8178 = vmatprep.subr.bf16.mxu0 %v13620_v5  ;;  %v13652_v26 = vld [vmem:[%s15924_s15 + $0x384] ss:$16 sps:$4 sm:$0xff]   ;;  %v13655_v28 = vld [vmem:[%s15924_s15 + $0x380] ss:$16 sps:$4 sm:$0xff]   ;;  %v13754_v4 = vld [vmem:[%s15926_s16 + $0x12c] ss:$144 sps:$4 sm:$0xff]  }
  0x7d   : > { %8241 = vmatprep.subr.bf16.mxu1 %v13622_v6  ;;  %v13656_v29 = vld [vmem:[%s15924_s15 + $0x164] ss:$16 sps:$4 sm:$0xff]   ;;  %v13660_v33 = vld [vmem:[%s15924_s15 + $0x160] ss:$16 sps:$4 sm:$0xff]   ;;  %v13757_v6 = vld [vmem:[%s15926_s16 + $0x128] ss:$144 sps:$4 sm:$0xff]  }
  0x7e   : > { %v13682_v30 = vld [vmem:[%s15926_s16 + $0x4] ss:$144 sps:$4 sm:$0xff]   ;;  %v13661_v34 = vld [vmem:[%s15924_s15 + $0x360] ss:$16 sps:$4 sm:$0xff]  }
  0x7f   : > { %8179 = vmatpush1.bf16.msra.mxu0 %v13624_v7  ;;  %v13658_v31 = vld [vmem:[%s15924_s15 + $0x364] ss:$16 sps:$4 sm:$0xff]   ;;  %8198 = vmatprep.mubr.bf16.mxu0 %v13682_v30  ;;  %v13666_v37 = vld [vmem:[%s15924_s15 + $0x140] ss:$16 sps:$4 sm:$0xff]   ;;  %v13799_v30 = vld [vmem:[%s15926_s16 + $0x1c] ss:$144 sps:$4 sm:$0xff]  }
  0x80   : > { %8242 = vmatpush1.bf16.msra.mxu1 %v13625_v8  ;;  %8180 = vmatprep.subr.bf16.mxu0 %v13626_v9  ;;  %v13662_v35 = vld [vmem:[%s15924_s15 + $0x144] ss:$16 sps:$4 sm:$0xff]   ;;  %v13667_v38 = vld [vmem:[%s15924_s15 + $0x340] ss:$16 sps:$4 sm:$0xff]  }
  0x81   : > { %8243 = vmatprep.subr.bf16.mxu1 %v13628_v10  ;;  %v13664_v36 = vld [vmem:[%s15924_s15 + $0x344] ss:$16 sps:$4 sm:$0xff]   ;;  %v13672_v41 = vld [vmem:[%s15924_s15 + $0x120] ss:$16 sps:$4 sm:$0xff]  }
  0x82   : > { %v13668_v39 = vld [vmem:[%s15924_s15 + $0x124] ss:$16 sps:$4 sm:$0xff]   ;;  %v13673_v42 = vld [vmem:[%s15924_s15 + $0x320] ss:$16 sps:$4 sm:$0xff]  }
  0x83   : > { %8181 = vmatpush1.bf16.msra.mxu0 %v13630_v11  ;;  %v13670_v40 = vld [vmem:[%s15924_s15 + $0x324] ss:$16 sps:$4 sm:$0xff]   ;;  %v13678_v45 = vld [vmem:[%s15924_s15 + $0x100] ss:$16 sps:$4 sm:$0xff]  }
  0x84   : > { %8244 = vmatpush1.bf16.msra.mxu1 %v13631_v12  ;;  %8182 = vmatprep.subr.bf16.mxu0 %v13632_v13  ;;  %v13674_v43 = vld [vmem:[%s15924_s15 + $0x104] ss:$16 sps:$4 sm:$0xff]   ;;  %v13679_v46 = vld [vmem:[%s15924_s15 + $0x300] ss:$16 sps:$4 sm:$0xff]  }
  0x85   : > { %8245 = vmatprep.subr.bf16.mxu1 %v13634_v14  ;;  %v13676_v44 = vld [vmem:[%s15924_s15 + $0x304] ss:$16 sps:$4 sm:$0xff]   ;;  %v13680_v49 = vld [vmem:[%s15926_s16] ss:$144 sps:$4 sm:$0xff]  }
  0x86   : > { %v13688_v47 = vld [vmem:[%s15924_s15 + $0x4e4] ss:$16 sps:$4 sm:$0xff]   ;;  %v13686_v51 = vld [vmem:[%s15924_s15 + $0x4e0] ss:$16 sps:$4 sm:$0xff]  }
  0x87   : > { %8183 = vmatpush2.bf16.msra.mxu0 %v13636_v15  ;;  %v13691_v48 = vld [vmem:[%s15924_s15 + $0x6e4] ss:$16 sps:$4 sm:$0xff]   ;;  %v13689_v52 = vld [vmem:[%s15924_s15 + $0x6e0] ss:$16 sps:$4 sm:$0xff]  }
  0x88   : > { %8246 = vmatpush2.bf16.msra.mxu1 %v13637_v16  ;;  %8184 = vmatprep.subr.bf16.mxu0 %v13638_v17  ;;  %v13694_v53 = vld [vmem:[%s15924_s15 + $0x4c4] ss:$16 sps:$4 sm:$0xff]   ;;  %v13692_v55 = vld [vmem:[%s15924_s15 + $0x4c0] ss:$16 sps:$4 sm:$0xff]   ;;  %v13772_v16 = vld [vmem:[%s15926_s16 + $0x24c] ss:$144 sps:$4 sm:$0xff]  }
  0x89   : > { %8247 = vmatprep.subr.bf16.mxu1 %v13640_v18  ;;  %v13697_v54 = vld [vmem:[%s15924_s15 + $0x6c4] ss:$16 sps:$4 sm:$0xff]   ;;  %v13695_v56 = vld [vmem:[%s15924_s15 + $0x6c0] ss:$16 sps:$4 sm:$0xff]   ;;  %v13775_v18 = vld [vmem:[%s15926_s16 + $0x248] ss:$144 sps:$4 sm:$0xff]  }
  0x8a   : > { %v13700_v57 = vld [vmem:[%s15924_s15 + $0x4a4] ss:$16 sps:$4 sm:$0xff]   ;;  %v13698_v59 = vld [vmem:[%s15924_s15 + $0x4a0] ss:$16 sps:$4 sm:$0xff]  }
  0x8b   : > { %8185 = vmatpush2.bf16.msra.mxu0 %v13642_v19  ;;  %v13703_v58 = vld [vmem:[%s15924_s15 + $0x6a4] ss:$16 sps:$4 sm:$0xff]   ;;  %v13701_v60 = vld [vmem:[%s15924_s15 + $0x6a0] ss:$16 sps:$4 sm:$0xff]  }
  0x8c   : > { %8248 = vmatpush2.bf16.msra.mxu1 %v13643_v20  ;;  %8186 = vmatprep.subr.bf16.mxu0 %v13644_v21  ;;  %v13706_v61 = vld [vmem:[%s15924_s15 + $0x484] ss:$16 sps:$4 sm:$0xff]   ;;  %v13704_v63 = vld [vmem:[%s15924_s15 + $0x480] ss:$16 sps:$4 sm:$0xff]  }
  0x8d   : > { %8249 = vmatprep.subr.bf16.mxu1 %v13646_v22  ;;  %v13709_v62 = vld [vmem:[%s15924_s15 + $0x684] ss:$16 sps:$4 sm:$0xff]   ;;  %v13707_v0 = vld [vmem:[%s15924_s15 + $0x680] ss:$16 sps:$4 sm:$0xff]  }
  0x8e   : > { %v13712_v1 = vld [vmem:[%s15924_s15 + $0x464] ss:$16 sps:$4 sm:$0xff]   ;;  %v13756_v5 = vld [vmem:[%s15926_s16 + $0x120] ss:$144 sps:$4 sm:$0xff]  }
  0x8f   : > { %8187 = vmatpush2.bf16.msra.mxu0 %v13648_v23  ;;  %v13715_v2 = vld [vmem:[%s15924_s15 + $0x664] ss:$16 sps:$4 sm:$0xff]   ;;  %v13710_v7 = vld [vmem:[%s15924_s15 + $0x460] ss:$16 sps:$4 sm:$0xff]  }
  0x90   : > { %8250 = vmatpush2.bf16.msra.mxu1 %v13649_v24  ;;  %8188 = vmatprep.subr.bf16.mxu0 %v13650_v25  ;;  %v13752_v3 = vld [vmem:[%s15926_s16 + $0x124] ss:$144 sps:$4 sm:$0xff]   ;;  %v13713_v8 = vld [vmem:[%s15924_s15 + $0x660] ss:$16 sps:$4 sm:$0xff]  }
  0x91   : > { %8251 = vmatprep.subr.bf16.mxu1 %v13652_v26  ;;  %v13718_v9 = vld [vmem:[%s15924_s15 + $0x444] ss:$16 sps:$4 sm:$0xff]   ;;  %v13716_v11 = vld [vmem:[%s15924_s15 + $0x440] ss:$16 sps:$4 sm:$0xff]  }
  0x92   : > { %v13721_v10 = vld [vmem:[%s15924_s15 + $0x644] ss:$16 sps:$4 sm:$0xff]   ;;  %v13719_v12 = vld [vmem:[%s15924_s15 + $0x640] ss:$16 sps:$4 sm:$0xff]  }
  0x93   : > { %8189 = vmatpush2.bf16.msra.mxu0 %v13654_v27  ;;  %v13724_v13 = vld [vmem:[%s15924_s15 + $0x424] ss:$16 sps:$4 sm:$0xff]   ;;  %v13774_v17 = vld [vmem:[%s15926_s16 + $0x240] ss:$144 sps:$4 sm:$0xff]  }
  0x94   : > { %8252 = vmatpush2.bf16.msra.mxu1 %v13655_v28  ;;  %8190 = vmatprep.subr.bf16.mxu0 %v13656_v29  ;;  %v13727_v14 = vld [vmem:[%s15924_s15 + $0x624] ss:$16 sps:$4 sm:$0xff]   ;;  %v13722_v19 = vld [vmem:[%s15924_s15 + $0x420] ss:$16 sps:$4 sm:$0xff]  }
  0x95   : > { %8253 = vmatprep.subr.bf16.mxu1 %v13658_v31  ;;  %v13770_v15 = vld [vmem:[%s15926_s16 + $0x244] ss:$144 sps:$4 sm:$0xff]   ;;  %v13725_v20 = vld [vmem:[%s15924_s15 + $0x620] ss:$16 sps:$4 sm:$0xff]  }
  0x96   : > { %v13730_v21 = vld [vmem:[%s15924_s15 + $0x404] ss:$16 sps:$4 sm:$0xff]   ;;  %v13728_v23 = vld [vmem:[%s15924_s15 + $0x400] ss:$16 sps:$4 sm:$0xff]  }
  0x97   : > { %8191 = vmatpush2.bf16.msra.mxu0 %v13660_v33  ;;  %v13733_v22 = vld [vmem:[%s15924_s15 + $0x604] ss:$16 sps:$4 sm:$0xff]   ;;  %v13731_v24 = vld [vmem:[%s15924_s15 + $0x600] ss:$16 sps:$4 sm:$0xff]  }
  0x98   : > { %8254 = vmatpush2.bf16.msra.mxu1 %v13661_v34  ;;  %8192 = vmatprep.subr.bf16.mxu0 %v13662_v35  ;;  %v13736_v25 = vld [vmem:[%s15924_s15 + $0x5e4] ss:$16 sps:$4 sm:$0xff]   ;;  %v13734_v27 = vld [vmem:[%s15924_s15 + $0x5e0] ss:$16 sps:$4 sm:$0xff]  }
  0x99   : > { %8255 = vmatprep.subr.bf16.mxu1 %v13664_v36  ;;  %v13739_v26 = vld [vmem:[%s15924_s15 + $0x7e4] ss:$16 sps:$4 sm:$0xff]   ;;  %v13737_v29 = vld [vmem:[%s15924_s15 + $0x7e0] ss:$16 sps:$4 sm:$0xff]  }
  0x9a   : > { %v13796_v28 = vld [vmem:[%s15926_s16 + $0x14] ss:$144 sps:$4 sm:$0xff]   ;;  %v13740_v33 = vld [vmem:[%s15924_s15 + $0x5c0] ss:$16 sps:$4 sm:$0xff]  }
  0x9b   : > { %8193 = vmatpush2.bf16.msra.mxu0 %v13666_v37  ;;  %v13742_v31 = vld [vmem:[%s15924_s15 + $0x5c4] ss:$16 sps:$4 sm:$0xff]   ;;  %v13743_v34 = vld [vmem:[%s15924_s15 + $0x7c0] ss:$16 sps:$4 sm:$0xff]  }
  0x9c   : > { %8256 = vmatpush2.bf16.msra.mxu1 %v13667_v38  ;;  %8194 = vmatprep.subr.bf16.mxu0 %v13668_v39  ;;  %v13745_v32 = vld [vmem:[%s15924_s15 + $0x7c4] ss:$16 sps:$4 sm:$0xff]   ;;  %v13746_v37 = vld [vmem:[%s15924_s15 + $0x5a0] ss:$16 sps:$4 sm:$0xff]  }
  0x9d   : > { %8257 = vmatprep.subr.bf16.mxu1 %v13670_v40  ;;  %v13748_v35 = vld [vmem:[%s15924_s15 + $0x5a4] ss:$16 sps:$4 sm:$0xff]   ;;  %v13749_v38 = vld [vmem:[%s15924_s15 + $0x7a0] ss:$16 sps:$4 sm:$0xff]  }
  0x9e   : > { %v13751_v36 = vld [vmem:[%s15924_s15 + $0x7a4] ss:$16 sps:$4 sm:$0xff]  }
  0x9f   : > { %8195 = vmatpush2.bf16.msra.mxu0 %v13672_v41  ;;  %v13760_v39 = vld [vmem:[%s15924_s15 + $0x584] ss:$16 sps:$4 sm:$0xff]   ;;  %v13758_v41 = vld [vmem:[%s15924_s15 + $0x580] ss:$16 sps:$4 sm:$0xff]  }
  0xa0   : > { %8258 = vmatpush2.bf16.msra.mxu1 %v13673_v42  ;;  %8196 = vmatprep.subr.bf16.mxu0 %v13674_v43  ;;  %v13763_v40 = vld [vmem:[%s15924_s15 + $0x784] ss:$16 sps:$4 sm:$0xff]   ;;  %v13761_v42 = vld [vmem:[%s15924_s15 + $0x780] ss:$16 sps:$4 sm:$0xff]  }
  0xa1   : > { %8259 = vmatprep.subr.bf16.mxu1 %v13676_v44  ;;  %v13766_v43 = vld [vmem:[%s15924_s15 + $0x564] ss:$16 sps:$4 sm:$0xff]  }
  0xa2   : > { %v13769_v44 = vld [vmem:[%s15924_s15 + $0x764] ss:$16 sps:$4 sm:$0xff]  }
  0xa3   : > { %8197 = vmatpush2.bf16.msra.mxu0 %v13678_v45  ;;  %v13764_v45 = vld [vmem:[%s15924_s15 + $0x560] ss:$16 sps:$4 sm:$0xff]  }
  0xa4   : > { %8260 = vmatpush2.bf16.msra.mxu1 %v13679_v46  ;;  %8292 = vmatprep.subr.bf16.mxu0 %v13688_v47  ;;  %v13767_v46 = vld [vmem:[%s15924_s15 + $0x760] ss:$16 sps:$4 sm:$0xff]   ;;  %v13778_v47 = vld [vmem:[%s15924_s15 + $0x544] ss:$16 sps:$4 sm:$0xff]  }
  0xa5   : > { %8355 = vmatprep.subr.bf16.mxu1 %v13691_v48  ;;  %v13781_v48 = vld [vmem:[%s15924_s15 + $0x744] ss:$16 sps:$4 sm:$0xff]  }
  0xa6   : > { %8199 = vmatmul.mubr.bf16.vlgmr.msra.gmra.mxu0 %v13680_v49  ;;  %v13776_v49 = vld [vmem:[%s15924_s15 + $0x540] ss:$16 sps:$4 sm:$0xff]  }
  0xa7   : > { %8262 = vmatmul.mubr.bf16.vlgmr.msra.gmra.mxu1 %v13683_v50  ;;  %8293 = vmatpush1.bf16.msra.mxu0 %v13686_v51  ;;  %v13779_v50 = vld [vmem:[%s15924_s15 + $0x740] ss:$16 sps:$4 sm:$0xff]   ;;  %v13784_v51 = vld [vmem:[%s15924_s15 + $0x524] ss:$16 sps:$4 sm:$0xff]  }
  0xa8   : > { %8356 = vmatpush1.bf16.msra.mxu1 %v13689_v52  ;;  %8294 = vmatprep.subr.bf16.mxu0 %v13694_v53  ;;  %v13787_v52 = vld [vmem:[%s15924_s15 + $0x724] ss:$16 sps:$4 sm:$0xff]   ;;  %v13782_v53 = vld [vmem:[%s15924_s15 + $0x520] ss:$16 sps:$4 sm:$0xff]  }
  0xa9   : > { %8357 = vmatprep.subr.bf16.mxu1 %v13697_v54  ;;  %8208 = vmatprep.mubr.bf16.mxu0 %v13752_v3  ;;  %v13785_v54 = vld [vmem:[%s15924_s15 + $0x720] ss:$16 sps:$4 sm:$0xff]   ;;  %v13812_v3 = vld [vmem:[%s15926_s16 + $0x134] ss:$144 sps:$4 sm:$0xff]  }
  0xaa   : > { %8271 = vmatprep.mubr.bf16.mxu1 %v13754_v4  ;;  %v13821_v4 = vld [vmem:[%s15926_s16 + $0x13c] ss:$144 sps:$4 sm:$0xff]  }
  0xab   : > { %8295 = vmatpush1.bf16.msra.mxu0 %v13692_v55  ;;  %v13790_v55 = vld [vmem:[%s15924_s15 + $0x504] ss:$16 sps:$4 sm:$0xff]  }
  0xac   : > { %8358 = vmatpush1.bf16.msra.mxu1 %v13695_v56  ;;  %8296 = vmatprep.subr.bf16.mxu0 %v13700_v57  ;;  %v13793_v56 = vld [vmem:[%s15924_s15 + $0x704] ss:$16 sps:$4 sm:$0xff]   ;;  %v13788_v57 = vld [vmem:[%s15924_s15 + $0x500] ss:$16 sps:$4 sm:$0xff]  }
  0xad   : > { %8359 = vmatprep.subr.bf16.mxu1 %v13703_v58  ;;  %v13791_v58 = vld [vmem:[%s15924_s15 + $0x700] ss:$16 sps:$4 sm:$0xff]  }
  0xae   : > { %8209 = vmatmul.mubr.bf16.gmra.mxu0 %v13756_v5  ;;  %v13806_v5 = vld [vmem:[%s15924_s15 + $0x8c0] ss:$16 sps:$4 sm:$0xff]  }
  0xaf   : > { %8297 = vmatpush1.bf16.msra.mxu0 %v13698_v59  ;;  %8272 = vmatmul.mubr.bf16.gmra.mxu1 %v13757_v6  ;;  %v13802_v59 = vld [vmem:[%s15924_s15 + $0x8e4] ss:$16 sps:$4 sm:$0xff]   ;;  %v13809_v6 = vld [vmem:[%s15924_s15 + $0xac0] ss:$16 sps:$4 sm:$0xff]  }
  0xb0   : > { %8360 = vmatpush1.bf16.msra.mxu1 %v13701_v60  ;;  %8298 = vmatprep.subr.bf16.mxu0 %v13706_v61  ;;  %v13805_v60 = vld [vmem:[%s15924_s15 + $0xae4] ss:$16 sps:$4 sm:$0xff]   ;;  %v13794_v61 = vld [vmem:[%s15926_s16 + $0x10] ss:$144 sps:$4 sm:$0xff]  }
  0xb1   : > { %8361 = vmatprep.subr.bf16.mxu1 %v13709_v62  ;;  %8218 = vmatprep.mubr.bf16.mxu0 %v13770_v15  ;;  %v13797_v62 = vld [vmem:[%s15926_s16 + $0x18] ss:$144 sps:$4 sm:$0xff]   ;;  %v13830_v15 = vld [vmem:[%s15926_s16 + $0x254] ss:$144 sps:$4 sm:$0xff]  }
  0xb2   : > { %8281 = vmatprep.mubr.bf16.mxu1 %v13772_v16  ;;  %v13839_v16 = vld [vmem:[%s15926_s16 + $0x25c] ss:$144 sps:$4 sm:$0xff]  }
  0xb3   : > { %8299 = vmatpush1.bf16.msra.mxu0 %v13704_v63  ;;  %v13800_v63 = vld [vmem:[%s15924_s15 + $0x8e0] ss:$16 sps:$4 sm:$0xff]  }
  0xb4   : > { %8362 = vmatpush1.bf16.msra.mxu1 %v13707_v0  ;;  %8300 = vmatprep.subr.bf16.mxu0 %v13712_v1  ;;  %v13803_v0 = vld [vmem:[%s15924_s15 + $0xae0] ss:$16 sps:$4 sm:$0xff]   ;;  %v13808_v1 = vld [vmem:[%s15924_s15 + $0x8c4] ss:$16 sps:$4 sm:$0xff]  }
  0xb5   : > { %8363 = vmatprep.subr.bf16.mxu1 %v13715_v2  ;;  %v13811_v2 = vld [vmem:[%s15924_s15 + $0xac4] ss:$16 sps:$4 sm:$0xff]  }
  0xb6   : > { %8219 = vmatmul.mubr.bf16.gmra.mxu0 %v13774_v17  ;;  %v13824_v17 = vld [vmem:[%s15924_s15 + $0x880] ss:$16 sps:$4 sm:$0xff]  }
  0xb7   : > { %8301 = vmatpush1.bf16.msra.mxu0 %v13710_v7  ;;  %8282 = vmatmul.mubr.bf16.gmra.mxu1 %v13775_v18  ;;  %v13817_v7 = vld [vmem:[%s15924_s15 + $0x8a4] ss:$16 sps:$4 sm:$0xff]   ;;  %v13827_v18 = vld [vmem:[%s15924_s15 + $0xa80] ss:$16 sps:$4 sm:$0xff]  }
  0xb8   : > { %8364 = vmatpush1.bf16.msra.mxu1 %v13713_v8  ;;  %8302 = vmatprep.subr.bf16.mxu0 %v13718_v9  ;;  %v13820_v8 = vld [vmem:[%s15924_s15 + $0xaa4] ss:$16 sps:$4 sm:$0xff]   ;;  %v13814_v9 = vld [vmem:[%s15926_s16 + $0x130] ss:$144 sps:$4 sm:$0xff]  }
  0xb9   : > { %8365 = vmatprep.subr.bf16.mxu1 %v13721_v10  ;;  %8324 = vmatprep.mubr.bf16.mxu0 %v13796_v28  ;;  %v13815_v10 = vld [vmem:[%s15924_s15 + $0x8a0] ss:$16 sps:$4 sm:$0xff]   ;;  %v13913_v28 = vld [vmem:[%s15926_s16 + $0x2c] ss:$144 sps:$4 sm:$0xff]  }
  0xba   : > { %8387 = vmatprep.mubr.bf16.mxu1 %v13799_v30  ;;  %v13845_v30 = vld [vmem:[%s15924_s15 + $0xa40] ss:$16 sps:$4 sm:$0xff]  }
  0xbb   : > { %8303 = vmatpush1.bf16.msra.mxu0 %v13716_v11  ;;  %v13818_v11 = vld [vmem:[%s15924_s15 + $0xaa0] ss:$16 sps:$4 sm:$0xff]  }
  0xbc   : > { %8366 = vmatpush1.bf16.msra.mxu1 %v13719_v12  ;;  %8304 = vmatprep.subr.bf16.mxu0 %v13724_v13  ;;  %v13823_v12 = vld [vmem:[%s15926_s16 + $0x138] ss:$144 sps:$4 sm:$0xff]   ;;  %v13826_v13 = vld [vmem:[%s15924_s15 + $0x884] ss:$16 sps:$4 sm:$0xff]  }
  0xbd   : > { %8367 = vmatprep.subr.bf16.mxu1 %v13727_v14  ;;  %v13829_v14 = vld [vmem:[%s15924_s15 + $0xa84] ss:$16 sps:$4 sm:$0xff]  }
  0xbf   : > { %8305 = vmatpush1.bf16.msra.mxu0 %v13722_v19  ;;  %v13835_v19 = vld [vmem:[%s15924_s15 + $0x864] ss:$16 sps:$4 sm:$0xff]  }
  0xc0   : > { %8368 = vmatpush1.bf16.msra.mxu1 %v13725_v20  ;;  %8306 = vmatprep.subr.bf16.mxu0 %v13730_v21  ;;  %v13838_v20 = vld [vmem:[%s15924_s15 + $0xa64] ss:$16 sps:$4 sm:$0xff]   ;;  %v13832_v21 = vld [vmem:[%s15926_s16 + $0x250] ss:$144 sps:$4 sm:$0xff]  }
  0xc1   : > { %8369 = vmatprep.subr.bf16.mxu1 %v13733_v22  ;;  %v13833_v22 = vld [vmem:[%s15924_s15 + $0x860] ss:$16 sps:$4 sm:$0xff]  }
  0xc3   : > { %8307 = vmatpush1.bf16.msra.mxu0 %v13728_v23  ;;  %v13836_v23 = vld [vmem:[%s15924_s15 + $0xa60] ss:$16 sps:$4 sm:$0xff]  }
  0xc4   : > { %8370 = vmatpush1.bf16.msra.mxu1 %v13731_v24  ;;  %8308 = vmatprep.subr.bf16.mxu0 %v13736_v25  ;;  %v13841_v24 = vld [vmem:[%s15926_s16 + $0x258] ss:$144 sps:$4 sm:$0xff]   ;;  %v13844_v25 = vld [vmem:[%s15924_s15 + $0x844] ss:$16 sps:$4 sm:$0xff]  }
  0xc5   : > { %8371 = vmatprep.subr.bf16.mxu1 %v13739_v26  ;;  %v13847_v26 = vld [vmem:[%s15924_s15 + $0xa44] ss:$16 sps:$4 sm:$0xff]  }
  0xc7   : > { %8309 = vmatpush2.bf16.msra.mxu0 %v13734_v27  ;;  %v13910_v27 = vld [vmem:[%s15926_s16 + $0x24] ss:$144 sps:$4 sm:$0xff]  }
  0xc8   : > { %8372 = vmatpush2.bf16.msra.mxu1 %v13737_v29  ;;  %8310 = vmatprep.subr.bf16.mxu0 %v13742_v31  ;;  %v13842_v29 = vld [vmem:[%s15924_s15 + $0x840] ss:$16 sps:$4 sm:$0xff]   ;;  %v13850_v31 = vld [vmem:[%s15924_s15 + $0x824] ss:$16 sps:$4 sm:$0xff]  }
  0xc9   : > { %8373 = vmatprep.subr.bf16.mxu1 %v13745_v32  ;;  %v13853_v32 = vld [vmem:[%s15924_s15 + $0xa24] ss:$16 sps:$4 sm:$0xff]  }
  0xcb   : > { %8311 = vmatpush2.bf16.msra.mxu0 %v13740_v33  ;;  %v13848_v33 = vld [vmem:[%s15924_s15 + $0x820] ss:$16 sps:$4 sm:$0xff]  }
  0xcc   : > { %8374 = vmatpush2.bf16.msra.mxu1 %v13743_v34  ;;  %8312 = vmatprep.subr.bf16.mxu0 %v13748_v35  ;;  %v13851_v34 = vld [vmem:[%s15924_s15 + $0xa20] ss:$16 sps:$4 sm:$0xff]   ;;  %v13856_v35 = vld [vmem:[%s15924_s15 + $0x804] ss:$16 sps:$4 sm:$0xff]  }
  0xcd   : > { %8375 = vmatprep.subr.bf16.mxu1 %v13751_v36  ;;  %v13859_v36 = vld [vmem:[%s15924_s15 + $0xa04] ss:$16 sps:$4 sm:$0xff]  }
  0xcf   : > { %8313 = vmatpush2.bf16.msra.mxu0 %v13746_v37  ;;  %v13854_v37 = vld [vmem:[%s15924_s15 + $0x800] ss:$16 sps:$4 sm:$0xff]  }
  0xd0   : > { %8376 = vmatpush2.bf16.msra.mxu1 %v13749_v38  ;;  %8314 = vmatprep.subr.bf16.mxu0 %v13760_v39  ;;  %v13857_v38 = vld [vmem:[%s15924_s15 + $0xa00] ss:$16 sps:$4 sm:$0xff]   ;;  %v13862_v39 = vld [vmem:[%s15924_s15 + $0x9e4] ss:$16 sps:$4 sm:$0xff]  }
  0xd1   : > { %8377 = vmatprep.subr.bf16.mxu1 %v13763_v40  ;;  %v13865_v40 = vld [vmem:[%s15924_s15 + $0xbe4] ss:$16 sps:$4 sm:$0xff]  }
  0xd3   : > { %8315 = vmatpush2.bf16.msra.mxu0 %v13758_v41  ;;  %v13860_v41 = vld [vmem:[%s15924_s15 + $0x9e0] ss:$16 sps:$4 sm:$0xff]  }
  0xd4   : > { %8378 = vmatpush2.bf16.msra.mxu1 %v13761_v42  ;;  %8316 = vmatprep.subr.bf16.mxu0 %v13766_v43  ;;  %v13863_v42 = vld [vmem:[%s15924_s15 + $0xbe0] ss:$16 sps:$4 sm:$0xff]   ;;  %v13868_v43 = vld [vmem:[%s15924_s15 + $0x9c4] ss:$16 sps:$4 sm:$0xff]  }
  0xd5   : > { %8379 = vmatprep.subr.bf16.mxu1 %v13769_v44  ;;  %v13871_v44 = vld [vmem:[%s15924_s15 + $0xbc4] ss:$16 sps:$4 sm:$0xff]  }
  0xd7   : > { %8317 = vmatpush2.bf16.msra.mxu0 %v13764_v45  ;;  %v13866_v45 = vld [vmem:[%s15924_s15 + $0x9c0] ss:$16 sps:$4 sm:$0xff]  }
  0xd8   : > { %8380 = vmatpush2.bf16.msra.mxu1 %v13767_v46  ;;  %8318 = vmatprep.subr.bf16.mxu0 %v13778_v47  ;;  %v13869_v46 = vld [vmem:[%s15924_s15 + $0xbc0] ss:$16 sps:$4 sm:$0xff]   ;;  %v13874_v47 = vld [vmem:[%s15924_s15 + $0x9a4] ss:$16 sps:$4 sm:$0xff]  }
  0xd9   : > { %8381 = vmatprep.subr.bf16.mxu1 %v13781_v48  ;;  %v13877_v48 = vld [vmem:[%s15924_s15 + $0xba4] ss:$16 sps:$4 sm:$0xff]  }
  0xdb   : > { %8319 = vmatpush2.bf16.msra.mxu0 %v13776_v49  ;;  %v13872_v49 = vld [vmem:[%s15924_s15 + $0x9a0] ss:$16 sps:$4 sm:$0xff]  }
  0xdc   : > { %8382 = vmatpush2.bf16.msra.mxu1 %v13779_v50  ;;  %8320 = vmatprep.subr.bf16.mxu0 %v13784_v51  ;;  %v13875_v50 = vld [vmem:[%s15924_s15 + $0xba0] ss:$16 sps:$4 sm:$0xff]   ;;  %v13880_v51 = vld [vmem:[%s15924_s15 + $0x984] ss:$16 sps:$4 sm:$0xff]  }
  0xdd   : > { %8383 = vmatprep.subr.bf16.mxu1 %v13787_v52  ;;  %v13883_v52 = vld [vmem:[%s15924_s15 + $0xb84] ss:$16 sps:$4 sm:$0xff]  }
  0xdf   : > { %8321 = vmatpush2.bf16.msra.mxu0 %v13782_v53  ;;  %v13878_v53 = vld [vmem:[%s15924_s15 + $0x980] ss:$16 sps:$4 sm:$0xff]  }
  0xe0   : > { %8384 = vmatpush2.bf16.msra.mxu1 %v13785_v54  ;;  %8322 = vmatprep.subr.bf16.mxu0 %v13790_v55  ;;  %v13881_v54 = vld [vmem:[%s15924_s15 + $0xb80] ss:$16 sps:$4 sm:$0xff]   ;;  %v13886_v55 = vld [vmem:[%s15924_s15 + $0x964] ss:$16 sps:$4 sm:$0xff]  }
  0xe1   : > { %8385 = vmatprep.subr.bf16.mxu1 %v13793_v56  ;;  %v13889_v56 = vld [vmem:[%s15924_s15 + $0xb64] ss:$16 sps:$4 sm:$0xff]  }
  0xe3   : > { %8323 = vmatpush2.bf16.msra.mxu0 %v13788_v57  ;;  %v13884_v57 = vld [vmem:[%s15924_s15 + $0x960] ss:$16 sps:$4 sm:$0xff]  }
  0xe4   : > { %8386 = vmatpush2.bf16.msra.mxu1 %v13791_v58  ;;  %8418 = vmatprep.subr.bf16.mxu0 %v13802_v59  ;;  %v13887_v58 = vld [vmem:[%s15924_s15 + $0xb60] ss:$16 sps:$4 sm:$0xff]   ;;  %v13892_v59 = vld [vmem:[%s15924_s15 + $0x944] ss:$16 sps:$4 sm:$0xff]  }
  0xe5   : > { %8481 = vmatprep.subr.bf16.mxu1 %v13805_v60  ;;  %v13895_v60 = vld [vmem:[%s15924_s15 + $0xb44] ss:$16 sps:$4 sm:$0xff]  }
  0xe6   : > { %8325 = vmatmul.mubr.bf16.vlgmr.msra.gmra.mxu0 %v13794_v61  ;;  %v13890_v61 = vld [vmem:[%s15924_s15 + $0x940] ss:$16 sps:$4 sm:$0xff]  }
  0xe7   : > { %8388 = vmatmul.mubr.bf16.vlgmr.msra.gmra.mxu1 %v13797_v62  ;;  %8419 = vmatpush1.bf16.msra.mxu0 %v13800_v63  ;;  %v13893_v62 = vld [vmem:[%s15924_s15 + $0xb40] ss:$16 sps:$4 sm:$0xff]   ;;  %v13898_v63 = vld [vmem:[%s15924_s15 + $0x924] ss:$16 sps:$4 sm:$0xff]  }
  0xe8   : > { %8482 = vmatpush1.bf16.msra.mxu1 %v13803_v0  ;;  %8420 = vmatprep.subr.bf16.mxu0 %v13808_v1  ;;  %v13901_v0 = vld [vmem:[%s15924_s15 + $0xb24] ss:$16 sps:$4 sm:$0xff]   ;;  %v13896_v1 = vld [vmem:[%s15924_s15 + $0x920] ss:$16 sps:$4 sm:$0xff]  }
  0xe9   : > { %8483 = vmatprep.subr.bf16.mxu1 %v13811_v2  ;;  %8334 = vmatprep.mubr.bf16.mxu0 %v13812_v3  ;;  %v13899_v2 = vld [vmem:[%s15924_s15 + $0xb20] ss:$16 sps:$4 sm:$0xff]   ;;  %v13904_v3 = vld [vmem:[%s15924_s15 + $0x904] ss:$16 sps:$4 sm:$0xff]  }
  0xea   : > { %8397 = vmatprep.mubr.bf16.mxu1 %v13821_v4  ;;  %v13907_v4 = vld [vmem:[%s15924_s15 + $0xb04] ss:$16 sps:$4 sm:$0xff]  }
  0xeb   : > { %8421 = vmatpush1.bf16.msra.mxu0 %v13806_v5  ;;  %v13902_v5 = vld [vmem:[%s15924_s15 + $0x900] ss:$16 sps:$4 sm:$0xff]  }
  0xec   : > { %8484 = vmatpush1.bf16.msra.mxu1 %v13809_v6  ;;  %8422 = vmatprep.subr.bf16.mxu0 %v13817_v7  ;;  %v13905_v6 = vld [vmem:[%s15924_s15 + $0xb00] ss:$16 sps:$4 sm:$0xff]   ;;  %v13916_v7 = vld [vmem:[%s15924_s15 + $0xce4] ss:$16 sps:$4 sm:$0xff]  }
  0xed   : > { %8485 = vmatprep.subr.bf16.mxu1 %v13820_v8  ;;  %v13919_v8 = vld [vmem:[%s15924_s15 + $0xee4] ss:$16 sps:$4 sm:$0xff]  }
  0xee   : > { %8335 = vmatmul.mubr.bf16.gmra.mxu0 %v13814_v9  ;;  %v13908_v9 = vld [vmem:[%s15926_s16 + $0x20] ss:$144 sps:$4 sm:$0xff]  }
  0xef   : > { %8398 = vmatmul.mubr.bf16.gmra.mxu1 %v13823_v12  ;;  %8423 = vmatpush1.bf16.msra.mxu0 %v13815_v10  ;;  %v13911_v10 = vld [vmem:[%s15926_s16 + $0x28] ss:$144 sps:$4 sm:$0xff]   ;;  %v13917_v12 = vld [vmem:[%s15924_s15 + $0xee0] ss:$16 sps:$4 sm:$0xff]  }
  0xf0   : > { %8486 = vmatpush1.bf16.msra.mxu1 %v13818_v11  ;;  %8424 = vmatprep.subr.bf16.mxu0 %v13826_v13  ;;  %v13914_v11 = vld [vmem:[%s15924_s15 + $0xce0] ss:$16 sps:$4 sm:$0xff]   ;;  %v13922_v13 = vld [vmem:[%s15924_s15 + $0xcc4] ss:$16 sps:$4 sm:$0xff]  }
  0xf1   : > { %8487 = vmatprep.subr.bf16.mxu1 %v13829_v14  ;;  %8344 = vmatprep.mubr.bf16.mxu0 %v13830_v15  ;;  %v13925_v14 = vld [vmem:[%s15924_s15 + $0xec4] ss:$16 sps:$4 sm:$0xff]  }
  0xf2   : > { %8407 = vmatprep.mubr.bf16.mxu1 %v13839_v16  ;;  %v13926_v15 = vld [vmem:[%s15926_s16 + $0x144] ss:$144 sps:$4 sm:$0xff]   ;;  %v13935_v16 = vld [vmem:[%s15926_s16 + $0x14c] ss:$144 sps:$4 sm:$0xff]  }
  0xf3   : > { %8425 = vmatpush1.bf16.msra.mxu0 %v13824_v17  ;;  %v13920_v17 = vld [vmem:[%s15924_s15 + $0xcc0] ss:$16 sps:$4 sm:$0xff]  }
  0xf4   : > { %8488 = vmatpush1.bf16.msra.mxu1 %v13827_v18  ;;  %8426 = vmatprep.subr.bf16.mxu0 %v13835_v19  ;;  %v13923_v18 = vld [vmem:[%s15924_s15 + $0xec0] ss:$16 sps:$4 sm:$0xff]   ;;  %v13931_v19 = vld [vmem:[%s15924_s15 + $0xca4] ss:$16 sps:$4 sm:$0xff]  }
  0xf5   : > { %8489 = vmatprep.subr.bf16.mxu1 %v13838_v20  ;;  %v13934_v20 = vld [vmem:[%s15924_s15 + $0xea4] ss:$16 sps:$4 sm:$0xff]  }
  0xf6   : > { %8345 = vmatmul.mubr.bf16.gmra.mxu0 %v13832_v21  ;;  %v13928_v21 = vld [vmem:[%s15926_s16 + $0x140] ss:$144 sps:$4 sm:$0xff]  }
  0xf7   : > { %8408 = vmatmul.mubr.bf16.gmra.mxu1 %v13841_v24  ;;  %8427 = vmatpush1.bf16.msra.mxu0 %v13833_v22  ;;  %v13929_v22 = vld [vmem:[%s15924_s15 + $0xca0] ss:$16 sps:$4 sm:$0xff]   ;;  %v13937_v24 = vld [vmem:[%s15926_s16 + $0x148] ss:$144 sps:$4 sm:$0xff]  }
  0xf8   : > { %8490 = vmatpush1.bf16.msra.mxu1 %v13836_v23  ;;  %8428 = vmatprep.subr.bf16.mxu0 %v13844_v25  ;;  %v13932_v23 = vld [vmem:[%s15924_s15 + $0xea0] ss:$16 sps:$4 sm:$0xff]   ;;  %v13940_v25 = vld [vmem:[%s15924_s15 + $0xc84] ss:$16 sps:$4 sm:$0xff]  }
  0xf9   : > { %8491 = vmatprep.subr.bf16.mxu1 %v13847_v26  ;;  %8450 = vmatprep.mubr.bf16.mxu0 %v13910_v27  ;;  %v13943_v26 = vld [vmem:[%s15924_s15 + $0xe84] ss:$16 sps:$4 sm:$0xff]  }
  0xfa   : > { %8513 = vmatprep.mubr.bf16.mxu1 %v13913_v28  ;;  %v13944_v27 = vld [vmem:[%s15926_s16 + $0x264] ss:$144 sps:$4 sm:$0xff]   ;;  %v13953_v28 = vld [vmem:[%s15926_s16 + $0x26c] ss:$144 sps:$4 sm:$0xff]  }
  0xfb   : > { %8429 = vmatpush1.bf16.msra.mxu0 %v13842_v29  ;;  %v13938_v29 = vld [vmem:[%s15924_s15 + $0xc80] ss:$16 sps:$4 sm:$0xff]  }
  0xfc   : > { %8492 = vmatpush1.bf16.msra.mxu1 %v13845_v30  ;;  %8430 = vmatprep.subr.bf16.mxu0 %v13850_v31  ;;  %v13941_v30 = vld [vmem:[%s15924_s15 + $0xe80] ss:$16 sps:$4 sm:$0xff]   ;;  %v13949_v31 = vld [vmem:[%s15924_s15 + $0xc64] ss:$16 sps:$4 sm:$0xff]  }
  0xfd   : > { %8493 = vmatprep.subr.bf16.mxu1 %v13853_v32  ;;  %v13952_v32 = vld [vmem:[%s15924_s15 + $0xe64] ss:$16 sps:$4 sm:$0xff]  }
  0xff   : > { %8431 = vmatpush1.bf16.msra.mxu0 %v13848_v33  ;;  %v13946_v33 = vld [vmem:[%s15926_s16 + $0x260] ss:$144 sps:$4 sm:$0xff]  }
 0x100   : > { %8494 = vmatpush1.bf16.msra.mxu1 %v13851_v34  ;;  %8432 = vmatprep.subr.bf16.mxu0 %v13856_v35  ;;  %v13947_v34 = vld [vmem:[%s15924_s15 + $0xc60] ss:$16 sps:$4 sm:$0xff]  }
 0x101   : > { %8495 = vmatprep.subr.bf16.mxu1 %v13859_v36  ;;  %v13950_v35 = vld [vmem:[%s15924_s15 + $0xe60] ss:$16 sps:$4 sm:$0xff]   ;;  %v13955_v36 = vld [vmem:[%s15926_s16 + $0x268] ss:$144 sps:$4 sm:$0xff]  }
 0x103   : > { %8433 = vmatpush1.bf16.msra.mxu0 %v13854_v37  ;;  %v13958_v37 = vld [vmem:[%s15924_s15 + $0xc44] ss:$16 sps:$4 sm:$0xff]  }
 0x104   : > { %8496 = vmatpush1.bf16.msra.mxu1 %v13857_v38  ;;  %8434 = vmatprep.subr.bf16.mxu0 %v13862_v39  ;;  %v13961_v38 = vld [vmem:[%s15924_s15 + $0xe44] ss:$16 sps:$4 sm:$0xff]  }
 0x105   : > { %8497 = vmatprep.subr.bf16.mxu1 %v13865_v40  ;;  %v14024_v39 = vld [vmem:[%s15926_s16 + $0x34] ss:$144 sps:$4 sm:$0xff]   ;;  %v14027_v40 = vld [vmem:[%s15926_s16 + $0x3c] ss:$144 sps:$4 sm:$0xff]  }
 0x107   : > { %8435 = vmatpush2.bf16.msra.mxu0 %v13860_v41  ;;  %v13956_v41 = vld [vmem:[%s15924_s15 + $0xc40] ss:$16 sps:$4 sm:$0xff]  }
 0x108   : > { %8498 = vmatpush2.bf16.msra.mxu1 %v13863_v42  ;;  %8436 = vmatprep.subr.bf16.mxu0 %v13868_v43  ;;  %v13959_v42 = vld [vmem:[%s15924_s15 + $0xe40] ss:$16 sps:$4 sm:$0xff]   ;;  %v13964_v43 = vld [vmem:[%s15924_s15 + $0xc24] ss:$16 sps:$4 sm:$0xff]  }
 0x109   : > { %8499 = vmatprep.subr.bf16.mxu1 %v13871_v44  ;;  %v13967_v44 = vld [vmem:[%s15924_s15 + $0xe24] ss:$16 sps:$4 sm:$0xff]  }
 0x10b   : > { %8437 = vmatpush2.bf16.msra.mxu0 %v13866_v45  ;;  %v13962_v45 = vld [vmem:[%s15924_s15 + $0xc20] ss:$16 sps:$4 sm:$0xff]  }
 0x10c   : > { %8500 = vmatpush2.bf16.msra.mxu1 %v13869_v46  ;;  %8438 = vmatprep.subr.bf16.mxu0 %v13874_v47  ;;  %v13965_v46 = vld [vmem:[%s15924_s15 + $0xe20] ss:$16 sps:$4 sm:$0xff]   ;;  %v13970_v47 = vld [vmem:[%s15924_s15 + $0xc04] ss:$16 sps:$4 sm:$0xff]  }
 0x10d   : > { %8501 = vmatprep.subr.bf16.mxu1 %v13877_v48  ;;  %v13973_v48 = vld [vmem:[%s15924_s15 + $0xe04] ss:$16 sps:$4 sm:$0xff]  }
 0x10f   : > { %8439 = vmatpush2.bf16.msra.mxu0 %v13872_v49  ;;  %v13968_v49 = vld [vmem:[%s15924_s15 + $0xc00] ss:$16 sps:$4 sm:$0xff]  }
 0x110   : > { %8502 = vmatpush2.bf16.msra.mxu1 %v13875_v50  ;;  %8440 = vmatprep.subr.bf16.mxu0 %v13880_v51  ;;  %v13971_v50 = vld [vmem:[%s15924_s15 + $0xe00] ss:$16 sps:$4 sm:$0xff]   ;;  %v13976_v51 = vld [vmem:[%s15924_s15 + $0xde4] ss:$16 sps:$4 sm:$0xff]  }
 0x111   : > { %8503 = vmatprep.subr.bf16.mxu1 %v13883_v52  ;;  %v13979_v52 = vld [vmem:[%s15924_s15 + $0xfe4] ss:$16 sps:$4 sm:$0xff]  }
 0x113   : > { %8441 = vmatpush2.bf16.msra.mxu0 %v13878_v53  ;;  %v13974_v53 = vld [vmem:[%s15924_s15 + $0xde0] ss:$16 sps:$4 sm:$0xff]  }
 0x114   : > { %8504 = vmatpush2.bf16.msra.mxu1 %v13881_v54  ;;  %8442 = vmatprep.subr.bf16.mxu0 %v13886_v55  ;;  %v13977_v54 = vld [vmem:[%s15924_s15 + $0xfe0] ss:$16 sps:$4 sm:$0xff]   ;;  %v13982_v55 = vld [vmem:[%s15924_s15 + $0xdc4] ss:$16 sps:$4 sm:$0xff]  }
 0x115   : > { %8505 = vmatprep.subr.bf16.mxu1 %v13889_v56  ;;  %v13985_v56 = vld [vmem:[%s15924_s15 + $0xfc4] ss:$16 sps:$4 sm:$0xff]  }
 0x117   : > { %8443 = vmatpush2.bf16.msra.mxu0 %v13884_v57  ;;  %v13980_v57 = vld [vmem:[%s15924_s15 + $0xdc0] ss:$16 sps:$4 sm:$0xff]  }
 0x118   : > { %8506 = vmatpush2.bf16.msra.mxu1 %v13887_v58  ;;  %8444 = vmatprep.subr.bf16.mxu0 %v13892_v59  ;;  %v13983_v58 = vld [vmem:[%s15924_s15 + $0xfc0] ss:$16 sps:$4 sm:$0xff]   ;;  %v13988_v59 = vld [vmem:[%s15924_s15 + $0xda4] ss:$16 sps:$4 sm:$0xff]  }
 0x119   : > { %8507 = vmatprep.subr.bf16.mxu1 %v13895_v60  ;;  %v13991_v60 = vld [vmem:[%s15924_s15 + $0xfa4] ss:$16 sps:$4 sm:$0xff]  }
 0x11b   : > { %8445 = vmatpush2.bf16.msra.mxu0 %v13890_v61  ;;  %v13986_v61 = vld [vmem:[%s15924_s15 + $0xda0] ss:$16 sps:$4 sm:$0xff]  }
 0x11c   : > { %8508 = vmatpush2.bf16.msra.mxu1 %v13893_v62  ;;  %8446 = vmatprep.subr.bf16.mxu0 %v13898_v63  ;;  %v13989_v62 = vld [vmem:[%s15924_s15 + $0xfa0] ss:$16 sps:$4 sm:$0xff]   ;;  %v13994_v63 = vld [vmem:[%s15924_s15 + $0xd84] ss:$16 sps:$4 sm:$0xff]  }
 0x11d   : > { %8509 = vmatprep.subr.bf16.mxu1 %v13901_v0  ;;  %v13997_v0 = vld [vmem:[%s15924_s15 + $0xf84] ss:$16 sps:$4 sm:$0xff]  }
 0x11f   : > { %8447 = vmatpush2.bf16.msra.mxu0 %v13896_v1  ;;  %v13992_v1 = vld [vmem:[%s15924_s15 + $0xd80] ss:$16 sps:$4 sm:$0xff]  }
 0x120   : > { %8510 = vmatpush2.bf16.msra.mxu1 %v13899_v2  ;;  %8448 = vmatprep.subr.bf16.mxu0 %v13904_v3  ;;  %v13995_v2 = vld [vmem:[%s15924_s15 + $0xf80] ss:$16 sps:$4 sm:$0xff]   ;;  %v14000_v3 = vld [vmem:[%s15924_s15 + $0xd64] ss:$16 sps:$4 sm:$0xff]  }
 0x121   : > { %8511 = vmatprep.subr.bf16.mxu1 %v13907_v4  ;;  %v14003_v4 = vld [vmem:[%s15924_s15 + $0xf64] ss:$16 sps:$4 sm:$0xff]  }
 0x123   : > { %8449 = vmatpush2.bf16.msra.mxu0 %v13902_v5  ;;  %v13998_v5 = vld [vmem:[%s15924_s15 + $0xd60] ss:$16 sps:$4 sm:$0xff]  }
 0x124   : > { %8512 = vmatpush2.bf16.msra.mxu1 %v13905_v6  ;;  %8544 = vmatprep.subr.bf16.mxu0 %v13916_v7  ;;  %v14001_v6 = vld [vmem:[%s15924_s15 + $0xf60] ss:$16 sps:$4 sm:$0xff]   ;;  %v14006_v7 = vld [vmem:[%s15924_s15 + $0xd44] ss:$16 sps:$4 sm:$0xff]  }
 0x125   : > { %8607 = vmatprep.subr.bf16.mxu1 %v13919_v8  ;;  %v14009_v8 = vld [vmem:[%s15924_s15 + $0xf44] ss:$16 sps:$4 sm:$0xff]  }
 0x126   : > { %8451 = vmatmul.mubr.bf16.vlgmr.msra.gmra.mxu0 %v13908_v9  ;;  %v14004_v9 = vld [vmem:[%s15924_s15 + $0xd40] ss:$16 sps:$4 sm:$0xff]  }
 0x127   : > { %8514 = vmatmul.mubr.bf16.vlgmr.msra.gmra.mxu1 %v13911_v10  ;;  %8545 = vmatpush1.bf16.msra.mxu0 %v13914_v11  ;;  %v14007_v10 = vld [vmem:[%s15924_s15 + $0xf40] ss:$16 sps:$4 sm:$0xff]   ;;  %v14012_v11 = vld [vmem:[%s15924_s15 + $0xd24] ss:$16 sps:$4 sm:$0xff]  }
 0x128   : > { %8608 = vmatpush1.bf16.msra.mxu1 %v13917_v12  ;;  %8546 = vmatprep.subr.bf16.mxu0 %v13922_v13  ;;  %v14015_v12 = vld [vmem:[%s15924_s15 + $0xf24] ss:$16 sps:$4 sm:$0xff]   ;;  %v14010_v13 = vld [vmem:[%s15924_s15 + $0xd20] ss:$16 sps:$4 sm:$0xff]  }
 0x129   : > { %8609 = vmatprep.subr.bf16.mxu1 %v13925_v14  ;;  %8460 = vmatprep.mubr.bf16.mxu0 %v13926_v15  ;;  %v14013_v14 = vld [vmem:[%s15924_s15 + $0xf20] ss:$16 sps:$4 sm:$0xff]   ;;  %v14018_v15 = vld [vmem:[%s15924_s15 + $0xd04] ss:$16 sps:$4 sm:$0xff]  }
 0x12a   : > { %8523 = vmatprep.mubr.bf16.mxu1 %v13935_v16  ;;  %v14021_v16 = vld [vmem:[%s15924_s15 + $0xf04] ss:$16 sps:$4 sm:$0xff]  }
 0x12b   : > { %8547 = vmatpush1.bf16.msra.mxu0 %v13920_v17  ;;  %v14016_v17 = vld [vmem:[%s15924_s15 + $0xd00] ss:$16 sps:$4 sm:$0xff]  }
 0x12c   : > { %8610 = vmatpush1.bf16.msra.mxu1 %v13923_v18  ;;  %8548 = vmatprep.subr.bf16.mxu0 %v13931_v19  ;;  %v14019_v18 = vld [vmem:[%s15924_s15 + $0xf00] ss:$16 sps:$4 sm:$0xff]   ;;  %v14030_v19 = vld [vmem:[%s15924_s15 + $0x10e4] ss:$16 sps:$4 sm:$0xff]  }
 0x12d   : > { %8611 = vmatprep.subr.bf16.mxu1 %v13934_v20  ;;  %v14033_v20 = vld [vmem:[%s15924_s15 + $0x12e4] ss:$16 sps:$4 sm:$0xff]  }
 0x12e   : > { %8461 = vmatmul.mubr.bf16.gmra.mxu0 %v13928_v21  ;;  %v14022_v21 = vld [vmem:[%s15926_s16 + $0x30] ss:$144 sps:$4 sm:$0xff]  }
 0x12f   : > { %8524 = vmatmul.mubr.bf16.gmra.mxu1 %v13937_v24  ;;  %8549 = vmatpush1.bf16.msra.mxu0 %v13929_v22  ;;  %v14025_v22 = vld [vmem:[%s15926_s16 + $0x38] ss:$144 sps:$4 sm:$0xff]   ;;  %v14031_v24 = vld [vmem:[%s15924_s15 + $0x12e0] ss:$16 sps:$4 sm:$0xff]  }
 0x130   : > { %8612 = vmatpush1.bf16.msra.mxu1 %v13932_v23  ;;  %8550 = vmatprep.subr.bf16.mxu0 %v13940_v25  ;;  %v14028_v23 = vld [vmem:[%s15924_s15 + $0x10e0] ss:$16 sps:$4 sm:$0xff]   ;;  %v14036_v25 = vld [vmem:[%s15924_s15 + $0x10c4] ss:$16 sps:$4 sm:$0xff]  }
 0x131   : > { %8613 = vmatprep.subr.bf16.mxu1 %v13943_v26  ;;  %8470 = vmatprep.mubr.bf16.mxu0 %v13944_v27  ;;  %v14039_v26 = vld [vmem:[%s15924_s15 + $0x12c4] ss:$16 sps:$4 sm:$0xff]  }
 0x132   : > { %8533 = vmatprep.mubr.bf16.mxu1 %v13953_v28  ;;  %v14040_v27 = vld [vmem:[%s15926_s16 + $0x154] ss:$144 sps:$4 sm:$0xff]   ;;  %v14049_v28 = vld [vmem:[%s15926_s16 + $0x15c] ss:$144 sps:$4 sm:$0xff]  }
 0x133   : > { %8551 = vmatpush1.bf16.msra.mxu0 %v13938_v29 }
 0x134   : > { %8614 = vmatpush1.bf16.msra.mxu1 %v13941_v30  ;;  %8552 = vmatprep.subr.bf16.mxu0 %v13949_v31  ;;  %v14034_v31 = vld [vmem:[%s15924_s15 + $0x10c0] ss:$16 sps:$4 sm:$0xff]  }
 0x135   : > { %8615 = vmatprep.subr.bf16.mxu1 %v13952_v32  ;;  %v14037_v32 = vld [vmem:[%s15924_s15 + $0x12c0] ss:$16 sps:$4 sm:$0xff]  }
 0x136   : > { %8471 = vmatmul.mubr.bf16.gmra.mxu0 %v13946_v33 }
 0x137   : > { %8534 = vmatmul.mubr.bf16.gmra.mxu1 %v13955_v36  ;;  %8553 = vmatpush1.bf16.msra.mxu0 %v13947_v34  ;;  %v14045_v34 = vld [vmem:[%s15924_s15 + $0x10a4] ss:$16 sps:$4 sm:$0xff]  }
 0x138   : > { %8616 = vmatpush1.bf16.msra.mxu1 %v13950_v35  ;;  %8554 = vmatprep.subr.bf16.mxu0 %v13958_v37  ;;  %v14048_v37 = vld [vmem:[%s15924_s15 + $0x12a4] ss:$16 sps:$4 sm:$0xff]  }
 0x139   : > { %8617 = vmatprep.subr.bf16.mxu1 %v13961_v38  ;;  %8576 = vmatprep.mubr.bf16.mxu0 %v14024_v39  ;;  %v14042_v39 = vld [vmem:[%s15926_s16 + $0x150] ss:$144 sps:$4 sm:$0xff]  }
 0x13a   : > { %8639 = vmatprep.mubr.bf16.mxu1 %v14027_v40  ;;  %v14043_v40 = vld [vmem:[%s15924_s15 + $0x10a0] ss:$16 sps:$4 sm:$0xff]  }
 0x13b   : > { %8555 = vmatpush1.bf16.msra.mxu0 %v13956_v41 }
 0x13c   : > { %8618 = vmatpush1.bf16.msra.mxu1 %v13959_v42  ;;  %8556 = vmatprep.subr.bf16.mxu0 %v13964_v43  ;;  %v14046_v43 = vld [vmem:[%s15924_s15 + $0x12a0] ss:$16 sps:$4 sm:$0xff]  }
 0x13d   : > { %8619 = vmatprep.subr.bf16.mxu1 %v13967_v44  ;;  %v14051_v44 = vld [vmem:[%s15926_s16 + $0x158] ss:$144 sps:$4 sm:$0xff]  }
 0x13f   : > { %8557 = vmatpush1.bf16.msra.mxu0 %v13962_v45 }
 0x140   : > { %8620 = vmatpush1.bf16.msra.mxu1 %v13965_v46  ;;  %8558 = vmatprep.subr.bf16.mxu0 %v13970_v47  ;;  %v14054_v46 = vld [vmem:[%s15924_s15 + $0x1084] ss:$16 sps:$4 sm:$0xff]  }
 0x141   : > { %8621 = vmatprep.subr.bf16.mxu1 %v13973_v48  ;;  %v14057_v47 = vld [vmem:[%s15924_s15 + $0x1284] ss:$16 sps:$4 sm:$0xff]  }
 0x142   : > { %v14058_v48 = vld [vmem:[%s15926_s16 + $0x274] ss:$144 sps:$4 sm:$0xff]  }
 0x143   : > { %8559 = vmatpush1.bf16.msra.mxu0 %v13968_v49  ;;  %v14067_v49 = vld [vmem:[%s15926_s16 + $0x27c] ss:$144 sps:$4 sm:$0xff]  }
 0x144   : > { %8622 = vmatpush1.bf16.msra.mxu1 %v13971_v50  ;;  %8560 = vmatprep.subr.bf16.mxu0 %v13976_v51  ;;  %v14052_v50 = vld [vmem:[%s15924_s15 + $0x1080] ss:$16 sps:$4 sm:$0xff]  }
 0x145   : > { %8623 = vmatprep.subr.bf16.mxu1 %v13979_v52  ;;  %v14055_v51 = vld [vmem:[%s15924_s15 + $0x1280] ss:$16 sps:$4 sm:$0xff]   ;;  %v14063_v52 = vld [vmem:[%s15924_s15 + $0x1064] ss:$16 sps:$4 sm:$0xff]  }
 0x147   : > { %8561 = vmatpush2.bf16.msra.mxu0 %v13974_v53 }
 0x148   : > { %8624 = vmatpush2.bf16.msra.mxu1 %v13977_v54  ;;  %8562 = vmatprep.subr.bf16.mxu0 %v13982_v55  ;;  %v14066_v55 = vld [vmem:[%s15924_s15 + $0x1264] ss:$16 sps:$4 sm:$0xff]  }
 0x149   : > { %8625 = vmatprep.subr.bf16.mxu1 %v13985_v56  ;;  %v14060_v56 = vld [vmem:[%s15926_s16 + $0x270] ss:$144 sps:$4 sm:$0xff]  }
 0x14b   : > { %8563 = vmatpush2.bf16.msra.mxu0 %v13980_v57  ;;  %v14061_v57 = vld [vmem:[%s15924_s15 + $0x1060] ss:$16 sps:$4 sm:$0xff]  }
 0x14c   : > { %8626 = vmatpush2.bf16.msra.mxu1 %v13983_v58  ;;  %8564 = vmatprep.subr.bf16.mxu0 %v13988_v59  ;;  %v14064_v58 = vld [vmem:[%s15924_s15 + $0x1260] ss:$16 sps:$4 sm:$0xff]   ;;  %v14069_v59 = vld [vmem:[%s15926_s16 + $0x278] ss:$144 sps:$4 sm:$0xff]  }
 0x14d   : > { %8627 = vmatprep.subr.bf16.mxu1 %v13991_v60 }
 0x14f   : > { %8565 = vmatpush2.bf16.msra.mxu0 %v13986_v61 }
 0x150   : > { %8628 = vmatpush2.bf16.msra.mxu1 %v13989_v62  ;;  %8566 = vmatprep.subr.bf16.mxu0 %v13994_v63  ;;  %v14072_v62 = vld [vmem:[%s15924_s15 + $0x1044] ss:$16 sps:$4 sm:$0xff]  }
 0x151   : > { %8629 = vmatprep.subr.bf16.mxu1 %v13997_v0  ;;  %v14075_v0 = vld [vmem:[%s15924_s15 + $0x1244] ss:$16 sps:$4 sm:$0xff]  }
 0x153   : > { %8567 = vmatpush2.bf16.msra.mxu0 %v13992_v1 }
 0x154   : > { %8630 = vmatpush2.bf16.msra.mxu1 %v13995_v2  ;;  %8568 = vmatprep.subr.bf16.mxu0 %v14000_v3 }
 0x155   : > { %8631 = vmatprep.subr.bf16.mxu1 %v14003_v4  ;;  %v14138_v4 = vld [vmem:[%s15926_s16 + $0x44] ss:$144 sps:$4 sm:$0xff]  }
 0x157   : > { %8569 = vmatpush2.bf16.msra.mxu0 %v13998_v5  ;;  %v14141_v5 = vld [vmem:[%s15926_s16 + $0x4c] ss:$144 sps:$4 sm:$0xff]  }
 0x158   : > { %8632 = vmatpush2.bf16.msra.mxu1 %v14001_v6  ;;  %8570 = vmatprep.subr.bf16.mxu0 %v14006_v7  ;;  %v14070_v6 = vld [vmem:[%s15924_s15 + $0x1040] ss:$16 sps:$4 sm:$0xff]  }
 0x159   : > { %8633 = vmatprep.subr.bf16.mxu1 %v14009_v8  ;;  %v14073_v7 = vld [vmem:[%s15924_s15 + $0x1240] ss:$16 sps:$4 sm:$0xff]  }
 0x15b   : > { %8571 = vmatpush2.bf16.msra.mxu0 %v14004_v9 }
 0x15c   : > { %8634 = vmatpush2.bf16.msra.mxu1 %v14007_v10  ;;  %8572 = vmatprep.subr.bf16.mxu0 %v14012_v11  ;;  %v14078_v10 = vld [vmem:[%s15924_s15 + $0x1024] ss:$16 sps:$4 sm:$0xff]  }
 0x15d   : > { %8635 = vmatprep.subr.bf16.mxu1 %v14015_v12  ;;  %v14081_v12 = vld [vmem:[%s15924_s15 + $0x1224] ss:$16 sps:$4 sm:$0xff]  }
 0x15f   : > { %8573 = vmatpush2.bf16.msra.mxu0 %v14010_v13 }
 0x160   : > { %8636 = vmatpush2.bf16.msra.mxu1 %v14013_v14  ;;  %8574 = vmatprep.subr.bf16.mxu0 %v14018_v15  ;;  %v14076_v15 = vld [vmem:[%s15924_s15 + $0x1020] ss:$16 sps:$4 sm:$0xff]  }
 0x161   : > { %8637 = vmatprep.subr.bf16.mxu1 %v14021_v16  ;;  %v14079_v16 = vld [vmem:[%s15924_s15 + $0x1220] ss:$16 sps:$4 sm:$0xff]  }
 0x163   : > { %8575 = vmatpush2.bf16.msra.mxu0 %v14016_v17 }
 0x164   : > { %8638 = vmatpush2.bf16.msra.mxu1 %v14019_v18  ;;  %8670 = vmatprep.subr.bf16.mxu0 %v14030_v19  ;;  %v14084_v19 = vld [vmem:[%s15924_s15 + $0x1004] ss:$16 sps:$4 sm:$0xff]  }
 0x165   : > { %8733 = vmatprep.subr.bf16.mxu1 %v14033_v20 }
 0x166   : > { %v8200_v29 = vpop.f32.mrf.mxu0  ;;  %8577 = vmatmul.mubr.bf16.vlgmr.msra.gmra.mxu0 %v14022_v21  ;;  %v14087_v21 = vld [vmem:[%s15924_s15 + $0x1204] ss:$16 sps:$4 sm:$0xff]  }
 0x167   : > { %v8263_v30 = vpop.f32.mrf.mxu1  ;;  %8640 = vmatmul.mubr.bf16.vlgmr.msra.gmra.mxu1 %v14025_v22  ;;  %8671 = vmatpush1.bf16.msra.mxu0 %v14028_v23 }
 0x168   : > { %v16235_v33 = vadd.f32 %v8263_v30, %v8200_v29  ;;  %8734 = vmatpush1.bf16.msra.mxu1 %v14031_v24  ;;  %v8202_v35 = vpop.f32.mrf.mxu0  ;;  %8672 = vmatprep.subr.bf16.mxu0 %v14036_v25  ;;  %v14082_v25 = vld [vmem:[%s15924_s15 + $0x1000] ss:$16 sps:$4 sm:$0xff]   ;;  %v14090_v29 = vld [vmem:[%s15924_s15 + $0x11e4] ss:$16 sps:$4 sm:$0xff]  }
 0x169   : > { %v8265_v36 = vpop.f32.mrf.mxu1  ;;  %8735 = vmatprep.subr.bf16.mxu1 %v14039_v26  ;;  %8586 = vmatprep.mubr.bf16.mxu0 %v14040_v27  ;;  %v14085_v26 = vld [vmem:[%s15924_s15 + $0x1200] ss:$16 sps:$4 sm:$0xff]  }
 0x16a   : > { %v16239_v38 = vadd.f32 %v8265_v36, %v8202_v35  ;;  %8649 = vmatprep.mubr.bf16.mxu1 %v14049_v28  ;;  %v8204_v41 = vpop.f32.mrf.mxu0  ;;  %v14096_v35 = vld [vmem:[%s15924_s15 + $0x11c4] ss:$16 sps:$4 sm:$0xff]  }
 0x16b   : > { %v8267_v42 = vpop.f32.mrf.mxu1  ;;  %8673 = vmatpush1.bf16.msra.mxu0 %v14034_v31  ;;  %v14093_v31 = vld [vmem:[%s15924_s15 + $0x13e4] ss:$16 sps:$4 sm:$0xff]  }
 0x16c   : > { %v16245_v45 = vadd.f32 %v8267_v42, %v8204_v41  ;;  %8736 = vmatpush1.bf16.msra.mxu1 %v14037_v32  ;;  %8674 = vmatprep.subr.bf16.mxu0 %v14045_v34  ;;  %v16254_v53 = vpop.f32.mrf.mxu0  ;;  %v14088_v32 = vld [vmem:[%s15924_s15 + $0x11e0] ss:$16 sps:$4 sm:$0xff]   ;;  %v14099_v36 = vld [vmem:[%s15924_s15 + $0x13c4] ss:$16 sps:$4 sm:$0xff]  }
 0x16d   : > { %8737 = vmatprep.subr.bf16.mxu1 %v14048_v37  ;;  %v16256_v54 = vpop.f32.mrf.mxu1  ;;  %v14091_v34 = vld [vmem:[%s15924_s15 + $0x13e0] ss:$16 sps:$4 sm:$0xff]   ;;  %v14105_v41 = vld [vmem:[%s15924_s15 + $0x13a4] ss:$16 sps:$4 sm:$0xff]  }
 0x16e   : > { %8587 = vmatmul.mubr.bf16.gmra.mxu0 %v14042_v39  ;;  %v8210_v60 = vpop.f32.mrf.mxu0  ;;  %v14094_v37 = vld [vmem:[%s15924_s15 + $0x11c0] ss:$16 sps:$4 sm:$0xff]  }
 0x16f   : > { %8650 = vmatmul.mubr.bf16.gmra.mxu1 %v14051_v44  ;;  %8675 = vmatpush1.bf16.msra.mxu0 %v14043_v40  ;;  %v8273_v61 = vpop.f32.mrf.mxu1  ;;  %v14097_v39 = vld [vmem:[%s15924_s15 + $0x13c0] ss:$16 sps:$4 sm:$0xff]   ;;  %v14102_v40 = vld [vmem:[%s15924_s15 + $0x11a4] ss:$16 sps:$4 sm:$0xff]  }
 0x170   : > { %8738 = vmatpush1.bf16.msra.mxu1 %v14046_v43  ;;  %8676 = vmatprep.subr.bf16.mxu0 %v14054_v46  ;;  %v16264_v63 = vadd.f32 %v8273_v61, %v8210_v60  ;;  %v8212_v1 = vpop.f32.mrf.mxu0  ;;  %v14100_v42 = vld [vmem:[%s15924_s15 + $0x11a0] ss:$16 sps:$4 sm:$0xff]   ;;  %v14108_v44 = vld [vmem:[%s15924_s15 + $0x1184] ss:$16 sps:$4 sm:$0xff]  }
 0x171   : > { %8739 = vmatprep.subr.bf16.mxu1 %v14057_v47  ;;  %8596 = vmatprep.mubr.bf16.mxu0 %v14058_v48  ;;  %v8275_v2 = vpop.f32.mrf.mxu1  ;;  %v14103_v43 = vld [vmem:[%s15924_s15 + $0x13a0] ss:$16 sps:$4 sm:$0xff]   ;;  %v14111_v46 = vld [vmem:[%s15924_s15 + $0x1384] ss:$16 sps:$4 sm:$0xff]  }
 0x172   : > { %8659 = vmatprep.mubr.bf16.mxu1 %v14067_v49  ;;  %v16267_v3 = vadd.f32 %v8275_v2, %v8212_v1  ;;  %v8214_v8 = vpop.f32.mrf.mxu0  ;;  %v14106_v47 = vld [vmem:[%s15924_s15 + $0x1180] ss:$16 sps:$4 sm:$0xff]   ;;  %v14114_v49 = vld [vmem:[%s15924_s15 + $0x1164] ss:$16 sps:$4 sm:$0xff]  }
 0x173   : > { %8677 = vmatpush1.bf16.msra.mxu0 %v14052_v50  ;;  %v8277_v9 = vpop.f32.mrf.mxu1  ;;  %v14109_v48 = vld [vmem:[%s15924_s15 + $0x1380] ss:$16 sps:$4 sm:$0xff]   ;;  %v14117_v50 = vld [vmem:[%s15924_s15 + $0x1364] ss:$16 sps:$4 sm:$0xff]  }
 0x174   : > { %8740 = vmatpush1.bf16.msra.mxu1 %v14055_v51  ;;  %8678 = vmatprep.subr.bf16.mxu0 %v14063_v52  ;;  %v16274_v11 = vadd.f32 %v8277_v9, %v8214_v8  ;;  %v16277_v13 = vpop.f32.mrf.mxu0  ;;  %v14112_v51 = vld [vmem:[%s15924_s15 + $0x1160] ss:$16 sps:$4 sm:$0xff]   ;;  %v14129_v60 = vld [vmem:[%s15924_s15 + $0x1324] ss:$16 sps:$4 sm:$0xff]   ;;  %v14139_v8 = vld [vmem:[%s15926_s16 + $0x48] ss:$144 sps:$4 sm:$0xff]  }
 0x175   : > { %8741 = vmatprep.subr.bf16.mxu1 %v14066_v55  ;;  %v16279_v14 = vpop.f32.mrf.mxu1  ;;  %v14115_v52 = vld [vmem:[%s15924_s15 + $0x1360] ss:$16 sps:$4 sm:$0xff]   ;;  %v14120_v55 = vld [vmem:[%s15924_s15 + $0x1144] ss:$16 sps:$4 sm:$0xff]  }
 0x176   : > { %8597 = vmatmul.mubr.bf16.gmra.mxu0 %v14060_v56  ;;  %v8220_v17 = vpop.f32.mrf.mxu0  ;;  %v14123_v56 = vld [vmem:[%s15924_s15 + $0x1344] ss:$16 sps:$4 sm:$0xff]   ;;  %v14124_v61 = vld [vmem:[%s15924_s15 + $0x1120] ss:$16 sps:$4 sm:$0xff]  }
 0x177   : > { %8660 = vmatmul.mubr.bf16.gmra.mxu1 %v14069_v59  ;;  %8679 = vmatpush1.bf16.msra.mxu0 %v14061_v57  ;;  %v8283_v18 = vpop.f32.mrf.mxu1  ;;  %v14118_v57 = vld [vmem:[%s15924_s15 + $0x1140] ss:$16 sps:$4 sm:$0xff]   ;;  %v14126_v59 = vld [vmem:[%s15924_s15 + $0x1124] ss:$16 sps:$4 sm:$0xff]  }
 0x178   : > { %8742 = vmatpush1.bf16.msra.mxu1 %v14064_v58  ;;  %8680 = vmatprep.subr.bf16.mxu0 %v14072_v62  ;;  %v16284_v20 = vadd.f32 %v8283_v18, %v8220_v17  ;;  %v8222_v22 = vpop.f32.mrf.mxu0  ;;  %v14121_v58 = vld [vmem:[%s15924_s15 + $0x1340] ss:$16 sps:$4 sm:$0xff]   ;;  %v14135_v1 = vld [vmem:[%s15924_s15 + $0x1304] ss:$16 sps:$4 sm:$0xff]  }
 0x179   : > { %8743 = vmatprep.subr.bf16.mxu1 %v14075_v0  ;;  %8702 = vmatprep.mubr.bf16.mxu0 %v14138_v4  ;;  %v8285_v23 = vpop.f32.mrf.mxu1  ;;  %v14127_v62 = vld [vmem:[%s15924_s15 + $0x1320] ss:$16 sps:$4 sm:$0xff]   ;;  %v14132_v0 = vld [vmem:[%s15924_s15 + $0x1104] ss:$16 sps:$4 sm:$0xff]  }
 0x17a   : > { %8765 = vmatprep.mubr.bf16.mxu1 %v14141_v5  ;;  %v16287_v24 = vadd.f32 %v8285_v23, %v8222_v22  ;;  %v8224_v27 = vpop.f32.mrf.mxu0  ;;  %v14130_v2 = vld [vmem:[%s15924_s15 + $0x1100] ss:$16 sps:$4 sm:$0xff]   ;;  %v14144_v5 = vld [vmem:[%s15924_s15 + $0x14e4] ss:$16 sps:$4 sm:$0xff]  }
 0x17b   : > { %8681 = vmatpush1.bf16.msra.mxu0 %v14070_v6  ;;  %v8287_v28 = vpop.f32.mrf.mxu1  ;;  %v14133_v4 = vld [vmem:[%s15924_s15 + $0x1300] ss:$16 sps:$4 sm:$0xff]   ;;  %v14147_v6 = vld [vmem:[%s15924_s15 + $0x16e4] ss:$16 sps:$4 sm:$0xff]  }
 0x17c   : > { %8744 = vmatpush1.bf16.msra.mxu1 %v14073_v7  ;;  %8682 = vmatprep.subr.bf16.mxu0 %v14078_v10  ;;  %v16292_v30 = vadd.f32 %v8287_v28, %v8224_v27  ;;  %v14136_v7 = vld [vmem:[%s15926_s16 + $0x40] ss:$144 sps:$4 sm:$0xff]   ;;  %v14153_v17 = vld [vmem:[%s15924_s15 + $0x16c4] ss:$16 sps:$4 sm:$0xff]  }
 0x17d   : > { %8745 = vmatprep.subr.bf16.mxu1 %v14081_v12  ;;  %v14142_v9 = vld [vmem:[%s15924_s15 + $0x14e0] ss:$16 sps:$4 sm:$0xff]   ;;  %v14150_v12 = vld [vmem:[%s15924_s15 + $0x14c4] ss:$16 sps:$4 sm:$0xff]  }
 0x17e   : > { %v14145_v10 = vld [vmem:[%s15924_s15 + $0x16e0] ss:$16 sps:$4 sm:$0xff]   ;;  %v14154_v18 = vld [vmem:[%s15926_s16 + $0x164] ss:$144 sps:$4 sm:$0xff]  }
 0x17f   : > { %8683 = vmatpush1.bf16.msra.mxu0 %v14076_v15  ;;  %v16332_v15 = vpop.f32.mrf.mxu0  ;;  %v14148_v23 = vld [vmem:[%s15924_s15 + $0x14c0] ss:$16 sps:$4 sm:$0xff]   ;;  %v14159_v27 = vld [vmem:[%s15924_s15 + $0x14a4] ss:$16 sps:$4 sm:$0xff]  }
 0x180   : > { %8746 = vmatpush1.bf16.msra.mxu1 %v14079_v16  ;;  %8684 = vmatprep.subr.bf16.mxu0 %v14084_v19  ;;  %v16334_v16 = vpop.f32.mrf.mxu1  ;;  %v14163_v19 = vld [vmem:[%s15926_s16 + $0x16c] ss:$144 sps:$4 sm:$0xff]  }
 0x181   : > { %8747 = vmatprep.subr.bf16.mxu1 %v14087_v21 }
 0x183   : > { %8685 = vmatpush1.bf16.msra.mxu0 %v14082_v25  ;;  %v14151_v25 = vld [vmem:[%s15924_s15 + $0x16c0] ss:$16 sps:$4 sm:$0xff]  }
 0x184   : > { %8748 = vmatpush1.bf16.msra.mxu1 %v14085_v26  ;;  %8686 = vmatprep.subr.bf16.mxu0 %v14090_v29 }
 0x185   : > { %8749 = vmatprep.subr.bf16.mxu1 %v14093_v31  ;;  %v14162_v31 = vld [vmem:[%s15924_s15 + $0x16a4] ss:$16 sps:$4 sm:$0xff]  }
 0x187   : > { %8687 = vmatpush2.bf16.msra.mxu0 %v14088_v32 }
 0x188   : > { %8750 = vmatpush2.bf16.msra.mxu1 %v14091_v34  ;;  %8688 = vmatprep.subr.bf16.mxu0 %v14096_v35  ;;  %v14156_v35 = vld [vmem:[%s15926_s16 + $0x160] ss:$144 sps:$4 sm:$0xff]  }
 0x189   : > { %8751 = vmatprep.subr.bf16.mxu1 %v14099_v36  ;;  %v14157_v36 = vld [vmem:[%s15924_s15 + $0x14a0] ss:$16 sps:$4 sm:$0xff]  }
 0x18b   : > { %8689 = vmatpush2.bf16.msra.mxu0 %v14094_v37 }
 0x18c   : > { %8752 = vmatpush2.bf16.msra.mxu1 %v14097_v39  ;;  %8690 = vmatprep.subr.bf16.mxu0 %v14102_v40  ;;  %v14160_v39 = vld [vmem:[%s15924_s15 + $0x16a0] ss:$16 sps:$4 sm:$0xff]   ;;  %v14165_v40 = vld [vmem:[%s15926_s16 + $0x168] ss:$144 sps:$4 sm:$0xff]  }
 0x18d   : > { %8753 = vmatprep.subr.bf16.mxu1 %v14105_v41 }
 0x18f   : > { %8691 = vmatpush2.bf16.msra.mxu0 %v14100_v42 }
 0x190   : > { %8754 = vmatpush2.bf16.msra.mxu1 %v14103_v43  ;;  %8692 = vmatprep.subr.bf16.mxu0 %v14108_v44 }
 0x191   : > { %8755 = vmatprep.subr.bf16.mxu1 %v14111_v46  ;;  %v14171_v46 = vld [vmem:[%s15924_s15 + $0x1684] ss:$16 sps:$4 sm:$0xff]  }
 0x193   : > { %8693 = vmatpush2.bf16.msra.mxu0 %v14106_v47 }
 0x194   : > { %8756 = vmatpush2.bf16.msra.mxu1 %v14109_v48  ;;  %8694 = vmatprep.subr.bf16.mxu0 %v14114_v49  ;;  %v14172_v48 = vld [vmem:[%s15926_s16 + $0x284] ss:$144 sps:$4 sm:$0xff]   ;;  %v14181_v49 = vld [vmem:[%s15926_s16 + $0x28c] ss:$144 sps:$4 sm:$0xff]  }
 0x195   : > { %8757 = vmatprep.subr.bf16.mxu1 %v14117_v50 }
 0x197   : > { %8695 = vmatpush2.bf16.msra.mxu0 %v14112_v51  ;;  %v14166_v51 = vld [vmem:[%s15924_s15 + $0x1480] ss:$16 sps:$4 sm:$0xff]  }
 0x198   : > { %8758 = vmatpush2.bf16.msra.mxu1 %v14115_v52  ;;  %8696 = vmatprep.subr.bf16.mxu0 %v14120_v55  ;;  %v14169_v52 = vld [vmem:[%s15924_s15 + $0x1680] ss:$16 sps:$4 sm:$0xff]  }
 0x199   : > { %8759 = vmatprep.subr.bf16.mxu1 %v14123_v56  ;;  %v14177_v56 = vld [vmem:[%s15924_s15 + $0x1464] ss:$16 sps:$4 sm:$0xff]  }
 0x19b   : > { %8697 = vmatpush2.bf16.msra.mxu0 %v14118_v57 }
 0x19c   : > { %8760 = vmatpush2.bf16.msra.mxu1 %v14121_v58  ;;  %8698 = vmatprep.subr.bf16.mxu0 %v14126_v59  ;;  %v14180_v59 = vld [vmem:[%s15924_s15 + $0x1664] ss:$16 sps:$4 sm:$0xff]  }
 0x19d   : > { %8761 = vmatprep.subr.bf16.mxu1 %v14129_v60 }
 0x19f   : > { %8699 = vmatpush2.bf16.msra.mxu0 %v14124_v61 }
 0x1a0   : > { %8762 = vmatpush2.bf16.msra.mxu1 %v14127_v62  ;;  %8700 = vmatprep.subr.bf16.mxu0 %v14132_v0  ;;  %v14174_v62 = vld [vmem:[%s15926_s16 + $0x280] ss:$144 sps:$4 sm:$0xff]  }
 0x1a1   : > { %8763 = vmatprep.subr.bf16.mxu1 %v14135_v1  ;;  %v14175_v0 = vld [vmem:[%s15924_s15 + $0x1460] ss:$16 sps:$4 sm:$0xff]  }
 0x1a3   : > { %8701 = vmatpush2.bf16.msra.mxu0 %v14130_v2  ;;  %v14178_v2 = vld [vmem:[%s15924_s15 + $0x1660] ss:$16 sps:$4 sm:$0xff]  }
 0x1a4   : > { %8764 = vmatpush2.bf16.msra.mxu1 %v14133_v4  ;;  %8796 = vmatprep.subr.bf16.mxu0 %v14144_v5  ;;  %v14183_v4 = vld [vmem:[%s15926_s16 + $0x288] ss:$144 sps:$4 sm:$0xff]  }
 0x1a5   : > { %8859 = vmatprep.subr.bf16.mxu1 %v14147_v6 }
 0x1a6   : > { %v8326_v21 = vpop.f32.mrf.mxu0  ;;  %8703 = vmatmul.mubr.bf16.vlgmr.msra.gmra.mxu0 %v14136_v7 }
 0x1a7   : > { %v8389_v22 = vpop.f32.mrf.mxu1  ;;  %8766 = vmatmul.mubr.bf16.vlgmr.msra.gmra.mxu1 %v14139_v8  ;;  %v8327_v26 = vadd.f32 %v8326_v21, %v16235_v33  ;;  %8797 = vmatpush1.bf16.msra.mxu0 %v14142_v9  ;;  %v14189_v9 = vld [vmem:[%s15924_s15 + $0x1644] ss:$16 sps:$4 sm:$0xff]   ;;  %v14187_v21 = vld [vmem:[%s15924_s15 + $0x1640] ss:$16 sps:$4 sm:$0xff]  }
 0x1a8   : > { %8860 = vmatpush1.bf16.msra.mxu1 %v14145_v10  ;;  %v8328_v28 = vpop.f32.mrf.mxu0  ;;  %8798 = vmatprep.subr.bf16.mxu0 %v14150_v12  ;;  %v14252_v12 = vld [vmem:[%s15926_s16 + $0x54] ss:$144 sps:$4 sm:$0xff]  }
 0x1a9   : > { %v8391_v29 = vpop.f32.mrf.mxu1  ;;  %8861 = vmatprep.subr.bf16.mxu1 %v14153_v17  ;;  %v16344_v32 = vadd.f32 %v8389_v22, %v8327_v26  ;;  %v8329_v34 = vadd.f32 %v8328_v28, %v16239_v38  ;;  %8712 = vmatprep.mubr.bf16.mxu0 %v14154_v18  ;;  %v14168_v38 = vld [vmem:[%s15924_s15 + $0x1484] ss:$16 sps:$4 sm:$0xff]  }
 0x1aa   : > { %8775 = vmatprep.mubr.bf16.mxu1 %v14163_v19  ;;  %v8330_v33 = vpop.f32.mrf.mxu0  ;;  %v14184_v19 = vld [vmem:[%s15924_s15 + $0x1440] ss:$16 sps:$4 sm:$0xff]  }
 0x1ab   : > { %v8393_v37 = vpop.f32.mrf.mxu1  ;;  %v16351_v41 = vadd.f32 %v8391_v29, %v8329_v34  ;;  %v8331_v42 = vadd.f32 %v8330_v33, %v16245_v45  ;;  %8799 = vmatpush1.bf16.msra.mxu0 %v14148_v23  ;;  %v14192_v23 = vld [vmem:[%s15924_s15 + $0x1424] ss:$16 sps:$4 sm:$0xff]   ;;  %v14190_v34 = vld [vmem:[%s15924_s15 + $0x1420] ss:$16 sps:$4 sm:$0xff]  }
 0x1ac   : > { %8862 = vmatpush1.bf16.msra.mxu1 %v14151_v25  ;;  %v16355_v43 = vpop.f32.mrf.mxu0  ;;  %8800 = vmatprep.subr.bf16.mxu0 %v14159_v27  ;;  %v14195_v27 = vld [vmem:[%s15924_s15 + $0x1624] ss:$16 sps:$4 sm:$0xff]  }
 0x1ad   : > { %v16357_v44 = vpop.f32.mrf.mxu1  ;;  %8863 = vmatprep.subr.bf16.mxu1 %v14162_v31  ;;  %v16360_v47 = vadd.f32 %v8393_v37, %v8331_v42  ;;  %v14201_v37 = vld [vmem:[%s15924_s15 + $0x1604] ss:$16 sps:$4 sm:$0xff]   ;;  %v14199_v42 = vld [vmem:[%s15924_s15 + $0x1600] ss:$16 sps:$4 sm:$0xff]  }
 0x1ae   : > { %v8336_v50 = vpop.f32.mrf.mxu0  ;;  %8713 = vmatmul.mubr.bf16.gmra.mxu0 %v14156_v35  ;;  %v14193_v35 = vld [vmem:[%s15924_s15 + $0x1620] ss:$16 sps:$4 sm:$0xff]  }
 0x1af   : > { %v8399_v45 = vpop.f32.mrf.mxu1  ;;  %8776 = vmatmul.mubr.bf16.gmra.mxu1 %v14165_v40  ;;  %v8337_v55 = vadd.f32 %v8336_v50, %v16264_v63  ;;  %8801 = vmatpush1.bf16.msra.mxu0 %v14157_v36  ;;  %v14196_v40 = vld [vmem:[%s15924_s15 + $0x1400] ss:$16 sps:$4 sm:$0xff]   ;;  %v14213_v50 = vld [vmem:[%s15924_s15 + $0x17c4] ss:$16 sps:$4 sm:$0xff]  }
 0x1b0   : > { %8864 = vmatpush1.bf16.msra.mxu1 %v14160_v39  ;;  %v8338_v57 = vpop.f32.mrf.mxu0  ;;  %8802 = vmatprep.subr.bf16.mxu0 %v14168_v38  ;;  %v14207_v38 = vld [vmem:[%s15924_s15 + $0x17e4] ss:$16 sps:$4 sm:$0xff]  }
 0x1b1   : > { %v8401_v58 = vpop.f32.mrf.mxu1  ;;  %8865 = vmatprep.subr.bf16.mxu1 %v14171_v46  ;;  %v8339_v60 = vadd.f32 %v8338_v57, %v16267_v3  ;;  %v16370_v61 = vadd.f32 %v8399_v45, %v8337_v55  ;;  %8722 = vmatprep.mubr.bf16.mxu0 %v14172_v48  ;;  %v14186_v3 = vld [vmem:[%s15924_s15 + $0x1444] ss:$16 sps:$4 sm:$0xff]   ;;  %v14202_v46 = vld [vmem:[%s15924_s15 + $0x15e0] ss:$16 sps:$4 sm:$0xff]  }
 0x1b2   : > { %8785 = vmatprep.mubr.bf16.mxu1 %v14181_v49  ;;  %v8340_v63 = vpop.f32.mrf.mxu0  ;;  %v14205_v48 = vld [vmem:[%s15924_s15 + $0x17e0] ss:$16 sps:$4 sm:$0xff]   ;;  %v14210_v49 = vld [vmem:[%s15924_s15 + $0x15c4] ss:$16 sps:$4 sm:$0xff]  }
 0x1b3   : > { %v8403_v1 = vpop.f32.mrf.mxu1  ;;  %v8341_v5 = vadd.f32 %v8340_v63, %v16274_v11  ;;  %v16377_v6 = vadd.f32 %v8401_v58, %v8339_v60  ;;  %8803 = vmatpush1.bf16.msra.mxu0 %v14166_v51  ;;  %v14255_v11 = vld [vmem:[%s15926_s16 + $0x5c] ss:$144 sps:$4 sm:$0xff]   ;;  %v14208_v45 = vld [vmem:[%s15924_s15 + $0x15c0] ss:$16 sps:$4 sm:$0xff]   ;;  %v14219_v55 = vld [vmem:[%s15924_s15 + $0x17a4] ss:$16 sps:$4 sm:$0xff]  }
 0x1b4   : > { %8866 = vmatpush1.bf16.msra.mxu1 %v14169_v52  ;;  %v16380_v7 = vpop.f32.mrf.mxu0  ;;  %8804 = vmatprep.subr.bf16.mxu0 %v14177_v56  ;;  %v14211_v51 = vld [vmem:[%s15924_s15 + $0x17c0] ss:$16 sps:$4 sm:$0xff]   ;;  %v14216_v52 = vld [vmem:[%s15924_s15 + $0x15a4] ss:$16 sps:$4 sm:$0xff]  }
 0x1b5   : > { %v16382_v8 = vpop.f32.mrf.mxu1  ;;  %8867 = vmatprep.subr.bf16.mxu1 %v14180_v59  ;;  %v16385_v10 = vadd.f32 %v8403_v1, %v8341_v5  ;;  %v14214_v56 = vld [vmem:[%s15924_s15 + $0x15a0] ss:$16 sps:$4 sm:$0xff]   ;;  %v14222_v58 = vld [vmem:[%s15924_s15 + $0x1584] ss:$16 sps:$4 sm:$0xff]  }
 0x1b6   : > { %v8346_v17 = vpop.f32.mrf.mxu0  ;;  %8723 = vmatmul.mubr.bf16.gmra.mxu0 %v14174_v62  ;;  %v14217_v57 = vld [vmem:[%s15924_s15 + $0x17a0] ss:$16 sps:$4 sm:$0xff]   ;;  %v14225_v59 = vld [vmem:[%s15924_s15 + $0x1784] ss:$16 sps:$4 sm:$0xff]  }
 0x1b7   : > { %v8409_v18 = vpop.f32.mrf.mxu1  ;;  %8786 = vmatmul.mubr.bf16.gmra.mxu1 %v14183_v4  ;;  %v8347_v22 = vadd.f32 %v8346_v17, %v16284_v20  ;;  %8805 = vmatpush1.bf16.msra.mxu0 %v14175_v0  ;;  %v14220_v60 = vld [vmem:[%s15924_s15 + $0x1580] ss:$16 sps:$4 sm:$0xff]   ;;  %v14228_v0 = vld [vmem:[%s15924_s15 + $0x1564] ss:$16 sps:$4 sm:$0xff]  }
 0x1b8   : > { %8868 = vmatpush1.bf16.msra.mxu1 %v14178_v2  ;;  %v8348_v25 = vpop.f32.mrf.mxu0  ;;  %8806 = vmatprep.subr.bf16.mxu0 %v14186_v3  ;;  %v14223_v62 = vld [vmem:[%s15924_s15 + $0x1780] ss:$16 sps:$4 sm:$0xff]   ;;  %v14231_v63 = vld [vmem:[%s15924_s15 + $0x1764] ss:$16 sps:$4 sm:$0xff]  }
 0x1b9   : > { %v8411_v26 = vpop.f32.mrf.mxu1  ;;  %8869 = vmatprep.subr.bf16.mxu1 %v14189_v9  ;;  %v8349_v28 = vadd.f32 %v8348_v25, %v16287_v24  ;;  %v16395_v29 = vadd.f32 %v8409_v18, %v8347_v22  ;;  %8828 = vmatprep.mubr.bf16.mxu0 %v14252_v12  ;;  %v14198_v24 = vld [vmem:[%s15924_s15 + $0x1404] ss:$16 sps:$4 sm:$0xff]   ;;  %v14226_v1 = vld [vmem:[%s15924_s15 + $0x1560] ss:$16 sps:$4 sm:$0xff]  }
 0x1ba   : > { %8891 = vmatprep.mubr.bf16.mxu1 %v14255_v11  ;;  %v8350_v20 = vpop.f32.mrf.mxu0  ;;  %v14229_v2 = vld [vmem:[%s15924_s15 + $0x1760] ss:$16 sps:$4 sm:$0xff]   ;;  %v14234_v4 = vld [vmem:[%s15924_s15 + $0x1544] ss:$16 sps:$4 sm:$0xff]  }
 0x1bb   : > { %v8413_v31 = vpop.f32.mrf.mxu1  ;;  %v8351_v36 = vadd.f32 %v8350_v20, %v16292_v30  ;;  %v16400_v33 = vadd.f32 %v8411_v26, %v8349_v28  ;;  %8807 = vmatpush1.bf16.msra.mxu0 %v14184_v19  ;;  %v14204_v30 = vld [vmem:[%s15924_s15 + $0x15e4] ss:$16 sps:$4 sm:$0xff]   ;;  %v14232_v3 = vld [vmem:[%s15924_s15 + $0x1540] ss:$16 sps:$4 sm:$0xff]   ;;  %v14253_v28 = vld [vmem:[%s15926_s16 + $0x58] ss:$144 sps:$4 sm:$0xff]  }
 0x1bc   : > { %8870 = vmatpush1.bf16.msra.mxu1 %v14187_v21  ;;  %8808 = vmatprep.subr.bf16.mxu0 %v14192_v23  ;;  %v14237_v5 = vld [vmem:[%s15924_s15 + $0x1744] ss:$16 sps:$4 sm:$0xff]   ;;  %v14235_v9 = vld [vmem:[%s15924_s15 + $0x1740] ss:$16 sps:$4 sm:$0xff]  }
 0x1bd   : > { %8871 = vmatprep.subr.bf16.mxu1 %v14195_v27  ;;  %v16404_v39 = vadd.f32 %v8413_v31, %v8351_v36  ;;  %v14240_v12 = vld [vmem:[%s15924_s15 + $0x1524] ss:$16 sps:$4 sm:$0xff]   ;;  %v14238_v17 = vld [vmem:[%s15924_s15 + $0x1520] ss:$16 sps:$4 sm:$0xff]   ;;  %v16449_v36 = vpop.f32.mrf.mxu1 }
 0x1be   : > { %v14243_v11 = vld [vmem:[%s15924_s15 + $0x1724] ss:$16 sps:$4 sm:$0xff]   ;;  %v14241_v18 = vld [vmem:[%s15924_s15 + $0x1720] ss:$16 sps:$4 sm:$0xff]  }
 0x1bf   : > { %8809 = vmatpush1.bf16.msra.mxu0 %v14190_v34  ;;  %v14246_v19 = vld [vmem:[%s15924_s15 + $0x1504] ss:$16 sps:$4 sm:$0xff]   ;;  %v14244_v22 = vld [vmem:[%s15924_s15 + $0x1500] ss:$16 sps:$4 sm:$0xff]  }
 0x1c0   : > { %8872 = vmatpush1.bf16.msra.mxu1 %v14193_v35  ;;  %8810 = vmatprep.subr.bf16.mxu0 %v14198_v24  ;;  %v14249_v21 = vld [vmem:[%s15924_s15 + $0x1704] ss:$16 sps:$4 sm:$0xff]   ;;  %v14247_v23 = vld [vmem:[%s15924_s15 + $0x1700] ss:$16 sps:$4 sm:$0xff]   ;;  %v16447_v35 = vpop.f32.mrf.mxu0 }
 0x1c1   : > { %8873 = vmatprep.subr.bf16.mxu1 %v14201_v37  ;;  %v14258_v25 = vld [vmem:[%s15924_s15 + $0x18e4] ss:$16 sps:$4 sm:$0xff]   ;;  %v14250_v27 = vld [vmem:[%s15926_s16 + $0x50] ss:$144 sps:$4 sm:$0xff]  }
 0x1c2   : > { %v14261_v26 = vld [vmem:[%s15924_s15 + $0x1ae4] ss:$16 sps:$4 sm:$0xff]   ;;  %v14256_v20 = vld [vmem:[%s15924_s15 + $0x18e0] ss:$16 sps:$4 sm:$0xff]  }
 0x1c3   : > { %8811 = vmatpush1.bf16.msra.mxu0 %v14196_v40  ;;  %v14259_v31 = vld [vmem:[%s15924_s15 + $0x1ae0] ss:$16 sps:$4 sm:$0xff]   ;;  %v14264_v34 = vld [vmem:[%s15924_s15 + $0x18c4] ss:$16 sps:$4 sm:$0xff]   ;;  %v14277_v40 = vld [vmem:[%s15926_s16 + $0x17c] ss:$144 sps:$4 sm:$0xff]  }
 0x1c4   : > { %8874 = vmatpush1.bf16.msra.mxu1 %v14199_v42  ;;  %8812 = vmatprep.subr.bf16.mxu0 %v14204_v30  ;;  %v14267_v24 = vld [vmem:[%s15924_s15 + $0x1ac4] ss:$16 sps:$4 sm:$0xff]  }
 0x1c5   : > { %8875 = vmatprep.subr.bf16.mxu1 %v14207_v38  ;;  %v14268_v37 = vld [vmem:[%s15926_s16 + $0x174] ss:$144 sps:$4 sm:$0xff]   ;;  %v14262_v38 = vld [vmem:[%s15924_s15 + $0x18c0] ss:$16 sps:$4 sm:$0xff]  }
 0x1c7   : > { %8813 = vmatpush2.bf16.msra.mxu0 %v14202_v46  ;;  %v14265_v46 = vld [vmem:[%s15924_s15 + $0x1ac0] ss:$16 sps:$4 sm:$0xff]  }
 0x1c8   : > { %8876 = vmatpush2.bf16.msra.mxu1 %v14205_v48  ;;  %8814 = vmatprep.subr.bf16.mxu0 %v14210_v49  ;;  %v14273_v49 = vld [vmem:[%s15924_s15 + $0x18a4] ss:$16 sps:$4 sm:$0xff]  }
 0x1c9   : > { %8877 = vmatprep.subr.bf16.mxu1 %v14213_v50 }
 0x1cb   : > { %8815 = vmatpush2.bf16.msra.mxu0 %v14208_v45 }
 0x1cc   : > { %8878 = vmatpush2.bf16.msra.mxu1 %v14211_v51  ;;  %8816 = vmatprep.subr.bf16.mxu0 %v14216_v52  ;;  %v14276_v51 = vld [vmem:[%s15924_s15 + $0x1aa4] ss:$16 sps:$4 sm:$0xff]  }
 0x1cd   : > { %8879 = vmatprep.subr.bf16.mxu1 %v14219_v55 }
 0x1cf   : > { %8817 = vmatpush2.bf16.msra.mxu0 %v14214_v56  ;;  %v14270_v56 = vld [vmem:[%s15926_s16 + $0x170] ss:$144 sps:$4 sm:$0xff]  }
 0x1d0   : > { %8880 = vmatpush2.bf16.msra.mxu1 %v14217_v57  ;;  %8818 = vmatprep.subr.bf16.mxu0 %v14222_v58  ;;  %v14271_v57 = vld [vmem:[%s15924_s15 + $0x18a0] ss:$16 sps:$4 sm:$0xff]  }
 0x1d1   : > { %8881 = vmatprep.subr.bf16.mxu1 %v14225_v59  ;;  %v14274_v59 = vld [vmem:[%s15924_s15 + $0x1aa0] ss:$16 sps:$4 sm:$0xff]  }
 0x1d3   : > { %8819 = vmatpush2.bf16.msra.mxu0 %v14220_v60  ;;  %v14279_v60 = vld [vmem:[%s15926_s16 + $0x178] ss:$144 sps:$4 sm:$0xff]  }
 0x1d4   : > { %8882 = vmatpush2.bf16.msra.mxu1 %v14223_v62  ;;  %8820 = vmatprep.subr.bf16.mxu0 %v14228_v0 }
 0x1d5   : > { %8883 = vmatprep.subr.bf16.mxu1 %v14231_v63 }
 0x1d7   : > { %8821 = vmatpush2.bf16.msra.mxu0 %v14226_v1 }
 0x1d8   : > { %8884 = vmatpush2.bf16.msra.mxu1 %v14229_v2  ;;  %8822 = vmatprep.subr.bf16.mxu0 %v14234_v4  ;;  %v14285_v2 = vld [vmem:[%s15924_s15 + $0x1a84] ss:$16 sps:$4 sm:$0xff]  }
 0x1d9   : > { %8885 = vmatprep.subr.bf16.mxu1 %v14237_v5  ;;  %v14286_v5 = vld [vmem:[%s15926_s16 + $0x294] ss:$144 sps:$4 sm:$0xff]  }
 0x1db   : > { %8823 = vmatpush2.bf16.msra.mxu0 %v14232_v3  ;;  %v14295_v3 = vld [vmem:[%s15926_s16 + $0x29c] ss:$144 sps:$4 sm:$0xff]  }
 0x1dc   : > { %8886 = vmatpush2.bf16.msra.mxu1 %v14235_v9  ;;  %8824 = vmatprep.subr.bf16.mxu0 %v14240_v12  ;;  %v14280_v12 = vld [vmem:[%s15924_s15 + $0x1880] ss:$16 sps:$4 sm:$0xff]  }
 0x1dd   : > { %8887 = vmatprep.subr.bf16.mxu1 %v14243_v11  ;;  %v14283_v11 = vld [vmem:[%s15924_s15 + $0x1a80] ss:$16 sps:$4 sm:$0xff]  }
 0x1df   : > { %8825 = vmatpush2.bf16.msra.mxu0 %v14238_v17 }
 0x1e0   : > { %8888 = vmatpush2.bf16.msra.mxu1 %v14241_v18  ;;  %8826 = vmatprep.subr.bf16.mxu0 %v14246_v19  ;;  %v14291_v18 = vld [vmem:[%s15924_s15 + $0x1864] ss:$16 sps:$4 sm:$0xff]  }
 0x1e1   : > { %8889 = vmatprep.subr.bf16.mxu1 %v14249_v21 }
 0x1e3   : > { %8827 = vmatpush2.bf16.msra.mxu0 %v14244_v22  ;;  %v14294_v22 = vld [vmem:[%s15924_s15 + $0x1a64] ss:$16 sps:$4 sm:$0xff]  }
 0x1e4   : > { %8890 = vmatpush2.bf16.msra.mxu1 %v14247_v23  ;;  %8922 = vmatprep.subr.bf16.mxu0 %v14258_v25 }
 0x1e5   : > { %8985 = vmatprep.subr.bf16.mxu1 %v14261_v26  ;;  %v14288_v26 = vld [vmem:[%s15926_s16 + $0x290] ss:$144 sps:$4 sm:$0xff]  }
 0x1e6   : > { %v8452_v42 = vpop.f32.mrf.mxu0  ;;  %8829 = vmatmul.mubr.bf16.vlgmr.msra.gmra.mxu0 %v14250_v27  ;;  %v14289_v27 = vld [vmem:[%s15924_s15 + $0x1860] ss:$16 sps:$4 sm:$0xff]  }
 0x1e7   : > { %v8515_v30 = vpop.f32.mrf.mxu1  ;;  %8892 = vmatmul.mubr.bf16.vlgmr.msra.gmra.mxu1 %v14253_v28  ;;  %v8453_v48 = vadd.f32 %v8452_v42, %v16344_v32  ;;  %8923 = vmatpush1.bf16.msra.mxu0 %v14256_v20  ;;  %v14292_v20 = vld [vmem:[%s15924_s15 + $0x1a60] ss:$16 sps:$4 sm:$0xff]   ;;  %v14303_v42 = vld [vmem:[%s15924_s15 + $0x1a44] ss:$16 sps:$4 sm:$0xff]  }
 0x1e8   : > { %8986 = vmatpush1.bf16.msra.mxu1 %v14259_v31  ;;  %v8454_v50 = vpop.f32.mrf.mxu0  ;;  %8924 = vmatprep.subr.bf16.mxu0 %v14264_v34  ;;  %v14297_v31 = vld [vmem:[%s15926_s16 + $0x298] ss:$144 sps:$4 sm:$0xff]  }
 0x1e9   : > { %v8517_v45 = vpop.f32.mrf.mxu1  ;;  %8987 = vmatprep.subr.bf16.mxu1 %v14267_v24  ;;  %v16459_v52 = vadd.f32 %v8515_v30, %v8453_v48  ;;  %v8455_v55 = vadd.f32 %v8454_v50, %v16351_v41  ;;  %8838 = vmatprep.mubr.bf16.mxu0 %v14268_v37  ;;  %v14282_v41 = vld [vmem:[%s15924_s15 + $0x1884] ss:$16 sps:$4 sm:$0xff]   ;;  %v14301_v50 = vld [vmem:[%s15924_s15 + $0x1a40] ss:$16 sps:$4 sm:$0xff]  }
 0x1ea   : > { %8901 = vmatprep.mubr.bf16.mxu1 %v14277_v40  ;;  %v8456_v32 = vpop.f32.mrf.mxu0 }
 0x1eb   : > { %v8519_v58 = vpop.f32.mrf.mxu1  ;;  %v16466_v62 = vadd.f32 %v8517_v45, %v8455_v55  ;;  %v8457_v0 = vadd.f32 %v8456_v32, %v16360_v47  ;;  %8925 = vmatpush1.bf16.msra.mxu0 %v14262_v38  ;;  %v14366_v38 = vld [vmem:[%s15926_s16 + $0x64] ss:$144 sps:$4 sm:$0xff]  }
 0x1ec   : > { %8988 = vmatpush1.bf16.msra.mxu1 %v14265_v46  ;;  %v16470_v63 = vpop.f32.mrf.mxu0  ;;  %8926 = vmatprep.subr.bf16.mxu0 %v14273_v49  ;;  %v14298_v49 = vld [vmem:[%s15924_s15 + $0x1840] ss:$16 sps:$4 sm:$0xff]  }
 0x1ed   : > { %v16472_v1 = vpop.f32.mrf.mxu1  ;;  %8989 = vmatprep.subr.bf16.mxu1 %v14276_v51  ;;  %v16475_v4 = vadd.f32 %v8519_v58, %v8457_v0  ;;  %v14306_v51 = vld [vmem:[%s15924_s15 + $0x1824] ss:$16 sps:$4 sm:$0xff]   ;;  %v14307_v0 = vld [vmem:[%s15924_s15 + $0x1a20] ss:$16 sps:$4 sm:$0xff]  }
 0x1ee   : > { %v8462_v9 = vpop.f32.mrf.mxu0  ;;  %8839 = vmatmul.mubr.bf16.gmra.mxu0 %v14270_v56 }
 0x1ef   : > { %v8525_v47 = vpop.f32.mrf.mxu1  ;;  %8902 = vmatmul.mubr.bf16.gmra.mxu1 %v14279_v60  ;;  %v8463_v17 = vadd.f32 %v8462_v9, %v16370_v61  ;;  %8927 = vmatpush1.bf16.msra.mxu0 %v14271_v57  ;;  %v14309_v57 = vld [vmem:[%s15924_s15 + $0x1a24] ss:$16 sps:$4 sm:$0xff]   ;;  %v14304_v60 = vld [vmem:[%s15924_s15 + $0x1820] ss:$16 sps:$4 sm:$0xff]  }
 0x1f0   : > { %8990 = vmatpush1.bf16.msra.mxu1 %v14274_v59  ;;  %v8464_v19 = vpop.f32.mrf.mxu0  ;;  %8928 = vmatprep.subr.bf16.mxu0 %v14282_v41  ;;  %v14310_v9 = vld [vmem:[%s15924_s15 + $0x1800] ss:$16 sps:$4 sm:$0xff]  }
 0x1f1   : > { %v8527_v21 = vpop.f32.mrf.mxu1  ;;  %8991 = vmatprep.subr.bf16.mxu1 %v14285_v2  ;;  %v8465_v23 = vadd.f32 %v8464_v19, %v16377_v6  ;;  %v16485_v25 = vadd.f32 %v8525_v47, %v8463_v17  ;;  %8848 = vmatprep.mubr.bf16.mxu0 %v14286_v5  ;;  %v14300_v6 = vld [vmem:[%s15924_s15 + $0x1844] ss:$16 sps:$4 sm:$0xff]   ;;  %v14313_v47 = vld [vmem:[%s15924_s15 + $0x1a00] ss:$16 sps:$4 sm:$0xff]  }
 0x1f2   : > { %8911 = vmatprep.mubr.bf16.mxu1 %v14295_v3  ;;  %v8466_v61 = vpop.f32.mrf.mxu0  ;;  %v14315_v5 = vld [vmem:[%s15924_s15 + $0x1a04] ss:$16 sps:$4 sm:$0xff]   ;;  %v14319_v17 = vld [vmem:[%s15924_s15 + $0x1be0] ss:$16 sps:$4 sm:$0xff]  }
 0x1f3   : > { %v8529_v28 = vpop.f32.mrf.mxu1  ;;  %v8467_v34 = vadd.f32 %v8466_v61, %v16385_v10  ;;  %v16492_v24 = vadd.f32 %v8527_v21, %v8465_v23  ;;  %8929 = vmatpush1.bf16.msra.mxu0 %v14280_v12  ;;  %v14369_v10 = vld [vmem:[%s15926_s16 + $0x6c] ss:$144 sps:$4 sm:$0xff]   ;;  %v14321_v12 = vld [vmem:[%s15924_s15 + $0x1be4] ss:$16 sps:$4 sm:$0xff]   ;;  %v14322_v21 = vld [vmem:[%s15924_s15 + $0x19c0] ss:$16 sps:$4 sm:$0xff]  }
 0x1f4   : > { %8992 = vmatpush1.bf16.msra.mxu1 %v14283_v11  ;;  %v16495_v37 = vpop.f32.mrf.mxu0  ;;  %8930 = vmatprep.subr.bf16.mxu0 %v14291_v18  ;;  %v14316_v11 = vld [vmem:[%s15924_s15 + $0x19e0] ss:$16 sps:$4 sm:$0xff]   ;;  %v14324_v18 = vld [vmem:[%s15924_s15 + $0x19c4] ss:$16 sps:$4 sm:$0xff]  }
 0x1f5   : > { %v16497_v40 = vpop.f32.mrf.mxu1  ;;  %8993 = vmatprep.subr.bf16.mxu1 %v14294_v22  ;;  %v16500_v30 = vadd.f32 %v8529_v28, %v8467_v34  ;;  %v14327_v19 = vld [vmem:[%s15924_s15 + $0x1bc4] ss:$16 sps:$4 sm:$0xff]   ;;  %v14325_v22 = vld [vmem:[%s15924_s15 + $0x1bc0] ss:$16 sps:$4 sm:$0xff]  }
 0x1f6   : > { %v8472_v46 = vpop.f32.mrf.mxu0  ;;  %8849 = vmatmul.mubr.bf16.gmra.mxu0 %v14288_v26  ;;  %v14330_v23 = vld [vmem:[%s15924_s15 + $0x19a4] ss:$16 sps:$4 sm:$0xff]   ;;  %v14331_v61 = vld [vmem:[%s15924_s15 + $0x1ba0] ss:$16 sps:$4 sm:$0xff]  }
 0x1f7   : > { %v8535_v48 = vpop.f32.mrf.mxu1  ;;  %8912 = vmatmul.mubr.bf16.gmra.mxu1 %v14297_v31  ;;  %v8473_v45 = vadd.f32 %v8472_v46, %v16395_v29  ;;  %8931 = vmatpush1.bf16.msra.mxu0 %v14289_v27  ;;  %v14333_v26 = vld [vmem:[%s15924_s15 + $0x1ba4] ss:$16 sps:$4 sm:$0xff]   ;;  %v14328_v27 = vld [vmem:[%s15924_s15 + $0x19a0] ss:$16 sps:$4 sm:$0xff]  }
 0x1f8   : > { %8994 = vmatpush1.bf16.msra.mxu1 %v14292_v20  ;;  %v8474_v55 = vpop.f32.mrf.mxu0  ;;  %8932 = vmatprep.subr.bf16.mxu0 %v14300_v6  ;;  %v14336_v28 = vld [vmem:[%s15924_s15 + $0x1984] ss:$16 sps:$4 sm:$0xff]   ;;  %v14334_v31 = vld [vmem:[%s15924_s15 + $0x1980] ss:$16 sps:$4 sm:$0xff]  }
 0x1f9   : > { %v8537_v56 = vpop.f32.mrf.mxu1  ;;  %8995 = vmatprep.subr.bf16.mxu1 %v14303_v42  ;;  %v8475_v32 = vadd.f32 %v8474_v55, %v16400_v33  ;;  %v16510_v58 = vadd.f32 %v8535_v48, %v8473_v45  ;;  %8954 = vmatprep.mubr.bf16.mxu0 %v14366_v38  ;;  %v14312_v33 = vld [vmem:[%s15924_s15 + $0x1804] ss:$16 sps:$4 sm:$0xff]   ;;  %v14337_v34 = vld [vmem:[%s15924_s15 + $0x1b80] ss:$16 sps:$4 sm:$0xff]  }
 0x1fa   : > { %9017 = vmatprep.mubr.bf16.mxu1 %v14369_v10  ;;  %v8476_v29 = vpop.f32.mrf.mxu0  ;;  %v14339_v20 = vld [vmem:[%s15924_s15 + $0x1b84] ss:$16 sps:$4 sm:$0xff]   ;;  %v14340_v38 = vld [vmem:[%s15924_s15 + $0x1960] ss:$16 sps:$4 sm:$0xff]  }
 0x1fb   : > { %v8539_v59 = vpop.f32.mrf.mxu1  ;;  %v8477_v41 = vadd.f32 %v8476_v29, %v16404_v39  ;;  %v16515_v2 = vadd.f32 %v8537_v56, %v8475_v32  ;;  %8933 = vmatpush1.bf16.msra.mxu0 %v14298_v49  ;;  %v14318_v39 = vld [vmem:[%s15924_s15 + $0x19e4] ss:$16 sps:$4 sm:$0xff]   ;;  %v14343_v10 = vld [vmem:[%s15924_s15 + $0x1b60] ss:$16 sps:$4 sm:$0xff]  }
 0x1fc   : > { %8996 = vmatpush1.bf16.msra.mxu1 %v14301_v50  ;;  %8934 = vmatprep.subr.bf16.mxu0 %v14306_v51  ;;  %v14342_v6 = vld [vmem:[%s15924_s15 + $0x1964] ss:$16 sps:$4 sm:$0xff]   ;;  %v14346_v49 = vld [vmem:[%s15924_s15 + $0x1940] ss:$16 sps:$4 sm:$0xff]  }
 0x1fd   : > { %8997 = vmatprep.subr.bf16.mxu1 %v14309_v57  ;;  %v16519_v3 = vadd.f32 %v8539_v59, %v8477_v41  ;;  %v14345_v42 = vld [vmem:[%s15924_s15 + $0x1b64] ss:$16 sps:$4 sm:$0xff]   ;;  %v14349_v50 = vld [vmem:[%s15924_s15 + $0x1b40] ss:$16 sps:$4 sm:$0xff]  }
 0x1fe   : > { %v14348_v46 = vld [vmem:[%s15924_s15 + $0x1944] ss:$16 sps:$4 sm:$0xff]   ;;  %v14352_v55 = vld [vmem:[%s15924_s15 + $0x1920] ss:$16 sps:$4 sm:$0xff]  }
 0x1ff   : > { %8935 = vmatpush1.bf16.msra.mxu0 %v14304_v60  ;;  %v14351_v48 = vld [vmem:[%s15924_s15 + $0x1b44] ss:$16 sps:$4 sm:$0xff]   ;;  %v14355_v56 = vld [vmem:[%s15924_s15 + $0x1b20] ss:$16 sps:$4 sm:$0xff]  }
 0x200   : > { %8998 = vmatpush1.bf16.msra.mxu1 %v14307_v0  ;;  %8936 = vmatprep.subr.bf16.mxu0 %v14312_v33  ;;  %v14354_v45 = vld [vmem:[%s15924_s15 + $0x1924] ss:$16 sps:$4 sm:$0xff]   ;;  %v14358_v29 = vld [vmem:[%s15924_s15 + $0x1900] ss:$16 sps:$4 sm:$0xff]   ;;  %v14367_v33 = vld [vmem:[%s15926_s16 + $0x68] ss:$144 sps:$4 sm:$0xff]  }
 0x201   : > { %8999 = vmatprep.subr.bf16.mxu1 %v14315_v5  ;;  %v14357_v51 = vld [vmem:[%s15924_s15 + $0x1b24] ss:$16 sps:$4 sm:$0xff]   ;;  %v14361_v59 = vld [vmem:[%s15924_s15 + $0x1b00] ss:$16 sps:$4 sm:$0xff]  }
 0x202   : > { %v14360_v57 = vld [vmem:[%s15924_s15 + $0x1904] ss:$16 sps:$4 sm:$0xff]   ;;  %v14364_v41 = vld [vmem:[%s15926_s16 + $0x60] ss:$144 sps:$4 sm:$0xff]  }
 0x203   : > { %8937 = vmatpush1.bf16.msra.mxu0 %v14310_v9  ;;  %v14363_v32 = vld [vmem:[%s15924_s15 + $0x1b04] ss:$16 sps:$4 sm:$0xff]   ;;  %v14370_v5 = vld [vmem:[%s15924_s15 + $0x1ce0] ss:$16 sps:$4 sm:$0xff]  }
 0x204   : > { %9000 = vmatpush1.bf16.msra.mxu1 %v14313_v47  ;;  %8938 = vmatprep.subr.bf16.mxu0 %v14318_v39  ;;  %v14372_v60 = vld [vmem:[%s15924_s15 + $0x1ce4] ss:$16 sps:$4 sm:$0xff]   ;;  %v14373_v9 = vld [vmem:[%s15924_s15 + $0x1ee0] ss:$16 sps:$4 sm:$0xff]   ;;  %v16562_v39 = vpop.f32.mrf.mxu0 }
 0x205   : > { %9001 = vmatprep.subr.bf16.mxu1 %v14321_v12  ;;  %v14375_v0 = vld [vmem:[%s15924_s15 + $0x1ee4] ss:$16 sps:$4 sm:$0xff]   ;;  %v16564_v12 = vpop.f32.mrf.mxu1 }
 0x206   : > { %v14378_v47 = vld [vmem:[%s15924_s15 + $0x1cc4] ss:$16 sps:$4 sm:$0xff]  }
 0x207   : > { %8939 = vmatpush2.bf16.msra.mxu0 %v14316_v11  ;;  %v14381_v11 = vld [vmem:[%s15924_s15 + $0x1ec4] ss:$16 sps:$4 sm:$0xff]  }
 0x208   : > { %9002 = vmatpush2.bf16.msra.mxu1 %v14319_v17  ;;  %8940 = vmatprep.subr.bf16.mxu0 %v14324_v18  ;;  %v14382_v17 = vld [vmem:[%s15926_s16 + $0x184] ss:$144 sps:$4 sm:$0xff]   ;;  %v14391_v18 = vld [vmem:[%s15926_s16 + $0x18c] ss:$144 sps:$4 sm:$0xff]  }
 0x209   : > { %9003 = vmatprep.subr.bf16.mxu1 %v14327_v19 }
 0x20b   : > { %8941 = vmatpush2.bf16.msra.mxu0 %v14322_v21 }
 0x20c   : > { %9004 = vmatpush2.bf16.msra.mxu1 %v14325_v22  ;;  %8942 = vmatprep.subr.bf16.mxu0 %v14330_v23  ;;  %v14376_v22 = vld [vmem:[%s15924_s15 + $0x1cc0] ss:$16 sps:$4 sm:$0xff]  }
 0x20d   : > { %9005 = vmatprep.subr.bf16.mxu1 %v14333_v26  ;;  %v14379_v23 = vld [vmem:[%s15924_s15 + $0x1ec0] ss:$16 sps:$4 sm:$0xff]  }
 0x20f   : > { %8943 = vmatpush2.bf16.msra.mxu0 %v14328_v27  ;;  %v14387_v27 = vld [vmem:[%s15924_s15 + $0x1ca4] ss:$16 sps:$4 sm:$0xff]  }
 0x210   : > { %9006 = vmatpush2.bf16.msra.mxu1 %v14331_v61  ;;  %8944 = vmatprep.subr.bf16.mxu0 %v14336_v28 }
 0x211   : > { %9007 = vmatprep.subr.bf16.mxu1 %v14339_v20  ;;  %v14390_v20 = vld [vmem:[%s15924_s15 + $0x1ea4] ss:$16 sps:$4 sm:$0xff]  }
 0x213   : > { %8945 = vmatpush2.bf16.msra.mxu0 %v14334_v31 }
 0x214   : > { %9008 = vmatpush2.bf16.msra.mxu1 %v14337_v34  ;;  %8946 = vmatprep.subr.bf16.mxu0 %v14342_v6  ;;  %v14384_v6 = vld [vmem:[%s15926_s16 + $0x180] ss:$144 sps:$4 sm:$0xff]  }
 0x215   : > { %9009 = vmatprep.subr.bf16.mxu1 %v14345_v42  ;;  %v14385_v42 = vld [vmem:[%s15924_s15 + $0x1ca0] ss:$16 sps:$4 sm:$0xff]  }
 0x217   : > { %8947 = vmatpush2.bf16.msra.mxu0 %v14340_v38 }
 0x218   : > { %9010 = vmatpush2.bf16.msra.mxu1 %v14343_v10  ;;  %8948 = vmatprep.subr.bf16.mxu0 %v14348_v46  ;;  %v14388_v10 = vld [vmem:[%s15924_s15 + $0x1ea0] ss:$16 sps:$4 sm:$0xff]   ;;  %v14393_v46 = vld [vmem:[%s15926_s16 + $0x188] ss:$144 sps:$4 sm:$0xff]  }
 0x219   : > { %9011 = vmatprep.subr.bf16.mxu1 %v14351_v48 }
 0x21b   : > { %8949 = vmatpush2.bf16.msra.mxu0 %v14346_v49 }
 0x21c   : > { %9012 = vmatpush2.bf16.msra.mxu1 %v14349_v50  ;;  %8950 = vmatprep.subr.bf16.mxu0 %v14354_v45 }
 0x21d   : > { %9013 = vmatprep.subr.bf16.mxu1 %v14357_v51  ;;  %v14399_v51 = vld [vmem:[%s15924_s15 + $0x1e84] ss:$16 sps:$4 sm:$0xff]  }
 0x21f   : > { %8951 = vmatpush2.bf16.msra.mxu0 %v14352_v55 }
 0x220   : > { %9014 = vmatpush2.bf16.msra.mxu1 %v14355_v56  ;;  %8952 = vmatprep.subr.bf16.mxu0 %v14360_v57  ;;  %v14400_v56 = vld [vmem:[%s15926_s16 + $0x2a4] ss:$144 sps:$4 sm:$0xff]   ;;  %v14409_v57 = vld [vmem:[%s15926_s16 + $0x2ac] ss:$144 sps:$4 sm:$0xff]  }
 0x221   : > { %9015 = vmatprep.subr.bf16.mxu1 %v14363_v32 }
 0x223   : > { %8953 = vmatpush2.bf16.msra.mxu0 %v14358_v29  ;;  %v14394_v29 = vld [vmem:[%s15924_s15 + $0x1c80] ss:$16 sps:$4 sm:$0xff]  }
 0x224   : > { %9016 = vmatpush2.bf16.msra.mxu1 %v14361_v59  ;;  %9048 = vmatprep.subr.bf16.mxu0 %v14372_v60  ;;  %v14397_v59 = vld [vmem:[%s15924_s15 + $0x1e80] ss:$16 sps:$4 sm:$0xff]  }
 0x225   : > { %9111 = vmatprep.subr.bf16.mxu1 %v14375_v0  ;;  %v14405_v0 = vld [vmem:[%s15924_s15 + $0x1c64] ss:$16 sps:$4 sm:$0xff]  }
 0x226   : > { %v8578_v19 = vpop.f32.mrf.mxu0  ;;  %8955 = vmatmul.mubr.bf16.vlgmr.msra.gmra.mxu0 %v14364_v41 }
 0x227   : > { %v8641_v21 = vpop.f32.mrf.mxu1  ;;  %9018 = vmatmul.mubr.bf16.vlgmr.msra.gmra.mxu1 %v14367_v33  ;;  %v8579_v26 = vadd.f32 %v8578_v19, %v16459_v52  ;;  %9049 = vmatpush1.bf16.msra.mxu0 %v14370_v5  ;;  %v14408_v5 = vld [vmem:[%s15924_s15 + $0x1e64] ss:$16 sps:$4 sm:$0xff]   ;;  %v14406_v19 = vld [vmem:[%s15924_s15 + $0x1e60] ss:$16 sps:$4 sm:$0xff]  }
 0x228   : > { %9112 = vmatpush1.bf16.msra.mxu1 %v14373_v9  ;;  %v8580_v61 = vpop.f32.mrf.mxu0  ;;  %9050 = vmatprep.subr.bf16.mxu0 %v14378_v47 }
 0x229   : > { %v8643_v28 = vpop.f32.mrf.mxu1  ;;  %9113 = vmatprep.subr.bf16.mxu1 %v14381_v11  ;;  %v16574_v31 = vadd.f32 %v8641_v21, %v8579_v26  ;;  %v8581_v34 = vadd.f32 %v8580_v61, %v16466_v62  ;;  %8964 = vmatprep.mubr.bf16.mxu0 %v14382_v17  ;;  %v14396_v62 = vld [vmem:[%s15924_s15 + $0x1c84] ss:$16 sps:$4 sm:$0xff]   ;;  %v14402_v11 = vld [vmem:[%s15926_s16 + $0x2a0] ss:$144 sps:$4 sm:$0xff]   ;;  %v14411_v21 = vld [vmem:[%s15926_s16 + $0x2a8] ss:$144 sps:$4 sm:$0xff]  }
 0x22a   : > { %9027 = vmatprep.mubr.bf16.mxu1 %v14391_v18  ;;  %v8582_v52 = vpop.f32.mrf.mxu0  ;;  %v14403_v17 = vld [vmem:[%s15924_s15 + $0x1c60] ss:$16 sps:$4 sm:$0xff]   ;;  %v14417_v61 = vld [vmem:[%s15924_s15 + $0x1e44] ss:$16 sps:$4 sm:$0xff]  }
 0x22b   : > { %v8645_v38 = vpop.f32.mrf.mxu1  ;;  %v16581_v48 = vadd.f32 %v8643_v28, %v8581_v34  ;;  %v8583_v49 = vadd.f32 %v8582_v52, %v16475_v4  ;;  %9051 = vmatpush1.bf16.msra.mxu0 %v14376_v22  ;;  %v14415_v52 = vld [vmem:[%s15924_s15 + $0x1e40] ss:$16 sps:$4 sm:$0xff]  }
 0x22c   : > { %9114 = vmatpush1.bf16.msra.mxu1 %v14379_v23  ;;  %v16585_v50 = vpop.f32.mrf.mxu0  ;;  %9052 = vmatprep.subr.bf16.mxu0 %v14387_v27 }
 0x22d   : > { %v16587_v45 = vpop.f32.mrf.mxu1  ;;  %9115 = vmatprep.subr.bf16.mxu1 %v14390_v20  ;;  %v16590_v55 = vadd.f32 %v8645_v38, %v8583_v49  ;;  %v14480_v20 = vld [vmem:[%s15926_s16 + $0x74] ss:$144 sps:$4 sm:$0xff]  }
 0x22e   : > { %v8588_v32 = vpop.f32.mrf.mxu0  ;;  %8965 = vmatmul.mubr.bf16.gmra.mxu0 %v14384_v6 }
 0x22f   : > { %v8651_v4 = vpop.f32.mrf.mxu1  ;;  %9028 = vmatmul.mubr.bf16.gmra.mxu1 %v14393_v46  ;;  %v8589_v60 = vadd.f32 %v8588_v32, %v16485_v25  ;;  %9053 = vmatpush1.bf16.msra.mxu0 %v14385_v42  ;;  %v14412_v42 = vld [vmem:[%s15924_s15 + $0x1c40] ss:$16 sps:$4 sm:$0xff]  }
 0x230   : > { %9116 = vmatpush1.bf16.msra.mxu1 %v14388_v10  ;;  %v8590_v41 = vpop.f32.mrf.mxu0  ;;  %9054 = vmatprep.subr.bf16.mxu0 %v14396_v62  ;;  %v14420_v10 = vld [vmem:[%s15924_s15 + $0x1c24] ss:$16 sps:$4 sm:$0xff]   ;;  %v14418_v32 = vld [vmem:[%s15924_s15 + $0x1c20] ss:$16 sps:$4 sm:$0xff]  }
 0x231   : > { %v8653_v33 = vpop.f32.mrf.mxu1  ;;  %9117 = vmatprep.subr.bf16.mxu1 %v14399_v51  ;;  %v8591_v9 = vadd.f32 %v8590_v41, %v16492_v24  ;;  %v16600_v47 = vadd.f32 %v8651_v4, %v8589_v60  ;;  %8974 = vmatprep.mubr.bf16.mxu0 %v14400_v56  ;;  %v14414_v24 = vld [vmem:[%s15924_s15 + $0x1c44] ss:$16 sps:$4 sm:$0xff]   ;;  %v14421_v4 = vld [vmem:[%s15924_s15 + $0x1e20] ss:$16 sps:$4 sm:$0xff]  }
 0x232   : > { %9037 = vmatprep.mubr.bf16.mxu1 %v14409_v57  ;;  %v8592_v25 = vpop.f32.mrf.mxu0  ;;  %v14423_v62 = vld [vmem:[%s15924_s15 + $0x1e24] ss:$16 sps:$4 sm:$0xff]   ;;  %v14424_v41 = vld [vmem:[%s15924_s15 + $0x1c00] ss:$16 sps:$4 sm:$0xff]  }
 0x233   : > { %v8655_v18 = vpop.f32.mrf.mxu1  ;;  %v8593_v22 = vadd.f32 %v8592_v25, %v16500_v30  ;;  %v16607_v23 = vadd.f32 %v8653_v33, %v8591_v9  ;;  %9055 = vmatpush1.bf16.msra.mxu0 %v14394_v29  ;;  %v14483_v30 = vld [vmem:[%s15926_s16 + $0x7c] ss:$144 sps:$4 sm:$0xff]   ;;  %v14429_v60 = vld [vmem:[%s15924_s15 + $0x1e04] ss:$16 sps:$4 sm:$0xff]   ;;  %v14430_v9 = vld [vmem:[%s15924_s15 + $0x1de0] ss:$16 sps:$4 sm:$0xff]  }
 0x234   : > { %9118 = vmatpush1.bf16.msra.mxu1 %v14397_v59  ;;  %v16610_v26 = vpop.f32.mrf.mxu0  ;;  %9056 = vmatprep.subr.bf16.mxu0 %v14405_v0  ;;  %v14432_v33 = vld [vmem:[%s15924_s15 + $0x1de4] ss:$16 sps:$4 sm:$0xff]  }
 0x235   : > { %v16612_v27 = vpop.f32.mrf.mxu1  ;;  %9119 = vmatprep.subr.bf16.mxu1 %v14408_v5  ;;  %v16615_v28 = vadd.f32 %v8655_v18, %v8593_v22  ;;  %v14435_v5 = vld [vmem:[%s15924_s15 + $0x1fe4] ss:$16 sps:$4 sm:$0xff]   ;;  %v14436_v18 = vld [vmem:[%s15924_s15 + $0x1dc0] ss:$16 sps:$4 sm:$0xff]  }
 0x236   : > { %v8598_v34 = vpop.f32.mrf.mxu0  ;;  %8975 = vmatmul.mubr.bf16.gmra.mxu0 %v14402_v11  ;;  %v14433_v11 = vld [vmem:[%s15924_s15 + $0x1fe0] ss:$16 sps:$4 sm:$0xff]   ;;  %v14441_v25 = vld [vmem:[%s15924_s15 + $0x1fc4] ss:$16 sps:$4 sm:$0xff]  }
 0x237   : > { %v8661_v6 = vpop.f32.mrf.mxu1  ;;  %9038 = vmatmul.mubr.bf16.gmra.mxu1 %v14411_v21  ;;  %v8599_v38 = vadd.f32 %v8598_v34, %v16510_v58  ;;  %9057 = vmatpush1.bf16.msra.mxu0 %v14403_v17  ;;  %v14438_v17 = vld [vmem:[%s15924_s15 + $0x1dc4] ss:$16 sps:$4 sm:$0xff]   ;;  %v14448_v34 = vld [vmem:[%s15924_s15 + $0x1d80] ss:$16 sps:$4 sm:$0xff]  }
 0x238   : > { %9120 = vmatpush1.bf16.msra.mxu1 %v14406_v19  ;;  %v8600_v46 = vpop.f32.mrf.mxu0  ;;  %9058 = vmatprep.subr.bf16.mxu0 %v14414_v24  ;;  %v14439_v19 = vld [vmem:[%s15924_s15 + $0x1fc0] ss:$16 sps:$4 sm:$0xff]   ;;  %v14444_v21 = vld [vmem:[%s15924_s15 + $0x1da4] ss:$16 sps:$4 sm:$0xff]  }
 0x239   : > { %v8663_v49 = vpop.f32.mrf.mxu1  ;;  %9121 = vmatprep.subr.bf16.mxu1 %v14417_v61  ;;  %v8601_v51 = vadd.f32 %v8600_v46, %v16515_v2  ;;  %v16625_v56 = vadd.f32 %v8661_v6, %v8599_v38  ;;  %9080 = vmatprep.mubr.bf16.mxu0 %v14480_v20  ;;  %v14426_v2 = vld [vmem:[%s15924_s15 + $0x1c04] ss:$16 sps:$4 sm:$0xff]   ;;  %v14442_v24 = vld [vmem:[%s15924_s15 + $0x1da0] ss:$16 sps:$4 sm:$0xff]  }
 0x23a   : > { %9143 = vmatprep.mubr.bf16.mxu1 %v14483_v30  ;;  %v8602_v57 = vpop.f32.mrf.mxu0  ;;  %v14447_v22 = vld [vmem:[%s15924_s15 + $0x1fa4] ss:$16 sps:$4 sm:$0xff]   ;;  %v14445_v61 = vld [vmem:[%s15924_s15 + $0x1fa0] ss:$16 sps:$4 sm:$0xff]  }
 0x23b   : > { %v8665_v58 = vpop.f32.mrf.mxu1  ;;  %v8603_v29 = vadd.f32 %v8602_v57, %v16519_v3  ;;  %v16630_v59 = vadd.f32 %v8663_v49, %v8601_v51  ;;  %9059 = vmatpush1.bf16.msra.mxu0 %v14412_v42  ;;  %v14427_v3 = vld [vmem:[%s15924_s15 + $0x1e00] ss:$16 sps:$4 sm:$0xff]   ;;  %v14450_v20 = vld [vmem:[%s15924_s15 + $0x1d84] ss:$16 sps:$4 sm:$0xff]  }
 0x23c   : > { %9122 = vmatpush1.bf16.msra.mxu1 %v14415_v52  ;;  %9060 = vmatprep.subr.bf16.mxu0 %v14420_v10  ;;  %v14453_v30 = vld [vmem:[%s15924_s15 + $0x1f84] ss:$16 sps:$4 sm:$0xff]   ;;  %v14451_v6 = vld [vmem:[%s15924_s15 + $0x1f80] ss:$16 sps:$4 sm:$0xff]  }
 0x23d   : > { %9123 = vmatprep.subr.bf16.mxu1 %v14423_v62  ;;  %v16634_v0 = vadd.f32 %v8665_v58, %v8603_v29  ;;  %v14456_v42 = vld [vmem:[%s15924_s15 + $0x1d64] ss:$16 sps:$4 sm:$0xff]   ;;  %v14454_v38 = vld [vmem:[%s15924_s15 + $0x1d60] ss:$16 sps:$4 sm:$0xff]  }
 0x23e   : > { %v14459_v52 = vld [vmem:[%s15924_s15 + $0x1f64] ss:$16 sps:$4 sm:$0xff]   ;;  %v14457_v10 = vld [vmem:[%s15924_s15 + $0x1f60] ss:$16 sps:$4 sm:$0xff]  }
 0x23f   : > { %9061 = vmatpush1.bf16.msra.mxu0 %v14418_v32  ;;  %v14462_v46 = vld [vmem:[%s15924_s15 + $0x1d44] ss:$16 sps:$4 sm:$0xff]   ;;  %v14460_v62 = vld [vmem:[%s15924_s15 + $0x1d40] ss:$16 sps:$4 sm:$0xff]  }
 0x240   : > { %9124 = vmatpush1.bf16.msra.mxu1 %v14421_v4  ;;  %9062 = vmatprep.subr.bf16.mxu0 %v14426_v2  ;;  %v14465_v49 = vld [vmem:[%s15924_s15 + $0x1f44] ss:$16 sps:$4 sm:$0xff]   ;;  %v14463_v51 = vld [vmem:[%s15924_s15 + $0x1f40] ss:$16 sps:$4 sm:$0xff]  }
 0x241   : > { %9125 = vmatprep.subr.bf16.mxu1 %v14429_v60  ;;  %v14468_v57 = vld [vmem:[%s15924_s15 + $0x1d24] ss:$16 sps:$4 sm:$0xff]   ;;  %v14466_v32 = vld [vmem:[%s15924_s15 + $0x1d20] ss:$16 sps:$4 sm:$0xff]  }
 0x242   : > { %v14471_v58 = vld [vmem:[%s15924_s15 + $0x1f24] ss:$16 sps:$4 sm:$0xff]   ;;  %v14469_v4 = vld [vmem:[%s15924_s15 + $0x1f20] ss:$16 sps:$4 sm:$0xff]  }
 0x243   : > { %9063 = vmatpush1.bf16.msra.mxu0 %v14424_v41  ;;  %v14474_v29 = vld [vmem:[%s15924_s15 + $0x1d04] ss:$16 sps:$4 sm:$0xff]   ;;  %v14472_v60 = vld [vmem:[%s15924_s15 + $0x1d00] ss:$16 sps:$4 sm:$0xff]  }
 0x244   : > { %9126 = vmatpush1.bf16.msra.mxu1 %v14427_v3  ;;  %9064 = vmatprep.subr.bf16.mxu0 %v14432_v33  ;;  %v14477_v2 = vld [vmem:[%s15924_s15 + $0x1f04] ss:$16 sps:$4 sm:$0xff]   ;;  %v14475_v41 = vld [vmem:[%s15924_s15 + $0x1f00] ss:$16 sps:$4 sm:$0xff]   ;;  %v14481_v33 = vld [vmem:[%s15926_s16 + $0x78] ss:$144 sps:$4 sm:$0xff]  }
 0x245   : > { %9127 = vmatprep.subr.bf16.mxu1 %v14435_v5  ;;  %v14478_v3 = vld [vmem:[%s15926_s16 + $0x70] ss:$144 sps:$4 sm:$0xff]   ;;  %v14486_v5 = vld [vmem:[%s15924_s15 + $0x20e4] ss:$16 sps:$4 sm:$0xff]  }
 0x247   : > { %9065 = vmatpush2.bf16.msra.mxu0 %v14430_v9  ;;  %v14489_v9 = vld [vmem:[%s15924_s15 + $0x22e4] ss:$16 sps:$4 sm:$0xff]  }
 0x248   : > { %9128 = vmatpush2.bf16.msra.mxu1 %v14433_v11  ;;  %9066 = vmatprep.subr.bf16.mxu0 %v14438_v17  ;;  %v14484_v11 = vld [vmem:[%s15924_s15 + $0x20e0] ss:$16 sps:$4 sm:$0xff]  }
 0x249   : > { %9129 = vmatprep.subr.bf16.mxu1 %v14441_v25  ;;  %v14487_v17 = vld [vmem:[%s15924_s15 + $0x22e0] ss:$16 sps:$4 sm:$0xff]   ;;  %v16676_v25 = vpop.f32.mrf.mxu0 }
 0x24b   : > { %9067 = vmatpush2.bf16.msra.mxu0 %v14436_v18  ;;  %v16678_v18 = vpop.f32.mrf.mxu1 }
 0x24c   : > { %9130 = vmatpush2.bf16.msra.mxu1 %v14439_v19  ;;  %9068 = vmatprep.subr.bf16.mxu0 %v14444_v21  ;;  %v14492_v19 = vld [vmem:[%s15924_s15 + $0x20c4] ss:$16 sps:$4 sm:$0xff]  }
 0x24d   : > { %9131 = vmatprep.subr.bf16.mxu1 %v14447_v22  ;;  %v14495_v21 = vld [vmem:[%s15924_s15 + $0x22c4] ss:$16 sps:$4 sm:$0xff]   ;;  %v14490_v22 = vld [vmem:[%s15924_s15 + $0x20c0] ss:$16 sps:$4 sm:$0xff]  }
 0x24f   : > { %9069 = vmatpush2.bf16.msra.mxu0 %v14442_v24  ;;  %v14493_v24 = vld [vmem:[%s15924_s15 + $0x22c0] ss:$16 sps:$4 sm:$0xff]  }
 0x250   : > { %9132 = vmatpush2.bf16.msra.mxu1 %v14445_v61  ;;  %9070 = vmatprep.subr.bf16.mxu0 %v14450_v20  ;;  %v14496_v61 = vld [vmem:[%s15926_s16 + $0x194] ss:$144 sps:$4 sm:$0xff]   ;;  %v14505_v20 = vld [vmem:[%s15926_s16 + $0x19c] ss:$144 sps:$4 sm:$0xff]  }
 0x251   : > { %9133 = vmatprep.subr.bf16.mxu1 %v14453_v30 }
 0x253   : > { %9071 = vmatpush2.bf16.msra.mxu0 %v14448_v34 }
 0x254   : > { %9134 = vmatpush2.bf16.msra.mxu1 %v14451_v6  ;;  %9072 = vmatprep.subr.bf16.mxu0 %v14456_v42 }
 0x255   : > { %9135 = vmatprep.subr.bf16.mxu1 %v14459_v52 }
 0x257   : > { %9073 = vmatpush2.bf16.msra.mxu0 %v14454_v38  ;;  %v14498_v38 = vld [vmem:[%s15926_s16 + $0x190] ss:$144 sps:$4 sm:$0xff]  }
 0x258   : > { %9136 = vmatpush2.bf16.msra.mxu1 %v14457_v10  ;;  %9074 = vmatprep.subr.bf16.mxu0 %v14462_v46  ;;  %v14501_v10 = vld [vmem:[%s15924_s15 + $0x20a4] ss:$16 sps:$4 sm:$0xff]  }
 0x259   : > { %9137 = vmatprep.subr.bf16.mxu1 %v14465_v49  ;;  %v14504_v46 = vld [vmem:[%s15924_s15 + $0x22a4] ss:$16 sps:$4 sm:$0xff]  }
 0x25b   : > { %9075 = vmatpush2.bf16.msra.mxu0 %v14460_v62 }
 0x25c   : > { %9138 = vmatpush2.bf16.msra.mxu1 %v14463_v51  ;;  %9076 = vmatprep.subr.bf16.mxu0 %v14468_v57  ;;  %v14499_v51 = vld [vmem:[%s15924_s15 + $0x20a0] ss:$16 sps:$4 sm:$0xff]  }
 0x25d   : > { %9139 = vmatprep.subr.bf16.mxu1 %v14471_v58  ;;  %v14502_v57 = vld [vmem:[%s15924_s15 + $0x22a0] ss:$16 sps:$4 sm:$0xff]  }
 0x25f   : > { %9077 = vmatpush2.bf16.msra.mxu0 %v14466_v32 }
 0x260   : > { %9140 = vmatpush2.bf16.msra.mxu1 %v14469_v4  ;;  %9078 = vmatprep.subr.bf16.mxu0 %v14474_v29 }
 0x261   : > { %9141 = vmatprep.subr.bf16.mxu1 %v14477_v2 }
 0x263   : > { %9079 = vmatpush2.bf16.msra.mxu0 %v14472_v60  ;;  %v14510_v60 = vld [vmem:[%s15924_s15 + $0x2084] ss:$16 sps:$4 sm:$0xff]  }
 0x264   : > { %9142 = vmatpush2.bf16.msra.mxu1 %v14475_v41  ;;  %9174 = vmatprep.subr.bf16.mxu0 %v14486_v5  ;;  %v14513_v41 = vld [vmem:[%s15924_s15 + $0x2284] ss:$16 sps:$4 sm:$0xff]   ;;  %v14511_v5 = vld [vmem:[%s15924_s15 + $0x2280] ss:$16 sps:$4 sm:$0xff]  }
 0x265   : > { %9237 = vmatprep.subr.bf16.mxu1 %v14489_v9  ;;  %v14514_v9 = vld [vmem:[%s15926_s16 + $0x2b4] ss:$144 sps:$4 sm:$0xff]  }
 0x266   : > { %v8704_v30 = vpop.f32.mrf.mxu0  ;;  %9081 = vmatmul.mubr.bf16.vlgmr.msra.gmra.mxu0 %v14478_v3 }
 0x267   : > { %v8767_v34 = vpop.f32.mrf.mxu1  ;;  %9144 = vmatmul.mubr.bf16.vlgmr.msra.gmra.mxu1 %v14481_v33  ;;  %v8705_v6 = vadd.f32 %v8704_v30, %v16574_v31  ;;  %9175 = vmatpush1.bf16.msra.mxu0 %v14484_v11  ;;  %v14507_v31 = vld [vmem:[%s15926_s16 + $0x198] ss:$144 sps:$4 sm:$0xff]   ;;  %v14508_v33 = vld [vmem:[%s15924_s15 + $0x2080] ss:$16 sps:$4 sm:$0xff]   ;;  %v14523_v11 = vld [vmem:[%s15926_s16 + $0x2bc] ss:$144 sps:$4 sm:$0xff]  }
 0x268   : > { %9238 = vmatpush1.bf16.msra.mxu1 %v14487_v17  ;;  %v8706_v42 = vpop.f32.mrf.mxu0  ;;  %9176 = vmatprep.subr.bf16.mxu0 %v14492_v19 }
 0x269   : > { %v8769_v52 = vpop.f32.mrf.mxu1  ;;  %9239 = vmatprep.subr.bf16.mxu1 %v14495_v21  ;;  %v16690_v49 = vadd.f32 %v8767_v34, %v8705_v6  ;;  %v8707_v62 = vadd.f32 %v8706_v42, %v16581_v48  ;;  %9090 = vmatprep.mubr.bf16.mxu0 %v14496_v61  ;;  %v14519_v61 = vld [vmem:[%s15924_s15 + $0x2064] ss:$16 sps:$4 sm:$0xff]   ;;  %v14517_v6 = vld [vmem:[%s15924_s15 + $0x2060] ss:$16 sps:$4 sm:$0xff]  }
 0x26a   : > { %9153 = vmatprep.mubr.bf16.mxu1 %v14505_v20  ;;  %v8708_v58 = vpop.f32.mrf.mxu0  ;;  %v14522_v20 = vld [vmem:[%s15924_s15 + $0x2264] ss:$16 sps:$4 sm:$0xff]   ;;  %v14520_v42 = vld [vmem:[%s15924_s15 + $0x2260] ss:$16 sps:$4 sm:$0xff]  }
 0x26b   : > { %v8771_v32 = vpop.f32.mrf.mxu1  ;;  %v16696_v4 = vadd.f32 %v8769_v52, %v8707_v62  ;;  %v8709_v29 = vadd.f32 %v8708_v58, %v16590_v55  ;;  %9177 = vmatpush1.bf16.msra.mxu0 %v14490_v22  ;;  %v14526_v58 = vld [vmem:[%s15924_s15 + $0x2040] ss:$16 sps:$4 sm:$0xff]  }
 0x26c   : > { %9240 = vmatpush1.bf16.msra.mxu1 %v14493_v24  ;;  %v16699_v48 = vpop.f32.mrf.mxu0  ;;  %9178 = vmatprep.subr.bf16.mxu0 %v14501_v10  ;;  %v14516_v24 = vld [vmem:[%s15926_s16 + $0x2b0] ss:$144 sps:$4 sm:$0xff]  }
 0x26d   : > { %v16701_v2 = vpop.f32.mrf.mxu1  ;;  %9241 = vmatprep.subr.bf16.mxu1 %v14504_v46  ;;  %v16705_v3 = vadd.f32 %v8771_v32, %v8709_v29  ;;  %v14529_v32 = vld [vmem:[%s15924_s15 + $0x2240] ss:$16 sps:$4 sm:$0xff]   ;;  %v14594_v29 = vld [vmem:[%s15926_s16 + $0x84] ss:$144 sps:$4 sm:$0xff]  }
 0x26e   : > { %v8714_v55 = vpop.f32.mrf.mxu0  ;;  %9091 = vmatmul.mubr.bf16.gmra.mxu0 %v14498_v38 }
 0x26f   : > { %v8777_v17 = vpop.f32.mrf.mxu1  ;;  %9154 = vmatmul.mubr.bf16.gmra.mxu1 %v14507_v31  ;;  %v8715_v19 = vadd.f32 %v8714_v55, %v16600_v47  ;;  %9179 = vmatpush1.bf16.msra.mxu0 %v14499_v51  ;;  %v14525_v47 = vld [vmem:[%s15926_s16 + $0x2b8] ss:$144 sps:$4 sm:$0xff]   ;;  %v14528_v51 = vld [vmem:[%s15924_s15 + $0x2044] ss:$16 sps:$4 sm:$0xff]  }
 0x270   : > { %9242 = vmatpush1.bf16.msra.mxu1 %v14502_v57  ;;  %v8716_v21 = vpop.f32.mrf.mxu0  ;;  %9180 = vmatprep.subr.bf16.mxu0 %v14510_v60  ;;  %v14531_v57 = vld [vmem:[%s15924_s15 + $0x2244] ss:$16 sps:$4 sm:$0xff]  }
 0x271   : > { %v8779_v22 = vpop.f32.mrf.mxu1  ;;  %9243 = vmatprep.subr.bf16.mxu1 %v14513_v41  ;;  %v8717_v30 = vadd.f32 %v8716_v21, %v16607_v23  ;;  %v16716_v34 = vadd.f32 %v8777_v17, %v8715_v19  ;;  %9100 = vmatprep.mubr.bf16.mxu0 %v14514_v9  ;;  %v14537_v55 = vld [vmem:[%s15924_s15 + $0x2224] ss:$16 sps:$4 sm:$0xff]   ;;  %v14532_v21 = vld [vmem:[%s15924_s15 + $0x2020] ss:$16 sps:$4 sm:$0xff]  }
 0x272   : > { %9163 = vmatprep.mubr.bf16.mxu1 %v14523_v11  ;;  %v8718_v52 = vpop.f32.mrf.mxu0  ;;  %v14534_v11 = vld [vmem:[%s15924_s15 + $0x2024] ss:$16 sps:$4 sm:$0xff]  }
 0x273   : > { %v8781_v38 = vpop.f32.mrf.mxu1  ;;  %v8719_v10 = vadd.f32 %v8718_v52, %v16615_v28  ;;  %v16722_v46 = vadd.f32 %v8779_v22, %v8717_v30  ;;  %9181 = vmatpush1.bf16.msra.mxu0 %v14508_v33  ;;  %v14597_v28 = vld [vmem:[%s15926_s16 + $0x8c] ss:$144 sps:$4 sm:$0xff]   ;;  %v14535_v22 = vld [vmem:[%s15924_s15 + $0x2220] ss:$16 sps:$4 sm:$0xff]   ;;  %v14543_v30 = vld [vmem:[%s15924_s15 + $0x2204] ss:$16 sps:$4 sm:$0xff]  }
 0x274   : > { %9244 = vmatpush1.bf16.msra.mxu1 %v14511_v5  ;;  %v16724_v23 = vpop.f32.mrf.mxu0  ;;  %9182 = vmatprep.subr.bf16.mxu0 %v14519_v61  ;;  %v14549_v52 = vld [vmem:[%s15924_s15 + $0x23e4] ss:$16 sps:$4 sm:$0xff]  }
 0x275   : > { %v16726_v62 = vpop.f32.mrf.mxu1  ;;  %9245 = vmatprep.subr.bf16.mxu1 %v14522_v20  ;;  %v16730_v31 = vadd.f32 %v8781_v38, %v8719_v10  ;;  %v14544_v38 = vld [vmem:[%s15924_s15 + $0x21e0] ss:$16 sps:$4 sm:$0xff]  }
 0x276   : > { %v8724_v60 = vpop.f32.mrf.mxu0  ;;  %9101 = vmatmul.mubr.bf16.gmra.mxu0 %v14516_v24  ;;  %v14547_v10 = vld [vmem:[%s15924_s15 + $0x23e0] ss:$16 sps:$4 sm:$0xff]  }
 0x277   : > { %v8787_v41 = vpop.f32.mrf.mxu1  ;;  %9164 = vmatmul.mubr.bf16.gmra.mxu1 %v14525_v47  ;;  %v8725_v33 = vadd.f32 %v8724_v60, %v16625_v56  ;;  %9183 = vmatpush1.bf16.msra.mxu0 %v14517_v6  ;;  %v14546_v47 = vld [vmem:[%s15924_s15 + $0x21e4] ss:$16 sps:$4 sm:$0xff]   ;;  %v14556_v60 = vld [vmem:[%s15924_s15 + $0x21a0] ss:$16 sps:$4 sm:$0xff]  }
 0x278   : > { %9246 = vmatpush1.bf16.msra.mxu1 %v14520_v42  ;;  %v8726_v5 = vpop.f32.mrf.mxu0  ;;  %9184 = vmatprep.subr.bf16.mxu0 %v14528_v51  ;;  %v14538_v42 = vld [vmem:[%s15924_s15 + $0x2000] ss:$16 sps:$4 sm:$0xff]   ;;  %v14552_v51 = vld [vmem:[%s15924_s15 + $0x21c4] ss:$16 sps:$4 sm:$0xff]  }
 0x279   : > { %v8789_v9 = vpop.f32.mrf.mxu1  ;;  %9247 = vmatprep.subr.bf16.mxu1 %v14531_v57  ;;  %v8727_v17 = vadd.f32 %v8726_v5, %v16630_v59  ;;  %v16740_v19 = vadd.f32 %v8787_v41, %v8725_v33  ;;  %9206 = vmatprep.mubr.bf16.mxu0 %v14594_v29  ;;  %v14540_v59 = vld [vmem:[%s15924_s15 + $0x2004] ss:$16 sps:$4 sm:$0xff]   ;;  %v14559_v41 = vld [vmem:[%s15924_s15 + $0x23a0] ss:$16 sps:$4 sm:$0xff]  }
 0x27a   : > { %9269 = vmatprep.mubr.bf16.mxu1 %v14597_v28  ;;  %v8728_v56 = vpop.f32.mrf.mxu0  ;;  %v14555_v57 = vld [vmem:[%s15924_s15 + $0x23c4] ss:$16 sps:$4 sm:$0xff]  }
 0x27b   : > { %20193 = vst [vmem:[#allocation4_spill] sm:$0xff] %v16740_v19  ;;  %v8791_v24 = vpop.f32.mrf.mxu1  ;;  %v8729_v61 = vadd.f32 %v8728_v56, %v16634_v0  ;;  %v16745_v20 = vadd.f32 %v8789_v9, %v8727_v17  ;;  %9185 = vmatpush1.bf16.msra.mxu0 %v14526_v58  ;;  %v14541_v0 = vld [vmem:[%s15924_s15 + $0x2200] ss:$16 sps:$4 sm:$0xff]   ;;  %v14558_v29 = vld [vmem:[%s15924_s15 + $0x21a4] ss:$16 sps:$4 sm:$0xff]  }
 0x27c   : > { %9248 = vmatpush1.bf16.msra.mxu1 %v14529_v32  ;;  %9186 = vmatprep.subr.bf16.mxu0 %v14534_v11  ;;  %v14550_v58 = vld [vmem:[%s15924_s15 + $0x21c0] ss:$16 sps:$4 sm:$0xff]   ;;  %v14561_v28 = vld [vmem:[%s15924_s15 + $0x23a4] ss:$16 sps:$4 sm:$0xff]  }
 0x27d   : > { %20194 = vst [vmem:[#allocation5_spill] sm:$0xff] %v16745_v20  ;;  %9249 = vmatprep.subr.bf16.mxu1 %v14537_v55  ;;  %v16749_v6 = vadd.f32 %v8791_v24, %v8729_v61  ;;  %v14553_v32 = vld [vmem:[%s15924_s15 + $0x23c0] ss:$16 sps:$4 sm:$0xff]   ;;  %v14564_v33 = vld [vmem:[%s15924_s15 + $0x2184] ss:$16 sps:$4 sm:$0xff]  }
 0x27e   : > { %v14567_v5 = vld [vmem:[%s15924_s15 + $0x2384] ss:$16 sps:$4 sm:$0xff]   ;;  %v14562_v9 = vld [vmem:[%s15924_s15 + $0x2180] ss:$16 sps:$4 sm:$0xff]  }
 0x27f   : > { %20195 = vst [vmem:[#allocation6_spill] sm:$0xff] %v16749_v6  ;;  %9187 = vmatpush1.bf16.msra.mxu0 %v14532_v21  ;;  %v14565_v11 = vld [vmem:[%s15924_s15 + $0x2380] ss:$16 sps:$4 sm:$0xff]   ;;  %v14570_v55 = vld [vmem:[%s15924_s15 + $0x2164] ss:$16 sps:$4 sm:$0xff]  }
 0x280   : > { %9250 = vmatpush1.bf16.msra.mxu1 %v14535_v22  ;;  %9188 = vmatprep.subr.bf16.mxu0 %v14540_v59  ;;  %v14573_v17 = vld [vmem:[%s15924_s15 + $0x2364] ss:$16 sps:$4 sm:$0xff]   ;;  %v14568_v21 = vld [vmem:[%s15924_s15 + $0x2160] ss:$16 sps:$4 sm:$0xff]   ;;  %v14742_v6 = vld [vmem:[%s15924_s15 + $0x428] ss:$16 sps:$4 sm:$0xff]  }
 0x281   : > { %9251 = vmatprep.subr.bf16.mxu1 %v14543_v30  ;;  %v14571_v22 = vld [vmem:[%s15924_s15 + $0x2360] ss:$16 sps:$4 sm:$0xff]   ;;  %v14576_v56 = vld [vmem:[%s15924_s15 + $0x2144] ss:$16 sps:$4 sm:$0xff]  }
 0x282   : > { %v14579_v24 = vld [vmem:[%s15924_s15 + $0x2344] ss:$16 sps:$4 sm:$0xff]   ;;  %v14574_v61 = vld [vmem:[%s15924_s15 + $0x2140] ss:$16 sps:$4 sm:$0xff]  }
 0x283   : > { %9189 = vmatpush1.bf16.msra.mxu0 %v14538_v42  ;;  %v14577_v59 = vld [vmem:[%s15924_s15 + $0x2340] ss:$16 sps:$4 sm:$0xff]   ;;  %v14582_v30 = vld [vmem:[%s15924_s15 + $0x2124] ss:$16 sps:$4 sm:$0xff]  }
 0x284   : > { %9252 = vmatpush1.bf16.msra.mxu1 %v14541_v0  ;;  %9190 = vmatprep.subr.bf16.mxu0 %v14546_v47  ;;  %v14585_v42 = vld [vmem:[%s15924_s15 + $0x2324] ss:$16 sps:$4 sm:$0xff]   ;;  %v14580_v0 = vld [vmem:[%s15924_s15 + $0x2120] ss:$16 sps:$4 sm:$0xff]  }
 0x285   : > { %9253 = vmatprep.subr.bf16.mxu1 %v14549_v52  ;;  %v14583_v47 = vld [vmem:[%s15924_s15 + $0x2320] ss:$16 sps:$4 sm:$0xff]   ;;  %v14588_v52 = vld [vmem:[%s15924_s15 + $0x2104] ss:$16 sps:$4 sm:$0xff]  }
 0x286   : > { %v15486_v20 = vld [vmem:[%s15926_s16 + $0x14] ss:$144 sps:$4 sm:$0xff]  }
 0x287   : > { %9191 = vmatpush2.bf16.msra.mxu0 %v14544_v38  ;;  %v14591_v38 = vld [vmem:[%s15924_s15 + $0x2304] ss:$16 sps:$4 sm:$0xff]  }
 0x288   : > { %9254 = vmatpush2.bf16.msra.mxu1 %v14547_v10  ;;  %9192 = vmatprep.subr.bf16.mxu0 %v14552_v51  ;;  %v14586_v10 = vld [vmem:[%s15924_s15 + $0x2100] ss:$16 sps:$4 sm:$0xff]  }
 0x289   : > { %9255 = vmatprep.subr.bf16.mxu1 %v14555_v57  ;;  %v14589_v51 = vld [vmem:[%s15924_s15 + $0x2300] ss:$16 sps:$4 sm:$0xff]  }
 0x28a   : > { %v14592_v57 = vld [vmem:[%s15926_s16 + $0x80] ss:$144 sps:$4 sm:$0xff]  }
 0x28b   : > { %9193 = vmatpush2.bf16.msra.mxu0 %v14550_v58  ;;  %v14595_v58 = vld [vmem:[%s15926_s16 + $0x88] ss:$144 sps:$4 sm:$0xff]  }
 0x28c   : > { %9256 = vmatpush2.bf16.msra.mxu1 %v14553_v32  ;;  %9194 = vmatprep.subr.bf16.mxu0 %v14558_v29  ;;  %v14600_v32 = vld [vmem:[%s15924_s15 + $0xec] ss:$16 sps:$4 sm:$0xff]  }
 0x28d   : > { %9257 = vmatprep.subr.bf16.mxu1 %v14561_v28  ;;  %v14603_v29 = vld [vmem:[%s15924_s15 + $0x2ec] ss:$16 sps:$4 sm:$0xff]   ;;  %v14598_v28 = vld [vmem:[%s15924_s15 + $0xe8] ss:$16 sps:$4 sm:$0xff]  }
 0x28f   : > { %9195 = vmatpush2.bf16.msra.mxu0 %v14556_v60  ;;  %v14601_v60 = vld [vmem:[%s15924_s15 + $0x2e8] ss:$16 sps:$4 sm:$0xff]  }
 0x290   : > { %9258 = vmatpush2.bf16.msra.mxu1 %v14559_v41  ;;  %9196 = vmatprep.subr.bf16.mxu0 %v14564_v33  ;;  %v14606_v41 = vld [vmem:[%s15924_s15 + $0xcc] ss:$16 sps:$4 sm:$0xff]  }
 0x291   : > { %9259 = vmatprep.subr.bf16.mxu1 %v14567_v5  ;;  %v14609_v33 = vld [vmem:[%s15924_s15 + $0x2cc] ss:$16 sps:$4 sm:$0xff]   ;;  %v14604_v5 = vld [vmem:[%s15924_s15 + $0xc8] ss:$16 sps:$4 sm:$0xff]  }
 0x293   : > { %9197 = vmatpush2.bf16.msra.mxu0 %v14562_v9  ;;  %v14607_v9 = vld [vmem:[%s15924_s15 + $0x2c8] ss:$16 sps:$4 sm:$0xff]  }
 0x294   : > { %9260 = vmatpush2.bf16.msra.mxu1 %v14565_v11  ;;  %9198 = vmatprep.subr.bf16.mxu0 %v14570_v55  ;;  %v14610_v11 = vld [vmem:[%s15926_s16 + $0x1a4] ss:$144 sps:$4 sm:$0xff]   ;;  %v14619_v55 = vld [vmem:[%s15926_s16 + $0x1ac] ss:$144 sps:$4 sm:$0xff]  }
 0x295   : > { %9261 = vmatprep.subr.bf16.mxu1 %v14573_v17  ;;  %v14612_v17 = vld [vmem:[%s15926_s16 + $0x1a0] ss:$144 sps:$4 sm:$0xff]  }
 0x297   : > { %9199 = vmatpush2.bf16.msra.mxu0 %v14568_v21  ;;  %v14615_v21 = vld [vmem:[%s15924_s15 + $0xac] ss:$16 sps:$4 sm:$0xff]  }
 0x298   : > { %9262 = vmatpush2.bf16.msra.mxu1 %v14571_v22  ;;  %9200 = vmatprep.subr.bf16.mxu0 %v14576_v56  ;;  %v14618_v22 = vld [vmem:[%s15924_s15 + $0x2ac] ss:$16 sps:$4 sm:$0xff]   ;;  %v14613_v56 = vld [vmem:[%s15924_s15 + $0xa8] ss:$16 sps:$4 sm:$0xff]  }
 0x299   : > { %9263 = vmatprep.subr.bf16.mxu1 %v14579_v24  ;;  %v14616_v24 = vld [vmem:[%s15924_s15 + $0x2a8] ss:$16 sps:$4 sm:$0xff]  }
 0x29b   : > { %9201 = vmatpush2.bf16.msra.mxu0 %v14574_v61  ;;  %v14621_v61 = vld [vmem:[%s15926_s16 + $0x1a8] ss:$144 sps:$4 sm:$0xff]  }
 0x29c   : > { %9264 = vmatpush2.bf16.msra.mxu1 %v14577_v59  ;;  %9202 = vmatprep.subr.bf16.mxu0 %v14582_v30  ;;  %v14624_v59 = vld [vmem:[%s15924_s15 + $0x8c] ss:$16 sps:$4 sm:$0xff]  }
 0x29d   : > { %9265 = vmatprep.subr.bf16.mxu1 %v14585_v42  ;;  %v14627_v30 = vld [vmem:[%s15924_s15 + $0x28c] ss:$16 sps:$4 sm:$0xff]   ;;  %v14622_v42 = vld [vmem:[%s15924_s15 + $0x88] ss:$16 sps:$4 sm:$0xff]  }
 0x29f   : > { %9203 = vmatpush2.bf16.msra.mxu0 %v14580_v0  ;;  %v14625_v0 = vld [vmem:[%s15924_s15 + $0x288] ss:$16 sps:$4 sm:$0xff]  }
 0x2a0   : > { %9266 = vmatpush2.bf16.msra.mxu1 %v14583_v47  ;;  %9204 = vmatprep.subr.bf16.mxu0 %v14588_v52  ;;  %v14628_v47 = vld [vmem:[%s15926_s16 + $0x2c4] ss:$144 sps:$4 sm:$0xff]   ;;  %v14637_v52 = vld [vmem:[%s15926_s16 + $0x2cc] ss:$144 sps:$4 sm:$0xff]  }
 0x2a1   : > { %9267 = vmatprep.subr.bf16.mxu1 %v14591_v38  ;;  %v14630_v38 = vld [vmem:[%s15926_s16 + $0x2c0] ss:$144 sps:$4 sm:$0xff]  }
 0x2a3   : > { %9205 = vmatpush2.bf16.msra.mxu0 %v14586_v10  ;;  %v14633_v10 = vld [vmem:[%s15924_s15 + $0x6c] ss:$16 sps:$4 sm:$0xff]  }
 0x2a4   : > { %9268 = vmatpush2.bf16.msra.mxu1 %v14589_v51  ;;  %9300 = vmatprep.subr.bf16.mxu0 %v14600_v32  ;;  %v14636_v51 = vld [vmem:[%s15924_s15 + $0x26c] ss:$16 sps:$4 sm:$0xff]   ;;  %v14639_v32 = vld [vmem:[%s15926_s16 + $0x2c8] ss:$144 sps:$4 sm:$0xff]  }
 0x2a5   : > { %9363 = vmatprep.subr.bf16.mxu1 %v14603_v29  ;;  %v14642_v29 = vld [vmem:[%s15924_s15 + $0x4c] ss:$16 sps:$4 sm:$0xff]  }
 0x2a6   : > { %9207 = vmatmul.mubr.bf16.vlgmr.msra.gmra.mxu0 %v14592_v57  ;;  %v14631_v57 = vld [vmem:[%s15924_s15 + $0x68] ss:$16 sps:$4 sm:$0xff]  }
 0x2a7   : > { %9270 = vmatmul.mubr.bf16.vlgmr.msra.gmra.mxu1 %v14595_v58  ;;  %9301 = vmatpush1.bf16.msra.mxu0 %v14598_v28  ;;  %v14634_v58 = vld [vmem:[%s15924_s15 + $0x268] ss:$16 sps:$4 sm:$0xff]   ;;  %v14645_v28 = vld [vmem:[%s15924_s15 + $0x24c] ss:$16 sps:$4 sm:$0xff]  }
 0x2a8   : > { %9364 = vmatpush1.bf16.msra.mxu1 %v14601_v60  ;;  %9302 = vmatprep.subr.bf16.mxu0 %v14606_v41  ;;  %v14640_v60 = vld [vmem:[%s15924_s15 + $0x48] ss:$16 sps:$4 sm:$0xff]  }
 0x2a9   : > { %9365 = vmatprep.subr.bf16.mxu1 %v14609_v33  ;;  %9216 = vmatprep.mubr.bf16.mxu0 %v14610_v11  ;;  %v14643_v41 = vld [vmem:[%s15924_s15 + $0x248] ss:$16 sps:$4 sm:$0xff]   ;;  %v14648_v33 = vld [vmem:[%s15924_s15 + $0x2c] ss:$16 sps:$4 sm:$0xff]  }
 0x2aa   : > { %9279 = vmatprep.mubr.bf16.mxu1 %v14619_v55  ;;  %v14649_v11 = vld [vmem:[%s15924_s15 + $0x228] ss:$16 sps:$4 sm:$0xff]   ;;  %v15474_v55 = vld [vmem:[%s15926_s16 + $0x4] ss:$144 sps:$4 sm:$0xff]  }
 0x2ab   : > { %9303 = vmatpush1.bf16.msra.mxu0 %v14604_v5  ;;  %v14651_v5 = vld [vmem:[%s15924_s15 + $0x22c] ss:$16 sps:$4 sm:$0xff]  }
 0x2ac   : > { %9366 = vmatpush1.bf16.msra.mxu1 %v14607_v9  ;;  %9304 = vmatprep.subr.bf16.mxu0 %v14615_v21  ;;  %v14646_v9 = vld [vmem:[%s15924_s15 + $0x28] ss:$16 sps:$4 sm:$0xff]   ;;  %v14654_v21 = vld [vmem:[%s15924_s15 + $0xc] ss:$16 sps:$4 sm:$0xff]  }
 0x2ad   : > { %9367 = vmatprep.subr.bf16.mxu1 %v14618_v22  ;;  %v14657_v22 = vld [vmem:[%s15924_s15 + $0x20c] ss:$16 sps:$4 sm:$0xff]  }
 0x2ae   : > { %9217 = vmatmul.mubr.bf16.gmra.mxu0 %v14612_v17  ;;  %v15475_v17 = vld [vmem:[%s15926_s16 + $0xc] ss:$144 sps:$4 sm:$0xff]  }
 0x2af   : > { %9280 = vmatmul.mubr.bf16.gmra.mxu1 %v14621_v61  ;;  %9305 = vmatpush1.bf16.msra.mxu0 %v14613_v56  ;;  %v14652_v56 = vld [vmem:[%s15924_s15 + $0x8] ss:$16 sps:$4 sm:$0xff]   ;;  %v14660_v61 = vld [vmem:[%s15924_s15 + $0x1ec] ss:$16 sps:$4 sm:$0xff]  }
 0x2b0   : > { %9368 = vmatpush1.bf16.msra.mxu1 %v14616_v24  ;;  %9306 = vmatprep.subr.bf16.mxu0 %v14624_v59  ;;  %v14655_v24 = vld [vmem:[%s15924_s15 + $0x208] ss:$16 sps:$4 sm:$0xff]   ;;  %v14663_v59 = vld [vmem:[%s15924_s15 + $0x3ec] ss:$16 sps:$4 sm:$0xff]  }
 0x2b1   : > { %9369 = vmatprep.subr.bf16.mxu1 %v14627_v30  ;;  %9226 = vmatprep.mubr.bf16.mxu0 %v14628_v47  ;;  %v14658_v30 = vld [vmem:[%s15924_s15 + $0x1e8] ss:$16 sps:$4 sm:$0xff]   ;;  %v14669_v47 = vld [vmem:[%s15924_s15 + $0x3cc] ss:$16 sps:$4 sm:$0xff]  }
 0x2b2   : > { %9289 = vmatprep.mubr.bf16.mxu1 %v14637_v52  ;;  %v14664_v52 = vld [vmem:[%s15924_s15 + $0x1c8] ss:$16 sps:$4 sm:$0xff]  }
 0x2b3   : > { %9307 = vmatpush1.bf16.msra.mxu0 %v14622_v42  ;;  %v14661_v42 = vld [vmem:[%s15924_s15 + $0x3e8] ss:$16 sps:$4 sm:$0xff]  }
 0x2b4   : > { %9370 = vmatpush1.bf16.msra.mxu1 %v14625_v0  ;;  %9308 = vmatprep.subr.bf16.mxu0 %v14633_v10  ;;  %v14666_v0 = vld [vmem:[%s15924_s15 + $0x1cc] ss:$16 sps:$4 sm:$0xff]  }
 0x2b5   : > { %9371 = vmatprep.subr.bf16.mxu1 %v14636_v51  ;;  %v14672_v10 = vld [vmem:[%s15924_s15 + $0x1ac] ss:$16 sps:$4 sm:$0xff]  }
 0x2b6   : > { %9227 = vmatmul.mubr.bf16.gmra.mxu0 %v14630_v38  ;;  %v14667_v38 = vld [vmem:[%s15924_s15 + $0x3c8] ss:$16 sps:$4 sm:$0xff]   ;;  %v14675_v51 = vld [vmem:[%s15924_s15 + $0x3ac] ss:$16 sps:$4 sm:$0xff]  }
 0x2b7   : > { %9290 = vmatmul.mubr.bf16.gmra.mxu1 %v14639_v32  ;;  %9309 = vmatpush1.bf16.msra.mxu0 %v14631_v57  ;;  %v14670_v57 = vld [vmem:[%s15924_s15 + $0x1a8] ss:$16 sps:$4 sm:$0xff]   ;;  %v14678_v32 = vld [vmem:[%s15924_s15 + $0x18c] ss:$16 sps:$4 sm:$0xff]  }
 0x2b8   : > { %9372 = vmatpush1.bf16.msra.mxu1 %v14634_v58  ;;  %9310 = vmatprep.subr.bf16.mxu0 %v14642_v29  ;;  %v14673_v58 = vld [vmem:[%s15924_s15 + $0x3a8] ss:$16 sps:$4 sm:$0xff]   ;;  %v14681_v29 = vld [vmem:[%s15924_s15 + $0x38c] ss:$16 sps:$4 sm:$0xff]  }
 0x2b9   : > { %9373 = vmatprep.subr.bf16.mxu1 %v14645_v28  ;;  %9332 = vmatprep.mubr.bf16.mxu0 %v15474_v55  ;;  %v14676_v28 = vld [vmem:[%s15924_s15 + $0x188] ss:$16 sps:$4 sm:$0xff]   ;;  %v14693_v55 = vld [vmem:[%s15924_s15 + $0x34c] ss:$16 sps:$4 sm:$0xff]  }
 0x2ba   : > { %9395 = vmatprep.mubr.bf16.mxu1 %v15475_v17  ;;  %v14688_v17 = vld [vmem:[%s15924_s15 + $0x148] ss:$16 sps:$4 sm:$0xff]  }
 0x2bb   : > { %9311 = vmatpush1.bf16.msra.mxu0 %v14640_v60  ;;  %v14679_v60 = vld [vmem:[%s15924_s15 + $0x388] ss:$16 sps:$4 sm:$0xff]  }
 0x2bc   : > { %9374 = vmatpush1.bf16.msra.mxu1 %v14643_v41  ;;  %9312 = vmatprep.subr.bf16.mxu0 %v14648_v33  ;;  %v14684_v41 = vld [vmem:[%s15924_s15 + $0x16c] ss:$16 sps:$4 sm:$0xff]  }
 0x2bd   : > { %9375 = vmatprep.subr.bf16.mxu1 %v14651_v5  ;;  %v14687_v33 = vld [vmem:[%s15924_s15 + $0x36c] ss:$16 sps:$4 sm:$0xff]   ;;  %v14682_v5 = vld [vmem:[%s15924_s15 + $0x168] ss:$16 sps:$4 sm:$0xff]  }
 0x2bf   : > { %9313 = vmatpush1.bf16.msra.mxu0 %v14646_v9  ;;  %v14685_v9 = vld [vmem:[%s15924_s15 + $0x368] ss:$16 sps:$4 sm:$0xff]  }
 0x2c0   : > { %9376 = vmatpush1.bf16.msra.mxu1 %v14649_v11  ;;  %9314 = vmatprep.subr.bf16.mxu0 %v14654_v21  ;;  %v14690_v11 = vld [vmem:[%s15924_s15 + $0x14c] ss:$16 sps:$4 sm:$0xff]   ;;  %v14691_v21 = vld [vmem:[%s15924_s15 + $0x348] ss:$16 sps:$4 sm:$0xff]  }
 0x2c1   : > { %9377 = vmatprep.subr.bf16.mxu1 %v14657_v22  ;;  %v14696_v22 = vld [vmem:[%s15924_s15 + $0x12c] ss:$16 sps:$4 sm:$0xff]  }
 0x2c3   : > { %9315 = vmatpush1.bf16.msra.mxu0 %v14652_v56  ;;  %v14699_v56 = vld [vmem:[%s15924_s15 + $0x32c] ss:$16 sps:$4 sm:$0xff]  }
 0x2c4   : > { %9378 = vmatpush1.bf16.msra.mxu1 %v14655_v24  ;;  %9316 = vmatprep.subr.bf16.mxu0 %v14660_v61  ;;  %v16855_v24 = vpop.f32.mrf.mxu0  ;;  %v14694_v61 = vld [vmem:[%s15924_s15 + $0x128] ss:$16 sps:$4 sm:$0xff]  }
 0x2c5   : > { %9379 = vmatprep.subr.bf16.mxu1 %v14663_v59  ;;  %v14697_v59 = vld [vmem:[%s15924_s15 + $0x328] ss:$16 sps:$4 sm:$0xff]  }
 0x2c7   : > { %9317 = vmatpush2.bf16.msra.mxu0 %v14658_v30  ;;  %v16859_v30 = vpop.f32.mrf.mxu0 }
 0x2c8   : > { %9380 = vmatpush2.bf16.msra.mxu1 %v14661_v42  ;;  %9318 = vmatprep.subr.bf16.mxu0 %v14666_v0  ;;  %v14702_v42 = vld [vmem:[%s15924_s15 + $0x10c] ss:$16 sps:$4 sm:$0xff]  }
 0x2c9   : > { %9381 = vmatprep.subr.bf16.mxu1 %v14669_v47  ;;  %v14705_v0 = vld [vmem:[%s15924_s15 + $0x30c] ss:$16 sps:$4 sm:$0xff]   ;;  %v14700_v47 = vld [vmem:[%s15924_s15 + $0x108] ss:$16 sps:$4 sm:$0xff]  }
 0x2cb   : > { %9319 = vmatpush2.bf16.msra.mxu0 %v14664_v52  ;;  %v14703_v52 = vld [vmem:[%s15924_s15 + $0x308] ss:$16 sps:$4 sm:$0xff]  }
 0x2cc   : > { %9382 = vmatpush2.bf16.msra.mxu1 %v14667_v38  ;;  %9320 = vmatprep.subr.bf16.mxu0 %v14672_v10  ;;  %v16865_v38 = vpop.f32.mrf.mxu1  ;;  %v16867_v10 = vpop.f32.mrf.mxu0 }
 0x2cd   : > { %9383 = vmatprep.subr.bf16.mxu1 %v14675_v51  ;;  %v14708_v51 = vld [vmem:[%s15924_s15 + $0x4ec] ss:$16 sps:$4 sm:$0xff]  }
 0x2cf   : > { %9321 = vmatpush2.bf16.msra.mxu0 %v14670_v57  ;;  %v14711_v57 = vld [vmem:[%s15924_s15 + $0x6ec] ss:$16 sps:$4 sm:$0xff]  }
 0x2d0   : > { %9384 = vmatpush2.bf16.msra.mxu1 %v14673_v58  ;;  %9322 = vmatprep.subr.bf16.mxu0 %v14678_v32  ;;  %v14706_v58 = vld [vmem:[%s15924_s15 + $0x4e8] ss:$16 sps:$4 sm:$0xff]  }
 0x2d1   : > { %9385 = vmatprep.subr.bf16.mxu1 %v14681_v29  ;;  %v14709_v32 = vld [vmem:[%s15924_s15 + $0x6e8] ss:$16 sps:$4 sm:$0xff]   ;;  %v16873_v29 = vpop.f32.mrf.mxu1 }
 0x2d3   : > { %9323 = vmatpush2.bf16.msra.mxu0 %v14676_v28  ;;  %v16875_v28 = vpop.f32.mrf.mxu0 }
 0x2d4   : > { %9386 = vmatpush2.bf16.msra.mxu1 %v14679_v60  ;;  %9324 = vmatprep.subr.bf16.mxu0 %v14684_v41  ;;  %v14714_v60 = vld [vmem:[%s15924_s15 + $0x4cc] ss:$16 sps:$4 sm:$0xff]  }
 0x2d5   : > { %9387 = vmatprep.subr.bf16.mxu1 %v14687_v33  ;;  %v14717_v41 = vld [vmem:[%s15924_s15 + $0x6cc] ss:$16 sps:$4 sm:$0xff]   ;;  %v14712_v33 = vld [vmem:[%s15924_s15 + $0x4c8] ss:$16 sps:$4 sm:$0xff]  }
 0x2d7   : > { %9325 = vmatpush2.bf16.msra.mxu0 %v14682_v5  ;;  %v16880_v5 = vpop.f32.mrf.mxu1 }
 0x2d8   : > { %9388 = vmatpush2.bf16.msra.mxu1 %v14685_v9  ;;  %9326 = vmatprep.subr.bf16.mxu0 %v14690_v11  ;;  %v15476_v9 = vld [vmem:[%s15926_s16] ss:$144 sps:$4 sm:$0xff]   ;;  %v15477_v11 = vld [vmem:[%s15926_s16 + $0x8] ss:$144 sps:$4 sm:$0xff]  }
 0x2d9   : > { %9389 = vmatprep.subr.bf16.mxu1 %v14693_v55  ;;  %v14715_v55 = vld [vmem:[%s15924_s15 + $0x6c8] ss:$16 sps:$4 sm:$0xff]  }
 0x2db   : > { %9327 = vmatpush2.bf16.msra.mxu0 %v14688_v17  ;;  %v16885_v17 = vpop.f32.mrf.mxu0 }
 0x2dc   : > { %9390 = vmatpush2.bf16.msra.mxu1 %v14691_v21  ;;  %9328 = vmatprep.subr.bf16.mxu0 %v14696_v22  ;;  %v14720_v21 = vld [vmem:[%s15924_s15 + $0x4ac] ss:$16 sps:$4 sm:$0xff]  }
 0x2dd   : > { %9391 = vmatprep.subr.bf16.mxu1 %v14699_v56  ;;  %v14723_v22 = vld [vmem:[%s15924_s15 + $0x6ac] ss:$16 sps:$4 sm:$0xff]   ;;  %v14718_v56 = vld [vmem:[%s15924_s15 + $0x4a8] ss:$16 sps:$4 sm:$0xff]  }
 0x2df   : > { %9329 = vmatpush2.bf16.msra.mxu0 %v14694_v61  ;;  %v14721_v61 = vld [vmem:[%s15924_s15 + $0x6a8] ss:$16 sps:$4 sm:$0xff]  }
 0x2e0   : > { %9392 = vmatpush2.bf16.msra.mxu1 %v14697_v59  ;;  %9330 = vmatprep.subr.bf16.mxu0 %v14702_v42  ;;  %v15478_v59 = vld [vmem:[%s15926_s16 + $0x124] ss:$144 sps:$4 sm:$0xff]   ;;  %v15479_v42 = vld [vmem:[%s15926_s16 + $0x12c] ss:$144 sps:$4 sm:$0xff]  }
 0x2e1   : > { %9393 = vmatprep.subr.bf16.mxu1 %v14705_v0  ;;  %v16893_v0 = vpop.f32.mrf.mxu1 }
 0x2e3   : > { %9331 = vmatpush2.bf16.msra.mxu0 %v14700_v47  ;;  %v16895_v47 = vpop.f32.mrf.mxu0 }
 0x2e4   : > { %9394 = vmatpush2.bf16.msra.mxu1 %v14703_v52  ;;  %9426 = vmatprep.subr.bf16.mxu0 %v14708_v51  ;;  %v14726_v52 = vld [vmem:[%s15924_s15 + $0x48c] ss:$16 sps:$4 sm:$0xff]  }
 0x2e5   : > { %9489 = vmatprep.subr.bf16.mxu1 %v14711_v57  ;;  %v14729_v51 = vld [vmem:[%s15924_s15 + $0x68c] ss:$16 sps:$4 sm:$0xff]   ;;  %v14724_v57 = vld [vmem:[%s15924_s15 + $0x488] ss:$16 sps:$4 sm:$0xff]  }
 0x2e6   : > { %9333 = vmatmul.mubr.bf16.vlgmr.msra.gmra.mxu0 %v15476_v9 }
 0x2e7   : > { %9396 = vmatmul.mubr.bf16.vlgmr.msra.gmra.mxu1 %v15477_v11  ;;  %9427 = vmatpush1.bf16.msra.mxu0 %v14706_v58  ;;  %v16900_v58 = vpop.f32.mrf.mxu1  ;;  %v14732_v11 = vld [vmem:[%s15924_s15 + $0x46c] ss:$16 sps:$4 sm:$0xff]  }
 0x2e8   : > { %9490 = vmatpush1.bf16.msra.mxu1 %v14709_v32  ;;  %9428 = vmatprep.subr.bf16.mxu0 %v14714_v60  ;;  %v14727_v32 = vld [vmem:[%s15924_s15 + $0x688] ss:$16 sps:$4 sm:$0xff]   ;;  %v15480_v60 = vld [vmem:[%s15926_s16 + $0x120] ss:$144 sps:$4 sm:$0xff]  }
 0x2e9   : > { %9491 = vmatprep.subr.bf16.mxu1 %v14717_v41  ;;  %9342 = vmatprep.mubr.bf16.mxu0 %v15478_v59  ;;  %v15481_v41 = vld [vmem:[%s15926_s16 + $0x128] ss:$144 sps:$4 sm:$0xff]   ;;  %v16907_v9 = vpop.f32.mrf.mxu1  ;;  %v15483_v59 = vld [vmem:[%s15926_s16 + $0x24c] ss:$144 sps:$4 sm:$0xff]  }
 0x2ea   : > { %9405 = vmatprep.mubr.bf16.mxu1 %v15479_v42  ;;  %20196 = vst [vmem:[#allocation7_spill] sm:$0xff] %v16907_v9 }
 0x2eb   : > { %9429 = vmatpush1.bf16.msra.mxu0 %v14712_v33  ;;  %v16905_v33 = vpop.f32.mrf.mxu0  ;;  %v16917_v42 = vpop.f32.mrf.mxu1 }
 0x2ec   : > { %9492 = vmatpush1.bf16.msra.mxu1 %v14715_v55  ;;  %9430 = vmatprep.subr.bf16.mxu0 %v14720_v21  ;;  %v14735_v55 = vld [vmem:[%s15924_s15 + $0x66c] ss:$16 sps:$4 sm:$0xff]   ;;  %v14730_v21 = vld [vmem:[%s15924_s15 + $0x468] ss:$16 sps:$4 sm:$0xff]   ;;  %20197 = vst [vmem:[#allocation8_spill] sm:$0xff] %v16917_v42 }
 0x2ed   : > { %9493 = vmatprep.subr.bf16.mxu1 %v14723_v22  ;;  %v15482_v22 = vld [vmem:[%s15926_s16 + $0x244] ss:$144 sps:$4 sm:$0xff]   ;;  %v14751_v42 = vld [vmem:[%s15924_s15 + $0x608] ss:$16 sps:$4 sm:$0xff]  }
 0x2ee   : > { %9343 = vmatmul.mubr.bf16.gmra.mxu0 %v15480_v60  ;;  %v14736_v60 = vld [vmem:[%s15924_s15 + $0x448] ss:$16 sps:$4 sm:$0xff]  }
 0x2ef   : > { %9406 = vmatmul.mubr.bf16.gmra.mxu1 %v15481_v41  ;;  %9431 = vmatpush1.bf16.msra.mxu0 %v14718_v56  ;;  %v14733_v56 = vld [vmem:[%s15924_s15 + $0x668] ss:$16 sps:$4 sm:$0xff]  }
 0x2f0   : > { %9494 = vmatpush1.bf16.msra.mxu1 %v14721_v61  ;;  %9432 = vmatprep.subr.bf16.mxu0 %v14726_v52  ;;  %v16915_v61 = vpop.f32.mrf.mxu0  ;;  %v14738_v52 = vld [vmem:[%s15924_s15 + $0x44c] ss:$16 sps:$4 sm:$0xff]   ;;  %v14739_v41 = vld [vmem:[%s15924_s15 + $0x648] ss:$16 sps:$4 sm:$0xff]  }
 0x2f1   : > { %9495 = vmatprep.subr.bf16.mxu1 %v14729_v51  ;;  %9352 = vmatprep.mubr.bf16.mxu0 %v15482_v22  ;;  %v14741_v51 = vld [vmem:[%s15924_s15 + $0x64c] ss:$16 sps:$4 sm:$0xff]   ;;  %v15484_v22 = vld [vmem:[%s15926_s16 + $0x240] ss:$144 sps:$4 sm:$0xff]  }
 0x2f2   : > { %9415 = vmatprep.mubr.bf16.mxu1 %v15483_v59  ;;  %v14747_v59 = vld [vmem:[%s15924_s15 + $0x62c] ss:$16 sps:$4 sm:$0xff]  }
 0x2f3   : > { %9433 = vmatpush1.bf16.msra.mxu0 %v14724_v57  ;;  %v15485_v57 = vld [vmem:[%s15926_s16 + $0x248] ss:$144 sps:$4 sm:$0xff]  }
 0x2f4   : > { %9496 = vmatpush1.bf16.msra.mxu1 %v14727_v32  ;;  %9434 = vmatprep.subr.bf16.mxu0 %v14732_v11  ;;  %v16925_v32 = vpop.f32.mrf.mxu0  ;;  %v16927_v11 = vpop.f32.mrf.mxu1 }
 0x2f5   : > { %9497 = vmatprep.subr.bf16.mxu1 %v14735_v55  ;;  %20198 = vst [vmem:[#allocation9_spill] sm:$0xff] %v16925_v32  ;;  %20199 = vst [vmem:[#allocation10_spill] sm:$0xff] %v16927_v11  ;;  %v14744_v55 = vld [vmem:[%s15924_s15 + $0x42c] ss:$16 sps:$4 sm:$0xff]   ;;  %v14748_v11 = vld [vmem:[%s15924_s15 + $0x408] ss:$16 sps:$4 sm:$0xff]  }
 0x2f6   : > { %9353 = vmatmul.mubr.bf16.gmra.mxu0 %v15484_v22  ;;  %v15487_v22 = vld [vmem:[%s15926_s16 + $0x1c] ss:$144 sps:$4 sm:$0xff]  }
 0x2f7   : > { %9416 = vmatmul.mubr.bf16.gmra.mxu1 %v15485_v57  ;;  %9435 = vmatpush1.bf16.msra.mxu0 %v14730_v21  ;;  %v14745_v57 = vld [vmem:[%s15924_s15 + $0x628] ss:$16 sps:$4 sm:$0xff]   ;;  %v16935_v21 = vpop.f32.mrf.mxu0  ;;  %v15491_v32 = vld [vmem:[%s15926_s16 + $0x13c] ss:$144 sps:$4 sm:$0xff]  }
 0x2f8   : > { %9498 = vmatpush1.bf16.msra.mxu1 %v14733_v56  ;;  %9436 = vmatprep.subr.bf16.mxu0 %v14738_v52  ;;  %20200 = vst [vmem:[#allocation11_spill] sm:$0xff] %v16935_v21  ;;  %v16937_v56 = vpop.f32.mrf.mxu1  ;;  %v14750_v52 = vld [vmem:[%s15924_s15 + $0x40c] ss:$16 sps:$4 sm:$0xff]  }
 0x2f9   : > { %9499 = vmatprep.subr.bf16.mxu1 %v14741_v51  ;;  %9458 = vmatprep.mubr.bf16.mxu0 %v15486_v20  ;;  %20201 = vst [vmem:[#allocation12_spill] sm:$0xff] %v16937_v56  ;;  %v14753_v51 = vld [vmem:[%s15924_s15 + $0x60c] ss:$16 sps:$4 sm:$0xff]   ;;  %v16943_v20 = vpop.f32.mrf.mxu0 }
 0x2fa   : > { %9521 = vmatprep.mubr.bf16.mxu1 %v15487_v22  ;;  %20202 = vst [vmem:[#allocation13_spill] sm:$0xff] %v16943_v20  ;;  %v14757_v22 = vld [vmem:[%s15924_s15 + $0x7e8] ss:$16 sps:$4 sm:$0xff]   ;;  %v14780_v20 = vld [vmem:[%s15924_s15 + $0x56c] ss:$16 sps:$4 sm:$0xff]  }
 0x2fb   : > { %9437 = vmatpush1.bf16.msra.mxu0 %v14736_v60  ;;  %v16945_v60 = vpop.f32.mrf.mxu1 }
 0x2fc   : > { %9500 = vmatpush1.bf16.msra.mxu1 %v14739_v41  ;;  %9438 = vmatprep.subr.bf16.mxu0 %v14744_v55  ;;  %20203 = vst [vmem:[#allocation14_spill] sm:$0xff] %v16945_v60  ;;  %v14756_v41 = vld [vmem:[%s15924_s15 + $0x5ec] ss:$16 sps:$4 sm:$0xff]  }
 0x2fd   : > { %9501 = vmatprep.subr.bf16.mxu1 %v14747_v59  ;;  %v14759_v55 = vld [vmem:[%s15924_s15 + $0x7ec] ss:$16 sps:$4 sm:$0xff]   ;;  %v14754_v59 = vld [vmem:[%s15924_s15 + $0x5e8] ss:$16 sps:$4 sm:$0xff]  }
 0x2fe   : > { %v14762_v60 = vld [vmem:[%s15924_s15 + $0x5cc] ss:$16 sps:$4 sm:$0xff]  }
 0x2ff   : > { %9439 = vmatpush1.bf16.msra.mxu0 %v14742_v6  ;;  %v16951_v6 = vpop.f32.mrf.mxu0 }
 0x300   : > { %9502 = vmatpush1.bf16.msra.mxu1 %v14745_v57  ;;  %9440 = vmatprep.subr.bf16.mxu0 %v14750_v52  ;;  %20204 = vst [vmem:[#allocation15_spill] sm:$0xff] %v16951_v6  ;;  %v16953_v57 = vpop.f32.mrf.mxu1  ;;  %v14765_v52 = vld [vmem:[%s15924_s15 + $0x7cc] ss:$16 sps:$4 sm:$0xff]  }
 0x301   : > { %9503 = vmatprep.subr.bf16.mxu1 %v14753_v51  ;;  %20205 = vst [vmem:[#allocation16_spill] sm:$0xff] %v16953_v57  ;;  %v14760_v51 = vld [vmem:[%s15924_s15 + $0x5c8] ss:$16 sps:$4 sm:$0xff]   ;;  %v14768_v6 = vld [vmem:[%s15924_s15 + $0x5ac] ss:$16 sps:$4 sm:$0xff]  }
 0x302   : > { %v16961_v56 = vpop.f32.mrf.mxu1 }
 0x303   : > { %9441 = vmatpush1.bf16.msra.mxu0 %v14748_v11  ;;  %v14763_v11 = vld [vmem:[%s15924_s15 + $0x7c8] ss:$16 sps:$4 sm:$0xff]   ;;  %20207 = vst [vmem:[#allocation18_spill] sm:$0xff] %v16961_v56 }
 0x304   : > { %9504 = vmatpush1.bf16.msra.mxu1 %v14751_v42  ;;  %9442 = vmatprep.subr.bf16.mxu0 %v14756_v41  ;;  %v16959_v42 = vpop.f32.mrf.mxu0  ;;  %v14771_v41 = vld [vmem:[%s15924_s15 + $0x7ac] ss:$16 sps:$4 sm:$0xff]   ;;  %v16969_v57 = vpop.f32.mrf.mxu1 }
 0x305   : > { %9505 = vmatprep.subr.bf16.mxu1 %v14759_v55  ;;  %20206 = vst [vmem:[#allocation17_spill] sm:$0xff] %v16959_v42  ;;  %20208 = vst [vmem:[#allocation19_spill] sm:$0xff] %v16969_v57  ;;  %v14774_v42 = vld [vmem:[%s15924_s15 + $0x58c] ss:$16 sps:$4 sm:$0xff]  }
 0x306   : > { %v16965_v55 = vpop.f32.mrf.mxu0 }
 0x307   : > { %9443 = vmatpush2.bf16.msra.mxu0 %v14754_v59  ;;  %v14766_v59 = vld [vmem:[%s15924_s15 + $0x5a8] ss:$16 sps:$4 sm:$0xff]  }
 0x308   : > { %9506 = vmatpush2.bf16.msra.mxu1 %v14757_v22  ;;  %9444 = vmatprep.subr.bf16.mxu0 %v14762_v60  ;;  %v14769_v22 = vld [vmem:[%s15924_s15 + $0x7a8] ss:$16 sps:$4 sm:$0xff]   ;;  %v14777_v60 = vld [vmem:[%s15924_s15 + $0x78c] ss:$16 sps:$4 sm:$0xff]   ;;  %v16975_v56 = vpop.f32.mrf.mxu0 }
 0x309   : > { %9507 = vmatprep.subr.bf16.mxu1 %v14765_v52  ;;  %v16973_v52 = vpop.f32.mrf.mxu1 }
 0x30a   : > { %20209 = vst [vmem:[#allocation20_spill] sm:$0xff] %v16973_v52  ;;  %v16983_v57 = vpop.f32.mrf.mxu0  ;;  %v14781_v52 = vld [vmem:[%s15924_s15 + $0x768] ss:$16 sps:$4 sm:$0xff]  }
 0x30b   : > { %9445 = vmatpush2.bf16.msra.mxu0 %v14760_v51  ;;  %v14772_v51 = vld [vmem:[%s15924_s15 + $0x588] ss:$16 sps:$4 sm:$0xff]   ;;  %20211 = vst [vmem:[#allocation22_spill] sm:$0xff] %v16983_v57  ;;  %v15488_v57 = vld [vmem:[%s15926_s16 + $0x10] ss:$144 sps:$4 sm:$0xff]  }
 0x30c   : > { %9508 = vmatpush2.bf16.msra.mxu1 %v14763_v11  ;;  %9446 = vmatprep.subr.bf16.mxu0 %v14768_v6  ;;  %v14775_v11 = vld [vmem:[%s15924_s15 + $0x788] ss:$16 sps:$4 sm:$0xff]   ;;  %v14783_v6 = vld [vmem:[%s15924_s15 + $0x76c] ss:$16 sps:$4 sm:$0xff]   ;;  %v16991_v21 = vpop.f32.mrf.mxu0 }
 0x30d   : > { %9509 = vmatprep.subr.bf16.mxu1 %v14771_v41  ;;  %v16981_v41 = vpop.f32.mrf.mxu1  ;;  %20213 = vst [vmem:[#allocation24_spill] sm:$0xff] %v16991_v21 }
 0x30e   : > { %20210 = vst [vmem:[#allocation21_spill] sm:$0xff] %v16981_v41  ;;  %v14784_v41 = vld [vmem:[%s15924_s15 + $0x548] ss:$16 sps:$4 sm:$0xff]   ;;  %v16999_v19 = vpop.f32.mrf.mxu0 }
 0x30f   : > { %9447 = vmatpush2.bf16.msra.mxu0 %v14766_v59  ;;  %v14778_v59 = vld [vmem:[%s15924_s15 + $0x568] ss:$16 sps:$4 sm:$0xff]   ;;  %20215 = vst [vmem:[#allocation26_spill] sm:$0xff] %v16999_v19 }
 0x310   : > { %9510 = vmatpush2.bf16.msra.mxu1 %v14769_v22  ;;  %9448 = vmatprep.subr.bf16.mxu0 %v14774_v42  ;;  %v14786_v22 = vld [vmem:[%s15924_s15 + $0x54c] ss:$16 sps:$4 sm:$0xff]   ;;  %v17007_v21 = vpop.f32.mrf.mxu0  ;;  %v14805_v19 = vld [vmem:[%s15924_s15 + $0xae8] ss:$16 sps:$4 sm:$0xff]  }
 0x311   : > { %9511 = vmatprep.subr.bf16.mxu1 %v14777_v60  ;;  %v14789_v42 = vld [vmem:[%s15924_s15 + $0x74c] ss:$16 sps:$4 sm:$0xff]   ;;  %v16989_v60 = vpop.f32.mrf.mxu1  ;;  %20217 = vst [vmem:[#allocation28_spill] sm:$0xff] %v17007_v21 }
 0x312   : > { %20212 = vst [vmem:[#allocation23_spill] sm:$0xff] %v16989_v60  ;;  %v14790_v60 = vld [vmem:[%s15924_s15 + $0x528] ss:$16 sps:$4 sm:$0xff]   ;;  %v17017_v9 = vpop.f32.mrf.mxu0 }
 0x313   : > { %9449 = vmatpush2.bf16.msra.mxu0 %v14772_v51  ;;  %v14787_v51 = vld [vmem:[%s15924_s15 + $0x748] ss:$16 sps:$4 sm:$0xff]   ;;  %20219 = vst [vmem:[#allocation30_spill] sm:$0xff] %v17017_v9 }
 0x314   : > { %9512 = vmatpush2.bf16.msra.mxu1 %v14775_v11  ;;  %9450 = vmatprep.subr.bf16.mxu0 %v14780_v20  ;;  %v14792_v11 = vld [vmem:[%s15924_s15 + $0x52c] ss:$16 sps:$4 sm:$0xff]   ;;  %v17025_v21 = vpop.f32.mrf.mxu0  ;;  %v14817_v9 = vld [vmem:[%s15924_s15 + $0xaa8] ss:$16 sps:$4 sm:$0xff]  }
 0x315   : > { %9513 = vmatprep.subr.bf16.mxu1 %v14783_v6  ;;  %v14795_v20 = vld [vmem:[%s15924_s15 + $0x72c] ss:$16 sps:$4 sm:$0xff]   ;;  %v16997_v6 = vpop.f32.mrf.mxu1  ;;  %20221 = vst [vmem:[#allocation32_spill] sm:$0xff] %v17025_v21  ;;  %v14814_v21 = vld [vmem:[%s15924_s15 + $0x8a8] ss:$16 sps:$4 sm:$0xff]  }
 0x316   : > { %20214 = vst [vmem:[#allocation25_spill] sm:$0xff] %v16997_v6  ;;  %v14796_v6 = vld [vmem:[%s15924_s15 + $0x508] ss:$16 sps:$4 sm:$0xff]  }
 0x317   : > { %9451 = vmatpush2.bf16.msra.mxu0 %v14778_v59  ;;  %v17003_v59 = vpop.f32.mrf.mxu1 }
 0x318   : > { %9514 = vmatpush2.bf16.msra.mxu1 %v14781_v52  ;;  %9452 = vmatprep.subr.bf16.mxu0 %v14786_v22  ;;  %v14793_v52 = vld [vmem:[%s15924_s15 + $0x728] ss:$16 sps:$4 sm:$0xff]   ;;  %20216 = vst [vmem:[#allocation27_spill] sm:$0xff] %v17003_v59  ;;  %v14798_v22 = vld [vmem:[%s15924_s15 + $0x50c] ss:$16 sps:$4 sm:$0xff]  }
 0x319   : > { %9515 = vmatprep.subr.bf16.mxu1 %v14789_v42  ;;  %v14801_v42 = vld [vmem:[%s15924_s15 + $0x70c] ss:$16 sps:$4 sm:$0xff]  }
 0x31a   : > { %v14804_v59 = vld [vmem:[%s15924_s15 + $0x8ec] ss:$16 sps:$4 sm:$0xff]  }
 0x31b   : > { %9453 = vmatpush2.bf16.msra.mxu0 %v14784_v41  ;;  %v14799_v41 = vld [vmem:[%s15924_s15 + $0x708] ss:$16 sps:$4 sm:$0xff]  }
 0x31c   : > { %9516 = vmatpush2.bf16.msra.mxu1 %v14787_v51  ;;  %9454 = vmatprep.subr.bf16.mxu0 %v14792_v11  ;;  %v17011_v51 = vpop.f32.mrf.mxu1  ;;  %v14807_v11 = vld [vmem:[%s15924_s15 + $0xaec] ss:$16 sps:$4 sm:$0xff]  }
 0x31d   : > { %9517 = vmatprep.subr.bf16.mxu1 %v14795_v20  ;;  %20218 = vst [vmem:[#allocation29_spill] sm:$0xff] %v17011_v51  ;;  %v14802_v20 = vld [vmem:[%s15924_s15 + $0x8e8] ss:$16 sps:$4 sm:$0xff]  }
 0x31e   : > { %v14811_v51 = vld [vmem:[%s15924_s15 + $0xac8] ss:$16 sps:$4 sm:$0xff]  }
 0x31f   : > { %9455 = vmatpush2.bf16.msra.mxu0 %v14790_v60  ;;  %v17019_v60 = vpop.f32.mrf.mxu1 }
 0x320   : > { %9518 = vmatpush2.bf16.msra.mxu1 %v14793_v52  ;;  %9456 = vmatprep.subr.bf16.mxu0 %v14798_v22  ;;  %20220 = vst [vmem:[#allocation31_spill] sm:$0xff] %v17019_v60  ;;  %v14810_v52 = vld [vmem:[%s15924_s15 + $0x8cc] ss:$16 sps:$4 sm:$0xff]   ;;  %v15490_v60 = vld [vmem:[%s15926_s16 + $0x134] ss:$144 sps:$4 sm:$0xff]  }
 0x321   : > { %9519 = vmatprep.subr.bf16.mxu1 %v14801_v42  ;;  %v14813_v22 = vld [vmem:[%s15924_s15 + $0xacc] ss:$16 sps:$4 sm:$0xff]   ;;  %v14808_v42 = vld [vmem:[%s15924_s15 + $0x8c8] ss:$16 sps:$4 sm:$0xff]  }
 0x323   : > { %9457 = vmatpush2.bf16.msra.mxu0 %v14796_v6  ;;  %v15489_v6 = vld [vmem:[%s15926_s16 + $0x18] ss:$144 sps:$4 sm:$0xff]  }
 0x324   : > { %9520 = vmatpush2.bf16.msra.mxu1 %v14799_v41  ;;  %9552 = vmatprep.subr.bf16.mxu0 %v14804_v59  ;;  %v17029_v59 = vpop.f32.mrf.mxu1  ;;  %v14816_v41 = vld [vmem:[%s15924_s15 + $0x8ac] ss:$16 sps:$4 sm:$0xff]  }
 0x325   : > { %9615 = vmatprep.subr.bf16.mxu1 %v14807_v11  ;;  %20222 = vst [vmem:[#allocation33_spill] sm:$0xff] %v17029_v59  ;;  %v14819_v11 = vld [vmem:[%s15924_s15 + $0xaac] ss:$16 sps:$4 sm:$0xff]  }
 0x326   : > { %9459 = vmatmul.mubr.bf16.vlgmr.msra.gmra.mxu0 %v15488_v57  ;;  %v17037_v57 = vpop.f32.mrf.mxu0  ;;  %v15495_v59 = vld [vmem:[%s15926_s16 + $0x25c] ss:$144 sps:$4 sm:$0xff]  }
 0x327   : > { %9522 = vmatmul.mubr.bf16.vlgmr.msra.gmra.mxu1 %v15489_v6  ;;  %9553 = vmatpush1.bf16.msra.mxu0 %v14802_v20  ;;  %20223 = vst [vmem:[#allocation34_spill] sm:$0xff] %v17037_v57  ;;  %v14822_v20 = vld [vmem:[%s15924_s15 + $0x88c] ss:$16 sps:$4 sm:$0xff]  }
 0x328   : > { %9616 = vmatpush1.bf16.msra.mxu1 %v14805_v19  ;;  %9554 = vmatprep.subr.bf16.mxu0 %v14810_v52  ;;  %v17039_v19 = vpop.f32.mrf.mxu1  ;;  %v17043_v52 = vpop.f32.mrf.mxu0 }
 0x329   : > { %9617 = vmatprep.subr.bf16.mxu1 %v14813_v22  ;;  %9468 = vmatprep.mubr.bf16.mxu0 %v15490_v60  ;;  %20224 = vst [vmem:[#allocation35_spill] sm:$0xff] %v17039_v19  ;;  %v14825_v60 = vld [vmem:[%s15924_s15 + $0xa8c] ss:$16 sps:$4 sm:$0xff]   ;;  %20225 = vst [vmem:[#allocation36_spill] sm:$0xff] %v17043_v52  ;;  %v15492_v22 = vld [vmem:[%s15926_s16 + $0x130] ss:$144 sps:$4 sm:$0xff]  }
 0x32a   : > { %9531 = vmatprep.mubr.bf16.mxu1 %v15491_v32  ;;  %v15493_v32 = vld [vmem:[%s15926_s16 + $0x138] ss:$144 sps:$4 sm:$0xff]   ;;  %v17049_v6 = vpop.f32.mrf.mxu1  ;;  %v15494_v19 = vld [vmem:[%s15926_s16 + $0x254] ss:$144 sps:$4 sm:$0xff]  }
 0x32b   : > { %9555 = vmatpush1.bf16.msra.mxu0 %v14808_v42  ;;  %v14823_v42 = vld [vmem:[%s15924_s15 + $0xa88] ss:$16 sps:$4 sm:$0xff]   ;;  %20226 = vst [vmem:[#allocation37_spill] sm:$0xff] %v17049_v6  ;;  %v15498_v6 = vld [vmem:[%s15926_s16 + $0x24] ss:$144 sps:$4 sm:$0xff]  }
 0x32c   : > { %9618 = vmatpush1.bf16.msra.mxu1 %v14811_v51  ;;  %9556 = vmatprep.subr.bf16.mxu0 %v14816_v41  ;;  %v14820_v51 = vld [vmem:[%s15924_s15 + $0x888] ss:$16 sps:$4 sm:$0xff]   ;;  %v14828_v41 = vld [vmem:[%s15924_s15 + $0x86c] ss:$16 sps:$4 sm:$0xff]  }
 0x32d   : > { %9619 = vmatprep.subr.bf16.mxu1 %v14819_v11  ;;  %v14831_v11 = vld [vmem:[%s15924_s15 + $0xa6c] ss:$16 sps:$4 sm:$0xff]   ;;  %v14829_v52 = vld [vmem:[%s15924_s15 + $0xa68] ss:$16 sps:$4 sm:$0xff]  }
 0x32e   : > { %9469 = vmatmul.mubr.bf16.gmra.mxu0 %v15492_v22  ;;  %v14826_v22 = vld [vmem:[%s15924_s15 + $0x868] ss:$16 sps:$4 sm:$0xff]  }
 0x32f   : > { %9532 = vmatmul.mubr.bf16.gmra.mxu1 %v15493_v32  ;;  %9557 = vmatpush1.bf16.msra.mxu0 %v14814_v21  ;;  %v17059_v21 = vpop.f32.mrf.mxu1  ;;  %v15496_v32 = vld [vmem:[%s15926_s16 + $0x250] ss:$144 sps:$4 sm:$0xff]  }
 0x330   : > { %9620 = vmatpush1.bf16.msra.mxu1 %v14817_v9  ;;  %9558 = vmatprep.subr.bf16.mxu0 %v14822_v20  ;;  %v17057_v9 = vpop.f32.mrf.mxu0  ;;  %20228 = vst [vmem:[#allocation39_spill] sm:$0xff] %v17059_v21  ;;  %v14834_v20 = vld [vmem:[%s15924_s15 + $0x84c] ss:$16 sps:$4 sm:$0xff]  }
 0x331   : > { %9621 = vmatprep.subr.bf16.mxu1 %v14825_v60  ;;  %9478 = vmatprep.mubr.bf16.mxu0 %v15494_v19  ;;  %20227 = vst [vmem:[#allocation38_spill] sm:$0xff] %v17057_v9  ;;  %v14837_v60 = vld [vmem:[%s15924_s15 + $0xa4c] ss:$16 sps:$4 sm:$0xff]   ;;  %v14847_v9 = vld [vmem:[%s15924_s15 + $0xa08] ss:$16 sps:$4 sm:$0xff]  }
 0x332   : > { %9541 = vmatprep.mubr.bf16.mxu1 %v15495_v59  ;;  %v17063_v19 = vpop.f32.mrf.mxu0  ;;  %v15497_v59 = vld [vmem:[%s15926_s16 + $0x258] ss:$144 sps:$4 sm:$0xff]   ;;  %v14840_v21 = vld [vmem:[%s15924_s15 + $0x82c] ss:$16 sps:$4 sm:$0xff]  }
 0x333   : > { %9559 = vmatpush1.bf16.msra.mxu0 %v14820_v51  ;;  %20229 = vst [vmem:[#allocation40_spill] sm:$0xff] %v17063_v19  ;;  %v14832_v51 = vld [vmem:[%s15924_s15 + $0x848] ss:$16 sps:$4 sm:$0xff]   ;;  %v14843_v19 = vld [vmem:[%s15924_s15 + $0xa2c] ss:$16 sps:$4 sm:$0xff]  }
 0x334   : > { %9622 = vmatpush1.bf16.msra.mxu1 %v14823_v42  ;;  %9560 = vmatprep.subr.bf16.mxu0 %v14828_v41  ;;  %v14835_v42 = vld [vmem:[%s15924_s15 + $0xa48] ss:$16 sps:$4 sm:$0xff]   ;;  %v17069_v41 = vpop.f32.mrf.mxu1 }
 0x335   : > { %9623 = vmatprep.subr.bf16.mxu1 %v14831_v11  ;;  %20230 = vst [vmem:[#allocation41_spill] sm:$0xff] %v17069_v41  ;;  %v17071_v11 = vpop.f32.mrf.mxu0  ;;  %v14849_v41 = vld [vmem:[%s15924_s15 + $0xa0c] ss:$16 sps:$4 sm:$0xff]  }
 0x336   : > { %9479 = vmatmul.mubr.bf16.gmra.mxu0 %v15496_v32  ;;  %v15499_v32 = vld [vmem:[%s15926_s16 + $0x2c] ss:$144 sps:$4 sm:$0xff]  }
 0x337   : > { %9542 = vmatmul.mubr.bf16.gmra.mxu1 %v15497_v59  ;;  %9561 = vmatpush1.bf16.msra.mxu0 %v14826_v22  ;;  %v14838_v22 = vld [vmem:[%s15924_s15 + $0x828] ss:$16 sps:$4 sm:$0xff]  }
 0x338   : > { %9624 = vmatpush1.bf16.msra.mxu1 %v14829_v52  ;;  %9562 = vmatprep.subr.bf16.mxu0 %v14834_v20  ;;  %v17077_v52 = vpop.f32.mrf.mxu1  ;;  %v14841_v59 = vld [vmem:[%s15924_s15 + $0xa28] ss:$16 sps:$4 sm:$0xff]   ;;  %v17081_v20 = vpop.f32.mrf.mxu0 }
 0x339   : > { %9625 = vmatprep.subr.bf16.mxu1 %v14837_v60  ;;  %9584 = vmatprep.mubr.bf16.mxu0 %v15498_v6  ;;  %20231 = vst [vmem:[#allocation42_spill] sm:$0xff] %v17077_v52  ;;  %v14846_v60 = vld [vmem:[%s15924_s15 + $0x80c] ss:$16 sps:$4 sm:$0xff]  }
 0x33a   : > { %9647 = vmatprep.mubr.bf16.mxu1 %v15499_v32  ;;  %v17085_v6 = vpop.f32.mrf.mxu1  ;;  %v14844_v32 = vld [vmem:[%s15924_s15 + $0x808] ss:$16 sps:$4 sm:$0xff]  }
 0x33b   : > { %9563 = vmatpush1.bf16.msra.mxu0 %v14832_v51  ;;  %20232 = vst [vmem:[#allocation43_spill] sm:$0xff] %v17085_v6  ;;  %v8270_v51 = vadd.f32 %v16256_v54, %v16254_v53  ;;  %v8280_v53 = vadd.f32 %v16279_v14, %v16277_v13  ;;  %v14856_v13 = vld [vmem:[%s15924_s15 + $0x9c8] ss:$16 sps:$4 sm:$0xff]  }
 0x33c   : > { %9626 = vmatpush1.bf16.msra.mxu1 %v14835_v42  ;;  %9564 = vmatprep.subr.bf16.mxu0 %v14840_v21  ;;  %v17091_v42 = vpop.f32.mrf.mxu0  ;;  %v14852_v21 = vld [vmem:[%s15924_s15 + $0x9ec] ss:$16 sps:$4 sm:$0xff]   ;;  %v17096_v52 = vpop.f32.mrf.mxu1  ;;  %v14859_v14 = vld [vmem:[%s15924_s15 + $0xbc8] ss:$16 sps:$4 sm:$0xff]  }
 0x33d   : > { %9627 = vmatprep.subr.bf16.mxu1 %v14843_v19  ;;  %v14855_v19 = vld [vmem:[%s15924_s15 + $0xbec] ss:$16 sps:$4 sm:$0xff]   ;;  %v8333_v57 = vadd.f32 %v16355_v43, %v8270_v51  ;;  %20233 = vst [vmem:[#allocation44_spill] sm:$0xff] %v17096_v52  ;;  %v8290_v43 = vadd.f32 %v16334_v16, %v16332_v15 }
 0x33e   : > { %v17102_v54 = vpop.f32.mrf.mxu0  ;;  %v17110_v51 = vpop.f32.mrf.mxu1  ;;  %v14864_v15 = vld [vmem:[%s15924_s15 + $0x9ac] ss:$16 sps:$4 sm:$0xff]  }
 0x33f   : > { %9565 = vmatpush1.bf16.msra.mxu0 %v14838_v22  ;;  %v14850_v22 = vld [vmem:[%s15924_s15 + $0x9e8] ss:$16 sps:$4 sm:$0xff]   ;;  %v8353_v52 = vadd.f32 %v16447_v35, %v8290_v43  ;;  %v14867_v16 = vld [vmem:[%s15924_s15 + $0xbac] ss:$16 sps:$4 sm:$0xff]  }
 0x340   : > { %9628 = vmatpush1.bf16.msra.mxu1 %v14841_v59  ;;  %9566 = vmatprep.subr.bf16.mxu0 %v14846_v60  ;;  %v14853_v59 = vld [vmem:[%s15924_s15 + $0xbe8] ss:$16 sps:$4 sm:$0xff]   ;;  %v14861_v60 = vld [vmem:[%s15924_s15 + $0xbcc] ss:$16 sps:$4 sm:$0xff]   ;;  %v17118_v6 = vpop.f32.mrf.mxu1 }
 0x341   : > { %9629 = vmatprep.subr.bf16.mxu1 %v14849_v41  ;;  %v14858_v41 = vld [vmem:[%s15924_s15 + $0x9cc] ss:$16 sps:$4 sm:$0xff]   ;;  %v14862_v35 = vld [vmem:[%s15924_s15 + $0x9a8] ss:$16 sps:$4 sm:$0xff]  }
 0x343   : > { %9567 = vmatpush1.bf16.msra.mxu0 %v14844_v32  ;;  %v8343_v32 = vadd.f32 %v16380_v7, %v8280_v53  ;;  %v8416_v7 = vadd.f32 %v16449_v36, %v8353_v52  ;;  %v17130_v53 = vpop.f32.mrf.mxu1  ;;  %v14873_v36 = vld [vmem:[%s15924_s15 + $0xb8c] ss:$16 sps:$4 sm:$0xff]  }
 0x344   : > { %9630 = vmatpush1.bf16.msra.mxu1 %v14847_v9  ;;  %9568 = vmatprep.subr.bf16.mxu0 %v14852_v21  ;;  %v8396_v9 = vadd.f32 %v16357_v44, %v8333_v57 }
 0x345   : > { %9631 = vmatprep.subr.bf16.mxu1 %v14855_v19  ;;  %v17116_v19 = vpop.f32.mrf.mxu0  ;;  %v8406_v44 = vadd.f32 %v16382_v8, %v8343_v32  ;;  %v14870_v8 = vld [vmem:[%s15924_s15 + $0x98c] ss:$16 sps:$4 sm:$0xff]   ;;  %v8479_v52 = vadd.f32 %v16562_v39, %v8416_v7 }
 0x346   : > { %v8459_v21 = vadd.f32 %v16470_v63, %v8396_v9  ;;  %v14865_v63 = vld [vmem:[%s15924_s15 + $0xba8] ss:$16 sps:$4 sm:$0xff]   ;;  %v17141_v9 = vpop.f32.mrf.mxu1  ;;  %v14876_v32 = vld [vmem:[%s15924_s15 + $0x96c] ss:$16 sps:$4 sm:$0xff]  }
 0x347   : > { %9569 = vmatpush2.bf16.msra.mxu0 %v14850_v22  ;;  %v8469_v22 = vadd.f32 %v16495_v37, %v8406_v44  ;;  %v14871_v37 = vld [vmem:[%s15924_s15 + $0xb88] ss:$16 sps:$4 sm:$0xff]   ;;  %v14879_v39 = vld [vmem:[%s15924_s15 + $0xb6c] ss:$16 sps:$4 sm:$0xff]  }
 0x348   : > { %9632 = vmatpush2.bf16.msra.mxu1 %v14853_v59  ;;  %9570 = vmatprep.subr.bf16.mxu0 %v14858_v41  ;;  %v8522_v57 = vadd.f32 %v16472_v1, %v8459_v21  ;;  %v17128_v59 = vpop.f32.mrf.mxu0  ;;  %v14868_v1 = vld [vmem:[%s15924_s15 + $0x988] ss:$16 sps:$4 sm:$0xff]   ;;  %v17154_v7 = vpop.f32.mrf.mxu1 }
 0x349   : > { %9633 = vmatprep.subr.bf16.mxu1 %v14861_v60  ;;  %v8532_v60 = vadd.f32 %v16497_v40, %v8469_v22  ;;  %v14874_v40 = vld [vmem:[%s15924_s15 + $0x968] ss:$16 sps:$4 sm:$0xff]  }
 0x34a   : > { %v8585_v41 = vadd.f32 %v16585_v50, %v8522_v57  ;;  %v17139_v43 = vpop.f32.mrf.mxu0  ;;  %v8542_v50 = vadd.f32 %v16564_v12, %v8479_v52  ;;  %v14882_v12 = vld [vmem:[%s15924_s15 + $0x94c] ss:$16 sps:$4 sm:$0xff]   ;;  %v14883_v57 = vld [vmem:[%s15924_s15 + $0xb48] ss:$16 sps:$4 sm:$0xff]  }
 0x34b   : > { %9571 = vmatpush2.bf16.msra.mxu0 %v14856_v13  ;;  %v14886_v52 = vld [vmem:[%s15924_s15 + $0x928] ss:$16 sps:$4 sm:$0xff]  }
 0x34c   : > { %9634 = vmatpush2.bf16.msra.mxu1 %v14859_v14  ;;  %9572 = vmatprep.subr.bf16.mxu0 %v14864_v15  ;;  %v8648_v13 = vadd.f32 %v16587_v45, %v8585_v41  ;;  %v8595_v14 = vadd.f32 %v16610_v26, %v8532_v60  ;;  %v8605_v21 = vadd.f32 %v16676_v25, %v8542_v50  ;;  %v14877_v15 = vld [vmem:[%s15924_s15 + $0xb68] ss:$16 sps:$4 sm:$0xff]   ;;  %v17152_v44 = vpop.f32.mrf.mxu0  ;;  %v14885_v45 = vld [vmem:[%s15924_s15 + $0xb4c] ss:$16 sps:$4 sm:$0xff]   ;;  %v20235_v60 = vld [vmem:[#allocation22_spill] sm:$0xff] }
 0x34d   : > { %9635 = vmatprep.subr.bf16.mxu1 %v14867_v16  ;;  %v8831_v26 = vadd.f32 %v16859_v30, %v16690_v49  ;;  %v8835_v49 = vadd.f32 %v16875_v28, %v16705_v3  ;;  %v8841_v3 = vadd.f32 %v16895_v47, %v16716_v34  ;;  %v14889_v41 = vld [vmem:[%s15924_s15 + $0xb28] ss:$16 sps:$4 sm:$0xff]   ;;  %v14894_v34 = vld [vmem:[%s15924_s15 + $0x90c] ss:$16 sps:$4 sm:$0xff]  }
 0x34e   : > { %v8711_v16 = vadd.f32 %v16699_v48, %v8648_v13  ;;  %v8658_v25 = vadd.f32 %v16612_v27, %v8595_v14  ;;  %v8833_v48 = vadd.f32 %v16867_v10, %v16696_v4  ;;  %v17170_v30 = vpop.f32.mrf.mxu0  ;;  %v17172_v27 = vpop.f32.mrf.mxu1  ;;  %v14891_v4 = vld [vmem:[%s15924_s15 + $0xb2c] ss:$16 sps:$4 sm:$0xff]   ;;  %v20237_v13 = vld [vmem:[#allocation4_spill] sm:$0xff] }
 0x34f   : > { %9573 = vmatpush2.bf16.msra.mxu0 %v14862_v35  ;;  %v8668_v35 = vadd.f32 %v16678_v18, %v8605_v21  ;;  %v14888_v18 = vld [vmem:[%s15924_s15 + $0x92c] ss:$16 sps:$4 sm:$0xff]  }
 0x350   : > { %9636 = vmatpush2.bf16.msra.mxu1 %v14865_v63  ;;  %9574 = vmatprep.subr.bf16.mxu0 %v14870_v8  ;;  %v14880_v63 = vld [vmem:[%s15924_s15 + $0x948] ss:$16 sps:$4 sm:$0xff]   ;;  %v8774_v22 = vadd.f32 %v16701_v2, %v8711_v16  ;;  %v8721_v8 = vadd.f32 %v16724_v23, %v8658_v25  ;;  %v8896_v23 = vadd.f32 %v16880_v5, %v8833_v48  ;;  %v14897_v5 = vld [vmem:[%s15924_s15 + $0xb0c] ss:$16 sps:$4 sm:$0xff]  }
 0x351   : > { %9637 = vmatprep.subr.bf16.mxu1 %v14873_v36  ;;  %v8731_v10 = vadd.f32 %v16855_v24, %v8668_v35  ;;  %v8894_v36 = vadd.f32 %v16873_v29, %v8831_v26  ;;  %v8898_v24 = vadd.f32 %v16893_v0, %v8835_v49  ;;  %v8843_v29 = vadd.f32 %v16905_v33, %v16722_v46  ;;  %v20234_v46 = vld [vmem:[#allocation9_spill] sm:$0xff]  ;;  %v20238_v14 = vld [vmem:[#allocation11_spill] sm:$0xff] }
 0x352   : > { %v8837_v2 = vadd.f32 %v16885_v17, %v8774_v22  ;;  %v17189_v17 = vpop.f32.mrf.mxu0  ;;  %v8845_v0 = vadd.f32 %v16915_v61, %v16730_v31  ;;  %v8851_v21 = vadd.f32 %v20238_v14, %v20237_v13  ;;  %v20241_v31 = vld [vmem:[#allocation5_spill] sm:$0xff]  ;;  %v20245_v22 = vld [vmem:[#allocation15_spill] sm:$0xff]  ;;  %v20256_v14 = vld [vmem:[#allocation16_spill] sm:$0xff] }
 0x353   : > { %9575 = vmatpush2.bf16.msra.mxu0 %v14868_v1  ;;  %v8957_v28 = vadd.f32 %v16965_v55, %v8894_v36  ;;  %v8784_v1 = vadd.f32 %v16726_v62, %v8721_v8  ;;  %v8794_v47 = vadd.f32 %v16865_v38, %v8731_v10  ;;  %v8959_v55 = vadd.f32 %v16975_v56, %v8896_v23  ;;  %v14892_v56 = vld [vmem:[%s15924_s15 + $0x908] ss:$16 sps:$4 sm:$0xff]   ;;  %v14900_v48 = vld [vmem:[%s15924_s15 + $0xcec] ss:$16 sps:$4 sm:$0xff]  }
 0x354   : > { %9638 = vmatpush2.bf16.msra.mxu1 %v14871_v37  ;;  %9576 = vmatprep.subr.bf16.mxu0 %v14876_v32  ;;  %v17191_v37 = vpop.f32.mrf.mxu1  ;;  %v8900_v62 = vadd.f32 %v16900_v58, %v8837_v2  ;;  %v8961_v32 = vadd.f32 %v20235_v60, %v8898_v24  ;;  %v14895_v58 = vld [vmem:[%s15924_s15 + $0xb08] ss:$16 sps:$4 sm:$0xff]   ;;  %v17212_v25 = vpop.f32.mrf.mxu0  ;;  %v20248_v2 = vld [vmem:[#allocation10_spill] sm:$0xff]  ;;  %v14906_v13 = vld [vmem:[%s15924_s15 + $0xccc] ss:$16 sps:$4 sm:$0xff]  }
 0x355   : > { %9639 = vmatprep.subr.bf16.mxu1 %v14879_v39  ;;  %v8847_v33 = vadd.f32 %v20234_v46, %v8784_v1  ;;  %v20236_v39 = vld [vmem:[#allocation7_spill] sm:$0xff]  ;;  %v20242_v61 = vld [vmem:[#allocation13_spill] sm:$0xff]  ;;  %v8908_v23 = vadd.f32 %v20248_v2, %v8845_v0  ;;  %v20251_v1 = vld [vmem:[#allocation26_spill] sm:$0xff] }
 0x356   : > { %v8904_v50 = vadd.f32 %v20236_v39, %v8841_v3  ;;  %v17214_v35 = vpop.f32.mrf.mxu1  ;;  %v20246_v49 = vld [vmem:[#allocation17_spill] sm:$0xff]  ;;  %v20249_v3 = vld [vmem:[#allocation12_spill] sm:$0xff]  ;;  %v20255_v60 = vld [vmem:[#allocation30_spill] sm:$0xff]  ;;  %v17235_v39 = vpop.f32.mrf.mxu0 }
 0x357   : > { %9577 = vmatpush2.bf16.msra.mxu0 %v14874_v40  ;;  %v20239_v40 = vld [vmem:[#allocation20_spill] sm:$0xff]  ;;  %v20254_v46 = vld [vmem:[#allocation25_spill] sm:$0xff]  ;;  %v20264_v2 = vld [vmem:[#allocation31_spill] sm:$0xff] }
 0x358   : > { %9640 = vmatpush2.bf16.msra.mxu1 %v14877_v15  ;;  %9578 = vmatprep.subr.bf16.mxu0 %v14882_v12  ;;  %v9020_v38 = vadd.f32 %v20239_v40, %v8957_v28  ;;  %v20240_v15 = vld [vmem:[#allocation8_spill] sm:$0xff]  ;;  %v8853_v12 = vadd.f32 %v20242_v61, %v20241_v31  ;;  %v8910_v28 = vadd.f32 %v20249_v3, %v8847_v33  ;;  %v20257_v40 = vld [vmem:[#allocation18_spill] sm:$0xff] }
 0x359   : > { %9641 = vmatprep.subr.bf16.mxu1 %v14885_v45  ;;  %v8906_v16 = vadd.f32 %v20240_v15, %v8843_v29  ;;  %v20243_v45 = vld [vmem:[#allocation24_spill] sm:$0xff]  ;;  %v8967_v24 = vadd.f32 %v20251_v1, %v8904_v50  ;;  %v20252_v29 = vld [vmem:[#allocation14_spill] sm:$0xff]  ;;  %v8971_v33 = vadd.f32 %v20255_v60, %v8908_v23  ;;  %v17237_v50 = vpop.f32.mrf.mxu1 }
 0x35a   : > { %v8963_v26 = vadd.f32 %v20243_v45, %v8900_v62  ;;  %v9083_v36 = vadd.f32 %v17071_v11, %v9020_v38  ;;  %v14901_v11 = vld [vmem:[%s15924_s15 + $0xee8] ss:$16 sps:$4 sm:$0xff]   ;;  %v20259_v15 = vld [vmem:[#allocation42_spill] sm:$0xff]  ;;  %v20261_v61 = vld [vmem:[#allocation32_spill] sm:$0xff] }
 0x35b   : > { %9579 = vmatpush2.bf16.msra.mxu0 %v14880_v63  ;;  %v14903_v63 = vld [vmem:[%s15924_s15 + $0xeec] ss:$16 sps:$4 sm:$0xff]   ;;  %v8973_v45 = vadd.f32 %v20261_v61, %v8910_v28  ;;  %v20265_v23 = vld [vmem:[#allocation34_spill] sm:$0xff]  ;;  %v20266_v28 = vld [vmem:[#allocation44_spill] sm:$0xff] }
 0x35c   : > { %9642 = vmatpush2.bf16.msra.mxu1 %v14883_v57  ;;  %9580 = vmatprep.subr.bf16.mxu0 %v14888_v18  ;;  %v20244_v57 = vld [vmem:[#allocation6_spill] sm:$0xff]  ;;  %v8857_v18 = vadd.f32 %v20246_v49, %v8794_v47  ;;  %v9026_v0 = vadd.f32 %v20254_v46, %v8963_v26  ;;  %v20263_v49 = vld [vmem:[#allocation43_spill] sm:$0xff]  ;;  %v20268_v60 = vld [vmem:[#allocation36_spill] sm:$0xff] }
 0x35d   : > { %9643 = vmatprep.subr.bf16.mxu1 %v14891_v4  ;;  %v8855_v8 = vadd.f32 %v20245_v22, %v20244_v57  ;;  %v20247_v4 = vld [vmem:[#allocation21_spill] sm:$0xff]  ;;  %v15500_v57 = vld [vmem:[%s15926_s16 + $0x20] ss:$144 sps:$4 sm:$0xff]  }
 0x35e   : > { %v9022_v10 = vadd.f32 %v20247_v4, %v8959_v55  ;;  %v14898_v55 = vld [vmem:[%s15924_s15 + $0xce8] ss:$16 sps:$4 sm:$0xff]   ;;  %v9089_v26 = vadd.f32 %v17102_v54, %v9026_v0  ;;  %v9034_v54 = vadd.f32 %v20264_v2, %v8971_v33  ;;  %v15503_v46 = vld [vmem:[%s15926_s16 + $0x14c] ss:$144 sps:$4 sm:$0xff]   ;;  %v15504_v2 = vld [vmem:[%s15926_s16 + $0x140] ss:$144 sps:$4 sm:$0xff]  }
 0x35f   : > { %9581 = vmatpush2.bf16.msra.mxu0 %v14886_v52  ;;  %v20250_v52 = vld [vmem:[#allocation23_spill] sm:$0xff]  ;;  %v8918_v38 = vadd.f32 %v20257_v40, %v8855_v8  ;;  %v20262_v22 = vld [vmem:[#allocation29_spill] sm:$0xff] }
 0x360   : > { %9644 = vmatpush2.bf16.msra.mxu1 %v14889_v41  ;;  %9582 = vmatprep.subr.bf16.mxu0 %v14894_v34  ;;  %v9024_v41 = vadd.f32 %v20250_v52, %v8961_v32  ;;  %v8914_v34 = vadd.f32 %v20252_v29, %v8851_v21  ;;  %v9085_v47 = vadd.f32 %v17081_v20, %v9022_v10  ;;  %v14909_v20 = vld [vmem:[%s15924_s15 + $0xecc] ss:$16 sps:$4 sm:$0xff]   ;;  %v14904_v10 = vld [vmem:[%s15924_s15 + $0xcc8] ss:$16 sps:$4 sm:$0xff]  }
 0x361   : > { %9645 = vmatprep.subr.bf16.mxu1 %v14897_v5  ;;  %v20253_v5 = vld [vmem:[#allocation28_spill] sm:$0xff]  ;;  %v8916_v21 = vadd.f32 %v20256_v14, %v8853_v12  ;;  %v15501_v12 = vld [vmem:[%s15926_s16 + $0x28] ss:$144 sps:$4 sm:$0xff]   ;;  %v14912_v29 = vld [vmem:[%s15924_s15 + $0xcac] ss:$16 sps:$4 sm:$0xff]  }
 0x362   : > { %v8969_v62 = vadd.f32 %v20253_v5, %v8906_v16  ;;  %v9087_v32 = vadd.f32 %v17091_v42, %v9024_v41  ;;  %v9146_v42 = vadd.f32 %v20259_v15, %v9083_v36  ;;  %v20260_v16 = vld [vmem:[#allocation27_spill] sm:$0xff]  ;;  %v8977_v3 = vadd.f32 %v20265_v23, %v8914_v34  ;;  %v582_v41 = vld [vmem:[#allocation2 + $0xb0] sm:$0xff]  ;;  %v20267_v34 = vld [vmem:[#allocation33_spill] sm:$0xff] }
 0x363   : > { %9583 = vmatpush2.bf16.msra.mxu0 %v14892_v56  ;;  %v20258_v56 = vld [vmem:[#allocation19_spill] sm:$0xff]  ;;  %v9030_v31 = vadd.f32 %v20260_v16, %v8967_v24  ;;  %v9036_v0 = vadd.f32 %v20267_v34, %v8973_v45  ;;  %v8979_v33 = vadd.f32 %v20268_v60, %v8916_v21  ;;  %v20270_v45 = vld [vmem:[#allocation38_spill] sm:$0xff] }
 0x364   : > { %9646 = vmatpush2.bf16.msra.mxu1 %v14895_v58  ;;  %9678 = vmatprep.subr.bf16.mxu0 %v14900_v48  ;;  %v17244_v58 = vadd.f32 %v20258_v56, %v8857_v18  ;;  %v9032_v8 = vadd.f32 %v20262_v22, %v8969_v62  ;;  %v9148_v18 = vadd.f32 %v20263_v49, %v9085_v47  ;;  %v14907_v36 = vld [vmem:[%s15924_s15 + $0xec8] ss:$16 sps:$4 sm:$0xff]   ;;  %v14915_v5 = vld [vmem:[%s15924_s15 + $0xeac] ss:$16 sps:$4 sm:$0xff]  }
 0x365   : > { %9741 = vmatprep.subr.bf16.mxu1 %v14903_v63  ;;  %v9150_v52 = vadd.f32 %v20266_v28, %v9087_v32  ;;  %v9093_v62 = vadd.f32 %v17116_v19, %v9030_v31  ;;  %v9152_v32 = vadd.f32 %v17110_v51, %v9089_v26  ;;  %v14913_v16 = vld [vmem:[%s15924_s15 + $0xea8] ss:$16 sps:$4 sm:$0xff]   ;;  %v8981_v21 = vadd.f32 %v20270_v45, %v8918_v38  ;;  %v586_v26 = vld [vmem:[#allocation2 + $0x60] sm:$0xff]  ;;  %v14930_v45 = vld [vmem:[%s15924_s15 + $0xc4c] ss:$16 sps:$4 sm:$0xff]  }
 0x366   : > { %v9208_v48 = vpop.f32.mrf.mxu0  ;;  %9585 = vmatmul.mubr.bf16.vlgmr.msra.gmra.mxu0 %v15500_v57  ;;  %v20269_v31 = vld [vmem:[#allocation35_spill] sm:$0xff]  ;;  %v9097_v51 = vadd.f32 %v17139_v43, %v9034_v54  ;;  %v9099_v38 = vadd.f32 %v17152_v44, %v9036_v0  ;;  %v20272_v44 = vld [vmem:[#allocation40_spill] sm:$0xff] }
 0x367   : > { %v9271_v63 = vpop.f32.mrf.mxu1  ;;  %9648 = vmatmul.mubr.bf16.vlgmr.msra.gmra.mxu1 %v15501_v12  ;;  %v9209_v4 = vadd.f32 %v9208_v48, %v9146_v42  ;;  %9679 = vmatpush1.bf16.msra.mxu0 %v14898_v55  ;;  %v14910_v42 = vld [vmem:[%s15924_s15 + $0xca8] ss:$16 sps:$4 sm:$0xff]   ;;  %v9040_v61 = vadd.f32 %v20269_v31, %v8977_v3  ;;  %v14921_v57 = vld [vmem:[%s15924_s15 + $0xe8c] ss:$16 sps:$4 sm:$0xff]   ;;  %v9156_v12 = vadd.f32 %v17118_v6, %v9093_v62  ;;  %v15506_v0 = vld [vmem:[%s15926_s16 + $0x264] ss:$144 sps:$4 sm:$0xff]  }
 0x368   : > { %9742 = vmatpush1.bf16.msra.mxu1 %v14901_v11  ;;  %v9210_v1 = vpop.f32.mrf.mxu0  ;;  %9680 = vmatprep.subr.bf16.mxu0 %v14906_v13  ;;  %v15502_v11 = vld [vmem:[%s15926_s16 + $0x144] ss:$144 sps:$4 sm:$0xff]   ;;  %v9095_v13 = vadd.f32 %v17128_v59, %v9032_v8  ;;  %v15505_v23 = vld [vmem:[%s15926_s16 + $0x148] ss:$144 sps:$4 sm:$0xff]  }
 0x369   : > { %v9273_v24 = vpop.f32.mrf.mxu1  ;;  %9743 = vmatprep.subr.bf16.mxu1 %v14909_v20  ;;  %v9272_v47 = vadd.f32 %v9271_v63, %v9209_v4  ;;  %v9211_v55 = vadd.f32 %v9210_v1, %v9148_v18  ;;  %9594 = vmatprep.mubr.bf16.mxu0 %v15502_v11  ;;  %v583_v20 = vld [vmem:[#allocation2] sm:$0xff]  ;;  %v14918_v63 = vld [vmem:[%s15924_s15 + $0xc8c] ss:$16 sps:$4 sm:$0xff]   ;;  %v9160_v1 = vadd.f32 %v17141_v9, %v9097_v51 }
 0x36a   : > { %9657 = vmatprep.mubr.bf16.mxu1 %v15503_v46  ;;  %v9212_v14 = vpop.f32.mrf.mxu0  ;;  %v20271_v18 = vld [vmem:[#allocation37_spill] sm:$0xff]  ;;  %v9158_v43 = vadd.f32 %v17130_v53, %v9095_v13  ;;  %v20273_v9 = vld [vmem:[#allocation39_spill] sm:$0xff]  ;;  %v591_v13 = vld [vmem:[#allocation2 + $0x90] sm:$0xff] }
 0x36b   : > { %v9275_v40 = vpop.f32.mrf.mxu1  ;;  %v10434_v19 = vadd.f32 %v9272_v47, %v582_v41  ;;  %v9274_v56 = vadd.f32 %v9273_v24, %v9211_v55  ;;  %v9213_v15 = vadd.f32 %v9212_v14, %v9150_v52  ;;  %9681 = vmatpush1.bf16.msra.mxu0 %v14904_v10  ;;  %v9042_v4 = vadd.f32 %v20271_v18, %v8979_v33  ;;  %v587_v10 = vld [vmem:[#allocation2 + $0x28] sm:$0xff] }
 0x36c   : > { %9744 = vmatpush1.bf16.msra.mxu1 %v14907_v36  ;;  %v9214_v59 = vpop.f32.mrf.mxu0  ;;  %9682 = vmatprep.subr.bf16.mxu0 %v14912_v29  ;;  %v14916_v52 = vld [vmem:[%s15924_s15 + $0xc88] ss:$16 sps:$4 sm:$0xff]   ;;  %v8983_v41 = vadd.f32 %v20272_v44, %v17244_v58  ;;  %v9103_v24 = vadd.f32 %v17170_v30, %v9040_v61  ;;  %v14924_v47 = vld [vmem:[%s15924_s15 + $0xc6c] ss:$16 sps:$4 sm:$0xff]   ;;  %v9044_v60 = vadd.f32 %v20273_v9, %v8981_v21 }
 0x36d   : > { %v9277_v48 = vpop.f32.mrf.mxu1  ;;  %9745 = vmatprep.subr.bf16.mxu1 %v14915_v5  ;;  %10458 = vst [vmem:[#allocation2 + $0xb0] sm:$0xff] %v10434_v19  ;;  %v10435_v22 = vadd.f32 %v9274_v56, %v583_v20  ;;  %v9276_v8 = vadd.f32 %v9275_v40, %v9213_v15  ;;  %v9215_v49 = vadd.f32 %v9214_v59, %v9152_v32  ;;  %v14919_v53 = vld [vmem:[%s15924_s15 + $0xe88] ss:$16 sps:$4 sm:$0xff]   ;;  %v14927_v55 = vld [vmem:[%s15924_s15 + $0xe6c] ss:$16 sps:$4 sm:$0xff]  }
 0x36e   : > { %v9218_v36 = vpop.f32.mrf.mxu0  ;;  %9595 = vmatmul.mubr.bf16.gmra.mxu0 %v15504_v2  ;;  %v590_v5 = vld [vmem:[#allocation2 + $0x88] sm:$0xff]  ;;  %v9162_v30 = vadd.f32 %v17154_v7, %v9099_v38  ;;  %v9105_v33 = vadd.f32 %v17189_v17, %v9042_v4  ;;  %v9107_v31 = vadd.f32 %v17212_v25, %v9044_v60  ;;  %v594_v17 = vld [vmem:[#allocation2 + $0x38] sm:$0xff]  ;;  %v9166_v51 = vadd.f32 %v17172_v27, %v9103_v24 }
 0x36f   : > { %v9281_v54 = vpop.f32.mrf.mxu1  ;;  %9658 = vmatmul.mubr.bf16.gmra.mxu1 %v15505_v23  ;;  %10459 = vst [vmem:[#allocation2] sm:$0xff] %v10435_v22  ;;  %v10438_v6 = vadd.f32 %v9276_v8, %v586_v26  ;;  %v9278_v3 = vadd.f32 %v9277_v48, %v9215_v49  ;;  %v9219_v28 = vadd.f32 %v9218_v36, %v9156_v12  ;;  %v15507_v58 = vld [vmem:[%s15926_s16 + $0x26c] ss:$144 sps:$4 sm:$0xff]   ;;  %v14922_v56 = vld [vmem:[%s15924_s15 + $0xc68] ss:$16 sps:$4 sm:$0xff]   ;;  %v595_v12 = vld [vmem:[#allocation2 + $0x50] sm:$0xff] }
 0x370   : > { %9683 = vmatpush1.bf16.msra.mxu0 %v14910_v42  ;;  %9746 = vmatpush1.bf16.msra.mxu1 %v14913_v16  ;;  %v9220_v29 = vpop.f32.mrf.mxu0  ;;  %v14925_v15 = vld [vmem:[%s15924_s15 + $0xe68] ss:$16 sps:$4 sm:$0xff]   ;;  %v14933_v21 = vld [vmem:[%s15924_s15 + $0xe4c] ss:$16 sps:$4 sm:$0xff]   ;;  %v15508_v22 = vld [vmem:[%s15926_s16 + $0x260] ss:$144 sps:$4 sm:$0xff]  }
 0x371   : > { %v9283_v62 = vpop.f32.mrf.mxu1  ;;  %9684 = vmatprep.subr.bf16.mxu0 %v14918_v63  ;;  %9747 = vmatprep.subr.bf16.mxu1 %v14921_v57  ;;  %10462 = vst [vmem:[#allocation2 + $0x60] sm:$0xff] %v10438_v6  ;;  %v10439_v11 = vadd.f32 %v9278_v3, %v587_v10  ;;  %v9221_v46 = vadd.f32 %v9220_v29, %v9158_v43  ;;  %v20274_v42 = vld [vmem:[#allocation41_spill] sm:$0xff]  ;;  %v603_v9 = vld [vmem:[#allocation2 + $0xb8] sm:$0xff] }
 0x372   : > { %v9282_v34 = vadd.f32 %v9281_v54, %v9219_v28  ;;  %9604 = vmatprep.mubr.bf16.mxu0 %v15506_v0  ;;  %9667 = vmatprep.mubr.bf16.mxu1 %v15507_v58  ;;  %v9222_v32 = vpop.f32.mrf.mxu0  ;;  %v9046_v16 = vadd.f32 %v20274_v42, %v8983_v41  ;;  %v9168_v63 = vadd.f32 %v17191_v37, %v9105_v33  ;;  %v15509_v49 = vld [vmem:[%s15926_s16 + $0x268] ss:$144 sps:$4 sm:$0xff]   ;;  %v14936_v2 = vld [vmem:[%s15924_s15 + $0xc2c] ss:$16 sps:$4 sm:$0xff]   ;;  %v15510_v28 = vld [vmem:[%s15926_s16 + $0x34] ss:$144 sps:$4 sm:$0xff]  }
 0x373   : > { %v9285_v20 = vpop.f32.mrf.mxu1  ;;  %10463 = vst [vmem:[#allocation2 + $0x28] sm:$0xff] %v10439_v11  ;;  %v9223_v40 = vadd.f32 %v9222_v32, %v9160_v1  ;;  %v9284_v19 = vadd.f32 %v9283_v62, %v9221_v46  ;;  %v14928_v37 = vld [vmem:[%s15924_s15 + $0xc48] ss:$16 sps:$4 sm:$0xff]   ;;  %v14939_v54 = vld [vmem:[%s15924_s15 + $0xe2c] ss:$16 sps:$4 sm:$0xff]  }
 0x374   : > { %v10442_v14 = vadd.f32 %v9282_v34, %v590_v5  ;;  %9685 = vmatpush1.bf16.msra.mxu0 %v14916_v52  ;;  %9748 = vmatpush1.bf16.msra.mxu1 %v14919_v53  ;;  %v9224_v7 = vpop.f32.mrf.mxu0  ;;  %v9109_v25 = vadd.f32 %v17235_v39, %v9046_v16  ;;  %v14931_v43 = vld [vmem:[%s15924_s15 + $0xe48] ss:$16 sps:$4 sm:$0xff]   ;;  %v9170_v39 = vadd.f32 %v17214_v35, %v9107_v31  ;;  %v15511_v52 = vld [vmem:[%s15926_s16 + $0x3c] ss:$144 sps:$4 sm:$0xff]  }
 0x375   : > { %v9287_v61 = vpop.f32.mrf.mxu1  ;;  %9686 = vmatprep.subr.bf16.mxu0 %v14924_v47  ;;  %9749 = vmatprep.subr.bf16.mxu1 %v14927_v55  ;;  %v10443_v26 = vadd.f32 %v9284_v19, %v591_v13  ;;  %v9225_v59 = vadd.f32 %v9224_v7, %v9162_v30  ;;  %v9286_v48 = vadd.f32 %v9285_v20, %v9223_v40  ;;  %v598_v10 = vld [vmem:[#allocation2 + $0xa8] sm:$0xff]  ;;  %v602_v55 = vld [vmem:[#allocation2 + $0x80] sm:$0xff] }
 0x376   : > { %10466 = vst [vmem:[#allocation2 + $0x88] sm:$0xff] %v10442_v14  ;;  %v9228_v57 = vpop.f32.mrf.mxu0  ;;  %9605 = vmatmul.mubr.bf16.gmra.mxu0 %v15508_v22  ;;  %v9172_v53 = vadd.f32 %v17237_v50, %v9109_v25  ;;  %v599_v44 = vld [vmem:[#allocation2 + $0x68] sm:$0xff] }
 0x377   : > { %v9291_v8 = vpop.f32.mrf.mxu1  ;;  %9668 = vmatmul.mubr.bf16.gmra.mxu1 %v15509_v49  ;;  %10467 = vst [vmem:[#allocation2 + $0x90] sm:$0xff] %v10443_v26  ;;  %v10446_v27 = vadd.f32 %v9286_v48, %v594_v17  ;;  %v9229_v18 = vadd.f32 %v9228_v57, %v9166_v51  ;;  %v9288_v4 = vadd.f32 %v9287_v61, %v9225_v59  ;;  %v14934_v5 = vld [vmem:[%s15924_s15 + $0xc28] ss:$16 sps:$4 sm:$0xff]   ;;  %v14942_v50 = vld [vmem:[%s15924_s15 + $0xc0c] ss:$16 sps:$4 sm:$0xff]  }
 0x378   : > { %9687 = vmatpush1.bf16.msra.mxu0 %v14922_v56  ;;  %9750 = vmatpush1.bf16.msra.mxu1 %v14925_v15  ;;  %v9230_v38 = vpop.f32.mrf.mxu0  ;;  %v14937_v62 = vld [vmem:[%s15924_s15 + $0xe28] ss:$16 sps:$4 sm:$0xff]   ;;  %v14945_v46 = vld [vmem:[%s15924_s15 + $0xe0c] ss:$16 sps:$4 sm:$0xff]  }
 0x379   : > { %v9293_v36 = vpop.f32.mrf.mxu1  ;;  %9688 = vmatprep.subr.bf16.mxu0 %v14930_v45  ;;  %9751 = vmatprep.subr.bf16.mxu1 %v14933_v21  ;;  %10470 = vst [vmem:[#allocation2 + $0x38] sm:$0xff] %v10446_v27  ;;  %v10447_v23 = vadd.f32 %v9288_v4, %v595_v12  ;;  %v9231_v6 = vadd.f32 %v9230_v38, %v9168_v63  ;;  %v14940_v33 = vld [vmem:[%s15924_s15 + $0xc08] ss:$16 sps:$4 sm:$0xff]   ;;  %v14948_v13 = vld [vmem:[%s15924_s15 + $0xdec] ss:$16 sps:$4 sm:$0xff]  }
 0x37a   : > { %v9292_v3 = vadd.f32 %v9291_v8, %v9229_v18  ;;  %9710 = vmatprep.mubr.bf16.mxu0 %v15510_v28  ;;  %9773 = vmatprep.mubr.bf16.mxu1 %v15511_v52  ;;  %v9232_v35 = vpop.f32.mrf.mxu0  ;;  %v14943_v32 = vld [vmem:[%s15924_s15 + $0xe08] ss:$16 sps:$4 sm:$0xff]   ;;  %v14951_v20 = vld [vmem:[%s15924_s15 + $0xfec] ss:$16 sps:$4 sm:$0xff]   ;;  %v15512_v52 = vld [vmem:[%s15926_s16 + $0x30] ss:$144 sps:$4 sm:$0xff]  }
 0x37b   : > { %v9295_v41 = vpop.f32.mrf.mxu1  ;;  %10471 = vst [vmem:[#allocation2 + $0x50] sm:$0xff] %v10447_v23  ;;  %v9233_v24 = vadd.f32 %v9232_v35, %v9170_v39  ;;  %v9294_v29 = vadd.f32 %v9293_v36, %v9231_v6  ;;  %v14946_v40 = vld [vmem:[%s15924_s15 + $0xde8] ss:$16 sps:$4 sm:$0xff]   ;;  %v14954_v56 = vld [vmem:[%s15924_s15 + $0xdcc] ss:$16 sps:$4 sm:$0xff]  }
 0x37c   : > { %v10450_v1 = vadd.f32 %v9292_v3, %v598_v10  ;;  %9689 = vmatpush1.bf16.msra.mxu0 %v14928_v37  ;;  %9752 = vmatpush1.bf16.msra.mxu1 %v14931_v43  ;;  %v9234_v47 = vpop.f32.mrf.mxu0  ;;  %v14949_v19 = vld [vmem:[%s15924_s15 + $0xfe8] ss:$16 sps:$4 sm:$0xff]   ;;  %v14957_v15 = vld [vmem:[%s15924_s15 + $0xfcc] ss:$16 sps:$4 sm:$0xff]  }
 0x37d   : > { %v9297_v11 = vpop.f32.mrf.mxu1  ;;  %9690 = vmatprep.subr.bf16.mxu0 %v14936_v2  ;;  %9753 = vmatprep.subr.bf16.mxu1 %v14939_v54  ;;  %v10451_v34 = vadd.f32 %v9294_v29, %v599_v44  ;;  %v9235_v0 = vadd.f32 %v9234_v47, %v9172_v53  ;;  %v9296_v58 = vadd.f32 %v9295_v41, %v9233_v24  ;;  %v14952_v42 = vld [vmem:[%s15924_s15 + $0xdc8] ss:$16 sps:$4 sm:$0xff]   ;;  %v14960_v31 = vld [vmem:[%s15924_s15 + $0xdac] ss:$16 sps:$4 sm:$0xff]   ;;  %v15514_v47 = vld [vmem:[%s15926_s16 + $0x154] ss:$144 sps:$4 sm:$0xff]  }
 0x37e   : > { %10474 = vst [vmem:[#allocation2 + $0xa8] sm:$0xff] %v10450_v1  ;;  %v14955_v16 = vld [vmem:[%s15924_s15 + $0xfc8] ss:$16 sps:$4 sm:$0xff]   ;;  %v14963_v7 = vld [vmem:[%s15924_s15 + $0xfac] ss:$16 sps:$4 sm:$0xff]  }
 0x37f   : > { %10475 = vst [vmem:[#allocation2 + $0x68] sm:$0xff] %v10451_v34  ;;  %v10454_v60 = vadd.f32 %v9296_v58, %v602_v55  ;;  %v9298_v30 = vadd.f32 %v9297_v11, %v9235_v0  ;;  %v14958_v17 = vld [vmem:[%s15924_s15 + $0xda8] ss:$16 sps:$4 sm:$0xff]   ;;  %v14966_v45 = vld [vmem:[%s15924_s15 + $0xd8c] ss:$16 sps:$4 sm:$0xff]  }
 0x380   : > { %9691 = vmatpush1.bf16.msra.mxu0 %v14934_v5  ;;  %9754 = vmatpush1.bf16.msra.mxu1 %v14937_v62  ;;  %v14961_v61 = vld [vmem:[%s15924_s15 + $0xfa8] ss:$16 sps:$4 sm:$0xff]   ;;  %v14969_v21 = vld [vmem:[%s15924_s15 + $0xf8c] ss:$16 sps:$4 sm:$0xff]  }
 0x381   : > { %9692 = vmatprep.subr.bf16.mxu0 %v14942_v50  ;;  %9755 = vmatprep.subr.bf16.mxu1 %v14945_v46  ;;  %10478 = vst [vmem:[#allocation2 + $0x80] sm:$0xff] %v10454_v60  ;;  %v10455_v14 = vadd.f32 %v9298_v30, %v603_v9  ;;  %v14964_v51 = vld [vmem:[%s15924_s15 + $0xd88] ss:$16 sps:$4 sm:$0xff]   ;;  %v14972_v59 = vld [vmem:[%s15924_s15 + $0xd6c] ss:$16 sps:$4 sm:$0xff]  }
 0x382   : > { %v14967_v26 = vld [vmem:[%s15924_s15 + $0xf88] ss:$16 sps:$4 sm:$0xff]   ;;  %v14975_v48 = vld [vmem:[%s15924_s15 + $0xf6c] ss:$16 sps:$4 sm:$0xff]  }
 0x383   : > { %10479 = vst [vmem:[#allocation2 + $0xb8] sm:$0xff] %v10455_v14  ;;  %v14970_v63 = vld [vmem:[%s15924_s15 + $0xd68] ss:$16 sps:$4 sm:$0xff]   ;;  %v14978_v57 = vld [vmem:[%s15924_s15 + $0xd4c] ss:$16 sps:$4 sm:$0xff]  }
 0x384   : > { %9693 = vmatpush1.bf16.msra.mxu0 %v14940_v33  ;;  %9756 = vmatpush1.bf16.msra.mxu1 %v14943_v32  ;;  %v14973_v25 = vld [vmem:[%s15924_s15 + $0xf68] ss:$16 sps:$4 sm:$0xff]   ;;  %v14981_v12 = vld [vmem:[%s15924_s15 + $0xf4c] ss:$16 sps:$4 sm:$0xff]   ;;  %v15516_v32 = vld [vmem:[%s15926_s16 + $0x150] ss:$144 sps:$4 sm:$0xff]  }
 0x385   : > { %9694 = vmatprep.subr.bf16.mxu0 %v14948_v13  ;;  %9757 = vmatprep.subr.bf16.mxu1 %v14951_v20  ;;  %v14976_v22 = vld [vmem:[%s15924_s15 + $0xd48] ss:$16 sps:$4 sm:$0xff]   ;;  %v14984_v49 = vld [vmem:[%s15924_s15 + $0xd2c] ss:$16 sps:$4 sm:$0xff]  }
 0x386   : > { %v14979_v8 = vld [vmem:[%s15924_s15 + $0xf48] ss:$16 sps:$4 sm:$0xff]   ;;  %v14987_v27 = vld [vmem:[%s15924_s15 + $0xf2c] ss:$16 sps:$4 sm:$0xff]  }
 0x387   : > { %v14982_v18 = vld [vmem:[%s15924_s15 + $0xd28] ss:$16 sps:$4 sm:$0xff]   ;;  %v14990_v37 = vld [vmem:[%s15924_s15 + $0xd0c] ss:$16 sps:$4 sm:$0xff]  }
 0x388   : > { %9695 = vmatpush2.bf16.msra.mxu0 %v14946_v40  ;;  %9758 = vmatpush2.bf16.msra.mxu1 %v14949_v19  ;;  %v14985_v4 = vld [vmem:[%s15924_s15 + $0xf28] ss:$16 sps:$4 sm:$0xff]   ;;  %v14993_v43 = vld [vmem:[%s15924_s15 + $0xf0c] ss:$16 sps:$4 sm:$0xff]  }
 0x389   : > { %9696 = vmatprep.subr.bf16.mxu0 %v14954_v56  ;;  %9759 = vmatprep.subr.bf16.mxu1 %v14957_v15  ;;  %v14988_v39 = vld [vmem:[%s15924_s15 + $0xd08] ss:$16 sps:$4 sm:$0xff]   ;;  %v14996_v10 = vld [vmem:[%s15924_s15 + $0x10ec] ss:$16 sps:$4 sm:$0xff]  }
 0x38a   : > { %v14991_v38 = vld [vmem:[%s15924_s15 + $0xf08] ss:$16 sps:$4 sm:$0xff]   ;;  %v14999_v36 = vld [vmem:[%s15924_s15 + $0x12ec] ss:$16 sps:$4 sm:$0xff]  }
 0x38b   : > { %v14994_v2 = vld [vmem:[%s15924_s15 + $0x10e8] ss:$16 sps:$4 sm:$0xff]   ;;  %v15002_v23 = vld [vmem:[%s15924_s15 + $0x10cc] ss:$16 sps:$4 sm:$0xff]  }
 0x38c   : > { %9697 = vmatpush2.bf16.msra.mxu0 %v14952_v42  ;;  %9760 = vmatpush2.bf16.msra.mxu1 %v14955_v16  ;;  %v14997_v54 = vld [vmem:[%s15924_s15 + $0x12e8] ss:$16 sps:$4 sm:$0xff]   ;;  %v15005_v6 = vld [vmem:[%s15924_s15 + $0x12cc] ss:$16 sps:$4 sm:$0xff]  }
 0x38d   : > { %9698 = vmatprep.subr.bf16.mxu0 %v14960_v31  ;;  %9761 = vmatprep.subr.bf16.mxu1 %v14963_v7  ;;  %v15513_v53 = vld [vmem:[%s15926_s16 + $0x38] ss:$144 sps:$4 sm:$0xff]   ;;  %v15008_v29 = vld [vmem:[%s15924_s15 + $0x10ac] ss:$16 sps:$4 sm:$0xff]   ;;  %v15518_v7 = vld [vmem:[%s15926_s16 + $0x274] ss:$144 sps:$4 sm:$0xff]  }
 0x38e   : > { %v15000_v44 = vld [vmem:[%s15924_s15 + $0x10c8] ss:$16 sps:$4 sm:$0xff]   ;;  %v15011_v5 = vld [vmem:[%s15924_s15 + $0x12ac] ss:$16 sps:$4 sm:$0xff]  }
 0x38f   : > { %v15003_v41 = vld [vmem:[%s15924_s15 + $0x12c8] ss:$16 sps:$4 sm:$0xff]   ;;  %v15515_v55 = vld [vmem:[%s15926_s16 + $0x15c] ss:$144 sps:$4 sm:$0xff]  }
 0x390   : > { %9699 = vmatpush2.bf16.msra.mxu0 %v14958_v17  ;;  %9762 = vmatpush2.bf16.msra.mxu1 %v14961_v61  ;;  %v15006_v34 = vld [vmem:[%s15924_s15 + $0x10a8] ss:$16 sps:$4 sm:$0xff]   ;;  %v15014_v60 = vld [vmem:[%s15924_s15 + $0x108c] ss:$16 sps:$4 sm:$0xff]  }
 0x391   : > { %9700 = vmatprep.subr.bf16.mxu0 %v14966_v45  ;;  %9763 = vmatprep.subr.bf16.mxu1 %v14969_v21  ;;  %v15009_v0 = vld [vmem:[%s15924_s15 + $0x12a8] ss:$16 sps:$4 sm:$0xff]   ;;  %v15017_v30 = vld [vmem:[%s15924_s15 + $0x128c] ss:$16 sps:$4 sm:$0xff]  }
 0x392   : > { %v15517_v13 = vld [vmem:[%s15926_s16 + $0x158] ss:$144 sps:$4 sm:$0xff]   ;;  %v15020_v15 = vld [vmem:[%s15924_s15 + $0x106c] ss:$16 sps:$4 sm:$0xff]  }
 0x393   : > { %v15012_v40 = vld [vmem:[%s15924_s15 + $0x1088] ss:$16 sps:$4 sm:$0xff]   ;;  %v15023_v42 = vld [vmem:[%s15924_s15 + $0x126c] ss:$16 sps:$4 sm:$0xff]  }
 0x394   : > { %9701 = vmatpush2.bf16.msra.mxu0 %v14964_v51  ;;  %9764 = vmatpush2.bf16.msra.mxu1 %v14967_v26  ;;  %v15015_v19 = vld [vmem:[%s15924_s15 + $0x1288] ss:$16 sps:$4 sm:$0xff]   ;;  %v15519_v17 = vld [vmem:[%s15926_s16 + $0x27c] ss:$144 sps:$4 sm:$0xff]  }
 0x395   : > { %9702 = vmatprep.subr.bf16.mxu0 %v14972_v59  ;;  %9765 = vmatprep.subr.bf16.mxu1 %v14975_v48  ;;  %v15018_v51 = vld [vmem:[%s15924_s15 + $0x1068] ss:$16 sps:$4 sm:$0xff]   ;;  %v15026_v48 = vld [vmem:[%s15924_s15 + $0x104c] ss:$16 sps:$4 sm:$0xff]  }
 0x396   : > { %v15021_v26 = vld [vmem:[%s15924_s15 + $0x1268] ss:$16 sps:$4 sm:$0xff]  }
 0x398   : > { %9703 = vmatpush2.bf16.msra.mxu0 %v14970_v63  ;;  %9766 = vmatpush2.bf16.msra.mxu1 %v14973_v25  ;;  %v15029_v63 = vld [vmem:[%s15924_s15 + $0x124c] ss:$16 sps:$4 sm:$0xff]  }
 0x399   : > { %9704 = vmatprep.subr.bf16.mxu0 %v14978_v57  ;;  %9767 = vmatprep.subr.bf16.mxu1 %v14981_v12 }
 0x39c   : > { %9705 = vmatpush2.bf16.msra.mxu0 %v14976_v22  ;;  %9768 = vmatpush2.bf16.msra.mxu1 %v14979_v8  ;;  %v15520_v22 = vld [vmem:[%s15926_s16 + $0x270] ss:$144 sps:$4 sm:$0xff]   ;;  %v15521_v8 = vld [vmem:[%s15926_s16 + $0x278] ss:$144 sps:$4 sm:$0xff]  }
 0x39d   : > { %9706 = vmatprep.subr.bf16.mxu0 %v14984_v49  ;;  %9769 = vmatprep.subr.bf16.mxu1 %v14987_v27 }
 0x3a0   : > { %9707 = vmatpush2.bf16.msra.mxu0 %v14982_v18  ;;  %9770 = vmatpush2.bf16.msra.mxu1 %v14985_v4  ;;  %v15024_v18 = vld [vmem:[%s15924_s15 + $0x1048] ss:$16 sps:$4 sm:$0xff]  }
 0x3a1   : > { %9708 = vmatprep.subr.bf16.mxu0 %v14990_v37  ;;  %9771 = vmatprep.subr.bf16.mxu1 %v14993_v43  ;;  %v15027_v4 = vld [vmem:[%s15924_s15 + $0x1248] ss:$16 sps:$4 sm:$0xff]   ;;  %v15032_v43 = vld [vmem:[%s15924_s15 + $0x102c] ss:$16 sps:$4 sm:$0xff]  }
 0x3a4   : > { %9709 = vmatpush2.bf16.msra.mxu0 %v14988_v39  ;;  %9772 = vmatpush2.bf16.msra.mxu1 %v14991_v38  ;;  %v15035_v39 = vld [vmem:[%s15924_s15 + $0x122c] ss:$16 sps:$4 sm:$0xff]  }
 0x3a5   : > { %9804 = vmatprep.subr.bf16.mxu0 %v14996_v10  ;;  %9867 = vmatprep.subr.bf16.mxu1 %v14999_v36 }
 0x3a6   : > { %v9334_v3 = vpop.f32.mrf.mxu0 }
 0x3a7   : > { %v9397_v28 = vpop.f32.mrf.mxu1  ;;  %9711 = vmatmul.mubr.bf16.vlgmr.msra.gmra.mxu0 %v15512_v52  ;;  %9774 = vmatmul.mubr.bf16.vlgmr.msra.gmra.mxu1 %v15513_v53  ;;  %v15038_v53 = vld [vmem:[%s15924_s15 + $0x100c] ss:$16 sps:$4 sm:$0xff]  }
 0x3a8   : > { %v17359_v35 = vadd.f32 %v9397_v28, %v9334_v3  ;;  %9805 = vmatpush1.bf16.msra.mxu0 %v14994_v2  ;;  %9868 = vmatpush1.bf16.msra.mxu1 %v14997_v54  ;;  %v9336_v1 = vpop.f32.mrf.mxu0  ;;  %v15522_v2 = vld [vmem:[%s15926_s16 + $0x44] ss:$144 sps:$4 sm:$0xff]   ;;  %v15523_v54 = vld [vmem:[%s15926_s16 + $0x4c] ss:$144 sps:$4 sm:$0xff]   ;;  %v15030_v3 = vld [vmem:[%s15924_s15 + $0x1028] ss:$16 sps:$4 sm:$0xff]  }
 0x3a9   : > { %v9399_v24 = vpop.f32.mrf.mxu1  ;;  %9806 = vmatprep.subr.bf16.mxu0 %v15002_v23  ;;  %9869 = vmatprep.subr.bf16.mxu1 %v15005_v6  ;;  %v15033_v28 = vld [vmem:[%s15924_s15 + $0x1228] ss:$16 sps:$4 sm:$0xff]  }
 0x3aa   : > { %v17365_v62 = vadd.f32 %v9399_v24, %v9336_v1  ;;  %9720 = vmatprep.mubr.bf16.mxu0 %v15514_v47  ;;  %9783 = vmatprep.mubr.bf16.mxu1 %v15515_v55  ;;  %v9338_v11 = vpop.f32.mrf.mxu0  ;;  %v15044_v47 = vld [vmem:[%s15924_s15 + $0x11ec] ss:$16 sps:$4 sm:$0xff]  }
 0x3ab   : > { %v9401_v50 = vpop.f32.mrf.mxu1  ;;  %v15047_v55 = vld [vmem:[%s15924_s15 + $0x13ec] ss:$16 sps:$4 sm:$0xff]  }
 0x3ac   : > { %v17369_v46 = vadd.f32 %v9401_v50, %v9338_v11  ;;  %9807 = vmatpush1.bf16.msra.mxu0 %v15000_v44  ;;  %9870 = vmatpush1.bf16.msra.mxu1 %v15003_v41  ;;  %v9340_v58 = vpop.f32.mrf.mxu0  ;;  %v15041_v44 = vld [vmem:[%s15924_s15 + $0x120c] ss:$16 sps:$4 sm:$0xff]   ;;  %v15042_v11 = vld [vmem:[%s15924_s15 + $0x11e8] ss:$16 sps:$4 sm:$0xff]  }
 0x3ad   : > { %v9403_v9 = vpop.f32.mrf.mxu1  ;;  %9808 = vmatprep.subr.bf16.mxu0 %v15008_v29  ;;  %9871 = vmatprep.subr.bf16.mxu1 %v15011_v5  ;;  %v15036_v29 = vld [vmem:[%s15924_s15 + $0x1008] ss:$16 sps:$4 sm:$0xff]  }
 0x3ae   : > { %v17375_v33 = vadd.f32 %v9403_v9, %v9340_v58  ;;  %v9344_v20 = vpop.f32.mrf.mxu0  ;;  %v15039_v5 = vld [vmem:[%s15924_s15 + $0x1208] ss:$16 sps:$4 sm:$0xff]  }
 0x3af   : > { %9721 = vmatmul.mubr.bf16.gmra.mxu0 %v15516_v32  ;;  %9784 = vmatmul.mubr.bf16.gmra.mxu1 %v15517_v13  ;;  %v9407_v14 = vpop.f32.mrf.mxu1  ;;  %v15045_v50 = vld [vmem:[%s15924_s15 + $0x13e8] ss:$16 sps:$4 sm:$0xff]  }
 0x3b0   : > { %9809 = vmatpush1.bf16.msra.mxu0 %v15006_v34  ;;  %9872 = vmatpush1.bf16.msra.mxu1 %v15009_v0  ;;  %v17381_v56 = vadd.f32 %v9407_v14, %v9344_v20  ;;  %v9346_v16 = vpop.f32.mrf.mxu0  ;;  %v15050_v34 = vld [vmem:[%s15924_s15 + $0x11cc] ss:$16 sps:$4 sm:$0xff]   ;;  %v15048_v58 = vld [vmem:[%s15924_s15 + $0x11c8] ss:$16 sps:$4 sm:$0xff]  }
 0x3b1   : > { %9810 = vmatprep.subr.bf16.mxu0 %v15014_v60  ;;  %9873 = vmatprep.subr.bf16.mxu1 %v15017_v30  ;;  %v9409_v31 = vpop.f32.mrf.mxu1  ;;  %v15053_v0 = vld [vmem:[%s15924_s15 + $0x13cc] ss:$16 sps:$4 sm:$0xff]   ;;  %v15051_v9 = vld [vmem:[%s15924_s15 + $0x13c8] ss:$16 sps:$4 sm:$0xff]  }
 0x3b2   : > { %9730 = vmatprep.mubr.bf16.mxu0 %v15518_v7  ;;  %9793 = vmatprep.mubr.bf16.mxu1 %v15519_v17  ;;  %v17387_v61 = vadd.f32 %v9409_v31, %v9346_v16  ;;  %v9348_v45 = vpop.f32.mrf.mxu0  ;;  %v15056_v60 = vld [vmem:[%s15924_s15 + $0x11ac] ss:$16 sps:$4 sm:$0xff]   ;;  %v15054_v32 = vld [vmem:[%s15924_s15 + $0x11a8] ss:$16 sps:$4 sm:$0xff]  }
 0x3b3   : > { %v9411_v21 = vpop.f32.mrf.mxu1  ;;  %v15059_v30 = vld [vmem:[%s15924_s15 + $0x13ac] ss:$16 sps:$4 sm:$0xff]   ;;  %v15057_v13 = vld [vmem:[%s15924_s15 + $0x13a8] ss:$16 sps:$4 sm:$0xff]  }
 0x3b4   : > { %9811 = vmatpush1.bf16.msra.mxu0 %v15012_v40  ;;  %9874 = vmatpush1.bf16.msra.mxu1 %v15015_v19  ;;  %v17391_v59 = vadd.f32 %v9411_v21, %v9348_v45  ;;  %v9350_v25 = vpop.f32.mrf.mxu0  ;;  %v15062_v20 = vld [vmem:[%s15924_s15 + $0x118c] ss:$16 sps:$4 sm:$0xff]   ;;  %v15060_v40 = vld [vmem:[%s15924_s15 + $0x1188] ss:$16 sps:$4 sm:$0xff]  }
 0x3b5   : > { %9812 = vmatprep.subr.bf16.mxu0 %v15020_v15  ;;  %9875 = vmatprep.subr.bf16.mxu1 %v15023_v42  ;;  %v9413_v57 = vpop.f32.mrf.mxu1  ;;  %v15065_v14 = vld [vmem:[%s15924_s15 + $0x138c] ss:$16 sps:$4 sm:$0xff]   ;;  %v15063_v19 = vld [vmem:[%s15924_s15 + $0x1388] ss:$16 sps:$4 sm:$0xff]  }
 0x3b6   : > { %v17395_v12 = vadd.f32 %v9413_v57, %v9350_v25  ;;  %v9354_v49 = vpop.f32.mrf.mxu0  ;;  %v15068_v15 = vld [vmem:[%s15924_s15 + $0x116c] ss:$16 sps:$4 sm:$0xff]   ;;  %v15066_v16 = vld [vmem:[%s15924_s15 + $0x1168] ss:$16 sps:$4 sm:$0xff]  }
 0x3b7   : > { %9731 = vmatmul.mubr.bf16.gmra.mxu0 %v15520_v22  ;;  %9794 = vmatmul.mubr.bf16.gmra.mxu1 %v15521_v8  ;;  %v9417_v27 = vpop.f32.mrf.mxu1  ;;  %v15071_v42 = vld [vmem:[%s15924_s15 + $0x136c] ss:$16 sps:$4 sm:$0xff]   ;;  %v15069_v31 = vld [vmem:[%s15924_s15 + $0x1368] ss:$16 sps:$4 sm:$0xff]  }
 0x3b8   : > { %9813 = vmatpush1.bf16.msra.mxu0 %v15018_v51  ;;  %9876 = vmatpush1.bf16.msra.mxu1 %v15021_v26  ;;  %v17401_v37 = vadd.f32 %v9417_v27, %v9354_v49  ;;  %v9356_v38 = vpop.f32.mrf.mxu0  ;;  %v15074_v7 = vld [vmem:[%s15924_s15 + $0x114c] ss:$16 sps:$4 sm:$0xff]   ;;  %v15072_v45 = vld [vmem:[%s15924_s15 + $0x1148] ss:$16 sps:$4 sm:$0xff]  }
 0x3b9   : > { %9814 = vmatprep.subr.bf16.mxu0 %v15026_v48  ;;  %9877 = vmatprep.subr.bf16.mxu1 %v15029_v63  ;;  %v9419_v10 = vpop.f32.mrf.mxu1  ;;  %v15077_v17 = vld [vmem:[%s15924_s15 + $0x134c] ss:$16 sps:$4 sm:$0xff]   ;;  %v15075_v21 = vld [vmem:[%s15924_s15 + $0x1348] ss:$16 sps:$4 sm:$0xff]  }
 0x3ba   : > { %v17405_v36 = vadd.f32 %v9419_v10, %v9356_v38  ;;  %9836 = vmatprep.mubr.bf16.mxu0 %v15522_v2  ;;  %9899 = vmatprep.mubr.bf16.mxu1 %v15523_v54  ;;  %v9358_v23 = vpop.f32.mrf.mxu0  ;;  %v15080_v51 = vld [vmem:[%s15924_s15 + $0x112c] ss:$16 sps:$4 sm:$0xff]   ;;  %v15078_v48 = vld [vmem:[%s15924_s15 + $0x1128] ss:$16 sps:$4 sm:$0xff]   ;;  %v15524_v2 = vld [vmem:[%s15926_s16 + $0x40] ss:$144 sps:$4 sm:$0xff]  }
 0x3bb   : > { %v9421_v6 = vpop.f32.mrf.mxu1  ;;  %v15083_v26 = vld [vmem:[%s15924_s15 + $0x132c] ss:$16 sps:$4 sm:$0xff]   ;;  %v15081_v63 = vld [vmem:[%s15924_s15 + $0x1328] ss:$16 sps:$4 sm:$0xff]  }
 0x3bc   : > { %9815 = vmatpush1.bf16.msra.mxu0 %v15024_v18  ;;  %9878 = vmatpush1.bf16.msra.mxu1 %v15027_v4  ;;  %v17411_v52 = vadd.f32 %v9421_v6, %v9358_v23  ;;  %v9360_v41 = vpop.f32.mrf.mxu0  ;;  %v15086_v25 = vld [vmem:[%s15924_s15 + $0x110c] ss:$16 sps:$4 sm:$0xff]   ;;  %v15084_v22 = vld [vmem:[%s15924_s15 + $0x1108] ss:$16 sps:$4 sm:$0xff]  }
 0x3bd   : > { %9816 = vmatprep.subr.bf16.mxu0 %v15032_v43  ;;  %9879 = vmatprep.subr.bf16.mxu1 %v15035_v39  ;;  %v9423_v1 = vpop.f32.mrf.mxu1  ;;  %v15089_v57 = vld [vmem:[%s15924_s15 + $0x130c] ss:$16 sps:$4 sm:$0xff]   ;;  %v15087_v8 = vld [vmem:[%s15924_s15 + $0x1308] ss:$16 sps:$4 sm:$0xff]  }
 0x3be   : > { %v17415_v24 = vadd.f32 %v9423_v1, %v9360_v41  ;;  %v15092_v49 = vld [vmem:[%s15924_s15 + $0x14ec] ss:$16 sps:$4 sm:$0xff]   ;;  %v15090_v18 = vld [vmem:[%s15924_s15 + $0x14e8] ss:$16 sps:$4 sm:$0xff]  }
 0x3bf   : > { %v15095_v27 = vld [vmem:[%s15924_s15 + $0x16ec] ss:$16 sps:$4 sm:$0xff]   ;;  %v15093_v4 = vld [vmem:[%s15924_s15 + $0x16e8] ss:$16 sps:$4 sm:$0xff]  }
 0x3c0   : > { %9817 = vmatpush1.bf16.msra.mxu0 %v15030_v3  ;;  %9880 = vmatpush1.bf16.msra.mxu1 %v15033_v28  ;;  %v15098_v43 = vld [vmem:[%s15924_s15 + $0x14cc] ss:$16 sps:$4 sm:$0xff]   ;;  %v15525_v54 = vld [vmem:[%s15926_s16 + $0x48] ss:$144 sps:$4 sm:$0xff]  }
 0x3c1   : > { %9818 = vmatprep.subr.bf16.mxu0 %v15038_v53  ;;  %9881 = vmatprep.subr.bf16.mxu1 %v15041_v44  ;;  %v15101_v39 = vld [vmem:[%s15924_s15 + $0x16cc] ss:$16 sps:$4 sm:$0xff]   ;;  %v15096_v6 = vld [vmem:[%s15924_s15 + $0x14c8] ss:$16 sps:$4 sm:$0xff]  }
 0x3c2   : > { %v15099_v3 = vld [vmem:[%s15924_s15 + $0x16c8] ss:$16 sps:$4 sm:$0xff]   ;;  %v15104_v44 = vld [vmem:[%s15924_s15 + $0x14ac] ss:$16 sps:$4 sm:$0xff]  }
 0x3c3   : > { %v15107_v41 = vld [vmem:[%s15924_s15 + $0x16ac] ss:$16 sps:$4 sm:$0xff]  }
 0x3c4   : > { %9819 = vmatpush1.bf16.msra.mxu0 %v15036_v29  ;;  %9882 = vmatpush1.bf16.msra.mxu1 %v15039_v5  ;;  %v15526_v5 = vld [vmem:[%s15926_s16 + $0x164] ss:$144 sps:$4 sm:$0xff]  }
 0x3c5   : > { %9820 = vmatprep.subr.bf16.mxu0 %v15044_v47  ;;  %9883 = vmatprep.subr.bf16.mxu1 %v15047_v55 }
 0x3c8   : > { %9821 = vmatpush2.bf16.msra.mxu0 %v15042_v11  ;;  %9884 = vmatpush2.bf16.msra.mxu1 %v15045_v50 }
 0x3c9   : > { %9822 = vmatprep.subr.bf16.mxu0 %v15050_v34  ;;  %9885 = vmatprep.subr.bf16.mxu1 %v15053_v0  ;;  %v15102_v34 = vld [vmem:[%s15924_s15 + $0x14a8] ss:$16 sps:$4 sm:$0xff]  }
 0x3ca   : > { %v15105_v0 = vld [vmem:[%s15924_s15 + $0x16a8] ss:$16 sps:$4 sm:$0xff]  }
 0x3cc   : > { %9823 = vmatpush2.bf16.msra.mxu0 %v15048_v58  ;;  %9886 = vmatpush2.bf16.msra.mxu1 %v15051_v9  ;;  %v15110_v9 = vld [vmem:[%s15924_s15 + $0x148c] ss:$16 sps:$4 sm:$0xff]  }
 0x3cd   : > { %9824 = vmatprep.subr.bf16.mxu0 %v15056_v60  ;;  %9887 = vmatprep.subr.bf16.mxu1 %v15059_v30  ;;  %v15113_v60 = vld [vmem:[%s15924_s15 + $0x168c] ss:$16 sps:$4 sm:$0xff]  }
 0x3d0   : > { %9825 = vmatpush2.bf16.msra.mxu0 %v15054_v32  ;;  %9888 = vmatpush2.bf16.msra.mxu1 %v15057_v13 }
 0x3d1   : > { %9826 = vmatprep.subr.bf16.mxu0 %v15062_v20  ;;  %9889 = vmatprep.subr.bf16.mxu1 %v15065_v14  ;;  %v15529_v14 = vld [vmem:[%s15926_s16 + $0x168] ss:$144 sps:$4 sm:$0xff]  }
 0x3d4   : > { %9827 = vmatpush2.bf16.msra.mxu0 %v15060_v40  ;;  %9890 = vmatpush2.bf16.msra.mxu1 %v15063_v19 }
 0x3d5   : > { %9828 = vmatprep.subr.bf16.mxu0 %v15068_v15  ;;  %9891 = vmatprep.subr.bf16.mxu1 %v15071_v42  ;;  %v15108_v15 = vld [vmem:[%s15924_s15 + $0x1488] ss:$16 sps:$4 sm:$0xff]  }
 0x3d6   : > { %v15111_v42 = vld [vmem:[%s15924_s15 + $0x1688] ss:$16 sps:$4 sm:$0xff]  }
 0x3d8   : > { %9829 = vmatpush2.bf16.msra.mxu0 %v15066_v16  ;;  %9892 = vmatpush2.bf16.msra.mxu1 %v15069_v31  ;;  %v15116_v31 = vld [vmem:[%s15924_s15 + $0x146c] ss:$16 sps:$4 sm:$0xff]  }
 0x3d9   : > { %9830 = vmatprep.subr.bf16.mxu0 %v15074_v7  ;;  %9893 = vmatprep.subr.bf16.mxu1 %v15077_v17  ;;  %v15119_v7 = vld [vmem:[%s15924_s15 + $0x166c] ss:$16 sps:$4 sm:$0xff]  }
 0x3dc   : > { %9831 = vmatpush2.bf16.msra.mxu0 %v15072_v45  ;;  %9894 = vmatpush2.bf16.msra.mxu1 %v15075_v21  ;;  %v15530_v21 = vld [vmem:[%s15926_s16 + $0x284] ss:$144 sps:$4 sm:$0xff]  }
 0x3dd   : > { %9832 = vmatprep.subr.bf16.mxu0 %v15080_v51  ;;  %9895 = vmatprep.subr.bf16.mxu1 %v15083_v26 }
 0x3e0   : > { %9833 = vmatpush2.bf16.msra.mxu0 %v15078_v48  ;;  %9896 = vmatpush2.bf16.msra.mxu1 %v15081_v63 }
 0x3e1   : > { %9834 = vmatprep.subr.bf16.mxu0 %v15086_v25  ;;  %9897 = vmatprep.subr.bf16.mxu1 %v15089_v57  ;;  %v15114_v25 = vld [vmem:[%s15924_s15 + $0x1468] ss:$16 sps:$4 sm:$0xff]  }
 0x3e4   : > { %9835 = vmatpush2.bf16.msra.mxu0 %v15084_v22  ;;  %9898 = vmatpush2.bf16.msra.mxu1 %v15087_v8  ;;  %v15122_v8 = vld [vmem:[%s15924_s15 + $0x144c] ss:$16 sps:$4 sm:$0xff]  }
 0x3e5   : > { %9930 = vmatprep.subr.bf16.mxu0 %v15092_v49  ;;  %9993 = vmatprep.subr.bf16.mxu1 %v15095_v27  ;;  %v15125_v49 = vld [vmem:[%s15924_s15 + $0x164c] ss:$16 sps:$4 sm:$0xff]  }
 0x3e6   : > { %v9460_v38 = vpop.f32.mrf.mxu0 }
 0x3e7   : > { %v9523_v10 = vpop.f32.mrf.mxu1  ;;  %9837 = vmatmul.mubr.bf16.vlgmr.msra.gmra.mxu0 %v15524_v2  ;;  %9900 = vmatmul.mubr.bf16.vlgmr.msra.gmra.mxu1 %v15525_v54  ;;  %v9461_v23 = vadd.f32 %v9460_v38, %v17359_v35  ;;  %v15527_v35 = vld [vmem:[%s15926_s16 + $0x16c] ss:$144 sps:$4 sm:$0xff]   ;;  %v15120_v2 = vld [vmem:[%s15924_s15 + $0x1448] ss:$16 sps:$4 sm:$0xff]  }
 0x3e8   : > { %9931 = vmatpush1.bf16.msra.mxu0 %v15090_v18  ;;  %9994 = vmatpush1.bf16.msra.mxu1 %v15093_v4  ;;  %v9462_v28 = vpop.f32.mrf.mxu0  ;;  %v15532_v4 = vld [vmem:[%s15926_s16 + $0x280] ss:$144 sps:$4 sm:$0xff]  }
 0x3e9   : > { %v9525_v53 = vpop.f32.mrf.mxu1  ;;  %9932 = vmatprep.subr.bf16.mxu0 %v15098_v43  ;;  %9995 = vmatprep.subr.bf16.mxu1 %v15101_v39  ;;  %v17464_v1 = vadd.f32 %v9523_v10, %v9461_v23  ;;  %v9463_v29 = vadd.f32 %v9462_v28, %v17365_v62  ;;  %v15533_v39 = vld [vmem:[%s15926_s16 + $0x288] ss:$144 sps:$4 sm:$0xff]  }
 0x3ea   : > { %9846 = vmatprep.mubr.bf16.mxu0 %v15526_v5  ;;  %9909 = vmatprep.mubr.bf16.mxu1 %v15527_v35  ;;  %v9464_v47 = vpop.f32.mrf.mxu0 }
 0x3eb   : > { %v9527_v55 = vpop.f32.mrf.mxu1  ;;  %v17469_v11 = vadd.f32 %v9525_v53, %v9463_v29  ;;  %v9465_v50 = vadd.f32 %v9464_v47, %v17369_v46  ;;  %v15528_v46 = vld [vmem:[%s15926_s16 + $0x160] ss:$144 sps:$4 sm:$0xff]   ;;  %v15126_v47 = vld [vmem:[%s15924_s15 + $0x1428] ss:$16 sps:$4 sm:$0xff]  }
 0x3ec   : > { %9933 = vmatpush1.bf16.msra.mxu0 %v15096_v6  ;;  %9996 = vmatpush1.bf16.msra.mxu1 %v15099_v3  ;;  %v9466_v58 = vpop.f32.mrf.mxu0  ;;  %v15128_v6 = vld [vmem:[%s15924_s15 + $0x142c] ss:$16 sps:$4 sm:$0xff]  }
 0x3ed   : > { %v9529_v62 = vpop.f32.mrf.mxu1  ;;  %9934 = vmatprep.subr.bf16.mxu0 %v15104_v44  ;;  %9997 = vmatprep.subr.bf16.mxu1 %v15107_v41  ;;  %v17476_v30 = vadd.f32 %v9527_v55, %v9465_v50  ;;  %v9467_v32 = vadd.f32 %v9466_v58, %v17375_v33  ;;  %v15131_v3 = vld [vmem:[%s15924_s15 + $0x162c] ss:$16 sps:$4 sm:$0xff]  }
 0x3ee   : > { %v9470_v13 = vpop.f32.mrf.mxu0  ;;  %v15535_v44 = vld [vmem:[%s15926_s16 + $0x5c] ss:$144 sps:$4 sm:$0xff]  }
 0x3ef   : > { %9847 = vmatmul.mubr.bf16.gmra.mxu0 %v15528_v46  ;;  %v9533_v20 = vpop.f32.mrf.mxu1  ;;  %9910 = vmatmul.mubr.bf16.gmra.mxu1 %v15529_v14  ;;  %v17481_v40 = vadd.f32 %v9529_v62, %v9467_v32  ;;  %v9471_v19 = vadd.f32 %v9470_v13, %v17381_v56  ;;  %v15531_v56 = vld [vmem:[%s15926_s16 + $0x28c] ss:$144 sps:$4 sm:$0xff]   ;;  %v15141_v46 = vld [vmem:[%s15924_s15 + $0x17e8] ss:$16 sps:$4 sm:$0xff]  }
 0x3f0   : > { %9935 = vmatpush1.bf16.msra.mxu0 %v15102_v34  ;;  %9998 = vmatpush1.bf16.msra.mxu1 %v15105_v0  ;;  %v9472_v16 = vpop.f32.mrf.mxu0  ;;  %v15134_v34 = vld [vmem:[%s15924_s15 + $0x140c] ss:$16 sps:$4 sm:$0xff]  }
 0x3f1   : > { %v9535_v33 = vpop.f32.mrf.mxu1  ;;  %9936 = vmatprep.subr.bf16.mxu0 %v15110_v9  ;;  %9999 = vmatprep.subr.bf16.mxu1 %v15113_v60  ;;  %v9473_v17 = vadd.f32 %v9472_v16, %v17387_v61  ;;  %v17489_v45 = vadd.f32 %v9533_v20, %v9471_v19  ;;  %v15117_v61 = vld [vmem:[%s15924_s15 + $0x1668] ss:$16 sps:$4 sm:$0xff]   ;;  %v15137_v0 = vld [vmem:[%s15924_s15 + $0x160c] ss:$16 sps:$4 sm:$0xff]  }
 0x3f2   : > { %9856 = vmatprep.mubr.bf16.mxu0 %v15530_v21  ;;  %9919 = vmatprep.mubr.bf16.mxu1 %v15531_v56  ;;  %v9474_v51 = vpop.f32.mrf.mxu0  ;;  %v15132_v9 = vld [vmem:[%s15924_s15 + $0x1408] ss:$16 sps:$4 sm:$0xff]   ;;  %v15140_v32 = vld [vmem:[%s15924_s15 + $0x15ec] ss:$16 sps:$4 sm:$0xff]  }
 0x3f3   : > { %v9537_v26 = vpop.f32.mrf.mxu1  ;;  %v9475_v48 = vadd.f32 %v9474_v51, %v17391_v59  ;;  %v17494_v63 = vadd.f32 %v9535_v33, %v9473_v17  ;;  %v15135_v60 = vld [vmem:[%s15924_s15 + $0x1608] ss:$16 sps:$4 sm:$0xff]   ;;  %v15143_v13 = vld [vmem:[%s15924_s15 + $0x17ec] ss:$16 sps:$4 sm:$0xff]  }
 0x3f4   : > { %9937 = vmatpush1.bf16.msra.mxu0 %v15108_v15  ;;  %10000 = vmatpush1.bf16.msra.mxu1 %v15111_v42  ;;  %v9476_v57 = vpop.f32.mrf.mxu0  ;;  %v15146_v20 = vld [vmem:[%s15924_s15 + $0x15cc] ss:$16 sps:$4 sm:$0xff]   ;;  %v15144_v19 = vld [vmem:[%s15924_s15 + $0x15c8] ss:$16 sps:$4 sm:$0xff]  }
 0x3f5   : > { %v9539_v22 = vpop.f32.mrf.mxu1  ;;  %9938 = vmatprep.subr.bf16.mxu0 %v15116_v31  ;;  %10001 = vmatprep.subr.bf16.mxu1 %v15119_v7  ;;  %v9477_v27 = vadd.f32 %v9476_v57, %v17395_v12  ;;  %v17501_v18 = vadd.f32 %v9537_v26, %v9475_v48  ;;  %v15123_v12 = vld [vmem:[%s15924_s15 + $0x1648] ss:$16 sps:$4 sm:$0xff]   ;;  %v15149_v14 = vld [vmem:[%s15924_s15 + $0x17cc] ss:$16 sps:$4 sm:$0xff]  }
 0x3f6   : > { %v9480_v59 = vpop.f32.mrf.mxu0  ;;  %v15147_v15 = vld [vmem:[%s15924_s15 + $0x17c8] ss:$16 sps:$4 sm:$0xff]   ;;  %v15152_v42 = vld [vmem:[%s15924_s15 + $0x15ac] ss:$16 sps:$4 sm:$0xff]  }
 0x3f7   : > { %9857 = vmatmul.mubr.bf16.gmra.mxu0 %v15532_v4  ;;  %v9543_v43 = vpop.f32.mrf.mxu1  ;;  %9920 = vmatmul.mubr.bf16.gmra.mxu1 %v15533_v39  ;;  %v9481_v38 = vadd.f32 %v9480_v59, %v17401_v37  ;;  %v17506_v10 = vadd.f32 %v9539_v22, %v9477_v27  ;;  %v15534_v37 = vld [vmem:[%s15926_s16 + $0x54] ss:$144 sps:$4 sm:$0xff]   ;;  %v15155_v16 = vld [vmem:[%s15924_s15 + $0x17ac] ss:$16 sps:$4 sm:$0xff]   ;;  %v15150_v33 = vld [vmem:[%s15924_s15 + $0x15a8] ss:$16 sps:$4 sm:$0xff]  }
 0x3f8   : > { %9939 = vmatpush1.bf16.msra.mxu0 %v15114_v25  ;;  %10002 = vmatpush1.bf16.msra.mxu1 %v15117_v61  ;;  %v9482_v54 = vpop.f32.mrf.mxu0  ;;  %v15153_v31 = vld [vmem:[%s15924_s15 + $0x17a8] ss:$16 sps:$4 sm:$0xff]   ;;  %v15158_v7 = vld [vmem:[%s15924_s15 + $0x158c] ss:$16 sps:$4 sm:$0xff]  }
 0x3f9   : > { %v9545_v23 = vpop.f32.mrf.mxu1  ;;  %9940 = vmatprep.subr.bf16.mxu0 %v15122_v8  ;;  %10003 = vmatprep.subr.bf16.mxu1 %v15125_v49  ;;  %v9483_v28 = vadd.f32 %v9482_v54, %v17405_v36  ;;  %v17513_v53 = vadd.f32 %v9543_v43, %v9481_v38  ;;  %v15129_v36 = vld [vmem:[%s15924_s15 + $0x1628] ss:$16 sps:$4 sm:$0xff]   ;;  %v15161_v17 = vld [vmem:[%s15924_s15 + $0x178c] ss:$16 sps:$4 sm:$0xff]  }
 0x3fa   : > { %9962 = vmatprep.mubr.bf16.mxu0 %v15534_v37  ;;  %10025 = vmatprep.mubr.bf16.mxu1 %v15535_v44  ;;  %v9484_v41 = vpop.f32.mrf.mxu0  ;;  %v15156_v21 = vld [vmem:[%s15924_s15 + $0x1588] ss:$16 sps:$4 sm:$0xff]   ;;  %v15164_v51 = vld [vmem:[%s15924_s15 + $0x156c] ss:$16 sps:$4 sm:$0xff]  }
 0x3fb   : > { %v9547_v29 = vpop.f32.mrf.mxu1  ;;  %v9485_v5 = vadd.f32 %v9484_v41, %v17411_v52  ;;  %v17518_v35 = vadd.f32 %v9545_v23, %v9483_v28  ;;  %v15159_v56 = vld [vmem:[%s15924_s15 + $0x1788] ss:$16 sps:$4 sm:$0xff]   ;;  %v15167_v26 = vld [vmem:[%s15924_s15 + $0x176c] ss:$16 sps:$4 sm:$0xff]   ;;  %v15536_v41 = vld [vmem:[%s15926_s16 + $0x50] ss:$144 sps:$4 sm:$0xff]  }
 0x3fc   : > { %9941 = vmatpush1.bf16.msra.mxu0 %v15120_v2  ;;  %10004 = vmatpush1.bf16.msra.mxu1 %v15123_v12  ;;  %v9486_v55 = vpop.f32.mrf.mxu0  ;;  %v15162_v48 = vld [vmem:[%s15924_s15 + $0x1568] ss:$16 sps:$4 sm:$0xff]   ;;  %v15170_v61 = vld [vmem:[%s15924_s15 + $0x154c] ss:$16 sps:$4 sm:$0xff]  }
 0x3fd   : > { %v9549_v50 = vpop.f32.mrf.mxu1  ;;  %9942 = vmatprep.subr.bf16.mxu0 %v15128_v6  ;;  %10005 = vmatprep.subr.bf16.mxu1 %v15131_v3  ;;  %v9487_v52 = vadd.f32 %v9486_v55, %v17415_v24  ;;  %v17525_v58 = vadd.f32 %v9547_v29, %v9485_v5  ;;  %v15138_v24 = vld [vmem:[%s15924_s15 + $0x15e8] ss:$16 sps:$4 sm:$0xff]   ;;  %v15173_v57 = vld [vmem:[%s15924_s15 + $0x174c] ss:$16 sps:$4 sm:$0xff]  }
 0x3fe   : > { %v15165_v25 = vld [vmem:[%s15924_s15 + $0x1768] ss:$16 sps:$4 sm:$0xff]   ;;  %v15176_v49 = vld [vmem:[%s15924_s15 + $0x152c] ss:$16 sps:$4 sm:$0xff]  }
 0x3ff   : > { %v17527_v62 = vadd.f32 %v9549_v50, %v9487_v52  ;;  %v15168_v22 = vld [vmem:[%s15924_s15 + $0x1548] ss:$16 sps:$4 sm:$0xff]   ;;  %v15179_v27 = vld [vmem:[%s15924_s15 + $0x172c] ss:$16 sps:$4 sm:$0xff]  }
 0x400   : > { %9943 = vmatpush1.bf16.msra.mxu0 %v15126_v47  ;;  %10006 = vmatpush1.bf16.msra.mxu1 %v15129_v36  ;;  %v15171_v8 = vld [vmem:[%s15924_s15 + $0x1748] ss:$16 sps:$4 sm:$0xff]   ;;  %v15182_v43 = vld [vmem:[%s15924_s15 + $0x150c] ss:$16 sps:$4 sm:$0xff]  }
 0x401   : > { %9944 = vmatprep.subr.bf16.mxu0 %v15134_v34  ;;  %10007 = vmatprep.subr.bf16.mxu1 %v15137_v0  ;;  %v15174_v59 = vld [vmem:[%s15924_s15 + $0x1528] ss:$16 sps:$4 sm:$0xff]   ;;  %v15185_v39 = vld [vmem:[%s15924_s15 + $0x170c] ss:$16 sps:$4 sm:$0xff]  }
 0x402   : > { %v15177_v4 = vld [vmem:[%s15924_s15 + $0x1728] ss:$16 sps:$4 sm:$0xff]   ;;  %v15188_v12 = vld [vmem:[%s15924_s15 + $0x18ec] ss:$16 sps:$4 sm:$0xff]  }
 0x403   : > { %v15180_v38 = vld [vmem:[%s15924_s15 + $0x1508] ss:$16 sps:$4 sm:$0xff]   ;;  %v15191_v54 = vld [vmem:[%s15924_s15 + $0x1aec] ss:$16 sps:$4 sm:$0xff]  }
 0x404   : > { %9945 = vmatpush1.bf16.msra.mxu0 %v15132_v9  ;;  %10008 = vmatpush1.bf16.msra.mxu1 %v15135_v60  ;;  %v15183_v2 = vld [vmem:[%s15924_s15 + $0x1708] ss:$16 sps:$4 sm:$0xff]   ;;  %v15194_v3 = vld [vmem:[%s15924_s15 + $0x18cc] ss:$16 sps:$4 sm:$0xff]   ;;  %v15538_v60 = vld [vmem:[%s15926_s16 + $0x174] ss:$144 sps:$4 sm:$0xff]  }
 0x405   : > { %9946 = vmatprep.subr.bf16.mxu0 %v15140_v32  ;;  %10009 = vmatprep.subr.bf16.mxu1 %v15143_v13  ;;  %v15186_v23 = vld [vmem:[%s15924_s15 + $0x18e8] ss:$16 sps:$4 sm:$0xff]   ;;  %v15197_v28 = vld [vmem:[%s15924_s15 + $0x1acc] ss:$16 sps:$4 sm:$0xff]  }
 0x406   : > { %v15189_v6 = vld [vmem:[%s15924_s15 + $0x1ae8] ss:$16 sps:$4 sm:$0xff]   ;;  %v15200_v34 = vld [vmem:[%s15924_s15 + $0x18ac] ss:$16 sps:$4 sm:$0xff]  }
 0x407   : > { %v15537_v29 = vld [vmem:[%s15926_s16 + $0x58] ss:$144 sps:$4 sm:$0xff]   ;;  %v15203_v0 = vld [vmem:[%s15924_s15 + $0x1aac] ss:$16 sps:$4 sm:$0xff]  }
 0x408   : > { %9947 = vmatpush2.bf16.msra.mxu0 %v15138_v24  ;;  %10010 = vmatpush2.bf16.msra.mxu1 %v15141_v46  ;;  %v15192_v47 = vld [vmem:[%s15924_s15 + $0x18c8] ss:$16 sps:$4 sm:$0xff]  }
 0x409   : > { %9948 = vmatprep.subr.bf16.mxu0 %v15146_v20  ;;  %10011 = vmatprep.subr.bf16.mxu1 %v15149_v14  ;;  %v15195_v36 = vld [vmem:[%s15924_s15 + $0x1ac8] ss:$16 sps:$4 sm:$0xff]  }
 0x40a   : > { %v15198_v20 = vld [vmem:[%s15924_s15 + $0x18a8] ss:$16 sps:$4 sm:$0xff]  }
 0x40b   : > { %v15201_v14 = vld [vmem:[%s15924_s15 + $0x1aa8] ss:$16 sps:$4 sm:$0xff]  }
 0x40c   : > { %9949 = vmatpush2.bf16.msra.mxu0 %v15144_v19  ;;  %10012 = vmatpush2.bf16.msra.mxu1 %v15147_v15  ;;  %v15206_v15 = vld [vmem:[%s15924_s15 + $0x188c] ss:$16 sps:$4 sm:$0xff]  }
 0x40d   : > { %9950 = vmatprep.subr.bf16.mxu0 %v15152_v42  ;;  %10013 = vmatprep.subr.bf16.mxu1 %v15155_v16  ;;  %v15209_v42 = vld [vmem:[%s15924_s15 + $0x1a8c] ss:$16 sps:$4 sm:$0xff]  }
 0x410   : > { %9951 = vmatpush2.bf16.msra.mxu0 %v15150_v33  ;;  %10014 = vmatpush2.bf16.msra.mxu1 %v15153_v31 }
 0x411   : > { %9952 = vmatprep.subr.bf16.mxu0 %v15158_v7  ;;  %10015 = vmatprep.subr.bf16.mxu1 %v15161_v17  ;;  %v15541_v17 = vld [vmem:[%s15926_s16 + $0x178] ss:$144 sps:$4 sm:$0xff]  }
 0x414   : > { %9953 = vmatpush2.bf16.msra.mxu0 %v15156_v21  ;;  %10016 = vmatpush2.bf16.msra.mxu1 %v15159_v56 }
 0x415   : > { %9954 = vmatprep.subr.bf16.mxu0 %v15164_v51  ;;  %10017 = vmatprep.subr.bf16.mxu1 %v15167_v26  ;;  %v15204_v51 = vld [vmem:[%s15924_s15 + $0x1888] ss:$16 sps:$4 sm:$0xff]  }
 0x416   : > { %v15207_v26 = vld [vmem:[%s15924_s15 + $0x1a88] ss:$16 sps:$4 sm:$0xff]  }
 0x418   : > { %9955 = vmatpush2.bf16.msra.mxu0 %v15162_v48  ;;  %10018 = vmatpush2.bf16.msra.mxu1 %v15165_v25  ;;  %v15212_v25 = vld [vmem:[%s15924_s15 + $0x186c] ss:$16 sps:$4 sm:$0xff]  }
 0x419   : > { %9956 = vmatprep.subr.bf16.mxu0 %v15170_v61  ;;  %10019 = vmatprep.subr.bf16.mxu1 %v15173_v57  ;;  %v15215_v61 = vld [vmem:[%s15924_s15 + $0x1a6c] ss:$16 sps:$4 sm:$0xff]  }
 0x41c   : > { %9957 = vmatpush2.bf16.msra.mxu0 %v15168_v22  ;;  %10020 = vmatpush2.bf16.msra.mxu1 %v15171_v8  ;;  %v15542_v8 = vld [vmem:[%s15926_s16 + $0x294] ss:$144 sps:$4 sm:$0xff]  }
 0x41d   : > { %9958 = vmatprep.subr.bf16.mxu0 %v15176_v49  ;;  %10021 = vmatprep.subr.bf16.mxu1 %v15179_v27 }
 0x420   : > { %9959 = vmatpush2.bf16.msra.mxu0 %v15174_v59  ;;  %10022 = vmatpush2.bf16.msra.mxu1 %v15177_v4 }
 0x421   : > { %9960 = vmatprep.subr.bf16.mxu0 %v15182_v43  ;;  %10023 = vmatprep.subr.bf16.mxu1 %v15185_v39  ;;  %v15210_v43 = vld [vmem:[%s15924_s15 + $0x1868] ss:$16 sps:$4 sm:$0xff]  }
 0x424   : > { %9961 = vmatpush2.bf16.msra.mxu0 %v15180_v38  ;;  %10024 = vmatpush2.bf16.msra.mxu1 %v15183_v2  ;;  %v15218_v2 = vld [vmem:[%s15924_s15 + $0x184c] ss:$16 sps:$4 sm:$0xff]  }
 0x425   : > { %10056 = vmatprep.subr.bf16.mxu0 %v15188_v12  ;;  %10119 = vmatprep.subr.bf16.mxu1 %v15191_v54  ;;  %v15221_v12 = vld [vmem:[%s15924_s15 + $0x1a4c] ss:$16 sps:$4 sm:$0xff]  }
 0x426   : > { %v9586_v37 = vpop.f32.mrf.mxu0 }
 0x427   : > { %v9649_v44 = vpop.f32.mrf.mxu1  ;;  %9963 = vmatmul.mubr.bf16.vlgmr.msra.gmra.mxu0 %v15536_v41  ;;  %10026 = vmatmul.mubr.bf16.vlgmr.msra.gmra.mxu1 %v15537_v29  ;;  %v9587_v5 = vadd.f32 %v9586_v37, %v17464_v1  ;;  %v15539_v1 = vld [vmem:[%s15926_s16 + $0x17c] ss:$144 sps:$4 sm:$0xff]   ;;  %v15216_v41 = vld [vmem:[%s15924_s15 + $0x1848] ss:$16 sps:$4 sm:$0xff]  }
 0x428   : > { %10057 = vmatpush1.bf16.msra.mxu0 %v15186_v23  ;;  %10120 = vmatpush1.bf16.msra.mxu1 %v15189_v6  ;;  %v9588_v55 = vpop.f32.mrf.mxu0  ;;  %v15544_v6 = vld [vmem:[%s15926_s16 + $0x290] ss:$144 sps:$4 sm:$0xff]  }
 0x429   : > { %v9651_v50 = vpop.f32.mrf.mxu1  ;;  %10058 = vmatprep.subr.bf16.mxu0 %v15194_v3  ;;  %10121 = vmatprep.subr.bf16.mxu1 %v15197_v28  ;;  %v17576_v52 = vadd.f32 %v9649_v44, %v9587_v5  ;;  %v9589_v9 = vadd.f32 %v9588_v55, %v17469_v11  ;;  %v15545_v28 = vld [vmem:[%s15926_s16 + $0x298] ss:$144 sps:$4 sm:$0xff]  }
 0x42a   : > { %9972 = vmatprep.mubr.bf16.mxu0 %v15538_v60  ;;  %10035 = vmatprep.mubr.bf16.mxu1 %v15539_v1  ;;  %v9590_v32 = vpop.f32.mrf.mxu0 }
 0x42b   : > { %v9653_v13 = vpop.f32.mrf.mxu1  ;;  %v17581_v24 = vadd.f32 %v9651_v50, %v9589_v9  ;;  %v9591_v46 = vadd.f32 %v9590_v32, %v17476_v30  ;;  %v15540_v30 = vld [vmem:[%s15926_s16 + $0x170] ss:$144 sps:$4 sm:$0xff]   ;;  %v15222_v32 = vld [vmem:[%s15924_s15 + $0x1828] ss:$16 sps:$4 sm:$0xff]  }
 0x42c   : > { %10059 = vmatpush1.bf16.msra.mxu0 %v15192_v47  ;;  %10122 = vmatpush1.bf16.msra.mxu1 %v15195_v36  ;;  %v9592_v19 = vpop.f32.mrf.mxu0  ;;  %v15224_v47 = vld [vmem:[%s15924_s15 + $0x182c] ss:$16 sps:$4 sm:$0xff]  }
 0x42d   : > { %v9655_v11 = vpop.f32.mrf.mxu1  ;;  %10060 = vmatprep.subr.bf16.mxu0 %v15200_v34  ;;  %10123 = vmatprep.subr.bf16.mxu1 %v15203_v0  ;;  %v17588_v16 = vadd.f32 %v9653_v13, %v9591_v46  ;;  %v9593_v33 = vadd.f32 %v9592_v19, %v17481_v40  ;;  %v15227_v36 = vld [vmem:[%s15924_s15 + $0x1a2c] ss:$16 sps:$4 sm:$0xff]  }
 0x42e   : > { %v9596_v31 = vpop.f32.mrf.mxu0  ;;  %v15547_v34 = vld [vmem:[%s15926_s16 + $0x6c] ss:$144 sps:$4 sm:$0xff]  }
 0x42f   : > { %9973 = vmatmul.mubr.bf16.gmra.mxu0 %v15540_v30  ;;  %v9659_v7 = vpop.f32.mrf.mxu1  ;;  %10036 = vmatmul.mubr.bf16.gmra.mxu1 %v15541_v17  ;;  %v17593_v21 = vadd.f32 %v9655_v11, %v9593_v33  ;;  %v9597_v56 = vadd.f32 %v9596_v31, %v17489_v45  ;;  %v15543_v45 = vld [vmem:[%s15926_s16 + $0x29c] ss:$144 sps:$4 sm:$0xff]   ;;  %v15237_v30 = vld [vmem:[%s15924_s15 + $0x1be8] ss:$16 sps:$4 sm:$0xff]  }
 0x430   : > { %10061 = vmatpush1.bf16.msra.mxu0 %v15198_v20  ;;  %10124 = vmatpush1.bf16.msra.mxu1 %v15201_v14  ;;  %v9598_v48 = vpop.f32.mrf.mxu0  ;;  %v15230_v20 = vld [vmem:[%s15924_s15 + $0x180c] ss:$16 sps:$4 sm:$0xff]  }
 0x431   : > { %v9661_v40 = vpop.f32.mrf.mxu1  ;;  %10062 = vmatprep.subr.bf16.mxu0 %v15206_v15  ;;  %10125 = vmatprep.subr.bf16.mxu1 %v15209_v42  ;;  %v9599_v57 = vadd.f32 %v9598_v48, %v17494_v63  ;;  %v17601_v22 = vadd.f32 %v9659_v7, %v9597_v56  ;;  %v15213_v63 = vld [vmem:[%s15924_s15 + $0x1a68] ss:$16 sps:$4 sm:$0xff]   ;;  %v15233_v14 = vld [vmem:[%s15924_s15 + $0x1a0c] ss:$16 sps:$4 sm:$0xff]  }
 0x432   : > { %9982 = vmatprep.mubr.bf16.mxu0 %v15542_v8  ;;  %10045 = vmatprep.mubr.bf16.mxu1 %v15543_v45  ;;  %v9600_v49 = vpop.f32.mrf.mxu0  ;;  %v15228_v15 = vld [vmem:[%s15924_s15 + $0x1808] ss:$16 sps:$4 sm:$0xff]   ;;  %v15236_v33 = vld [vmem:[%s15924_s15 + $0x19ec] ss:$16 sps:$4 sm:$0xff]  }
 0x433   : > { %v9663_v27 = vpop.f32.mrf.mxu1  ;;  %v9601_v59 = vadd.f32 %v9600_v49, %v17501_v18  ;;  %v17606_v4 = vadd.f32 %v9661_v40, %v9599_v57  ;;  %v15231_v42 = vld [vmem:[%s15924_s15 + $0x1a08] ss:$16 sps:$4 sm:$0xff]   ;;  %v15239_v31 = vld [vmem:[%s15924_s15 + $0x1bec] ss:$16 sps:$4 sm:$0xff]  }
 0x434   : > { %10063 = vmatpush1.bf16.msra.mxu0 %v15204_v51  ;;  %10126 = vmatpush1.bf16.msra.mxu1 %v15207_v26  ;;  %v9602_v39 = vpop.f32.mrf.mxu0  ;;  %v15242_v7 = vld [vmem:[%s15924_s15 + $0x19cc] ss:$16 sps:$4 sm:$0xff]   ;;  %v15240_v56 = vld [vmem:[%s15924_s15 + $0x19c8] ss:$16 sps:$4 sm:$0xff]  }
 0x435   : > { %v9665_v38 = vpop.f32.mrf.mxu1  ;;  %10064 = vmatprep.subr.bf16.mxu0 %v15212_v25  ;;  %10127 = vmatprep.subr.bf16.mxu1 %v15215_v61  ;;  %v9603_v54 = vadd.f32 %v9602_v39, %v17506_v10  ;;  %v17613_v23 = vadd.f32 %v9663_v27, %v9601_v59  ;;  %v15219_v10 = vld [vmem:[%s15924_s15 + $0x1a48] ss:$16 sps:$4 sm:$0xff]   ;;  %v15245_v17 = vld [vmem:[%s15924_s15 + $0x1bcc] ss:$16 sps:$4 sm:$0xff]  }
 0x436   : > { %v9606_v18 = vpop.f32.mrf.mxu0  ;;  %v15243_v51 = vld [vmem:[%s15924_s15 + $0x1bc8] ss:$16 sps:$4 sm:$0xff]   ;;  %v15248_v26 = vld [vmem:[%s15924_s15 + $0x19ac] ss:$16 sps:$4 sm:$0xff]  }
 0x437   : > { %9983 = vmatmul.mubr.bf16.gmra.mxu0 %v15544_v6  ;;  %v9669_v3 = vpop.f32.mrf.mxu1  ;;  %10046 = vmatmul.mubr.bf16.gmra.mxu1 %v15545_v28  ;;  %v9607_v37 = vadd.f32 %v9606_v18, %v17513_v53  ;;  %v17618_v44 = vadd.f32 %v9665_v38, %v9603_v54  ;;  %v15546_v53 = vld [vmem:[%s15926_s16 + $0x64] ss:$144 sps:$4 sm:$0xff]   ;;  %v15251_v48 = vld [vmem:[%s15924_s15 + $0x1bac] ss:$16 sps:$4 sm:$0xff]   ;;  %v15246_v40 = vld [vmem:[%s15924_s15 + $0x19a8] ss:$16 sps:$4 sm:$0xff]  }
 0x438   : > { %10065 = vmatpush1.bf16.msra.mxu0 %v15210_v43  ;;  %10128 = vmatpush1.bf16.msra.mxu1 %v15213_v63  ;;  %v9608_v29 = vpop.f32.mrf.mxu0  ;;  %v15249_v25 = vld [vmem:[%s15924_s15 + $0x1ba8] ss:$16 sps:$4 sm:$0xff]   ;;  %v15254_v61 = vld [vmem:[%s15924_s15 + $0x198c] ss:$16 sps:$4 sm:$0xff]  }
 0x439   : > { %v9671_v5 = vpop.f32.mrf.mxu1  ;;  %10066 = vmatprep.subr.bf16.mxu0 %v15218_v2  ;;  %10129 = vmatprep.subr.bf16.mxu1 %v15221_v12  ;;  %v9609_v55 = vadd.f32 %v9608_v29, %v17518_v35  ;;  %v17625_v50 = vadd.f32 %v9669_v3, %v9607_v37  ;;  %v15225_v35 = vld [vmem:[%s15924_s15 + $0x1a28] ss:$16 sps:$4 sm:$0xff]   ;;  %v15257_v57 = vld [vmem:[%s15924_s15 + $0x1b8c] ss:$16 sps:$4 sm:$0xff]  }
 0x43a   : > { %10088 = vmatprep.mubr.bf16.mxu0 %v15546_v53  ;;  %10151 = vmatprep.mubr.bf16.mxu1 %v15547_v34  ;;  %v9610_v0 = vpop.f32.mrf.mxu0  ;;  %v15252_v8 = vld [vmem:[%s15924_s15 + $0x1988] ss:$16 sps:$4 sm:$0xff]   ;;  %v15260_v49 = vld [vmem:[%s15924_s15 + $0x196c] ss:$16 sps:$4 sm:$0xff]  }
 0x43b   : > { %v9673_v9 = vpop.f32.mrf.mxu1  ;;  %v9611_v60 = vadd.f32 %v9610_v0, %v17525_v58  ;;  %v17630_v1 = vadd.f32 %v9671_v5, %v9609_v55  ;;  %v15255_v45 = vld [vmem:[%s15924_s15 + $0x1b88] ss:$16 sps:$4 sm:$0xff]   ;;  %v15263_v27 = vld [vmem:[%s15924_s15 + $0x1b6c] ss:$16 sps:$4 sm:$0xff]   ;;  %v15548_v0 = vld [vmem:[%s15926_s16 + $0x60] ss:$144 sps:$4 sm:$0xff]  }
 0x43c   : > { %10067 = vmatpush1.bf16.msra.mxu0 %v15216_v41  ;;  %10130 = vmatpush1.bf16.msra.mxu1 %v15219_v10  ;;  %v9612_v13 = vpop.f32.mrf.mxu0  ;;  %v15258_v59 = vld [vmem:[%s15924_s15 + $0x1968] ss:$16 sps:$4 sm:$0xff]   ;;  %v15266_v63 = vld [vmem:[%s15924_s15 + $0x194c] ss:$16 sps:$4 sm:$0xff]  }
 0x43d   : > { %v9675_v46 = vpop.f32.mrf.mxu1  ;;  %10068 = vmatprep.subr.bf16.mxu0 %v15224_v47  ;;  %10131 = vmatprep.subr.bf16.mxu1 %v15227_v36  ;;  %v9613_v58 = vadd.f32 %v9612_v13, %v17527_v62  ;;  %v17637_v19 = vadd.f32 %v9673_v9, %v9611_v60  ;;  %v15234_v62 = vld [vmem:[%s15924_s15 + $0x19e8] ss:$16 sps:$4 sm:$0xff]   ;;  %v15269_v39 = vld [vmem:[%s15924_s15 + $0x1b4c] ss:$16 sps:$4 sm:$0xff]  }
 0x43e   : > { %v15261_v43 = vld [vmem:[%s15924_s15 + $0x1b68] ss:$16 sps:$4 sm:$0xff]   ;;  %v15272_v12 = vld [vmem:[%s15924_s15 + $0x192c] ss:$16 sps:$4 sm:$0xff]  }
 0x43f   : > { %v17639_v11 = vadd.f32 %v9675_v46, %v9613_v58  ;;  %v15264_v38 = vld [vmem:[%s15924_s15 + $0x1948] ss:$16 sps:$4 sm:$0xff]   ;;  %v15275_v54 = vld [vmem:[%s15924_s15 + $0x1b2c] ss:$16 sps:$4 sm:$0xff]  }
 0x440   : > { %10069 = vmatpush1.bf16.msra.mxu0 %v15222_v32  ;;  %10132 = vmatpush1.bf16.msra.mxu1 %v15225_v35  ;;  %v15267_v2 = vld [vmem:[%s15924_s15 + $0x1b48] ss:$16 sps:$4 sm:$0xff]   ;;  %v15278_v3 = vld [vmem:[%s15924_s15 + $0x190c] ss:$16 sps:$4 sm:$0xff]  }
 0x441   : > { %10070 = vmatprep.subr.bf16.mxu0 %v15230_v20  ;;  %10133 = vmatprep.subr.bf16.mxu1 %v15233_v14  ;;  %v15270_v18 = vld [vmem:[%s15924_s15 + $0x1928] ss:$16 sps:$4 sm:$0xff]   ;;  %v15281_v28 = vld [vmem:[%s15924_s15 + $0x1b0c] ss:$16 sps:$4 sm:$0xff]  }
 0x442   : > { %v15273_v6 = vld [vmem:[%s15924_s15 + $0x1b28] ss:$16 sps:$4 sm:$0xff]   ;;  %v15284_v10 = vld [vmem:[%s15924_s15 + $0x1cec] ss:$16 sps:$4 sm:$0xff]  }
 0x443   : > { %v15276_v37 = vld [vmem:[%s15924_s15 + $0x1908] ss:$16 sps:$4 sm:$0xff]   ;;  %v15287_v29 = vld [vmem:[%s15924_s15 + $0x1eec] ss:$16 sps:$4 sm:$0xff]  }
 0x444   : > { %10071 = vmatpush1.bf16.msra.mxu0 %v15228_v15  ;;  %10134 = vmatpush1.bf16.msra.mxu1 %v15231_v42  ;;  %v15279_v41 = vld [vmem:[%s15924_s15 + $0x1b08] ss:$16 sps:$4 sm:$0xff]   ;;  %v15290_v36 = vld [vmem:[%s15924_s15 + $0x1ccc] ss:$16 sps:$4 sm:$0xff]   ;;  %v15550_v42 = vld [vmem:[%s15926_s16 + $0x184] ss:$144 sps:$4 sm:$0xff]  }
 0x445   : > { %10072 = vmatprep.subr.bf16.mxu0 %v15236_v33  ;;  %10135 = vmatprep.subr.bf16.mxu1 %v15239_v31  ;;  %v15282_v5 = vld [vmem:[%s15924_s15 + $0x1ce8] ss:$16 sps:$4 sm:$0xff]   ;;  %v15293_v55 = vld [vmem:[%s15924_s15 + $0x1ecc] ss:$16 sps:$4 sm:$0xff]  }
 0x446   : > { %v15285_v47 = vld [vmem:[%s15924_s15 + $0x1ee8] ss:$16 sps:$4 sm:$0xff]   ;;  %v15296_v20 = vld [vmem:[%s15924_s15 + $0x1cac] ss:$16 sps:$4 sm:$0xff]  }
 0x447   : > { %v15549_v9 = vld [vmem:[%s15926_s16 + $0x68] ss:$144 sps:$4 sm:$0xff]   ;;  %v15299_v14 = vld [vmem:[%s15924_s15 + $0x1eac] ss:$16 sps:$4 sm:$0xff]  }
 0x448   : > { %10073 = vmatpush2.bf16.msra.mxu0 %v15234_v62  ;;  %10136 = vmatpush2.bf16.msra.mxu1 %v15237_v30  ;;  %v15288_v32 = vld [vmem:[%s15924_s15 + $0x1cc8] ss:$16 sps:$4 sm:$0xff]  }
 0x449   : > { %10074 = vmatprep.subr.bf16.mxu0 %v15242_v7  ;;  %10137 = vmatprep.subr.bf16.mxu1 %v15245_v17  ;;  %v15291_v35 = vld [vmem:[%s15924_s15 + $0x1ec8] ss:$16 sps:$4 sm:$0xff]  }
 0x44a   : > { %v15294_v7 = vld [vmem:[%s15924_s15 + $0x1ca8] ss:$16 sps:$4 sm:$0xff]  }
 0x44b   : > { %v15297_v17 = vld [vmem:[%s15924_s15 + $0x1ea8] ss:$16 sps:$4 sm:$0xff]  }
 0x44c   : > { %10075 = vmatpush2.bf16.msra.mxu0 %v15240_v56  ;;  %10138 = vmatpush2.bf16.msra.mxu1 %v15243_v51  ;;  %v15302_v51 = vld [vmem:[%s15924_s15 + $0x1c8c] ss:$16 sps:$4 sm:$0xff]  }
 0x44d   : > { %10076 = vmatprep.subr.bf16.mxu0 %v15248_v26  ;;  %10139 = vmatprep.subr.bf16.mxu1 %v15251_v48  ;;  %v15305_v26 = vld [vmem:[%s15924_s15 + $0x1e8c] ss:$16 sps:$4 sm:$0xff]  }
 0x450   : > { %10077 = vmatpush2.bf16.msra.mxu0 %v15246_v40  ;;  %10140 = vmatpush2.bf16.msra.mxu1 %v15249_v25 }
 0x451   : > { %10078 = vmatprep.subr.bf16.mxu0 %v15254_v61  ;;  %10141 = vmatprep.subr.bf16.mxu1 %v15257_v57  ;;  %v15553_v57 = vld [vmem:[%s15926_s16 + $0x188] ss:$144 sps:$4 sm:$0xff]  }
 0x454   : > { %10079 = vmatpush2.bf16.msra.mxu0 %v15252_v8  ;;  %10142 = vmatpush2.bf16.msra.mxu1 %v15255_v45 }
 0x455   : > { %10080 = vmatprep.subr.bf16.mxu0 %v15260_v49  ;;  %10143 = vmatprep.subr.bf16.mxu1 %v15263_v27  ;;  %v15300_v49 = vld [vmem:[%s15924_s15 + $0x1c88] ss:$16 sps:$4 sm:$0xff]  }
 0x456   : > { %v15303_v27 = vld [vmem:[%s15924_s15 + $0x1e88] ss:$16 sps:$4 sm:$0xff]  }
 0x458   : > { %10081 = vmatpush2.bf16.msra.mxu0 %v15258_v59  ;;  %10144 = vmatpush2.bf16.msra.mxu1 %v15261_v43  ;;  %v15308_v43 = vld [vmem:[%s15924_s15 + $0x1c6c] ss:$16 sps:$4 sm:$0xff]  }
 0x459   : > { %10082 = vmatprep.subr.bf16.mxu0 %v15266_v63  ;;  %10145 = vmatprep.subr.bf16.mxu1 %v15269_v39  ;;  %v15311_v63 = vld [vmem:[%s15924_s15 + $0x1e6c] ss:$16 sps:$4 sm:$0xff]  }
 0x45c   : > { %10083 = vmatpush2.bf16.msra.mxu0 %v15264_v38  ;;  %10146 = vmatpush2.bf16.msra.mxu1 %v15267_v2  ;;  %v15554_v2 = vld [vmem:[%s15926_s16 + $0x2a4] ss:$144 sps:$4 sm:$0xff]  }
 0x45d   : > { %10084 = vmatprep.subr.bf16.mxu0 %v15272_v12  ;;  %10147 = vmatprep.subr.bf16.mxu1 %v15275_v54 }
 0x460   : > { %10085 = vmatpush2.bf16.msra.mxu0 %v15270_v18  ;;  %10148 = vmatpush2.bf16.msra.mxu1 %v15273_v6 }
 0x461   : > { %10086 = vmatprep.subr.bf16.mxu0 %v15278_v3  ;;  %10149 = vmatprep.subr.bf16.mxu1 %v15281_v28  ;;  %v15306_v3 = vld [vmem:[%s15924_s15 + $0x1c68] ss:$16 sps:$4 sm:$0xff]  }
 0x464   : > { %10087 = vmatpush2.bf16.msra.mxu0 %v15276_v37  ;;  %10150 = vmatpush2.bf16.msra.mxu1 %v15279_v41  ;;  %v15314_v41 = vld [vmem:[%s15924_s15 + $0x1c4c] ss:$16 sps:$4 sm:$0xff]  }
 0x465   : > { %10182 = vmatprep.subr.bf16.mxu0 %v15284_v10  ;;  %10245 = vmatprep.subr.bf16.mxu1 %v15287_v29  ;;  %v15317_v10 = vld [vmem:[%s15924_s15 + $0x1e4c] ss:$16 sps:$4 sm:$0xff]  }
 0x467   : > { %v9712_v53 = vpop.f32.mrf.mxu0  ;;  %v9775_v34 = vpop.f32.mrf.mxu1  ;;  %10089 = vmatmul.mubr.bf16.vlgmr.msra.gmra.mxu0 %v15548_v0  ;;  %10152 = vmatmul.mubr.bf16.vlgmr.msra.gmra.mxu1 %v15549_v9  ;;  %v15312_v0 = vld [vmem:[%s15924_s15 + $0x1c48] ss:$16 sps:$4 sm:$0xff]  }
 0x468   : > { %v9713_v60 = vadd.f32 %v9712_v53, %v17576_v52  ;;  %10183 = vmatpush1.bf16.msra.mxu0 %v15282_v5  ;;  %10246 = vmatpush1.bf16.msra.mxu1 %v15285_v47  ;;  %v15551_v52 = vld [vmem:[%s15926_s16 + $0x18c] ss:$144 sps:$4 sm:$0xff]   ;;  %v15556_v47 = vld [vmem:[%s15926_s16 + $0x2a0] ss:$144 sps:$4 sm:$0xff]  }
 0x469   : > { %v9714_v13 = vpop.f32.mrf.mxu0  ;;  %v9777_v46 = vpop.f32.mrf.mxu1  ;;  %10184 = vmatprep.subr.bf16.mxu0 %v15290_v36  ;;  %10247 = vmatprep.subr.bf16.mxu1 %v15293_v55  ;;  %v15557_v55 = vld [vmem:[%s15926_s16 + $0x2a8] ss:$144 sps:$4 sm:$0xff]  }
 0x46a   : > { %v17688_v58 = vadd.f32 %v9775_v34, %v9713_v60  ;;  %v9715_v15 = vadd.f32 %v9714_v13, %v17581_v24  ;;  %10098 = vmatprep.mubr.bf16.mxu0 %v15550_v42  ;;  %10161 = vmatprep.mubr.bf16.mxu1 %v15551_v52 }
 0x46b   : > { %v9716_v33 = vpop.f32.mrf.mxu0  ;;  %v9779_v31 = vpop.f32.mrf.mxu1 }
 0x46c   : > { %v17693_v62 = vadd.f32 %v9777_v46, %v9715_v15  ;;  %v9717_v30 = vadd.f32 %v9716_v33, %v17588_v16  ;;  %10185 = vmatpush1.bf16.msra.mxu0 %v15288_v32  ;;  %10248 = vmatpush1.bf16.msra.mxu1 %v15291_v35  ;;  %v15552_v16 = vld [vmem:[%s15926_s16 + $0x180] ss:$144 sps:$4 sm:$0xff]   ;;  %v15320_v32 = vld [vmem:[%s15924_s15 + $0x1c2c] ss:$16 sps:$4 sm:$0xff]   ;;  %v15318_v33 = vld [vmem:[%s15924_s15 + $0x1c28] ss:$16 sps:$4 sm:$0xff]  }
 0x46d   : > { %v9718_v56 = vpop.f32.mrf.mxu0  ;;  %v9781_v24 = vpop.f32.mrf.mxu1  ;;  %10186 = vmatprep.subr.bf16.mxu0 %v15296_v20  ;;  %10249 = vmatprep.subr.bf16.mxu1 %v15299_v14  ;;  %v15323_v35 = vld [vmem:[%s15924_s15 + $0x1e2c] ss:$16 sps:$4 sm:$0xff]  }
 0x46e   : > { %v17700_v48 = vadd.f32 %v9779_v31, %v9717_v30  ;;  %v9719_v40 = vadd.f32 %v9718_v56, %v17593_v21  ;;  %v15559_v20 = vld [vmem:[%s15926_s16 + $0x7c] ss:$144 sps:$4 sm:$0xff]  }
 0x46f   : > { %v9722_v25 = vpop.f32.mrf.mxu0  ;;  %10099 = vmatmul.mubr.bf16.gmra.mxu0 %v15552_v16  ;;  %v9785_v61 = vpop.f32.mrf.mxu1  ;;  %10162 = vmatmul.mubr.bf16.gmra.mxu1 %v15553_v57  ;;  %v15333_v16 = vld [vmem:[%s15924_s15 + $0x1fe8] ss:$16 sps:$4 sm:$0xff]   ;;  %v15341_v57 = vld [vmem:[%s15924_s15 + $0x1fcc] ss:$16 sps:$4 sm:$0xff]  }
 0x470   : > { %v17705_v8 = vadd.f32 %v9781_v24, %v9719_v40  ;;  %v9723_v45 = vadd.f32 %v9722_v25, %v17601_v22  ;;  %10187 = vmatpush1.bf16.msra.mxu0 %v15294_v7  ;;  %10250 = vmatpush1.bf16.msra.mxu1 %v15297_v17  ;;  %v15555_v22 = vld [vmem:[%s15926_s16 + $0x2ac] ss:$144 sps:$4 sm:$0xff]  }
 0x471   : > { %v9724_v59 = vpop.f32.mrf.mxu0  ;;  %v9787_v21 = vpop.f32.mrf.mxu1  ;;  %10188 = vmatprep.subr.bf16.mxu0 %v15302_v51  ;;  %10251 = vmatprep.subr.bf16.mxu1 %v15305_v26  ;;  %v15326_v7 = vld [vmem:[%s15924_s15 + $0x1c0c] ss:$16 sps:$4 sm:$0xff]   ;;  %v15324_v51 = vld [vmem:[%s15924_s15 + $0x1c08] ss:$16 sps:$4 sm:$0xff]  }
 0x472   : > { %v9725_v39 = vadd.f32 %v9724_v59, %v17606_v4  ;;  %v17713_v38 = vadd.f32 %v9785_v61, %v9723_v45  ;;  %10108 = vmatprep.mubr.bf16.mxu0 %v15554_v2  ;;  %10171 = vmatprep.mubr.bf16.mxu1 %v15555_v22  ;;  %v15309_v4 = vld [vmem:[%s15924_s15 + $0x1e68] ss:$16 sps:$4 sm:$0xff]   ;;  %v15329_v17 = vld [vmem:[%s15924_s15 + $0x1e0c] ss:$16 sps:$4 sm:$0xff]  }
 0x473   : > { %v9726_v12 = vpop.f32.mrf.mxu0  ;;  %v9789_v54 = vpop.f32.mrf.mxu1  ;;  %v15327_v26 = vld [vmem:[%s15924_s15 + $0x1e08] ss:$16 sps:$4 sm:$0xff]   ;;  %v15332_v40 = vld [vmem:[%s15924_s15 + $0x1dec] ss:$16 sps:$4 sm:$0xff]  }
 0x474   : > { %v9727_v18 = vadd.f32 %v9726_v12, %v17613_v23  ;;  %v17718_v6 = vadd.f32 %v9787_v21, %v9725_v39  ;;  %10189 = vmatpush1.bf16.msra.mxu0 %v15300_v49  ;;  %10252 = vmatpush1.bf16.msra.mxu1 %v15303_v27  ;;  %v15335_v25 = vld [vmem:[%s15924_s15 + $0x1fec] ss:$16 sps:$4 sm:$0xff]   ;;  %v15336_v45 = vld [vmem:[%s15924_s15 + $0x1dc8] ss:$16 sps:$4 sm:$0xff]  }
 0x475   : > { %v9728_v28 = vpop.f32.mrf.mxu0  ;;  %v9791_v37 = vpop.f32.mrf.mxu1  ;;  %10190 = vmatprep.subr.bf16.mxu0 %v15308_v43  ;;  %10253 = vmatprep.subr.bf16.mxu1 %v15311_v63  ;;  %v15338_v61 = vld [vmem:[%s15924_s15 + $0x1dcc] ss:$16 sps:$4 sm:$0xff]   ;;  %v15339_v49 = vld [vmem:[%s15924_s15 + $0x1fc8] ss:$16 sps:$4 sm:$0xff]  }
 0x476   : > { %v9729_v29 = vadd.f32 %v9728_v28, %v17618_v44  ;;  %v17725_v5 = vadd.f32 %v9789_v54, %v9727_v18  ;;  %v15315_v44 = vld [vmem:[%s15924_s15 + $0x1e48] ss:$16 sps:$4 sm:$0xff]   ;;  %v15344_v27 = vld [vmem:[%s15924_s15 + $0x1dac] ss:$16 sps:$4 sm:$0xff]  }
 0x477   : > { %v9732_v23 = vpop.f32.mrf.mxu0  ;;  %10109 = vmatmul.mubr.bf16.gmra.mxu0 %v15556_v47  ;;  %v9795_v36 = vpop.f32.mrf.mxu1  ;;  %10172 = vmatmul.mubr.bf16.gmra.mxu1 %v15557_v55  ;;  %v15347_v59 = vld [vmem:[%s15924_s15 + $0x1fac] ss:$16 sps:$4 sm:$0xff]   ;;  %v15342_v21 = vld [vmem:[%s15924_s15 + $0x1da8] ss:$16 sps:$4 sm:$0xff]  }
 0x478   : > { %v9733_v53 = vadd.f32 %v9732_v23, %v17625_v50  ;;  %v17730_v34 = vadd.f32 %v9791_v37, %v9729_v29  ;;  %10191 = vmatpush1.bf16.msra.mxu0 %v15306_v3  ;;  %10254 = vmatpush1.bf16.msra.mxu1 %v15309_v4  ;;  %v15558_v50 = vld [vmem:[%s15926_s16 + $0x74] ss:$144 sps:$4 sm:$0xff]   ;;  %v15345_v43 = vld [vmem:[%s15924_s15 + $0x1fa8] ss:$16 sps:$4 sm:$0xff]   ;;  %v15350_v63 = vld [vmem:[%s15924_s15 + $0x1d8c] ss:$16 sps:$4 sm:$0xff]  }
 0x479   : > { %v9734_v9 = vpop.f32.mrf.mxu0  ;;  %v9797_v60 = vpop.f32.mrf.mxu1  ;;  %10192 = vmatprep.subr.bf16.mxu0 %v15314_v41  ;;  %10255 = vmatprep.subr.bf16.mxu1 %v15317_v10  ;;  %v15353_v39 = vld [vmem:[%s15924_s15 + $0x1f8c] ss:$16 sps:$4 sm:$0xff]   ;;  %v15348_v2 = vld [vmem:[%s15924_s15 + $0x1d88] ss:$16 sps:$4 sm:$0xff]  }
 0x47a   : > { %v9735_v13 = vadd.f32 %v9734_v9, %v17630_v1  ;;  %v17737_v46 = vadd.f32 %v9795_v36, %v9733_v53  ;;  %10214 = vmatprep.mubr.bf16.mxu0 %v15558_v50  ;;  %10277 = vmatprep.mubr.bf16.mxu1 %v15559_v20  ;;  %v15321_v1 = vld [vmem:[%s15924_s15 + $0x1e28] ss:$16 sps:$4 sm:$0xff]   ;;  %v15356_v12 = vld [vmem:[%s15924_s15 + $0x1d6c] ss:$16 sps:$4 sm:$0xff]  }
 0x47b   : > { %v9736_v14 = vpop.f32.mrf.mxu0  ;;  %v9799_v15 = vpop.f32.mrf.mxu1  ;;  %v15351_v22 = vld [vmem:[%s15924_s15 + $0x1f88] ss:$16 sps:$4 sm:$0xff]   ;;  %v15359_v54 = vld [vmem:[%s15924_s15 + $0x1f6c] ss:$16 sps:$4 sm:$0xff]  }
 0x47c   : > { %v9737_v42 = vadd.f32 %v9736_v14, %v17637_v19  ;;  %v17742_v52 = vadd.f32 %v9797_v60, %v9735_v13  ;;  %10193 = vmatpush1.bf16.msra.mxu0 %v15312_v0  ;;  %10256 = vmatpush1.bf16.msra.mxu1 %v15315_v44  ;;  %v15354_v18 = vld [vmem:[%s15924_s15 + $0x1d68] ss:$16 sps:$4 sm:$0xff]   ;;  %v15362_v4 = vld [vmem:[%s15924_s15 + $0x1d4c] ss:$16 sps:$4 sm:$0xff]   ;;  %v15560_v14 = vld [vmem:[%s15926_s16 + $0x70] ss:$144 sps:$4 sm:$0xff]  }
 0x47d   : > { %v9738_v31 = vpop.f32.mrf.mxu0  ;;  %v9801_v30 = vpop.f32.mrf.mxu1  ;;  %10194 = vmatprep.subr.bf16.mxu0 %v15320_v32  ;;  %10257 = vmatprep.subr.bf16.mxu1 %v15323_v35  ;;  %v15357_v3 = vld [vmem:[%s15924_s15 + $0x1f68] ss:$16 sps:$4 sm:$0xff]   ;;  %v15365_v28 = vld [vmem:[%s15924_s15 + $0x1f4c] ss:$16 sps:$4 sm:$0xff]  }
 0x47e   : > { %v9739_v19 = vadd.f32 %v9738_v31, %v17639_v11  ;;  %v17749_v56 = vadd.f32 %v9799_v15, %v9737_v42  ;;  %v15330_v11 = vld [vmem:[%s15924_s15 + $0x1de8] ss:$16 sps:$4 sm:$0xff]   ;;  %v15368_v10 = vld [vmem:[%s15924_s15 + $0x1d2c] ss:$16 sps:$4 sm:$0xff]  }
 0x47f   : > { %v15360_v37 = vld [vmem:[%s15924_s15 + $0x1d48] ss:$16 sps:$4 sm:$0xff]   ;;  %v15371_v29 = vld [vmem:[%s15924_s15 + $0x1f2c] ss:$16 sps:$4 sm:$0xff]  }
 0x480   : > { %v17751_v24 = vadd.f32 %v9801_v30, %v9739_v19  ;;  %10195 = vmatpush1.bf16.msra.mxu0 %v15318_v33  ;;  %10258 = vmatpush1.bf16.msra.mxu1 %v15321_v1  ;;  %v15363_v41 = vld [vmem:[%s15924_s15 + $0x1f48] ss:$16 sps:$4 sm:$0xff]   ;;  %v15374_v36 = vld [vmem:[%s15924_s15 + $0x1d0c] ss:$16 sps:$4 sm:$0xff]  }
 0x481   : > { %10196 = vmatprep.subr.bf16.mxu0 %v15326_v7  ;;  %10259 = vmatprep.subr.bf16.mxu1 %v15329_v17  ;;  %v15366_v23 = vld [vmem:[%s15924_s15 + $0x1d28] ss:$16 sps:$4 sm:$0xff]   ;;  %v15377_v55 = vld [vmem:[%s15924_s15 + $0x1f0c] ss:$16 sps:$4 sm:$0xff]  }
 0x482   : > { %v15369_v47 = vld [vmem:[%s15924_s15 + $0x1f28] ss:$16 sps:$4 sm:$0xff]   ;;  %v15380_v44 = vld [vmem:[%s15924_s15 + $0x20ec] ss:$16 sps:$4 sm:$0xff]  }
 0x483   : > { %v15372_v53 = vld [vmem:[%s15924_s15 + $0x1d08] ss:$16 sps:$4 sm:$0xff]   ;;  %v15383_v9 = vld [vmem:[%s15924_s15 + $0x22ec] ss:$16 sps:$4 sm:$0xff]  }
 0x484   : > { %10197 = vmatpush1.bf16.msra.mxu0 %v15324_v51  ;;  %10260 = vmatpush1.bf16.msra.mxu1 %v15327_v26  ;;  %v15375_v0 = vld [vmem:[%s15924_s15 + $0x1f08] ss:$16 sps:$4 sm:$0xff]   ;;  %v15386_v35 = vld [vmem:[%s15924_s15 + $0x20cc] ss:$16 sps:$4 sm:$0xff]   ;;  %v15562_v26 = vld [vmem:[%s15926_s16 + $0x194] ss:$144 sps:$4 sm:$0xff]  }
 0x485   : > { %10198 = vmatprep.subr.bf16.mxu0 %v15332_v40  ;;  %10261 = vmatprep.subr.bf16.mxu1 %v15335_v25  ;;  %v15378_v60 = vld [vmem:[%s15924_s15 + $0x20e8] ss:$16 sps:$4 sm:$0xff]   ;;  %v15389_v13 = vld [vmem:[%s15924_s15 + $0x22cc] ss:$16 sps:$4 sm:$0xff]  }
 0x486   : > { %v15381_v32 = vld [vmem:[%s15924_s15 + $0x22e8] ss:$16 sps:$4 sm:$0xff]   ;;  %v15392_v7 = vld [vmem:[%s15924_s15 + $0x20ac] ss:$16 sps:$4 sm:$0xff]  }
 0x487   : > { %v15561_v15 = vld [vmem:[%s15926_s16 + $0x78] ss:$144 sps:$4 sm:$0xff]   ;;  %v15395_v17 = vld [vmem:[%s15924_s15 + $0x22ac] ss:$16 sps:$4 sm:$0xff]  }
 0x488   : > { %10199 = vmatpush2.bf16.msra.mxu0 %v15330_v11  ;;  %10262 = vmatpush2.bf16.msra.mxu1 %v15333_v16  ;;  %v15384_v33 = vld [vmem:[%s15924_s15 + $0x20c8] ss:$16 sps:$4 sm:$0xff]  }
 0x489   : > { %10200 = vmatprep.subr.bf16.mxu0 %v15338_v61  ;;  %10263 = vmatprep.subr.bf16.mxu1 %v15341_v57  ;;  %v15387_v1 = vld [vmem:[%s15924_s15 + $0x22c8] ss:$16 sps:$4 sm:$0xff]  }
 0x48a   : > { %v15390_v61 = vld [vmem:[%s15924_s15 + $0x20a8] ss:$16 sps:$4 sm:$0xff]  }
 0x48b   : > { %v15393_v57 = vld [vmem:[%s15924_s15 + $0x22a8] ss:$16 sps:$4 sm:$0xff]  }
 0x48c   : > { %10201 = vmatpush2.bf16.msra.mxu0 %v15336_v45  ;;  %10264 = vmatpush2.bf16.msra.mxu1 %v15339_v49  ;;  %v15398_v49 = vld [vmem:[%s15924_s15 + $0x208c] ss:$16 sps:$4 sm:$0xff]  }
 0x48d   : > { %10202 = vmatprep.subr.bf16.mxu0 %v15344_v27  ;;  %10265 = vmatprep.subr.bf16.mxu1 %v15347_v59  ;;  %v15401_v27 = vld [vmem:[%s15924_s15 + $0x228c] ss:$16 sps:$4 sm:$0xff]  }
 0x490   : > { %10203 = vmatpush2.bf16.msra.mxu0 %v15342_v21  ;;  %10266 = vmatpush2.bf16.msra.mxu1 %v15345_v43 }
 0x491   : > { %10204 = vmatprep.subr.bf16.mxu0 %v15350_v63  ;;  %10267 = vmatprep.subr.bf16.mxu1 %v15353_v39  ;;  %v15565_v39 = vld [vmem:[%s15926_s16 + $0x198] ss:$144 sps:$4 sm:$0xff]  }
 0x494   : > { %10205 = vmatpush2.bf16.msra.mxu0 %v15348_v2  ;;  %10268 = vmatpush2.bf16.msra.mxu1 %v15351_v22 }
 0x495   : > { %10206 = vmatprep.subr.bf16.mxu0 %v15356_v12  ;;  %10269 = vmatprep.subr.bf16.mxu1 %v15359_v54  ;;  %v15396_v12 = vld [vmem:[%s15924_s15 + $0x2088] ss:$16 sps:$4 sm:$0xff]  }
 0x496   : > { %v15399_v54 = vld [vmem:[%s15924_s15 + $0x2288] ss:$16 sps:$4 sm:$0xff]  }
 0x498   : > { %10207 = vmatpush2.bf16.msra.mxu0 %v15354_v18  ;;  %10270 = vmatpush2.bf16.msra.mxu1 %v15357_v3  ;;  %v15404_v3 = vld [vmem:[%s15924_s15 + $0x206c] ss:$16 sps:$4 sm:$0xff]  }
 0x499   : > { %10208 = vmatprep.subr.bf16.mxu0 %v15362_v4  ;;  %10271 = vmatprep.subr.bf16.mxu1 %v15365_v28  ;;  %v15407_v4 = vld [vmem:[%s15924_s15 + $0x226c] ss:$16 sps:$4 sm:$0xff]  }
 0x49c   : > { %10209 = vmatpush2.bf16.msra.mxu0 %v15360_v37  ;;  %10272 = vmatpush2.bf16.msra.mxu1 %v15363_v41  ;;  %v15566_v41 = vld [vmem:[%s15926_s16 + $0x2b4] ss:$144 sps:$4 sm:$0xff]  }
 0x49d   : > { %10210 = vmatprep.subr.bf16.mxu0 %v15368_v10  ;;  %10273 = vmatprep.subr.bf16.mxu1 %v15371_v29 }
 0x4a0   : > { %10211 = vmatpush2.bf16.msra.mxu0 %v15366_v23  ;;  %10274 = vmatpush2.bf16.msra.mxu1 %v15369_v47 }
 0x4a1   : > { %10212 = vmatprep.subr.bf16.mxu0 %v15374_v36  ;;  %10275 = vmatprep.subr.bf16.mxu1 %v15377_v55  ;;  %v15402_v36 = vld [vmem:[%s15924_s15 + $0x2068] ss:$16 sps:$4 sm:$0xff]  }
 0x4a4   : > { %10213 = vmatpush2.bf16.msra.mxu0 %v15372_v53  ;;  %10276 = vmatpush2.bf16.msra.mxu1 %v15375_v0  ;;  %v15410_v0 = vld [vmem:[%s15924_s15 + $0x204c] ss:$16 sps:$4 sm:$0xff]  }
 0x4a5   : > { %10308 = vmatprep.subr.bf16.mxu0 %v15380_v44  ;;  %10371 = vmatprep.subr.bf16.mxu1 %v15383_v9  ;;  %v15413_v44 = vld [vmem:[%s15924_s15 + $0x224c] ss:$16 sps:$4 sm:$0xff]  }
 0x4a7   : > { %v9838_v50 = vpop.f32.mrf.mxu0  ;;  %v9901_v20 = vpop.f32.mrf.mxu1  ;;  %10215 = vmatmul.mubr.bf16.vlgmr.msra.gmra.mxu0 %v15560_v14  ;;  %10278 = vmatmul.mubr.bf16.vlgmr.msra.gmra.mxu1 %v15561_v15  ;;  %v15408_v14 = vld [vmem:[%s15924_s15 + $0x2048] ss:$16 sps:$4 sm:$0xff]  }
 0x4a8   : > { %v9839_v42 = vadd.f32 %v9838_v50, %v17688_v58  ;;  %10309 = vmatpush1.bf16.msra.mxu0 %v15378_v60  ;;  %10372 = vmatpush1.bf16.msra.mxu1 %v15381_v32  ;;  %v15563_v58 = vld [vmem:[%s15926_s16 + $0x19c] ss:$144 sps:$4 sm:$0xff]   ;;  %v15568_v32 = vld [vmem:[%s15926_s16 + $0x2b0] ss:$144 sps:$4 sm:$0xff]  }
 0x4a9   : > { %v9840_v31 = vpop.f32.mrf.mxu0  ;;  %v9903_v30 = vpop.f32.mrf.mxu1  ;;  %10310 = vmatprep.subr.bf16.mxu0 %v15386_v35  ;;  %10373 = vmatprep.subr.bf16.mxu1 %v15389_v13  ;;  %v15569_v13 = vld [vmem:[%s15926_s16 + $0x2b8] ss:$144 sps:$4 sm:$0xff]  }
 0x4aa   : > { %v17800_v19 = vadd.f32 %v9901_v20, %v9839_v42  ;;  %v9841_v51 = vadd.f32 %v9840_v31, %v17693_v62  ;;  %10224 = vmatprep.mubr.bf16.mxu0 %v15562_v26  ;;  %10287 = vmatprep.mubr.bf16.mxu1 %v15563_v58 }
 0x4ab   : > { %v9842_v40 = vpop.f32.mrf.mxu0  ;;  %v9905_v25 = vpop.f32.mrf.mxu1 }
 0x4ac   : > { %v17805_v11 = vadd.f32 %v9903_v30, %v9841_v51  ;;  %v9843_v16 = vadd.f32 %v9842_v40, %v17700_v48  ;;  %10311 = vmatpush1.bf16.msra.mxu0 %v15384_v33  ;;  %10374 = vmatpush1.bf16.msra.mxu1 %v15387_v1  ;;  %v15564_v48 = vld [vmem:[%s15926_s16 + $0x190] ss:$144 sps:$4 sm:$0xff]   ;;  %v15416_v33 = vld [vmem:[%s15924_s15 + $0x202c] ss:$16 sps:$4 sm:$0xff]   ;;  %v15414_v40 = vld [vmem:[%s15924_s15 + $0x2028] ss:$16 sps:$4 sm:$0xff]  }
 0x4ad   : > { %v9844_v45 = vpop.f32.mrf.mxu0  ;;  %v9907_v62 = vpop.f32.mrf.mxu1  ;;  %10312 = vmatprep.subr.bf16.mxu0 %v15392_v7  ;;  %10375 = vmatprep.subr.bf16.mxu1 %v15395_v17  ;;  %v15419_v1 = vld [vmem:[%s15924_s15 + $0x222c] ss:$16 sps:$4 sm:$0xff]  }
 0x4ae   : > { %v17812_v59 = vadd.f32 %v9905_v25, %v9843_v16  ;;  %v9845_v21 = vadd.f32 %v9844_v45, %v17705_v8  ;;  %v15571_v7 = vld [vmem:[%s15926_s16 + $0x8c] ss:$144 sps:$4 sm:$0xff]  }
 0x4af   : > { %v9848_v43 = vpop.f32.mrf.mxu0  ;;  %10225 = vmatmul.mubr.bf16.gmra.mxu0 %v15564_v48  ;;  %v9911_v63 = vpop.f32.mrf.mxu1  ;;  %10288 = vmatmul.mubr.bf16.gmra.mxu1 %v15565_v39  ;;  %v15429_v48 = vld [vmem:[%s15924_s15 + $0x23e8] ss:$16 sps:$4 sm:$0xff]   ;;  %v15437_v39 = vld [vmem:[%s15924_s15 + $0x23cc] ss:$16 sps:$4 sm:$0xff]  }
 0x4b0   : > { %v17817_v2 = vadd.f32 %v9907_v62, %v9845_v21  ;;  %v9849_v22 = vadd.f32 %v9848_v43, %v17713_v38  ;;  %10313 = vmatpush1.bf16.msra.mxu0 %v15390_v61  ;;  %10376 = vmatpush1.bf16.msra.mxu1 %v15393_v57  ;;  %v15567_v38 = vld [vmem:[%s15926_s16 + $0x2bc] ss:$144 sps:$4 sm:$0xff]  }
 0x4b1   : > { %v9850_v18 = vpop.f32.mrf.mxu0  ;;  %v9913_v8 = vpop.f32.mrf.mxu1  ;;  %10314 = vmatprep.subr.bf16.mxu0 %v15398_v49  ;;  %10377 = vmatprep.subr.bf16.mxu1 %v15401_v27  ;;  %v15422_v61 = vld [vmem:[%s15924_s15 + $0x200c] ss:$16 sps:$4 sm:$0xff]   ;;  %v15420_v49 = vld [vmem:[%s15924_s15 + $0x2008] ss:$16 sps:$4 sm:$0xff]  }
 0x4b2   : > { %v9851_v28 = vadd.f32 %v9850_v18, %v17718_v6  ;;  %v17825_v37 = vadd.f32 %v9911_v63, %v9849_v22  ;;  %10234 = vmatprep.mubr.bf16.mxu0 %v15566_v41  ;;  %10297 = vmatprep.mubr.bf16.mxu1 %v15567_v38  ;;  %v15405_v6 = vld [vmem:[%s15924_s15 + $0x2268] ss:$16 sps:$4 sm:$0xff]   ;;  %v15425_v57 = vld [vmem:[%s15924_s15 + $0x220c] ss:$16 sps:$4 sm:$0xff]  }
 0x4b3   : > { %v9852_v10 = vpop.f32.mrf.mxu0  ;;  %v9915_v29 = vpop.f32.mrf.mxu1  ;;  %v15423_v27 = vld [vmem:[%s15924_s15 + $0x2208] ss:$16 sps:$4 sm:$0xff]   ;;  %v15428_v21 = vld [vmem:[%s15924_s15 + $0x21ec] ss:$16 sps:$4 sm:$0xff]  }
 0x4b4   : > { %v9853_v23 = vadd.f32 %v9852_v10, %v17725_v5  ;;  %v17830_v47 = vadd.f32 %v9913_v8, %v9851_v28  ;;  %10315 = vmatpush1.bf16.msra.mxu0 %v15396_v12  ;;  %10378 = vmatpush1.bf16.msra.mxu1 %v15399_v54  ;;  %v15431_v43 = vld [vmem:[%s15924_s15 + $0x23ec] ss:$16 sps:$4 sm:$0xff]   ;;  %v15432_v22 = vld [vmem:[%s15924_s15 + $0x21c8] ss:$16 sps:$4 sm:$0xff]  }
 0x4b5   : > { %v9854_v55 = vpop.f32.mrf.mxu0  ;;  %v9917_v53 = vpop.f32.mrf.mxu1  ;;  %10316 = vmatprep.subr.bf16.mxu0 %v15404_v3  ;;  %10379 = vmatprep.subr.bf16.mxu1 %v15407_v4  ;;  %v15434_v63 = vld [vmem:[%s15924_s15 + $0x21cc] ss:$16 sps:$4 sm:$0xff]   ;;  %v15435_v12 = vld [vmem:[%s15924_s15 + $0x23c8] ss:$16 sps:$4 sm:$0xff]  }
 0x4b6   : > { %v9855_v9 = vadd.f32 %v9854_v55, %v17730_v34  ;;  %v17837_v60 = vadd.f32 %v9915_v29, %v9853_v23  ;;  %v15411_v34 = vld [vmem:[%s15924_s15 + $0x2248] ss:$16 sps:$4 sm:$0xff]   ;;  %v15440_v54 = vld [vmem:[%s15924_s15 + $0x21ac] ss:$16 sps:$4 sm:$0xff]  }
 0x4b7   : > { %v9858_v5 = vpop.f32.mrf.mxu0  ;;  %10235 = vmatmul.mubr.bf16.gmra.mxu0 %v15568_v32  ;;  %v9921_v35 = vpop.f32.mrf.mxu1  ;;  %10298 = vmatmul.mubr.bf16.gmra.mxu1 %v15569_v13  ;;  %v15443_v18 = vld [vmem:[%s15924_s15 + $0x23ac] ss:$16 sps:$4 sm:$0xff]   ;;  %v15438_v8 = vld [vmem:[%s15924_s15 + $0x21a8] ss:$16 sps:$4 sm:$0xff]  }
 0x4b8   : > { %v9859_v50 = vadd.f32 %v9858_v5, %v17737_v46  ;;  %v17842_v20 = vadd.f32 %v9917_v53, %v9855_v9  ;;  %10317 = vmatpush1.bf16.msra.mxu0 %v15402_v36  ;;  %10380 = vmatpush1.bf16.msra.mxu1 %v15405_v6  ;;  %v15570_v46 = vld [vmem:[%s15926_s16 + $0x84] ss:$144 sps:$4 sm:$0xff]   ;;  %v15441_v3 = vld [vmem:[%s15924_s15 + $0x23a8] ss:$16 sps:$4 sm:$0xff]   ;;  %v15446_v4 = vld [vmem:[%s15924_s15 + $0x218c] ss:$16 sps:$4 sm:$0xff]  }
 0x4b9   : > { %v9860_v15 = vpop.f32.mrf.mxu0  ;;  %v9923_v42 = vpop.f32.mrf.mxu1  ;;  %10318 = vmatprep.subr.bf16.mxu0 %v15410_v0  ;;  %10381 = vmatprep.subr.bf16.mxu1 %v15413_v44  ;;  %v15449_v28 = vld [vmem:[%s15924_s15 + $0x238c] ss:$16 sps:$4 sm:$0xff]   ;;  %v15444_v41 = vld [vmem:[%s15924_s15 + $0x2188] ss:$16 sps:$4 sm:$0xff]  }
 0x4ba   : > { %v9861_v31 = vadd.f32 %v9860_v15, %v17742_v52  ;;  %v17849_v30 = vadd.f32 %v9921_v35, %v9859_v50  ;;  %10340 = vmatprep.mubr.bf16.mxu0 %v15570_v46  ;;  %10403 = vmatprep.mubr.bf16.mxu1 %v15571_v7  ;;  %v15417_v52 = vld [vmem:[%s15924_s15 + $0x2228] ss:$16 sps:$4 sm:$0xff]   ;;  %v15452_v10 = vld [vmem:[%s15924_s15 + $0x216c] ss:$16 sps:$4 sm:$0xff]   ;;  %v15578_v46 = vld [vmem:[%s15926_s16 + $0x2c4] ss:$144 sps:$4 sm:$0xff]  }
 0x4bb   : > { %v9862_v17 = vpop.f32.mrf.mxu0  ;;  %v9925_v51 = vpop.f32.mrf.mxu1  ;;  %v15447_v38 = vld [vmem:[%s15924_s15 + $0x2388] ss:$16 sps:$4 sm:$0xff]   ;;  %v15455_v29 = vld [vmem:[%s15924_s15 + $0x236c] ss:$16 sps:$4 sm:$0xff]  }
 0x4bc   : > { %v9863_v26 = vadd.f32 %v9862_v17, %v17749_v56  ;;  %v17854_v58 = vadd.f32 %v9923_v42, %v9861_v31  ;;  %10319 = vmatpush1.bf16.msra.mxu0 %v15408_v14  ;;  %10382 = vmatpush1.bf16.msra.mxu1 %v15411_v34  ;;  %v15450_v23 = vld [vmem:[%s15924_s15 + $0x2168] ss:$16 sps:$4 sm:$0xff]   ;;  %v15458_v6 = vld [vmem:[%s15924_s15 + $0x214c] ss:$16 sps:$4 sm:$0xff]   ;;  %v15572_v34 = vld [vmem:[%s15926_s16 + $0x80] ss:$144 sps:$4 sm:$0xff]  }
 0x4bd   : > { %v9864_v25 = vpop.f32.mrf.mxu0  ;;  %v9927_v16 = vpop.f32.mrf.mxu1  ;;  %10320 = vmatprep.subr.bf16.mxu0 %v15416_v33  ;;  %10383 = vmatprep.subr.bf16.mxu1 %v15419_v1  ;;  %v15453_v36 = vld [vmem:[%s15924_s15 + $0x2368] ss:$16 sps:$4 sm:$0xff]   ;;  %v15461_v55 = vld [vmem:[%s15924_s15 + $0x234c] ss:$16 sps:$4 sm:$0xff]   ;;  %v15574_v42 = vld [vmem:[%s15926_s16 + $0x1a4] ss:$144 sps:$4 sm:$0xff]  }
 0x4be   : > { %v9865_v56 = vadd.f32 %v9864_v25, %v17751_v24  ;;  %v17861_v45 = vadd.f32 %v9925_v51, %v9863_v26  ;;  %v15426_v24 = vld [vmem:[%s15924_s15 + $0x21e8] ss:$16 sps:$4 sm:$0xff]   ;;  %v15464_v44 = vld [vmem:[%s15924_s15 + $0x212c] ss:$16 sps:$4 sm:$0xff]   ;;  %v15576_v1 = vld [vmem:[%s15926_s16 + $0x1a0] ss:$144 sps:$4 sm:$0xff]  }
 0x4bf   : > { %v15456_v53 = vld [vmem:[%s15924_s15 + $0x2148] ss:$16 sps:$4 sm:$0xff]   ;;  %v15467_v9 = vld [vmem:[%s15924_s15 + $0x232c] ss:$16 sps:$4 sm:$0xff]   ;;  %v15580_v17 = vld [vmem:[%s15926_s16 + $0x2c0] ss:$144 sps:$4 sm:$0xff]  }
 0x4c0   : > { %v17863_v62 = vadd.f32 %v9927_v16, %v9865_v56  ;;  %10321 = vmatpush1.bf16.msra.mxu0 %v15414_v40  ;;  %10384 = vmatpush1.bf16.msra.mxu1 %v15417_v52  ;;  %v15459_v0 = vld [vmem:[%s15924_s15 + $0x2348] ss:$16 sps:$4 sm:$0xff]   ;;  %v15470_v35 = vld [vmem:[%s15924_s15 + $0x210c] ss:$16 sps:$4 sm:$0xff]  }
 0x4c1   : > { %10322 = vmatprep.subr.bf16.mxu0 %v15422_v61  ;;  %10385 = vmatprep.subr.bf16.mxu1 %v15425_v57  ;;  %v15462_v5 = vld [vmem:[%s15924_s15 + $0x2128] ss:$16 sps:$4 sm:$0xff]   ;;  %v15473_v13 = vld [vmem:[%s15924_s15 + $0x230c] ss:$16 sps:$4 sm:$0xff]  }
 0x4c2   : > { %20275 = vst [vmem:[#allocation9_spill] sm:$0xff] %v17863_v62  ;;  %v15465_v32 = vld [vmem:[%s15924_s15 + $0x2328] ss:$16 sps:$4 sm:$0xff]   ;;  %v15575_v33 = vld [vmem:[%s15926_s16 + $0x1ac] ss:$144 sps:$4 sm:$0xff]  }
 0x4c3   : > { %v15468_v50 = vld [vmem:[%s15924_s15 + $0x2108] ss:$16 sps:$4 sm:$0xff]   ;;  %v15579_v7 = vld [vmem:[%s15926_s16 + $0x2cc] ss:$144 sps:$4 sm:$0xff]  }
 0x4c4   : > { %10323 = vmatpush1.bf16.msra.mxu0 %v15420_v49  ;;  %10386 = vmatpush1.bf16.msra.mxu1 %v15423_v27  ;;  %v15471_v14 = vld [vmem:[%s15924_s15 + $0x2308] ss:$16 sps:$4 sm:$0xff]  }
 0x4c5   : > { %10324 = vmatprep.subr.bf16.mxu0 %v15428_v21  ;;  %10387 = vmatprep.subr.bf16.mxu1 %v15431_v43  ;;  %v15573_v15 = vld [vmem:[%s15926_s16 + $0x88] ss:$144 sps:$4 sm:$0xff]  }
 0x4c6   : > { %v15577_v31 = vld [vmem:[%s15926_s16 + $0x1a8] ss:$144 sps:$4 sm:$0xff]  }
 0x4c7   : > { %v15581_v51 = vld [vmem:[%s15926_s16 + $0x2c8] ss:$144 sps:$4 sm:$0xff]  }
 0x4c8   : > { %10325 = vmatpush2.bf16.msra.mxu0 %v15426_v24  ;;  %10388 = vmatpush2.bf16.msra.mxu1 %v15429_v48 }
 0x4c9   : > { %10326 = vmatprep.subr.bf16.mxu0 %v15434_v63  ;;  %10389 = vmatprep.subr.bf16.mxu1 %v15437_v39 }
 0x4cc   : > { %10327 = vmatpush2.bf16.msra.mxu0 %v15432_v22  ;;  %10390 = vmatpush2.bf16.msra.mxu1 %v15435_v12 }
 0x4cd   : > { %10328 = vmatprep.subr.bf16.mxu0 %v15440_v54  ;;  %10391 = vmatprep.subr.bf16.mxu1 %v15443_v18 }
 0x4d0   : > { %10329 = vmatpush2.bf16.msra.mxu0 %v15438_v8  ;;  %10392 = vmatpush2.bf16.msra.mxu1 %v15441_v3 }
 0x4d1   : > { %10330 = vmatprep.subr.bf16.mxu0 %v15446_v4  ;;  %10393 = vmatprep.subr.bf16.mxu1 %v15449_v28 }
 0x4d4   : > { %10331 = vmatpush2.bf16.msra.mxu0 %v15444_v41  ;;  %10394 = vmatpush2.bf16.msra.mxu1 %v15447_v38 }
 0x4d5   : > { %10332 = vmatprep.subr.bf16.mxu0 %v15452_v10  ;;  %10395 = vmatprep.subr.bf16.mxu1 %v15455_v29 }
 0x4d8   : > { %10333 = vmatpush2.bf16.msra.mxu0 %v15450_v23  ;;  %10396 = vmatpush2.bf16.msra.mxu1 %v15453_v36 }
 0x4d9   : > { %10334 = vmatprep.subr.bf16.mxu0 %v15458_v6  ;;  %10397 = vmatprep.subr.bf16.mxu1 %v15461_v55 }
 0x4dc   : > { %10335 = vmatpush2.bf16.msra.mxu0 %v15456_v53  ;;  %10398 = vmatpush2.bf16.msra.mxu1 %v15459_v0 }
 0x4dd   : > { %10336 = vmatprep.subr.bf16.mxu0 %v15464_v44  ;;  %10399 = vmatprep.subr.bf16.mxu1 %v15467_v9 }
 0x4e0   : > { %10337 = vmatpush2.bf16.msra.mxu0 %v15462_v5  ;;  %10400 = vmatpush2.bf16.msra.mxu1 %v15465_v32 }
 0x4e1   : > { %10338 = vmatprep.subr.bf16.mxu0 %v15470_v35  ;;  %10401 = vmatprep.subr.bf16.mxu1 %v15473_v13 }
 0x4e4   : > { %10339 = vmatpush2.bf16.msra.mxu0 %v15468_v50  ;;  %10402 = vmatpush2.bf16.msra.mxu1 %v15471_v14 }
 0x4e7   : > { %10341 = vmatmul.mubr.bf16.vlgmr.msra.gmra.mxu0 %v15572_v34  ;;  %10404 = vmatmul.mubr.bf16.vlgmr.msra.gmra.mxu1 %v15573_v15  ;;  %v17909_v26 = vpop.f32.mrf.mxu0  ;;  %v17913_v52 = vpop.f32.mrf.mxu1 }
 0x4e8   : > { %10350 = vmatprep.mubr.bf16.mxu0 %v15574_v42  ;;  %10413 = vmatprep.mubr.bf16.mxu1 %v15575_v33 }
 0x4e9   : > { %v17911_v40 = vpop.f32.mrf.mxu0  ;;  %v17917_v16 = vpop.f32.mrf.mxu1 }
 0x4eb   : > { %v17915_v25 = vpop.f32.mrf.mxu0  ;;  %v17921_v57 = vpop.f32.mrf.mxu1 }
 0x4ed   : > { %v17919_v61 = vpop.f32.mrf.mxu0  ;;  %v17925_v49 = vpop.f32.mrf.mxu1 }
 0x4ef   : > { %10351 = vmatmul.mubr.bf16.gmra.mxu0 %v15576_v1  ;;  %10414 = vmatmul.mubr.bf16.gmra.mxu1 %v15577_v31  ;;  %v17923_v56 = vpop.f32.mrf.mxu0  ;;  %v17929_v21 = vpop.f32.mrf.mxu1 }
 0x4f0   : > { %10360 = vmatprep.mubr.bf16.mxu0 %v15578_v46  ;;  %10423 = vmatprep.mubr.bf16.mxu1 %v15579_v7 }
 0x4f1   : > { %v17927_v27 = vpop.f32.mrf.mxu0  ;;  %v17933_v24 = vpop.f32.mrf.mxu1 }
 0x4f3   : > { %v17931_v43 = vpop.f32.mrf.mxu0  ;;  %v17937_v63 = vpop.f32.mrf.mxu1 }
 0x4f5   : > { %v17935_v48 = vpop.f32.mrf.mxu0  ;;  %v17941_v22 = vpop.f32.mrf.mxu1 }
 0x4f7   : > { %10361 = vmatmul.mubr.bf16.gmra.mxu0 %v15580_v17  ;;  %10424 = vmatmul.mubr.bf16.gmra.mxu1 %v15581_v51  ;;  %v17939_v39 = vpop.f32.mrf.mxu0  ;;  %v17945_v54 = vpop.f32.mrf.mxu1 }
 0x4f9   : > { %v17943_v12 = vpop.f32.mrf.mxu0  ;;  %v17949_v8 = vpop.f32.mrf.mxu1 }
 0x4fb   : > { %v17947_v18 = vpop.f32.mrf.mxu0  ;;  %v17953_v4 = vpop.f32.mrf.mxu1 }
 0x4fc   : > { %20277 = vst [vmem:[#allocation7_spill] sm:$0xff] %v17953_v4 }
 0x4fd   : > { %v17951_v3 = vpop.f32.mrf.mxu0  ;;  %v17955_v41 = vpop.f32.mrf.mxu1 }
 0x4fe   : > { %20276 = vst [vmem:[#allocation22_spill] sm:$0xff] %v17951_v3  ;;  %20278 = vst [vmem:[#allocation4_spill] sm:$0xff] %v17955_v41  ;;  %v9965_v3 = vadd.f32 %v17909_v26, %v17800_v19  ;;  %v9975_v19 = vadd.f32 %v17923_v56, %v17825_v37 }
 0x527   : > { %v10090_v28 = vpop.f32.mrf.mxu0  ;;  %v10153_v38 = vpop.f32.mrf.mxu1 }
 0x529   : > { %v10092_v10 = vpop.f32.mrf.mxu0  ;;  %v10155_v29 = vpop.f32.mrf.mxu1 }
 0x52b   : > { %v10094_v23 = vpop.f32.mrf.mxu0  ;;  %v17957_v36 = vpop.f32.mrf.mxu1 }
 0x52d   : > { %v10096_v6 = vpop.f32.mrf.mxu0  ;;  %v17959_v55 = vpop.f32.mrf.mxu1 }
 0x52f   : > { %v10100_v53 = vpop.f32.mrf.mxu0  ;;  %v17961_v0 = vpop.f32.mrf.mxu1 }
 0x531   : > { %v10102_v44 = vpop.f32.mrf.mxu0  ;;  %v17963_v9 = vpop.f32.mrf.mxu1 }
 0x533   : > { %v17965_v5 = vpop.f32.mrf.mxu0  ;;  %v17967_v32 = vpop.f32.mrf.mxu1 }
 0x534   : > { %20279 = vst [vmem:[#allocation11_spill] sm:$0xff] %v17967_v32 }
 0x535   : > { %v17969_v35 = vpop.f32.mrf.mxu0  ;;  %v17971_v13 = vpop.f32.mrf.mxu1 }
 0x536   : > { %20280 = vst [vmem:[#allocation20_spill] sm:$0xff] %v17971_v13 }
 0x537   : > { %v17973_v50 = vpop.f32.mrf.mxu0  ;;  %v17975_v14 = vpop.f32.mrf.mxu1 }
 0x538   : > { %20281 = vst [vmem:[#allocation8_spill] sm:$0xff] %v17973_v50  ;;  %20282 = vst [vmem:[#allocation5_spill] sm:$0xff] %v17975_v14 }
 0x539   : > { %v17977_v34 = vpop.f32.mrf.mxu0  ;;  %v17979_v15 = vpop.f32.mrf.mxu1 }
 0x53a   : > { %20283 = vst [vmem:[#allocation13_spill] sm:$0xff] %v17977_v34  ;;  %20284 = vst [vmem:[#allocation24_spill] sm:$0xff] %v17979_v15 }
 0x53b   : > { %v17981_v42 = vpop.f32.mrf.mxu0  ;;  %v17983_v33 = vpop.f32.mrf.mxu1 }
 0x53c   : > { %20285 = vst [vmem:[#allocation6_spill] sm:$0xff] %v17981_v42  ;;  %20286 = vst [vmem:[#allocation15_spill] sm:$0xff] %v17983_v33 }
 0x53d   : > { %v17985_v1 = vpop.f32.mrf.mxu0  ;;  %v17987_v31 = vpop.f32.mrf.mxu1 }
 0x53e   : > { %20287 = vst [vmem:[#allocation17_spill] sm:$0xff] %v17985_v1  ;;  %20288 = vst [vmem:[#allocation21_spill] sm:$0xff] %v17987_v31 }
 0x567   : > { %v10216_v46 = vpop.f32.mrf.mxu0  ;;  %v10279_v7 = vpop.f32.mrf.mxu1 }
 0x569   : > { %v10218_v17 = vpop.f32.mrf.mxu0  ;;  %v10281_v51 = vpop.f32.mrf.mxu1 }
 0x56b   : > { %v10220_v41 = vpop.f32.mrf.mxu0  ;;  %v17989_v13 = vpop.f32.mrf.mxu1 }
 0x56d   : > { %v10222_v14 = vpop.f32.mrf.mxu0  ;;  %v17991_v4 = vpop.f32.mrf.mxu1 }
 0x56e   : > { %20289 = vst [vmem:[#allocation10_spill] sm:$0xff] %v17991_v4  ;;  %v9967_v4 = vadd.f32 %v17911_v40, %v17805_v11 }
 0x56f   : > { %v10226_v34 = vpop.f32.mrf.mxu0  ;;  %v17993_v15 = vpop.f32.mrf.mxu1 }
 0x570   : > { %20290 = vst [vmem:[#allocation12_spill] sm:$0xff] %v17993_v15 }
 0x571   : > { %v17995_v42 = vpop.f32.mrf.mxu0  ;;  %v17997_v33 = vpop.f32.mrf.mxu1 }
 0x572   : > { %20291 = vst [vmem:[#allocation23_spill] sm:$0xff] %v17997_v33  ;;  %v10028_v33 = vadd.f32 %v17913_v52, %v9965_v3  ;;  %v9977_v52 = vadd.f32 %v17927_v27, %v17830_v47  ;;  %v9981_v47 = vadd.f32 %v17935_v48, %v17842_v20  ;;  %v9985_v27 = vadd.f32 %v17939_v39, %v17849_v30 }
 0x573   : > { %v17999_v1 = vpop.f32.mrf.mxu0  ;;  %v18001_v31 = vpop.f32.mrf.mxu1 }
 0x574   : > { %20292 = vst [vmem:[#allocation26_spill] sm:$0xff] %v17999_v1  ;;  %20293 = vst [vmem:[#allocation14_spill] sm:$0xff] %v18001_v31  ;;  %v9969_v1 = vadd.f32 %v17915_v25, %v17812_v59  ;;  %v10030_v31 = vadd.f32 %v17917_v16, %v9967_v4 }
 0x575   : > { %v18003_v50 = vpop.f32.mrf.mxu0  ;;  %v18005_v32 = vpop.f32.mrf.mxu1 }
 0x576   : > { %20294 = vst [vmem:[#allocation28_spill] sm:$0xff] %v18003_v50  ;;  %20295 = vst [vmem:[#allocation25_spill] sm:$0xff] %v18005_v32  ;;  %v9971_v32 = vadd.f32 %v17919_v61, %v17817_v2  ;;  %v10091_v50 = vadd.f32 %v10090_v28, %v10028_v33  ;;  %v10032_v40 = vadd.f32 %v17921_v57, %v9969_v1 }
 0x577   : > { %v18011_v62 = vpop.f32.mrf.mxu0  ;;  %v18013_v15 = vpop.f32.mrf.mxu1  ;;  %v10038_v2 = vadd.f32 %v17929_v21, %v9975_v19  ;;  %v9979_v61 = vadd.f32 %v17931_v43, %v17837_v60  ;;  %v10040_v28 = vadd.f32 %v17933_v24, %v9977_v52  ;;  %v9987_v24 = vadd.f32 %v17943_v12, %v17854_v58  ;;  %v20301_v19 = vld [vmem:[#allocation10_spill] sm:$0xff] }
 0x578   : > { %20296 = vst [vmem:[#allocation30_spill] sm:$0xff] %v18013_v15  ;;  %v10093_v15 = vadd.f32 %v10092_v10, %v10030_v31  ;;  %v10034_v59 = vadd.f32 %v17925_v49, %v9971_v32  ;;  %v10154_v25 = vadd.f32 %v10153_v38, %v10091_v50  ;;  %v10095_v16 = vadd.f32 %v10094_v23, %v10032_v40  ;;  %v20297_v31 = vld [vmem:[#allocation9_spill] sm:$0xff] }
 0x579   : > { %v18023_v26 = vpop.f32.mrf.mxu0  ;;  %v18025_v11 = vpop.f32.mrf.mxu1  ;;  %v10101_v49 = vadd.f32 %v10100_v53, %v10038_v2  ;;  %v10042_v60 = vadd.f32 %v17937_v63, %v9979_v61  ;;  %v10103_v43 = vadd.f32 %v10102_v44, %v10040_v28  ;;  %v10048_v53 = vadd.f32 %v17945_v54, %v9985_v27  ;;  %v20304_v61 = vld [vmem:[#allocation13_spill] sm:$0xff]  ;;  %v588_v28 = vld [vmem:[#allocation2 + $0x40] sm:$0xff] }
 0x57a   : > { %v10156_v3 = vadd.f32 %v10155_v29, %v10093_v15  ;;  %v10097_v4 = vadd.f32 %v10096_v6, %v10034_v59  ;;  %v10217_v57 = vadd.f32 %v10216_v46, %v10154_v25  ;;  %v10158_v21 = vadd.f32 %v17957_v36, %v10095_v16  ;;  %v20303_v16 = vld [vmem:[#allocation20_spill] sm:$0xff] }
 0x57b   : > { %v18034_v37 = vpop.f32.mrf.mxu0  ;;  %v18036_v56 = vpop.f32.mrf.mxu1  ;;  %v10044_v6 = vadd.f32 %v17941_v22, %v9981_v47  ;;  %v10164_v30 = vadd.f32 %v17961_v0, %v10101_v49  ;;  %v10105_v39 = vadd.f32 %v17965_v5, %v10042_v60  ;;  %v9989_v58 = vadd.f32 %v17947_v18, %v17861_v45  ;;  %v584_v22 = vld [vmem:[#allocation2 + $0x10] sm:$0xff]  ;;  %v20300_v45 = vld [vmem:[#allocation8_spill] sm:$0xff] }
 0x57c   : > { %v10219_v38 = vadd.f32 %v10218_v17, %v10156_v3  ;;  %v10160_v23 = vadd.f32 %v17959_v55, %v10097_v4  ;;  %v10280_v20 = vadd.f32 %v10279_v7, %v10217_v57  ;;  %v10221_v48 = vadd.f32 %v10220_v41, %v10158_v21  ;;  %v20299_v7 = vld [vmem:[#allocation11_spill] sm:$0xff]  ;;  %v20305_v4 = vld [vmem:[#allocation12_spill] sm:$0xff] }
 0x57d   : > { %v18045_v10 = vpop.f32.mrf.mxu0  ;;  %v18047_v29 = vpop.f32.mrf.mxu1  ;;  %v10166_v12 = vadd.f32 %v17963_v9, %v10103_v43  ;;  %v10107_v41 = vadd.f32 %v17969_v35, %v10044_v6  ;;  %v10227_v55 = vadd.f32 %v10226_v34, %v10164_v30  ;;  %v10050_v5 = vadd.f32 %v17949_v8, %v9987_v24  ;;  %v585_v35 = vld [vmem:[#allocation2 + $0x48] sm:$0xff]  ;;  %v20307_v43 = vld [vmem:[#allocation4_spill] sm:$0xff]  ;;  %v20310_v30 = vld [vmem:[#allocation23_spill] sm:$0xff] }
 0x57e   : > { %v10282_v44 = vadd.f32 %v10281_v51, %v10219_v38  ;;  %v10223_v32 = vadd.f32 %v10222_v14, %v10160_v23  ;;  %v10284_v33 = vadd.f32 %v17989_v13, %v10221_v48  ;;  %v20298_v14 = vld [vmem:[#allocation22_spill] sm:$0xff]  ;;  %v10168_v17 = vadd.f32 %v20299_v7, %v10105_v39  ;;  %v20302_v13 = vld [vmem:[#allocation7_spill] sm:$0xff]  ;;  %v20308_v23 = vld [vmem:[#allocation5_spill] sm:$0xff] }
 0x57f   : > { %v9991_v46 = vadd.f32 %v20298_v14, %v20297_v31  ;;  %v10111_v18 = vadd.f32 %v20300_v45, %v10048_v53  ;;  %v10229_v9 = vadd.f32 %v17995_v42, %v10166_v12  ;;  %v10052_v25 = vadd.f32 %v20302_v13, %v9989_v58  ;;  %v20306_v42 = vld [vmem:[#allocation26_spill] sm:$0xff] }
 0x580   : > { %v10286_v40 = vadd.f32 %v20301_v19, %v10223_v32  ;;  %v10170_v2 = vadd.f32 %v20303_v16, %v10107_v41  ;;  %v10113_v3 = vadd.f32 %v20304_v61, %v10050_v5  ;;  %v10290_v57 = vadd.f32 %v20305_v4, %v10227_v55  ;;  %v20309_v48 = vld [vmem:[#allocation6_spill] sm:$0xff]  ;;  %v20312_v41 = vld [vmem:[#allocation24_spill] sm:$0xff]  ;;  %v592_v5 = vld [vmem:[#allocation2 + $0x18] sm:$0xff] }
 0x581   : > { %v10231_v27 = vadd.f32 %v20306_v42, %v10168_v17  ;;  %v10054_v24 = vadd.f32 %v20307_v43, %v9991_v46  ;;  %v10115_v6 = vadd.f32 %v20309_v48, %v10052_v25  ;;  %v10292_v39 = vadd.f32 %v20310_v30, %v10229_v9  ;;  %v20315_v17 = vld [vmem:[#allocation15_spill] sm:$0xff]  ;;  %v20318_v13 = vld [vmem:[#allocation30_spill] sm:$0xff] }
 0x582   : > { %v10176_v55 = vadd.f32 %v20312_v41, %v10113_v3  ;;  %v593_v9 = vld [vmem:[#allocation2 + $0x98] sm:$0xff]  ;;  %v596_v16 = vld [vmem:[#allocation2 + $0x70] sm:$0xff] }
 0x583   : > { %v10178_v45 = vadd.f32 %v20315_v17, %v10115_v6  ;;  %v600_v43 = vld [vmem:[#allocation2 + $0x30] sm:$0xff]  ;;  %v601_v30 = vld [vmem:[#allocation2 + $0x58] sm:$0xff] }
 0x585   : > { %v10241_v3 = vadd.f32 %v18034_v37, %v10178_v45 }
 0x587   : > { %v10304_v37 = vadd.f32 %v18036_v56, %v10241_v3  ;;  %v605_v56 = vld [vmem:[#allocation2 + $0x8] sm:$0xff] }
 0x5a7   : > { %v10342_v36 = vpop.f32.mrf.mxu0  ;;  %v10405_v63 = vpop.f32.mrf.mxu1 }
 0x5a8   : > { %v10343_v50 = vadd.f32 %v10342_v36, %v10280_v20  ;;  %v10174_v20 = vadd.f32 %v20308_v23, %v10111_v18  ;;  %v589_v36 = vld [vmem:[#allocation2 + $0x78] sm:$0xff]  ;;  %v10239_v18 = vadd.f32 %v18023_v26, %v10176_v55 }
 0x5a9   : > { %v10344_v15 = vpop.f32.mrf.mxu0  ;;  %v10407_v0 = vpop.f32.mrf.mxu1 }
 0x5aa   : > { %v10406_v1 = vadd.f32 %v10405_v63, %v10343_v50  ;;  %v10345_v54 = vadd.f32 %v10344_v15, %v10282_v44  ;;  %v20311_v44 = vld [vmem:[#allocation28_spill] sm:$0xff] }
 0x5ab   : > { %v10346_v34 = vpop.f32.mrf.mxu0  ;;  %v10409_v51 = vpop.f32.mrf.mxu1  ;;  %v10233_v32 = vadd.f32 %v20311_v44, %v10170_v2  ;;  %v604_v44 = vld [vmem:[#allocation2 + $0x20] sm:$0xff] }
 0x5ac   : > { %v10436_v52 = vadd.f32 %v10406_v1, %v584_v22  ;;  %v10408_v8 = vadd.f32 %v10407_v0, %v10345_v54  ;;  %v10347_v59 = vadd.f32 %v10346_v34, %v10284_v33  ;;  %v20313_v22 = vld [vmem:[#allocation17_spill] sm:$0xff]  ;;  %v10237_v0 = vadd.f32 %v18011_v62, %v10174_v20  ;;  %v20314_v54 = vld [vmem:[#allocation14_spill] sm:$0xff] }
 0x5ad   : > { %v10348_v47 = vpop.f32.mrf.mxu0  ;;  %v10411_v49 = vpop.f32.mrf.mxu1  ;;  %v10117_v15 = vadd.f32 %v20313_v22, %v10054_v24  ;;  %v10294_v31 = vadd.f32 %v20314_v54, %v10231_v27 }
 0x5ae   : > { %10460 = vst [vmem:[#allocation2 + $0x10] sm:$0xff] %v10436_v52  ;;  %v10437_v21 = vadd.f32 %v10408_v8, %v585_v35  ;;  %v10410_v38 = vadd.f32 %v10409_v51, %v10347_v59  ;;  %v10349_v60 = vadd.f32 %v10348_v47, %v10286_v40  ;;  %v20316_v51 = vld [vmem:[#allocation25_spill] sm:$0xff]  ;;  %v10300_v25 = vadd.f32 %v20318_v13, %v10237_v0  ;;  %v597_v47 = vld [vmem:[#allocation2 + $0xa0] sm:$0xff] }
 0x5af   : > { %v10352_v63 = vpop.f32.mrf.mxu0  ;;  %v10415_v53 = vpop.f32.mrf.mxu1  ;;  %v10296_v19 = vadd.f32 %v20316_v51, %v10233_v32  ;;  %v20317_v8 = vld [vmem:[#allocation21_spill] sm:$0xff] }
 0x5b0   : > { %10461 = vst [vmem:[#allocation2 + $0x48] sm:$0xff] %v10437_v21  ;;  %v10440_v50 = vadd.f32 %v10410_v38, %v588_v28  ;;  %v10412_v58 = vadd.f32 %v10411_v49, %v10349_v60  ;;  %v10353_v12 = vadd.f32 %v10352_v63, %v10290_v57  ;;  %v10180_v59 = vadd.f32 %v20317_v8, %v10117_v15 }
 0x5b1   : > { %v10354_v33 = vpop.f32.mrf.mxu0  ;;  %v10417_v1 = vpop.f32.mrf.mxu1  ;;  %v10302_v28 = vadd.f32 %v18025_v11, %v10239_v18 }
 0x5b2   : > { %10464 = vst [vmem:[#allocation2 + $0x40] sm:$0xff] %v10440_v50  ;;  %v10441_v14 = vadd.f32 %v10412_v58, %v589_v36  ;;  %v10416_v46 = vadd.f32 %v10415_v53, %v10353_v12  ;;  %v10355_v7 = vadd.f32 %v10354_v33, %v10292_v39  ;;  %v10243_v27 = vadd.f32 %v18045_v10, %v10180_v59 }
 0x5b3   : > { %v10356_v35 = vpop.f32.mrf.mxu0  ;;  %v10419_v34 = vpop.f32.mrf.mxu1 }
 0x5b4   : > { %10465 = vst [vmem:[#allocation2 + $0x78] sm:$0xff] %v10441_v14  ;;  %v10444_v62 = vadd.f32 %v10416_v46, %v592_v5  ;;  %v10418_v40 = vadd.f32 %v10417_v1, %v10355_v7  ;;  %v10357_v52 = vadd.f32 %v10356_v35, %v10294_v31  ;;  %v10306_v36 = vadd.f32 %v18047_v29, %v10243_v27 }
 0x5b5   : > { %v10358_v2 = vpop.f32.mrf.mxu0  ;;  %v10421_v61 = vpop.f32.mrf.mxu1 }
 0x5b6   : > { %10468 = vst [vmem:[#allocation2 + $0x18] sm:$0xff] %v10444_v62  ;;  %v10445_v26 = vadd.f32 %v10418_v40, %v593_v9  ;;  %v10420_v4 = vadd.f32 %v10419_v34, %v10357_v52  ;;  %v10359_v57 = vadd.f32 %v10358_v2, %v10296_v19 }
 0x5b7   : > { %v10362_v49 = vpop.f32.mrf.mxu0  ;;  %v10425_v42 = vpop.f32.mrf.mxu1 }
 0x5b8   : > { %10469 = vst [vmem:[#allocation2 + $0x98] sm:$0xff] %v10445_v26  ;;  %v10448_v21 = vadd.f32 %v10420_v4, %v596_v16  ;;  %v10422_v38 = vadd.f32 %v10421_v61, %v10359_v57  ;;  %v10363_v60 = vadd.f32 %v10362_v49, %v10300_v25 }
 0x5b9   : > { %v10364_v24 = vpop.f32.mrf.mxu0  ;;  %v10427_v23 = vpop.f32.mrf.mxu1 }
 0x5ba   : > { %10472 = vst [vmem:[#allocation2 + $0x70] sm:$0xff] %v10448_v21  ;;  %v10449_v20 = vadd.f32 %v10422_v38, %v597_v47  ;;  %v10426_v48 = vadd.f32 %v10425_v42, %v10363_v60  ;;  %v10365_v6 = vadd.f32 %v10364_v24, %v10302_v28 }
 0x5bb   : > { %v10366_v11 = vpop.f32.mrf.mxu0  ;;  %v10429_v39 = vpop.f32.mrf.mxu1 }
 0x5bc   : > { %10473 = vst [vmem:[#allocation2 + $0xa0] sm:$0xff] %v10449_v20  ;;  %v10452_v10 = vadd.f32 %v10426_v48, %v600_v43  ;;  %v10428_v63 = vadd.f32 %v10427_v23, %v10365_v6  ;;  %v10367_v53 = vadd.f32 %v10366_v11, %v10304_v37 }
 0x5bd   : > { %v10368_v32 = vpop.f32.mrf.mxu0  ;;  %v10431_v41 = vpop.f32.mrf.mxu1 }
 0x5be   : > { %10476 = vst [vmem:[#allocation2 + $0x30] sm:$0xff] %v10452_v10  ;;  %v10453_v50 = vadd.f32 %v10428_v63, %v601_v30  ;;  %v10430_v58 = vadd.f32 %v10429_v39, %v10367_v53  ;;  %v10369_v12 = vadd.f32 %v10368_v32, %v10306_v36 }
 0x5c0   : > { %10477 = vst [vmem:[#allocation2 + $0x58] sm:$0xff] %v10453_v50  ;;  %v10456_v55 = vadd.f32 %v10430_v58, %v604_v44  ;;  %v10432_v22 = vadd.f32 %v10431_v41, %v10369_v12  ;;  %10485 = sbr.rel (%p13526_p11) target bundleno = 2157 (0x86d), region = 71 }
 0x5c2   : > { %10480 = vst [vmem:[#allocation2 + $0x20] sm:$0xff] %v10456_v55  ;;  %v10457_v15 = vadd.f32 %v10432_v22, %v605_v56 }
 0x5c4   : > { %10481 = vst [vmem:[#allocation2 + $0x8] sm:$0xff] %v10457_v15 }
 0x5c5   : > { %v20064_v29 = vlaneseq  ;;  %v15623_v0 = vmov 0.0   ;;  %v10510_v33 = vld [vmem:[%s20060_s2] sm:$0xf]  ;;  %v10507_v1 = vld [vmem:[#allocation2 + $0xb8] sm:$0xff]  ;;  %v10503_v17 = vld [vmem:[#allocation2 + $0x68] sm:$0xff]  ;;  %vm10584_vm0 = vcmask 392192  }
 0x5c6   : > { %10661 = vmatprep.mubr.f32.mxu0 %v15623_v0  ;;  %10750 = vmatprep.mubr.f32.mxu1 %v15623_v0  ;;  %v10506_v31 = vld [vmem:[#allocation2 + $0x80] sm:$0xff]  ;;  %v10502_v18 = vld [vmem:[#allocation2 + $0xa8] sm:$0xff]  ;;  %v10499_v62 = vld [vmem:[#allocation2 + $0x50] sm:$0xff]  ;;  %vm11810_vm1 = vcmask 130112   ;;  %vm11817_vm2 = vcmask 195712   ;;  %vm11824_vm3 = vcmask 261312  }
 0x5c7   : > { %v18096_v5 = vshrl.u32 %v20064_v29, 7  ;;  %v10505_v40 = vld [vmem:[#allocation2 + $0x58] sm:$0xff]  ;;  %v10504_v26 = vld [vmem:[#allocation2 + $0x30] sm:$0xff]  ;;  %v10501_v57 = vld [vmem:[#allocation2 + $0xa0] sm:$0xff]  ;;  %vm12111_vm4 = vcmask 1041409   ;;  %vm12113_vm5 = vcmask 1042434  }
 0x5c8   : > { %v10498_v25 = vld [vmem:[#allocation2 + $0x38] sm:$0xff]  ;;  %v10495_v4 = vld [vmem:[#allocation2 + $0x90] sm:$0xff]  ;;  %v10494_v27 = vld [vmem:[#allocation2 + $0x88] sm:$0xff]  ;;  %vm12115_vm6 = vcmask 1043459   ;;  %vm12117_vm7 = vcmask 1044484   ;;  %vm12119_vm8 = vcmask 1045509  }
 0x5c9   : > { %20319 = vst [vmem:[#allocation45_spill] sm:$0xff] %v18096_v5  ;;  %v10518_v54 = vsub.s32 1, %v18096_v5  ;;  %v10514_v14 = vsub.s32 0, %v18096_v5  ;;  %v10526_v46 = vsub.s32 3, %v18096_v5  ;;  %v10522_v7 = vsub.s32 2, %v18096_v5  ;;  %v10508_v51 = vld [vmem:[#allocation2 + $0x20] sm:$0xff] }
 0x5ca   : > { %v10500_v21 = vld [vmem:[#allocation2 + $0x70] sm:$0xff]  ;;  %v10491_v24 = vld [vmem:[#allocation2 + $0x28] sm:$0xff]  ;;  %v10497_v6 = vld [vmem:[#allocation2 + $0x98] sm:$0xff]  ;;  %vm12121_vm9 = vcmask 1046534   ;;  %vm12123_vm10 = vcmask 1047559   ;;  %vm12134_vm11 = vcmask 261120  }
 0x5cb   : > { %v10509_v45 = vld [vmem:[#allocation2 + $0x8] sm:$0xff]  ;;  %v18105_v9 = vrot.slane %v10510_v33, %v10518_v54  ;;  %v18107_v35 = vrot.slane %v10510_v33, %v10514_v14  ;;  %v18109_v34 = vrot.slane %v10510_v33, %v10526_v46  ;;  %v18111_v19 = vrot.slane %v10510_v33, %v10522_v7  ;;  %v10490_v36 = vld [vmem:[#allocation2 + $0x60] sm:$0xff]  ;;  %v10496_v10 = vld [vmem:[#allocation2 + $0x18] sm:$0xff] }
 0x5cc   : > { %v10487_v63 = vld [vmem:[#allocation2] sm:$0xff]  ;;  %v10493_v58 = vld [vmem:[#allocation2 + $0x78] sm:$0xff]  ;;  %v10486_v12 = vld [vmem:[#allocation2 + $0xb0] sm:$0xff]  ;;  %vm12141_vm12 = vcmask 7168  }
 0x5cd   : > { %v10553_v52 = vadd.f32 %v18105_v9, %v10507_v1  ;;  %v10552_v8 = vadd.f32 %v18107_v35, %v10506_v31  ;;  %v10549_v59 = vadd.f32 %v18105_v9, %v10503_v17  ;;  %v10555_v13 = vadd.f32 %v18109_v34, %v10509_v45  ;;  %v10492_v56 = vld [vmem:[#allocation2 + $0x40] sm:$0xff]  ;;  %v10489_v33 = vld [vmem:[#allocation2 + $0x48] sm:$0xff]  ;;  %v10488_v46 = vld [vmem:[#allocation2 + $0x10] sm:$0xff] }
 0x5ce   : > { %v10548_v16 = vadd.f32 %v18107_v35, %v10502_v18  ;;  %v10554_v2 = vadd.f32 %v18111_v19, %v10508_v51  ;;  %v10545_v61 = vadd.f32 %v18105_v9, %v10499_v62  ;;  %v10551_v3 = vadd.f32 %v18109_v34, %v10505_v40  ;;  %v18373_v29 = vld [vmem:[%s20062_s4 + $0x148] sm:$0xff]  ;;  %v18569_v5 = vld [vmem:[%s20062_s4 + $0x1d8] sm:$0xff] }
 0x5cf   : > { %v10577_v28 = vmax.f32 %v10553_v52, 0.0  ;;  %v10576_v47 = vmax.f32 %v10552_v8, 0.0  ;;  %v10573_v49 = vmax.f32 %v10549_v59, 0.0  ;;  %v10579_v42 = vmax.f32 %v10555_v13, 0.0  ;;  %20342 = vst [vmem:[#allocation68_spill] sm:$0xff] %v18569_v5 }
 0x5d0   : > { %v10572_v38 = vmax.f32 %v10548_v16, 0.0  ;;  %v10578_v60 = vmax.f32 %v10554_v2, 0.0  ;;  %v10575_v43 = vmax.f32 %v10551_v3, 0.0  ;;  %v10569_v23 = vmax.f32 %v10545_v61, 0.0  ;;  %v10583_v2 = vld [vmem:[%s20061_s3 + $0x18] sm:$0xff]  ;;  %v18166_v61 = vld [vmem:[%s20062_s4 + $0x40] sm:$0xff] }
 0x5d1   : > { %10617 = vmatprep.subr.mxu0 %v10577_v28  ;;  %10706 = vmatprep.subr.mxu1 %v10579_v42  ;;  %v10544_v37 = vadd.f32 %v18107_v35, %v10498_v25  ;;  %v10550_v20 = vadd.f32 %v18111_v19, %v10504_v26  ;;  %v10541_v48 = vadd.f32 %v18105_v9, %v10495_v4  ;;  %v18171_v3 = vld [vmem:[%s20062_s4] sm:$0xff]  ;;  %v18203_v42 = vld [vmem:[%s20062_s4 + $0xc8] sm:$0xff] }
 0x5d2   : > { %10618 = vmatpush1.msra.mxu0 %v10576_v47  ;;  %10707 = vmatpush1.msra.mxu1 %v10578_v60  ;;  %v10547_v30 = vadd.f32 %v18109_v34, %v10501_v57  ;;  %v10540_v11 = vadd.f32 %v18107_v35, %v10494_v27  ;;  %v10546_v39 = vadd.f32 %v18111_v19, %v10500_v21  ;;  %v18176_v26 = vld [vmem:[%s20062_s4 + $0xc0] sm:$0xff]  ;;  %v18191_v57 = vld [vmem:[%s20062_s4 + $0x48] sm:$0xff]  ;;  %v18536_v21 = vld [vmem:[%s20062_s4 + $0x390] sm:$0xff] }
 0x5d3   : > { %10619 = vmatprep.subr.mxu0 %v10573_v49  ;;  %10708 = vmatprep.subr.mxu1 %v10575_v43  ;;  %v10568_v53 = vmax.f32 %v10544_v37, 0.0  ;;  %v10574_v44 = vmax.f32 %v10550_v20, 0.0  ;;  %v10565_v32 = vmax.f32 %v10541_v48, 0.0  ;;  %v10537_v50 = vadd.f32 %v18105_v9, %v10491_v24  ;;  %v18186_v4 = vld [vmem:[%s20062_s4 + $0x240] sm:$0xff]  ;;  %v18197_v47 = vld [vmem:[%s20062_s4 + $0x8] sm:$0xff]  ;;  %v18442_v37 = vld [vmem:[%s20062_s4 + $0x310] sm:$0xff] }
 0x5d4   : > { %10620 = vmatpush1.msra.mxu0 %v10572_v38  ;;  %v10571_v41 = vmax.f32 %v10547_v30, 0.0  ;;  %v10564_v55 = vmax.f32 %v10540_v11, 0.0  ;;  %v10570_v22 = vmax.f32 %v10546_v39, 0.0  ;;  %v10543_v15 = vadd.f32 %v18109_v34, %v10497_v6  ;;  %v18213_v24 = vld [vmem:[%s20062_s4 + $0x208] sm:$0xff]  ;;  %v18228_v11 = vld [vmem:[%s20062_s4 + $0x80] sm:$0xff]  ;;  %20324 = vst [vmem:[#allocation50_spill] sm:$0xff] %v18442_v37 }
 0x5d5   : > { %10621 = vmatprep.subr.mxu0 %v10569_v23  ;;  %10709 = vmatpush1.msra.mxu1 %v10574_v44  ;;  %v10561_v1 = vmax.f32 %v10537_v50, 0.0  ;;  %v10536_v54 = vadd.f32 %v18107_v35, %v10490_v36  ;;  %v10542_v31 = vadd.f32 %v18111_v19, %v10496_v10  ;;  %v10533_v14 = vadd.f32 %v18105_v9, %v10487_v63  ;;  %v18218_v23 = vld [vmem:[%s20062_s4 + $0x248] sm:$0xff]  ;;  %v18242_v44 = vld [vmem:[%s20062_s4 + $0x50] sm:$0xff]  ;;  %v18252_v50 = vld [vmem:[%s20062_s4 + $0x2c0] sm:$0xff] }
 0x5d6   : > { %10622 = vmatpush1.msra.mxu0 %v10568_v53  ;;  %10710 = vmatprep.subr.mxu1 %v10571_v41  ;;  %v10567_v7 = vmax.f32 %v10543_v15, 0.0  ;;  %v10539_v17 = vadd.f32 %v18109_v34, %v10493_v58  ;;  %v10532_v45 = vadd.f32 %v18107_v35, %v10486_v12  ;;  %v10538_v18 = vadd.f32 %v18111_v19, %v10492_v56  ;;  %v10580_v35 = vld [vmem:[%s20061_s3] sm:$0xff]  ;;  %v18233_v39 = vld [vmem:[%s20062_s4 + $0x88] sm:$0xff]  ;;  %v18407_v12 = vld [vmem:[%s20062_s4 + $0x2d8] sm:$0xff] }
 0x5d7   : > { %10623 = vmatprep.subr.mxu0 %v10565_v32  ;;  %10711 = vmatpush1.msra.mxu1 %v10570_v22  ;;  %v10560_v51 = vmax.f32 %v10536_v54, 0.0  ;;  %v10566_v62 = vmax.f32 %v10542_v31, 0.0  ;;  %v10557_v40 = vmax.f32 %v10533_v14, 0.0  ;;  %v10535_v52 = vadd.f32 %v18109_v34, %v10489_v33  ;;  %v10581_v34 = vld [vmem:[%s20061_s3 + $0x8] sm:$0xff]  ;;  %v18247_v32 = vld [vmem:[%s20062_s4 + $0x280] sm:$0xff]  ;;  %v18266_v22 = vld [vmem:[%s20062_s4 + $0x58] sm:$0xff] }
 0x5d8   : > { %10624 = vmatpush1.msra.mxu0 %v10564_v55  ;;  %10712 = vmatprep.subr.mxu1 %v10567_v7  ;;  %v10563_v9 = vmax.f32 %v10539_v17, 0.0  ;;  %v10556_v8 = vmax.f32 %v10532_v45, 0.0  ;;  %v10562_v59 = vmax.f32 %v10538_v18, 0.0  ;;  %v10534_v13 = vadd.f32 %v18111_v19, %v10488_v46  ;;  %v10582_v19 = vld [vmem:[%s20061_s3 + $0x10] sm:$0xff]  ;;  %v18261_v55 = vld [vmem:[%s20062_s4 + $0x288] sm:$0xff]  ;;  %v18280_v14 = vld [vmem:[%s20062_s4 + $0x100] sm:$0xff] }
 0x5d9   : > { %10625 = vmatprep.subr.mxu0 %v10561_v1  ;;  %10713 = vmatpush1.msra.mxu1 %v10566_v62  ;;  %v10559_v25 = vmax.f32 %v10535_v52, 0.0  ;;  %v18275_v31 = vld [vmem:[%s20062_s4 + $0x2c8] sm:$0xff]  ;;  %v18286_v7 = vld [vmem:[%s20062_s4 + $0x210] sm:$0xff]  ;;  %v18295_v62 = vld [vmem:[%s20062_s4 + $0x218] sm:$0xff]  ;;  %20337 = vst [vmem:[#allocation63_spill] sm:$0xff] %v18536_v21 }
 0x5da   : > { %10626 = vmatpush1.msra.mxu0 %v10560_v51  ;;  %10714 = vmatprep.subr.mxu1 %v10563_v9  ;;  %v10558_v16 = vmax.f32 %v10534_v13, 0.0  ;;  %v18302_v9 = vld [vmem:[%s20062_s4 + $0x250] sm:$0xff]  ;;  %v18345_v17 = vld [vmem:[%s20062_s4 + $0x308] sm:$0xff]  ;;  %v18379_v1 = vld [vmem:[%s20062_s4 + $0x298] sm:$0xff] }
 0x5db   : > { %10627 = vmatprep.subr.mxu0 %v10557_v40  ;;  %10715 = vmatpush1.msra.mxu1 %v10562_v59  ;;  %v18308_v59 = vld [vmem:[%s20062_s4 + $0x108] sm:$0xff]  ;;  %v18330_v52 = vld [vmem:[%s20062_s4 + $0x90] sm:$0xff]  ;;  %v18339_v40 = vld [vmem:[%s20062_s4 + $0x98] sm:$0xff] }
 0x5dc   : > { %10628 = vmatpush1.msra.mxu0 %v10556_v8  ;;  %10716 = vmatprep.subr.mxu1 %v10559_v25  ;;  %v18314_v25 = vld [vmem:[%s20062_s4 + $0x258] sm:$0xff]  ;;  %v18358_v45 = vld [vmem:[%s20062_s4 + $0x290] sm:$0xff]  ;;  %v18387_v54 = vld [vmem:[%s20062_s4 + $0x348] sm:$0xff] }
 0x5dd   : > { %13527 = vmatmul.mubr.msk.f32.vlgmr.msra.gmra.mxu0 %vm10584_vm0, %v10580_v35  ;;  %10717 = vmatpush1.msra.mxu1 %v10558_v16  ;;  %v18350_v16 = vld [vmem:[%s20062_s4 + $0x140] sm:$0xff]  ;;  %20320 = vst [vmem:[#allocation46_spill] sm:$0xff] %v18387_v54  ;;  %v18414_v13 = vld [vmem:[%s20062_s4 + $0x110] sm:$0xff]  ;;  %v18420_v18 = vld [vmem:[%s20062_s4 + $0x188] sm:$0xff]  ;;  %v20397_v54 = vunpack.c.h.bf16 %v18203_v42 }
 0x5de   : > { %13531 = vmatmul.mubr.msk.f32.vlgmr.msra.gmra.mxu1 %vm10584_vm0, %v10580_v35  ;;  %10667 = vmatprep.mubr.f32.mxu0 %v15623_v0  ;;  %v18399_v35 = vld [vmem:[%s20062_s4 + $0x2d0] sm:$0xff]  ;;  %20322 = vst [vmem:[#allocation48_spill] sm:$0xff] %v18420_v18  ;;  %v18426_v33 = vld [vmem:[%s20062_s4 + $0x118] sm:$0xff]  ;;  %v18434_v8 = vld [vmem:[%s20062_s4 + $0x380] sm:$0xff] }
 0x5df   : > { %10756 = vmatprep.mubr.f32.mxu1 %v15623_v0  ;;  %20323 = vst [vmem:[#allocation49_spill] sm:$0xff] %v18434_v8  ;;  %v18451_v56 = vld [vmem:[%s20062_s4 + $0x318] sm:$0xff]  ;;  %v18457_v41 = vld [vmem:[%s20062_s4 + $0x388] sm:$0xff]  ;;  %v18462_v51 = vld [vmem:[%s20062_s4 + $0x1c0] sm:$0xff] }
 0x5e0   : > { %20325 = vst [vmem:[#allocation51_spill] sm:$0xff] %v18451_v56  ;;  %20326 = vst [vmem:[#allocation52_spill] sm:$0xff] %v18457_v41  ;;  %v18470_v30 = vld [vmem:[%s20062_s4 + $0x150] sm:$0xff]  ;;  %v18476_v58 = vld [vmem:[%s20062_s4 + $0x3c0] sm:$0xff] }
 0x5e1   : > { %13528 = vmatmul.mubr.msk.f32.gmra.mxu0 %vm10584_vm0, %v10581_v34  ;;  %20327 = vst [vmem:[#allocation53_spill] sm:$0xff] %v18462_v51  ;;  %20328 = vst [vmem:[#allocation54_spill] sm:$0xff] %v18470_v30  ;;  %v18485_v6 = vld [vmem:[%s20062_s4 + $0x1c8] sm:$0xff]  ;;  %v18491_v43 = vld [vmem:[%s20062_s4 + $0x158] sm:$0xff] }
 0x5e2   : > { %13532 = vmatmul.mubr.msk.f32.gmra.mxu1 %vm10584_vm0, %v10581_v34  ;;  %10673 = vmatprep.mubr.f32.mxu0 %v15623_v0  ;;  %v18392_v34 = vld [vmem:[%s20062_s4 + $0x180] sm:$0xff]  ;;  %20329 = vst [vmem:[#allocation55_spill] sm:$0xff] %v18476_v58  ;;  %20330 = vst [vmem:[#allocation56_spill] sm:$0xff] %v18485_v6  ;;  %v18499_v46 = vld [vmem:[%s20062_s4 + $0x3c8] sm:$0xff] }
 0x5e3   : > { %10762 = vmatprep.mubr.f32.mxu1 %v15623_v0  ;;  %20321 = vst [vmem:[#allocation47_spill] sm:$0xff] %v18392_v34  ;;  %20331 = vst [vmem:[#allocation57_spill] sm:$0xff] %v18491_v43  ;;  %v18506_v38 = vld [vmem:[%s20062_s4 + $0x350] sm:$0xff]  ;;  %v18511_v15 = vld [vmem:[%s20062_s4 + $0x358] sm:$0xff] }
 0x5e4   : > { %20332 = vst [vmem:[#allocation58_spill] sm:$0xff] %v18499_v46  ;;  %20333 = vst [vmem:[#allocation59_spill] sm:$0xff] %v18506_v38  ;;  %v18517_v48 = vld [vmem:[%s20062_s4 + $0x190] sm:$0xff]  ;;  %v18526_v36 = vld [vmem:[%s20062_s4 + $0x198] sm:$0xff] }
 0x5e5   : > { %13529 = vmatmul.mubr.msk.f32.gmra.mxu0 %vm10584_vm0, %v10582_v19  ;;  %20334 = vst [vmem:[#allocation60_spill] sm:$0xff] %v18511_v15  ;;  %20335 = vst [vmem:[#allocation61_spill] sm:$0xff] %v18517_v48  ;;  %v18541_v63 = vld [vmem:[%s20062_s4 + $0x1d0] sm:$0xff]  ;;  %v18550_v60 = vld [vmem:[%s20062_s4 + $0x398] sm:$0xff] }
 0x5e6   : > { %13533 = vmatmul.mubr.msk.f32.gmra.mxu1 %vm10584_vm0, %v10582_v19  ;;  %10679 = vmatprep.mubr.f32.mxu0 %v15623_v0  ;;  %v18322_v19 = vld [vmem:[%s20062_s4 + $0x300] sm:$0xff]  ;;  %20336 = vst [vmem:[#allocation62_spill] sm:$0xff] %v18526_v36  ;;  %20338 = vst [vmem:[#allocation64_spill] sm:$0xff] %v18541_v63  ;;  %v18555_v10 = vld [vmem:[%s20062_s4 + $0x10] sm:$0xff] }
 0x5e7   : > { %10768 = vmatprep.mubr.f32.mxu1 %v15623_v0  ;;  %v18181_v0 = vld [vmem:[%s20062_s4 + $0x200] sm:$0xff]  ;;  %20339 = vst [vmem:[#allocation65_spill] sm:$0xff] %v18550_v60  ;;  %20340 = vst [vmem:[#allocation66_spill] sm:$0xff] %v18555_v10  ;;  %v18560_v53 = vld [vmem:[%s20062_s4 + $0x3d0] sm:$0xff] }
 0x5e8   : > { %20341 = vst [vmem:[#allocation67_spill] sm:$0xff] %v18560_v53  ;;  %v18574_v46 = vld [vmem:[%s20062_s4 + $0x18] sm:$0xff]  ;;  %v18588_v36 = vld [vmem:[%s20062_s4 + $0xd0] sm:$0xff]  ;;  %v18606_v51 = vld [vmem:[%s20062_s4 + $0x60] sm:$0xff]  ;;  %v20389_v10 = vunpack.c.l.bf16 %v18181_v0 }
 0x5e9   : > { %13530 = vmatmul.mubr.msk.f32.gmra.mxu0 %vm10584_vm0, %v10583_v2  ;;  %20343 = vst [vmem:[#allocation69_spill] sm:$0xff] %v18574_v46  ;;  %v18579_v20 = vld [vmem:[%s20062_s4 + $0x3d8] sm:$0xff]  ;;  %20345 = vst [vmem:[#allocation71_spill] sm:$0xff] %v18588_v36  ;;  %v18611_v27 = vld [vmem:[%s20062_s4 + $0x68] sm:$0xff]  ;;  %v20384_v46 = vunpack.c.l.bf16 %v18171_v3 }
 0x5ea   : > { %13534 = vmatmul.mubr.msk.f32.gmra.mxu1 %vm10584_vm0, %v10583_v2  ;;  %v18364_v2 = vld [vmem:[%s20062_s4 + $0x340] sm:$0xff]  ;;  %20344 = vst [vmem:[#allocation70_spill] sm:$0xff] %v18579_v20  ;;  %v18593_v6 = vld [vmem:[%s20062_s4 + $0xd8] sm:$0xff]  ;;  %20347 = vst [vmem:[#allocation73_spill] sm:$0xff] %v18606_v51 }
 0x5eb   : > { %20346 = vst [vmem:[#allocation72_spill] sm:$0xff] %v18593_v6  ;;  %20348 = vst [vmem:[#allocation74_spill] sm:$0xff] %v18611_v27  ;;  %v18620_v15 = vld [vmem:[%s20062_s4 + $0x20] sm:$0xff]  ;;  %v18625_v49 = vld [vmem:[%s20062_s4 + $0x28] sm:$0xff] }
 0x5ec   : > { %20349 = vst [vmem:[#allocation75_spill] sm:$0xff] %v18620_v15  ;;  %20350 = vst [vmem:[#allocation76_spill] sm:$0xff] %v18625_v49  ;;  %v18634_v21 = vld [vmem:[%s20062_s4 + $0x260] sm:$0xff]  ;;  %v18639_v36 = vld [vmem:[%s20062_s4 + $0x268] sm:$0xff] }
 0x5ed   : > { %20351 = vst [vmem:[#allocation77_spill] sm:$0xff] %v18634_v21  ;;  %20352 = vst [vmem:[#allocation78_spill] sm:$0xff] %v18639_v36  ;;  %v18648_v63 = vld [vmem:[%s20062_s4 + $0x220] sm:$0xff]  ;;  %v18653_v6 = vld [vmem:[%s20062_s4 + $0x228] sm:$0xff] }
 0x5ee   : > { %20353 = vst [vmem:[#allocation79_spill] sm:$0xff] %v18648_v63  ;;  %20354 = vst [vmem:[#allocation80_spill] sm:$0xff] %v18653_v6  ;;  %v18662_v58 = vld [vmem:[%s20062_s4 + $0x2a0] sm:$0xff]  ;;  %v18667_v27 = vld [vmem:[%s20062_s4 + $0x2a8] sm:$0xff] }
 0x5ef   : > { %20355 = vst [vmem:[#allocation81_spill] sm:$0xff] %v18662_v58  ;;  %20356 = vst [vmem:[#allocation82_spill] sm:$0xff] %v18667_v27  ;;  %v18676_v28 = vld [vmem:[%s20062_s4 + $0xa0] sm:$0xff]  ;;  %v18681_v49 = vld [vmem:[%s20062_s4 + $0xa8] sm:$0xff] }
 0x5f0   : > { %20357 = vst [vmem:[#allocation83_spill] sm:$0xff] %v18676_v28  ;;  %20358 = vst [vmem:[#allocation84_spill] sm:$0xff] %v18681_v49  ;;  %v18690_v48 = vld [vmem:[%s20062_s4 + $0xe0] sm:$0xff]  ;;  %v18695_v36 = vld [vmem:[%s20062_s4 + $0xe8] sm:$0xff] }
 0x5f1   : > { %20359 = vst [vmem:[#allocation85_spill] sm:$0xff] %v18690_v48  ;;  %20360 = vst [vmem:[#allocation86_spill] sm:$0xff] %v18695_v36  ;;  %v18704_v53 = vld [vmem:[%s20062_s4 + $0x30] sm:$0xff]  ;;  %v18709_v6 = vld [vmem:[%s20062_s4 + $0x38] sm:$0xff] }
 0x5f2   : > { %20361 = vst [vmem:[#allocation87_spill] sm:$0xff] %v18704_v53  ;;  %20362 = vst [vmem:[#allocation88_spill] sm:$0xff] %v18709_v6  ;;  %v18718_v20 = vld [vmem:[%s20062_s4 + $0x2e0] sm:$0xff]  ;;  %v18723_v27 = vld [vmem:[%s20062_s4 + $0x2e8] sm:$0xff] }
 0x5f3   : > { %20363 = vst [vmem:[#allocation89_spill] sm:$0xff] %v18718_v20  ;;  %20364 = vst [vmem:[#allocation90_spill] sm:$0xff] %v18723_v27  ;;  %v18732_v51 = vld [vmem:[%s20062_s4 + $0x270] sm:$0xff]  ;;  %v18737_v49 = vld [vmem:[%s20062_s4 + $0x278] sm:$0xff] }
 0x5f4   : > { %20365 = vst [vmem:[#allocation91_spill] sm:$0xff] %v18732_v51  ;;  %20366 = vst [vmem:[#allocation92_spill] sm:$0xff] %v18737_v49  ;;  %v18746_v15 = vld [vmem:[%s20062_s4 + $0x120] sm:$0xff]  ;;  %v18751_v36 = vld [vmem:[%s20062_s4 + $0x128] sm:$0xff] }
 0x5f5   : > { %20367 = vst [vmem:[#allocation93_spill] sm:$0xff] %v18746_v15  ;;  %20368 = vst [vmem:[#allocation94_spill] sm:$0xff] %v18751_v36  ;;  %v18760_v21 = vld [vmem:[%s20062_s4 + $0xb0] sm:$0xff]  ;;  %v18765_v6 = vld [vmem:[%s20062_s4 + $0xb8] sm:$0xff] }
 0x5f6   : > { %20369 = vst [vmem:[#allocation95_spill] sm:$0xff] %v18760_v21  ;;  %20370 = vst [vmem:[#allocation96_spill] sm:$0xff] %v18765_v6  ;;  %v18774_v63 = vld [vmem:[%s20062_s4 + $0x320] sm:$0xff]  ;;  %v18779_v27 = vld [vmem:[%s20062_s4 + $0x328] sm:$0xff] }
 0x5f7   : > { %20371 = vst [vmem:[#allocation97_spill] sm:$0xff] %v18774_v63  ;;  %20372 = vst [vmem:[#allocation98_spill] sm:$0xff] %v18779_v27  ;;  %v18788_v58 = vld [vmem:[%s20062_s4 + $0x2b0] sm:$0xff]  ;;  %v18793_v49 = vld [vmem:[%s20062_s4 + $0x2b8] sm:$0xff] }
 0x5f8   : > { %20373 = vst [vmem:[#allocation99_spill] sm:$0xff] %v18788_v58  ;;  %20374 = vst [vmem:[#allocation100_spill] sm:$0xff] %v18793_v49  ;;  %v18802_v28 = vld [vmem:[%s20062_s4 + $0x160] sm:$0xff]  ;;  %v18807_v36 = vld [vmem:[%s20062_s4 + $0x168] sm:$0xff] }
 0x5f9   : > { %20375 = vst [vmem:[#allocation101_spill] sm:$0xff] %v18802_v28  ;;  %20376 = vst [vmem:[#allocation102_spill] sm:$0xff] %v18807_v36  ;;  %v18816_v48 = vld [vmem:[%s20062_s4 + $0xf0] sm:$0xff]  ;;  %v18821_v6 = vld [vmem:[%s20062_s4 + $0xf8] sm:$0xff]  ;;  %v20383_v36 = vunpack.c.l.bf16 %v18166_v61 }
 0x5fa   : > { %20377 = vst [vmem:[#allocation103_spill] sm:$0xff] %v18816_v48  ;;  %20378 = vst [vmem:[#allocation104_spill] sm:$0xff] %v18821_v6  ;;  %v18830_v53 = vld [vmem:[%s20062_s4 + $0x360] sm:$0xff]  ;;  %v18835_v27 = vld [vmem:[%s20062_s4 + $0x368] sm:$0xff]  ;;  %v20390_v6 = vunpack.c.h.bf16 %v18166_v61  ;;  %v20395_v61 = vunpack.c.l.bf16 %v18213_v24 }
 0x5fb   : > { %20379 = vst [vmem:[#allocation105_spill] sm:$0xff] %v18830_v53  ;;  %20380 = vst [vmem:[#allocation106_spill] sm:$0xff] %v18835_v27  ;;  %v18844_v20 = vld [vmem:[%s20062_s4 + $0x2f0] sm:$0xff]  ;;  %v18849_v49 = vld [vmem:[%s20062_s4 + $0x2f8] sm:$0xff]  ;;  %v20385_v27 = vunpack.c.l.bf16 %v18176_v26 }
 0x5fc   : > { %20381 = vst [vmem:[#allocation107_spill] sm:$0xff] %v18844_v20  ;;  %20382 = vst [vmem:[#allocation108_spill] sm:$0xff] %v18849_v49  ;;  %v18858_v51 = vld [vmem:[%s20062_s4 + $0x1a0] sm:$0xff]  ;;  %v18884_v15 = vld [vmem:[%s20062_s4 + $0x1a8] sm:$0xff] }
 0x69d   : > { %v18864_v58 = vpop.f32.mrf.mxu0 }
 0x69e   : > { %v18870_v48 = vpop.f32.mrf.mxu1  ;;  %v11175_v28 = vmul.f32 %v20383_v36, %v18864_v58  ;;  %v11159_v5 = vmul.f32 %v20384_v46, %v18864_v58  ;;  %v11207_v63 = vmul.f32 %v20385_v27, %v18864_v58  ;;  %v20386_v36 = vunpack.c.l.bf16 %v18191_v57 }
 0x69f   : > { %v18887_v21 = vpop.f32.mrf.mxu0  ;;  %v20387_v46 = vunpack.c.l.bf16 %v18197_v47  ;;  %v20388_v27 = vunpack.c.l.bf16 %v18203_v42  ;;  %v11287_v60 = vmul.f32 %v20389_v10, %v18864_v58  ;;  %v20394_v10 = vunpack.c.h.bf16 %v18191_v57 }
 0x6a0   : > { %v11177_v49 = vmul.f32 %v20386_v36, %v18870_v48  ;;  %v18901_v41 = vpop.f32.mrf.mxu1  ;;  %v11176_v38 = vmul.f32 %v20390_v6, %v18887_v21  ;;  %v20391_v36 = vunpack.c.h.bf16 %v18171_v3  ;;  %v11289_v6 = vmul.f32 %v20395_v61, %v18870_v48 }
 0x6a1   : > { %v11161_v20 = vmul.f32 %v20387_v46, %v18870_v48  ;;  %v11209_v53 = vmul.f32 %v20388_v27, %v18870_v48  ;;  %v20392_v46 = vunpack.c.h.bf16 %v18176_v26  ;;  %v20393_v27 = vunpack.c.h.bf16 %v18181_v0  ;;  %v18915_v30 = vpop.f32.mrf.mxu0 }
 0x6a2   : > { %v11160_v8 = vmul.f32 %v20391_v36, %v18887_v21  ;;  %v11178_v34 = vmul.f32 %v20394_v10, %v18901_v41  ;;  %v11435_v26 = vadd.f32 %v11176_v38, %v11175_v28  ;;  %v20396_v57 = vunpack.c.h.bf16 %v18197_v47 }
 0x6a3   : > { %v11208_v43 = vmul.f32 %v20392_v46, %v18887_v21  ;;  %v11288_v18 = vmul.f32 %v20393_v27, %v18887_v21  ;;  %v18925_v0 = vpop.f32.mrf.mxu0  ;;  %v18927_v27 = vpop.f32.mrf.mxu1  ;;  %v11210_v61 = vmul.f32 %v20397_v54, %v18901_v41  ;;  %v20398_v3 = vunpack.c.l.bf16 %v18186_v4 }
 0x6a4   : > { %v11415_v46 = vadd.f32 %v11160_v8, %v11159_v5  ;;  %v11162_v10 = vmul.f32 %v20396_v57, %v18901_v41  ;;  %v20399_v5 = vunpack.c.h.bf16 %v18186_v4  ;;  %v11436_v38 = vadd.f32 %v11435_v26, %v11177_v49  ;;  %v18953_v4 = vld [vmem:[%s20062_s4 + $0x3a0] sm:$0xff] }
 0x6a5   : > { %v11475_v56 = vadd.f32 %v11208_v43, %v11207_v63  ;;  %v11575_v37 = vadd.f32 %v11288_v18, %v11287_v60  ;;  %v11303_v36 = vmul.f32 %v20398_v3, %v18864_v58  ;;  %v20400_v63 = vunpack.c.l.bf16 %v18218_v23 }
 0x6a6   : > { %v11304_v28 = vmul.f32 %v20399_v5, %v18887_v21  ;;  %v11416_v60 = vadd.f32 %v11415_v46, %v11161_v20  ;;  %v20401_v42 = vunpack.c.l.bf16 %v18242_v44  ;;  %v20402_v3 = vunpack.c.h.bf16 %v18242_v44 }
 0x6a7   : > { %v11476_v43 = vadd.f32 %v11475_v56, %v11209_v53  ;;  %v11305_v47 = vmul.f32 %v20400_v63, %v18870_v48  ;;  %v11576_v18 = vadd.f32 %v11575_v37, %v11289_v6  ;;  %v11437_v49 = vadd.f32 %v11436_v38, %v11178_v34  ;;  %v18959_v6 = vpop.f32.mrf.mxu1 }
 0x6a8   : > { %v11595_v8 = vadd.f32 %v11304_v28, %v11303_v36  ;;  %v11179_v54 = vmul.f32 %v20401_v42, %v18915_v30  ;;  %v11180_v57 = vmul.f32 %v20402_v3, %v18925_v0  ;;  %v11417_v20 = vadd.f32 %v11416_v60, %v11162_v10 }
 0x6a9   : > { %v20403_v53 = vunpack.c.l.bf16 %v18266_v22  ;;  %v11477_v36 = vadd.f32 %v11476_v43, %v11210_v61  ;;  %v20404_v44 = vunpack.c.h.bf16 %v18213_v24  ;;  %v20405_v46 = vunpack.c.h.bf16 %v18218_v23  ;;  %11438 = vadd.xlane.f32.xlu1 %v11437_v49 }
 0x6aa   : > { %v11440_v28 = vadd.f32 %v11180_v57, %v11179_v54  ;;  %11418 = vadd.xlane.f32.xlu0 %v11417_v20  ;;  %v20406_v34 = vunpack.c.l.bf16 %v18228_v11  ;;  %v20407_v38 = vunpack.c.h.bf16 %v18228_v11  ;;  %v20408_v61 = vunpack.c.l.bf16 %v18233_v39 }
 0x6ab   : > { %v11181_v37 = vmul.f32 %v20403_v53, %v18927_v27  ;;  %v11290_v26 = vmul.f32 %v20404_v44, %v18901_v41  ;;  %v11306_v5 = vmul.f32 %v20405_v46, %v18901_v41  ;;  %v11596_v23 = vadd.f32 %v11595_v8, %v11305_v47 }
 0x6ac   : > { %v11191_v10 = vmul.f32 %v20406_v34, %v18864_v58  ;;  %v11192_v60 = vmul.f32 %v20407_v38, %v18887_v21  ;;  %v11193_v24 = vmul.f32 %v20408_v61, %v18870_v48  ;;  %v20409_v42 = vunpack.c.l.bf16 %v18286_v7 }
 0x6ad   : > { %v11577_v63 = vadd.f32 %v11576_v18, %v11290_v26  ;;  %v20410_v3 = vunpack.c.h.bf16 %v18286_v7  ;;  %v20411_v11 = vunpack.c.h.bf16 %v18266_v22  ;;  %v11441_v20 = vadd.f32 %v11440_v28, %v11181_v37  ;;  %11478 = vadd.xlane.f32.xlu1 %v11477_v36 }
 0x6ae   : > { %v11291_v54 = vmul.f32 %v20409_v42, %v18915_v30  ;;  %v11455_v53 = vadd.f32 %v11192_v60, %v11191_v10  ;;  %v20412_v44 = vunpack.c.l.bf16 %v18295_v62  ;;  %v20413_v47 = vunpack.c.h.bf16 %v18233_v39  ;;  %v20638_v60 = vld [vmem:[#allocation106_spill] sm:$0xff] }
 0x6af   : > { %v11292_v57 = vmul.f32 %v20410_v3, %v18925_v0  ;;  %v11182_v49 = vmul.f32 %v20411_v11, %v18959_v6  ;;  %v20414_v26 = vunpack.c.l.bf16 %v18247_v32  ;;  %v20415_v34 = vunpack.c.h.bf16 %v18247_v32  ;;  %11578 = vadd.xlane.f32.xlu0 %v11577_v63  ;;  %v19014_v63 = vld [vmem:[%s20062_s4 + $0x1e0] sm:$0xff] }
 0x6b0   : > { %v11293_v46 = vmul.f32 %v20412_v44, %v18927_v27  ;;  %v11194_v18 = vmul.f32 %v20413_v47, %v18901_v41  ;;  %v11456_v37 = vadd.f32 %v11455_v53, %v11193_v24  ;;  %v20416_v28 = vunpack.c.l.bf16 %v18261_v55 }
 0x6b1   : > { %v11580_v8 = vadd.f32 %v11292_v57, %v11291_v54  ;;  %v11319_v7 = vmul.f32 %v20414_v26, %v18864_v58  ;;  %v11320_v22 = vmul.f32 %v20415_v34, %v18887_v21  ;;  %v20417_v39 = vunpack.c.l.bf16 %v18302_v9 }
 0x6b2   : > { %v11321_v10 = vmul.f32 %v20416_v28, %v18870_v48  ;;  %v20418_v61 = vunpack.c.h.bf16 %v18295_v62  ;;  %v20419_v36 = vunpack.c.h.bf16 %v18302_v9  ;;  %v11597_v3 = vadd.f32 %v11596_v23, %v11306_v5 }
 0x6b3   : > { %v11307_v38 = vmul.f32 %v20417_v39, %v18915_v30  ;;  %v11581_v54 = vadd.f32 %v11580_v8, %v11293_v46  ;;  %v11615_v32 = vadd.f32 %v11320_v22, %v11319_v7  ;;  %v11442_v57 = vadd.f32 %v11441_v20, %v11182_v49 }
 0x6b4   : > { %v11294_v42 = vmul.f32 %v20418_v61, %v18959_v6  ;;  %v11308_v24 = vmul.f32 %v20419_v36, %v18925_v0  ;;  %v20420_v11 = vunpack.c.l.bf16 %v18314_v25  ;;  %v20421_v62 = vunpack.c.h.bf16 %v18252_v50  ;;  %11598 = vadd.xlane.f32.xlu0 %v11597_v3 }
 0x6b5   : > { %v11457_v46 = vadd.f32 %v11456_v37, %v11194_v18  ;;  %v20422_v9 = vunpack.c.h.bf16 %v18261_v55  ;;  %v20423_v26 = vunpack.c.l.bf16 %v18252_v50  ;;  %11443 = vadd.xlane.f32.xlu1 %v11442_v57  ;;  %v11616_v5 = vadd.f32 %v11615_v32, %v11321_v10  ;;  %v19037_v55 = vld [vmem:[%s20062_s4 + $0x130] sm:$0xff] }
 0x6b6   : > { %v11309_v53 = vmul.f32 %v20420_v11, %v18927_v27  ;;  %v11336_v44 = vmul.f32 %v20421_v62, %v18887_v21  ;;  %v11600_v8 = vadd.f32 %v11308_v24, %v11307_v38  ;;  %v20424_v23 = vunpack.c.h.bf16 %v18314_v25 }
 0x6b7   : > { %v11322_v47 = vmul.f32 %v20422_v9, %v18901_v41  ;;  %v11335_v7 = vmul.f32 %v20423_v26, %v18864_v58  ;;  %v20425_v20 = vunpack.c.l.bf16 %v18330_v52  ;;  %v11582_v50 = vadd.f32 %v11581_v54, %v11294_v42 }
 0x6b8   : > { %v11310_v49 = vmul.f32 %v20424_v23, %v18959_v6  ;;  %v20426_v22 = vunpack.c.l.bf16 %v18275_v31  ;;  %v20427_v25 = vunpack.c.h.bf16 %v18330_v52  ;;  %v11601_v39 = vadd.f32 %v11600_v8, %v11309_v53  ;;  %11458 = vadd.xlane.f32.xlu0 %v11457_v46 }
 0x6b9   : > { %v11195_v18 = vmul.f32 %v20425_v20, %v18915_v30  ;;  %v11635_v28 = vadd.f32 %v11336_v44, %v11335_v7  ;;  %v20428_v38 = vunpack.c.l.bf16 %v18339_v40  ;;  %v20429_v32 = vunpack.c.l.bf16 %v18280_v14  ;;  %11583 = vadd.xlane.f32.xlu1 %v11582_v50 }
 0x6ba   : > { %v11337_v37 = vmul.f32 %v20426_v22, %v18870_v48  ;;  %v11196_v10 = vmul.f32 %v20427_v25, %v18925_v0  ;;  %v20430_v42 = vunpack.c.h.bf16 %v18280_v14  ;;  %v20431_v3 = vunpack.c.l.bf16 %v18308_v59 }
 0x6bb   : > { %v11197_v61 = vmul.f32 %v20428_v38, %v18927_v27  ;;  %v11223_v36 = vmul.f32 %v20429_v32, %v18864_v58  ;;  %v10979_v52 = vunpack.c.l.bf16 %v19037_v55  ;;  %v11617_v53 = vadd.f32 %v11616_v5, %v11322_v47  ;;  %v19076_v5 = vld [vmem:[%s20062_s4 + $0x138] sm:$0xff] }
 0x6bc   : > { %v11224_v54 = vmul.f32 %v20430_v42, %v18887_v21  ;;  %v11460_v24 = vadd.f32 %v11196_v10, %v11195_v18  ;;  %v11225_v57 = vmul.f32 %v20431_v3, %v18870_v48  ;;  %v20432_v44 = vunpack.c.l.bf16 %v18358_v45 }
 0x6bd   : > { %v10980_v14 = vunpack.c.h.bf16 %v19037_v55  ;;  %v11636_v8 = vadd.f32 %v11635_v28, %v11337_v37  ;;  %v20433_v26 = vunpack.c.h.bf16 %v18339_v40  ;;  %v20434_v23 = vunpack.c.h.bf16 %v18358_v45  ;;  %11618 = vadd.xlane.f32.xlu0 %v11617_v53 }
 0x6be   : > { %v11495_v62 = vadd.f32 %v11224_v54, %v11223_v36  ;;  %v11323_v9 = vmul.f32 %v20432_v44, %v18915_v30  ;;  %v20435_v46 = vunpack.c.l.bf16 %v18379_v1  ;;  %v11602_v18 = vadd.f32 %v11601_v39, %v11310_v49 }
 0x6bf   : > { %v11198_v7 = vmul.f32 %v20433_v26, %v18959_v6  ;;  %v11324_v20 = vmul.f32 %v20434_v23, %v18925_v0  ;;  %v11461_v50 = vadd.f32 %v11460_v24, %v11197_v61  ;;  %v20436_v22 = vunpack.c.l.bf16 %v18322_v19 }
 0x6c0   : > { %v11325_v47 = vmul.f32 %v20435_v46, %v18927_v27  ;;  %v20437_v37 = vunpack.c.h.bf16 %v18322_v19  ;;  %v20438_v28 = vunpack.c.h.bf16 %v18275_v31  ;;  %v11496_v10 = vadd.f32 %v11495_v62, %v11225_v57  ;;  %11603 = vadd.xlane.f32.xlu1 %v11602_v18 }
 0x6c1   : > { %v11351_v40 = vmul.f32 %v20436_v22, %v18864_v58  ;;  %v11620_v38 = vadd.f32 %v11324_v20, %v11323_v9  ;;  %v20439_v32 = vunpack.c.l.bf16 %v18399_v35  ;;  %v20440_v49 = vunpack.c.l.bf16 %v18345_v17 }
 0x6c2   : > { %v11352_v45 = vmul.f32 %v20437_v37, %v18887_v21  ;;  %v11338_v25 = vmul.f32 %v20438_v28, %v18901_v41  ;;  %v20441_v19 = vunpack.c.h.bf16 %v18399_v35  ;;  %v10981_v31 = vunpack.c.l.bf16 %v19076_v5  ;;  %v19109_v35 = vld [vmem:[%s20062_s4 + $0x3a8] sm:$0xff] }
 0x6c3   : > { %v11339_v36 = vmul.f32 %v20439_v32, %v18915_v30  ;;  %v11353_v39 = vmul.f32 %v20440_v49, %v18870_v48  ;;  %v20442_v54 = vunpack.c.h.bf16 %v18308_v59  ;;  %v20443_v3 = vunpack.c.h.bf16 %v18379_v1 }
 0x6c4   : > { %v11655_v61 = vadd.f32 %v11352_v45, %v11351_v40  ;;  %v11340_v42 = vmul.f32 %v20441_v19, %v18925_v0  ;;  %v11621_v53 = vadd.f32 %v11620_v38, %v11325_v47  ;;  %v20444_v62 = vunpack.c.l.bf16 %v18407_v12 }
 0x6c5   : > { %v11226_v24 = vmul.f32 %v20442_v54, %v18901_v41  ;;  %v11326_v57 = vmul.f32 %v20443_v3, %v18959_v6  ;;  %v11637_v9 = vadd.f32 %v11636_v8, %v11338_v25  ;;  %v11462_v26 = vadd.f32 %v11461_v50, %v11198_v7 }
 0x6c6   : > { %v11341_v44 = vmul.f32 %v20444_v62, %v18927_v27  ;;  %v11640_v23 = vadd.f32 %v11340_v42, %v11339_v36  ;;  %v20445_v59 = vunpack.c.h.bf16 %v18350_v16  ;;  %v20446_v1 = vunpack.c.l.bf16 %v18350_v16 }
 0x6c7   : > { %v20447_v47 = vunpack.c.l.bf16 %v18414_v13  ;;  %v20448_v22 = vunpack.c.h.bf16 %v18414_v13  ;;  %11638 = vadd.xlane.f32.xlu0 %v11637_v9  ;;  %11463 = vadd.xlane.f32.xlu1 %v11462_v26  ;;  %v11497_v7 = vadd.f32 %v11496_v10, %v11226_v24  ;;  %v11656_v50 = vadd.f32 %v11655_v61, %v11353_v39  ;;  %v20455_v24 = vld [vmem:[#allocation46_spill] sm:$0xff] }
 0x6c8   : > { %v11240_v20 = vmul.f32 %v20445_v59, %v18887_v21  ;;  %v11239_v46 = vmul.f32 %v20446_v1, %v18864_v58  ;;  %v20449_v37 = vunpack.c.h.bf16 %v18407_v12  ;;  %v11622_v28 = vadd.f32 %v11621_v53, %v11326_v57  ;;  %v20457_v53 = vld [vmem:[#allocation50_spill] sm:$0xff]  ;;  %v20461_v59 = vld [vmem:[#allocation51_spill] sm:$0xff] }
 0x6c9   : > { %v11227_v18 = vmul.f32 %v20447_v47, %v18915_v30  ;;  %v11228_v40 = vmul.f32 %v20448_v22, %v18925_v0  ;;  %v11641_v25 = vadd.f32 %v11640_v23, %v11341_v44  ;;  %v20450_v38 = vunpack.c.l.bf16 %v18373_v29 }
 0x6ca   : > { %v11342_v45 = vmul.f32 %v20449_v37, %v18959_v6  ;;  %v11515_v13 = vadd.f32 %v11240_v20, %v11239_v46  ;;  %v20451_v36 = vunpack.c.l.bf16 %v18426_v33  ;;  %v20452_v10 = vunpack.c.l.bf16 %v18364_v2 }
 0x6cb   : > { %v11241_v32 = vmul.f32 %v20450_v38, %v18870_v48  ;;  %v11500_v19 = vadd.f32 %v11228_v40, %v11227_v18  ;;  %v20453_v12 = vunpack.c.h.bf16 %v18364_v2  ;;  %v20454_v42 = vunpack.c.h.bf16 %v18345_v17  ;;  %11498 = vadd.xlane.f32.xlu0 %v11497_v7  ;;  %11623 = vadd.xlane.f32.xlu1 %v11622_v28  ;;  %v19165_v7 = vld [vmem:[%s20062_s4 + $0x1e8] sm:$0xff]  ;;  %v20464_v38 = vld [vmem:[#allocation47_spill] sm:$0xff] }
 0x6cc   : > { %v11229_v49 = vmul.f32 %v20451_v36, %v18927_v27  ;;  %v11367_v39 = vmul.f32 %v20452_v10, %v18864_v58  ;;  %v20456_v3 = vunpack.c.l.bf16 %v20455_v24  ;;  %v20458_v62 = vunpack.c.l.bf16 %v20457_v53 }
 0x6cd   : > { %v11368_v61 = vmul.f32 %v20453_v12, %v18887_v21  ;;  %v11354_v54 = vmul.f32 %v20454_v42, %v18901_v41  ;;  %v20459_v9 = vunpack.c.h.bf16 %v20457_v53  ;;  %v20460_v2 = vunpack.c.h.bf16 %v18373_v29  ;;  %v20468_v12 = vld [vmem:[#allocation54_spill] sm:$0xff] }
 0x6ce   : > { %v11369_v57 = vmul.f32 %v20456_v3, %v18870_v48  ;;  %v11355_v44 = vmul.f32 %v20458_v62, %v18915_v30  ;;  %v20462_v20 = vunpack.c.l.bf16 %v20461_v59  ;;  %v11642_v18 = vadd.f32 %v11641_v25, %v11342_v45 }
 0x6cf   : > { %v11356_v26 = vmul.f32 %v20459_v9, %v18925_v0  ;;  %v11242_v23 = vmul.f32 %v20460_v2, %v18901_v41  ;;  %v11675_v17 = vadd.f32 %v11368_v61, %v11367_v39  ;;  %v11657_v47 = vadd.f32 %v11656_v50, %v11354_v54  ;;  %v20474_v9 = vld [vmem:[#allocation57_spill] sm:$0xff] }
 0x6d0   : > { %v11357_v1 = vmul.f32 %v20462_v20, %v18927_v27  ;;  %v20463_v22 = vunpack.c.h.bf16 %v18426_v33  ;;  %v11516_v29 = vadd.f32 %v11515_v13, %v11241_v32  ;;  %v11501_v28 = vadd.f32 %v11500_v19, %v11229_v49  ;;  %11643 = vadd.xlane.f32.xlu1 %v11642_v18  ;;  %v20471_v19 = vld [vmem:[#allocation48_spill] sm:$0xff] }
 0x6d1   : > { %v11660_v37 = vadd.f32 %v11356_v26, %v11355_v44  ;;  %v20465_v36 = vunpack.c.l.bf16 %v20464_v38  ;;  %v20466_v50 = vunpack.c.h.bf16 %v20464_v38  ;;  %v11676_v25 = vadd.f32 %v11675_v17, %v11369_v57  ;;  %11658 = vadd.xlane.f32.xlu0 %v11657_v47  ;;  %v19198_v47 = vld [vmem:[%s20062_s4 + $0x3e0] sm:$0xff]  ;;  %v20479_v38 = vld [vmem:[#allocation59_spill] sm:$0xff] }
 0x6d2   : > { %v11230_v40 = vmul.f32 %v20463_v22, %v18959_v6  ;;  %v20467_v33 = vunpack.c.h.bf16 %v20461_v59  ;;  %v20469_v61 = vunpack.c.l.bf16 %v20468_v12  ;;  %v20470_v32 = vunpack.c.h.bf16 %v20468_v12  ;;  %v20476_v59 = vld [vmem:[#allocation49_spill] sm:$0xff] }
 0x6d3   : > { %v11255_v10 = vmul.f32 %v20465_v36, %v18864_v58  ;;  %v11256_v45 = vmul.f32 %v20466_v50, %v18887_v21  ;;  %v11661_v49 = vadd.f32 %v11660_v37, %v11357_v1  ;;  %v20472_v54 = vunpack.c.l.bf16 %v20471_v19 }
 0x6d4   : > { %v11358_v39 = vmul.f32 %v20467_v33, %v18959_v6  ;;  %v11243_v42 = vmul.f32 %v20469_v61, %v18915_v30  ;;  %v11244_v13 = vmul.f32 %v20470_v32, %v18925_v0  ;;  %v20473_v62 = vunpack.c.h.bf16 %v20455_v24 }
 0x6d5   : > { %v11257_v3 = vmul.f32 %v20472_v54, %v18870_v48  ;;  %v11535_v57 = vadd.f32 %v11256_v45, %v11255_v10  ;;  %v20475_v26 = vunpack.c.l.bf16 %v20474_v9  ;;  %v20477_v20 = vunpack.c.h.bf16 %v20476_v59 }
 0x6d6   : > { %v11370_v44 = vmul.f32 %v20473_v62, %v18901_v41  ;;  %v11520_v17 = vadd.f32 %v11244_v13, %v11243_v42  ;;  %v11517_v18 = vadd.f32 %v11516_v29, %v11242_v23  ;;  %v11502_v22 = vadd.f32 %v11501_v28, %v11230_v40  ;;  %v20484_v42 = vld [vmem:[#allocation52_spill] sm:$0xff]  ;;  %v20486_v62 = vld [vmem:[#allocation53_spill] sm:$0xff] }
 0x6d7   : > { %v11245_v2 = vmul.f32 %v20475_v26, %v18927_v27  ;;  %v11384_v1 = vmul.f32 %v20477_v20, %v18887_v21  ;;  %v20478_v24 = vunpack.c.h.bf16 %v20471_v19  ;;  %v20480_v36 = vunpack.c.l.bf16 %v20479_v38 }
 0x6d8   : > { %v11677_v50 = vadd.f32 %v11676_v25, %v11370_v44  ;;  %v20481_v45 = vunpack.c.h.bf16 %v20474_v9  ;;  %v20482_v12 = vunpack.c.l.bf16 %v20476_v59  ;;  %v20483_v23 = vunpack.c.h.bf16 %v20479_v38  ;;  %11518 = vadd.xlane.f32.xlu0 %v11517_v18  ;;  %11503 = vadd.xlane.f32.xlu1 %v11502_v22 }
 0x6d9   : > { %v11258_v37 = vmul.f32 %v20478_v24, %v18901_v41  ;;  %v11371_v10 = vmul.f32 %v20480_v36, %v18915_v30  ;;  %v11662_v29 = vadd.f32 %v11661_v49, %v11358_v39  ;;  %v11536_v28 = vadd.f32 %v11535_v57, %v11257_v3  ;;  %v19228_v39 = vld [vmem:[%s20062_s4 + $0x3e8] sm:$0xff]  ;;  %v20489_v49 = vld [vmem:[#allocation60_spill] sm:$0xff] }
 0x6da   : > { %v11246_v33 = vmul.f32 %v20481_v45, %v18959_v6  ;;  %v11383_v61 = vmul.f32 %v20482_v12, %v18864_v58  ;;  %v11372_v40 = vmul.f32 %v20483_v23, %v18925_v0  ;;  %v20485_v32 = vunpack.c.l.bf16 %v20484_v42  ;;  %v20494_v24 = vld [vmem:[#allocation56_spill] sm:$0xff]  ;;  %v20496_v12 = vld [vmem:[#allocation62_spill] sm:$0xff] }
 0x6db   : > { %v11521_v19 = vadd.f32 %v11520_v17, %v11245_v2  ;;  %v20487_v44 = vunpack.c.l.bf16 %v20486_v62  ;;  %v20488_v26 = vunpack.c.h.bf16 %v20486_v62  ;;  %v20490_v3 = vunpack.c.l.bf16 %v20489_v49  ;;  %v20491_v2 = vld [vmem:[#allocation61_spill] sm:$0xff] }
 0x6dc   : > { %v11385_v25 = vmul.f32 %v20485_v32, %v18870_v48  ;;  %v11695_v54 = vadd.f32 %v11384_v1, %v11383_v61  ;;  %v11680_v20 = vadd.f32 %v11372_v40, %v11371_v10  ;;  %v20492_v17 = vunpack.c.l.bf16 %v20491_v2  ;;  %11678 = vadd.xlane.f32.xlu0 %v11677_v50  ;;  %11663 = vadd.xlane.f32.xlu1 %v11662_v29 }
 0x6dd   : > { %v11271_v9 = vmul.f32 %v20487_v44, %v18864_v58  ;;  %v11272_v59 = vmul.f32 %v20488_v26, %v18887_v21  ;;  %v11373_v57 = vmul.f32 %v20490_v3, %v18927_v27  ;;  %v20493_v18 = vunpack.c.h.bf16 %v20491_v2 }
 0x6de   : > { %v11259_v1 = vmul.f32 %v20492_v17, %v18915_v30  ;;  %v20495_v38 = vunpack.c.l.bf16 %v20494_v24  ;;  %v20497_v61 = vunpack.c.l.bf16 %v20496_v12  ;;  %v11537_v10 = vadd.f32 %v11536_v28, %v11258_v37  ;;  %v20500_v17 = vld [vmem:[#allocation55_spill] sm:$0xff] }
 0x6df   : > { %v11260_v22 = vmul.f32 %v20493_v18, %v18925_v0  ;;  %v11555_v45 = vadd.f32 %v11272_v59, %v11271_v9  ;;  %v20498_v40 = vunpack.c.h.bf16 %v20484_v42  ;;  %v11522_v3 = vadd.f32 %v11521_v19, %v11246_v33  ;;  %v20503_v28 = vld [vmem:[#allocation63_spill] sm:$0xff] }
 0x6e0   : > { %v11273_v36 = vmul.f32 %v20495_v38, %v18870_v48  ;;  %v11261_v23 = vmul.f32 %v20497_v61, %v18927_v27  ;;  %v11696_v2 = vadd.f32 %v11695_v54, %v11385_v25  ;;  %v20499_v9 = vunpack.c.h.bf16 %v20489_v49  ;;  %11538 = vadd.xlane.f32.xlu0 %v11537_v10 }
 0x6e1   : > { %v11386_v62 = vmul.f32 %v20498_v40, %v18901_v41  ;;  %v11540_v44 = vadd.f32 %v11260_v22, %v11259_v1  ;;  %v20501_v18 = vunpack.c.h.bf16 %v20500_v17  ;;  %v11681_v50 = vadd.f32 %v11680_v20, %v11373_v57  ;;  %11523 = vadd.xlane.f32.xlu1 %v11522_v3  ;;  %v20509_v40 = vld [vmem:[#allocation65_spill] sm:$0xff] }
 0x6e2   : > { %v11374_v59 = vmul.f32 %v20499_v9, %v18959_v6  ;;  %v20502_v37 = vunpack.c.l.bf16 %v20500_v17  ;;  %v20504_v42 = vunpack.c.l.bf16 %v20503_v28  ;;  %v20505_v33 = vunpack.c.h.bf16 %v20503_v28 }
 0x6e3   : > { %v11400_v38 = vmul.f32 %v20501_v18, %v18887_v21  ;;  %v11556_v19 = vadd.f32 %v11555_v45, %v11273_v36  ;;  %v20506_v54 = vunpack.c.h.bf16 %v20496_v12  ;;  %v11541_v22 = vadd.f32 %v11540_v44, %v11261_v23  ;;  %v20507_v21 = vld [vmem:[#allocation58_spill] sm:$0xff]  ;;  %v20512_v23 = vld [vmem:[#allocation64_spill] sm:$0xff] }
 0x6e4   : > { %v11399_v29 = vmul.f32 %v20502_v37, %v18864_v58  ;;  %v11387_v1 = vmul.f32 %v20504_v42, %v18915_v30  ;;  %v11388_v25 = vmul.f32 %v20505_v33, %v18925_v0  ;;  %v20508_v57 = vunpack.c.l.bf16 %v20507_v21  ;;  %v19271_v58 = vpop.f32.mrf.mxu0  ;;  %v19279_v36 = vld [vmem:[%s20062_s4 + $0x330] sm:$0xff] }
 0x6e5   : > { %v11262_v49 = vmul.f32 %v20506_v54, %v18959_v6  ;;  %v20510_v9 = vunpack.c.l.bf16 %v20509_v40  ;;  %v20513_v10 = vunpack.c.l.bf16 %v20512_v23  ;;  %v20514_v3 = vunpack.c.h.bf16 %v20512_v23  ;;  %v20515_v42 = vld [vmem:[#allocation66_spill] sm:$0xff] }
 0x6e6   : > { %v11401_v20 = vmul.f32 %v20508_v57, %v18870_v48  ;;  %v11715_v61 = vadd.f32 %v11400_v38, %v11399_v29  ;;  %v11700_v18 = vadd.f32 %v11388_v25, %v11387_v1  ;;  %v20511_v48 = vunpack.c.h.bf16 %v20494_v24 }
 0x6e7   : > { %v11389_v17 = vmul.f32 %v20510_v9, %v18927_v27  ;;  %v11275_v44 = vmul.f32 %v20513_v10, %v18915_v30  ;;  %v11276_v38 = vmul.f32 %v20514_v3, %v18925_v0  ;;  %v11697_v29 = vadd.f32 %v11696_v2, %v11386_v62  ;;  %v19305_v10 = vpop.f32.mrf.mxu0 }
 0x6e8   : > { %v11274_v12 = vmul.f32 %v20511_v48, %v18901_v41  ;;  %v11682_v28 = vadd.f32 %v11681_v50, %v11374_v59  ;;  %v20516_v1 = vunpack.c.l.bf16 %v20515_v42  ;;  %v20517_v24 = vunpack.c.h.bf16 %v20515_v42 }
 0x6e9   : > { %v20518_v57 = vunpack.c.h.bf16 %v20507_v21  ;;  %v20519_v48 = vunpack.c.h.bf16 %v20509_v40  ;;  %11698 = vadd.xlane.f32.xlu0 %v11697_v29  ;;  %v11542_v2 = vadd.f32 %v11541_v22, %v11262_v49  ;;  %v11716_v59 = vadd.f32 %v11715_v61, %v11401_v20  ;;  %v20520_v21 = vld [vmem:[#allocation68_spill] sm:$0xff]  ;;  %v20522_v29 = vld [vmem:[#allocation69_spill] sm:$0xff]  ;;  %v20524_v20 = vld [vmem:[#allocation67_spill] sm:$0xff] }
 0x6ea   : > { %v11163_v33 = vmul.f32 %v20516_v1, %v18915_v30  ;;  %v11164_v25 = vmul.f32 %v20517_v24, %v18925_v0  ;;  %v11557_v54 = vadd.f32 %v11556_v19, %v11274_v12  ;;  %11683 = vadd.xlane.f32.xlu1 %v11682_v28  ;;  %v11701_v50 = vadd.f32 %v11700_v18, %v11389_v17  ;;  %v19310_v19 = vld [vmem:[%s20062_s4 + $0x338] sm:$0xff] }
 0x6eb   : > { %v11402_v9 = vmul.f32 %v20518_v57, %v18901_v41  ;;  %v11390_v23 = vmul.f32 %v20519_v48, %v18959_v6  ;;  %v20521_v40 = vunpack.c.l.bf16 %v20520_v21  ;;  %v11560_v3 = vadd.f32 %v11276_v38, %v11275_v44  ;;  %v20527_v1 = vld [vmem:[#allocation71_spill] sm:$0xff] }
 0x6ec   : > { %v20523_v28 = vunpack.c.l.bf16 %v20522_v29  ;;  %v11420_v22 = vadd.f32 %v11164_v25, %v11163_v33  ;;  %v20525_v61 = vunpack.c.l.bf16 %v20524_v20  ;;  %v20526_v18 = vunpack.c.h.bf16 %v20524_v20  ;;  %v20531_v25 = vld [vmem:[#allocation73_spill] sm:$0xff] }
 0x6ed   : > { %v11277_v12 = vmul.f32 %v20521_v40, %v18927_v27  ;;  %v20528_v24 = vunpack.c.l.bf16 %v20527_v1  ;;  %v20529_v44 = vunpack.c.h.bf16 %v20527_v1  ;;  %v20530_v48 = vunpack.c.h.bf16 %v20520_v21  ;;  %11558 = vadd.xlane.f32.xlu0 %v11557_v54  ;;  %v19341_v1 = vpop.f32.mrf.mxu1  ;;  %v20535_v54 = vld [vmem:[#allocation70_spill] sm:$0xff] }
 0x6ee   : > { %v11165_v49 = vmul.f32 %v20523_v28, %v18927_v27  ;;  %v11403_v17 = vmul.f32 %v20525_v61, %v18915_v30  ;;  %v11404_v42 = vmul.f32 %v20526_v18, %v18925_v0  ;;  %v20532_v40 = vunpack.c.l.bf16 %v20531_v25  ;;  %11543 = vadd.xlane.f32.xlu1 %v11542_v2 }
 0x6ef   : > { %v11211_v57 = vmul.f32 %v20528_v24, %v18915_v30  ;;  %v11212_v38 = vmul.f32 %v20529_v44, %v18925_v0  ;;  %v11278_v33 = vmul.f32 %v20530_v48, %v18959_v6  ;;  %v20533_v20 = vunpack.c.h.bf16 %v20531_v25  ;;  %v19350_v48 = vld [vmem:[%s20062_s4 + $0x170] sm:$0xff] }
 0x6f0   : > { %v11183_v28 = vmul.f32 %v20532_v40, %v19271_v58  ;;  %v11717_v30 = vadd.f32 %v11716_v59, %v11402_v9  ;;  %v11702_v24 = vadd.f32 %v11701_v50, %v11390_v23  ;;  %v20534_v0 = vunpack.c.h.bf16 %v20522_v29  ;;  %v20537_v23 = vld [vmem:[#allocation75_spill] sm:$0xff]  ;;  %v20539_v29 = vld [vmem:[#allocation72_spill] sm:$0xff] }
 0x6f1   : > { %v11184_v61 = vmul.f32 %v20533_v20, %v19305_v10  ;;  %v11561_v25 = vadd.f32 %v11560_v3, %v11277_v12  ;;  %v11421_v40 = vadd.f32 %v11420_v22, %v11165_v49  ;;  %v20536_v2 = vunpack.c.l.bf16 %v20535_v54  ;;  %v20542_v12 = vld [vmem:[#allocation74_spill] sm:$0xff] }
 0x6f2   : > { %v11166_v21 = vmul.f32 %v20534_v0, %v18959_v6  ;;  %v20538_v59 = vunpack.c.l.bf16 %v20537_v23  ;;  %v11720_v20 = vadd.f32 %v11404_v42, %v11403_v17  ;;  %v20540_v0 = vunpack.c.l.bf16 %v20539_v29  ;;  %11718 = vadd.xlane.f32.xlu0 %v11717_v30  ;;  %11703 = vadd.xlane.f32.xlu1 %v11702_v24  ;;  %v19371_v42 = vpop.f32.mrf.mxu1 }
 0x6f3   : > { %v11405_v9 = vmul.f32 %v20536_v2, %v18927_v27  ;;  %v11480_v26 = vadd.f32 %v11212_v38, %v11211_v57  ;;  %v20541_v32 = vunpack.c.h.bf16 %v20537_v23  ;;  %v20543_v3 = vunpack.c.l.bf16 %v20542_v12  ;;  %v20544_v2 = vld [vmem:[#allocation76_spill] sm:$0xff]  ;;  %v20546_v57 = vld [vmem:[#allocation77_spill] sm:$0xff] }
 0x6f4   : > { %v11167_v50 = vmul.f32 %v20538_v59, %v19271_v58  ;;  %v11213_v37 = vmul.f32 %v20540_v0, %v18927_v27  ;;  %v11445_v22 = vadd.f32 %v11184_v61, %v11183_v28  ;;  %v20545_v45 = vunpack.c.l.bf16 %v20544_v2  ;;  %v19382_v28 = vld [vmem:[%s20062_s4 + $0x178] sm:$0xff] }
 0x6f5   : > { %v11168_v13 = vmul.f32 %v20541_v32, %v19305_v10  ;;  %v11185_v49 = vmul.f32 %v20543_v3, %v19341_v1  ;;  %v20547_v38 = vunpack.c.l.bf16 %v20546_v57  ;;  %v20548_v23 = vunpack.c.h.bf16 %v20546_v57  ;;  %v20551_v0 = vld [vmem:[#allocation79_spill] sm:$0xff] }
 0x6f6   : > { %v11169_v53 = vmul.f32 %v20545_v45, %v19341_v1  ;;  %v11562_v61 = vadd.f32 %v11561_v25, %v11278_v33  ;;  %v20549_v30 = vunpack.c.h.bf16 %v20535_v54  ;;  %v20550_v24 = vunpack.c.h.bf16 %v20539_v29  ;;  %v19397_v33 = vpop.f32.mrf.mxu0 }
 0x6f7   : > { %v11425_v27 = vadd.f32 %v11168_v13, %v11167_v50  ;;  %v11311_v32 = vmul.f32 %v20547_v38, %v19271_v58  ;;  %v11312_v59 = vmul.f32 %v20548_v23, %v19305_v10  ;;  %v20552_v3 = vunpack.c.l.bf16 %v20551_v0 }
 0x6f8   : > { %v11406_v13 = vmul.f32 %v20549_v30, %v18959_v6  ;;  %v11214_v50 = vmul.f32 %v20550_v24, %v18959_v6  ;;  %v11422_v38 = vadd.f32 %v11421_v40, %v11166_v21  ;;  %v11721_v23 = vadd.f32 %v11720_v20, %v11405_v9  ;;  %11563 = vadd.xlane.f32.xlu1 %v11562_v61  ;;  %v19413_v20 = vld [vmem:[%s20062_s4 + $0x70] sm:$0xff]  ;;  %v20560_v61 = vld [vmem:[#allocation81_spill] sm:$0xff] }
 0x6f9   : > { %v11295_v57 = vmul.f32 %v20552_v3, %v19271_v58  ;;  %v11481_v44 = vadd.f32 %v11480_v26, %v11213_v37  ;;  %v20553_v46 = vunpack.c.h.bf16 %v20551_v0  ;;  %v20554_v25 = vunpack.c.h.bf16 %v20542_v12  ;;  %v20556_v37 = vld [vmem:[#allocation78_spill] sm:$0xff]  ;;  %v20558_v12 = vld [vmem:[#allocation80_spill] sm:$0xff] }
 0x6fa   : > { %v11446_v30 = vadd.f32 %v11445_v22, %v11185_v49  ;;  %v20555_v6 = vunpack.c.h.bf16 %v20544_v2  ;;  %11423 = vadd.xlane.f32.xlu0 %v11422_v38  ;;  %v11426_v26 = vadd.f32 %v11425_v27, %v11169_v53  ;;  %v20557_v21 = vunpack.c.l.bf16 %v20556_v37  ;;  %v20563_v38 = vld [vmem:[#allocation83_spill] sm:$0xff] }
 0x6fb   : > { %v11296_v45 = vmul.f32 %v20553_v46, %v19305_v10  ;;  %v11186_v54 = vmul.f32 %v20554_v25, %v19371_v42  ;;  %v11605_v40 = vadd.f32 %v11312_v59, %v11311_v32  ;;  %v20559_v49 = vunpack.c.l.bf16 %v20558_v12 }
 0x6fc   : > { %v11170_v29 = vmul.f32 %v20555_v6, %v19371_v42  ;;  %v11313_v46 = vmul.f32 %v20557_v21, %v19341_v1  ;;  %v20561_v53 = vunpack.c.l.bf16 %v20560_v61  ;;  %v20562_v0 = vunpack.c.h.bf16 %v20560_v61 }
 0x6fd   : > { %v11297_v22 = vmul.f32 %v20559_v49, %v19341_v1  ;;  %v11585_v2 = vadd.f32 %v11296_v45, %v11295_v57  ;;  %v11722_v59 = vadd.f32 %v11721_v23, %v11406_v13  ;;  %v11482_v3 = vadd.f32 %v11481_v44, %v11214_v50  ;;  %v19430_v45 = vpop.f32.mrf.mxu0 }
 0x6fe   : > { %v11327_v27 = vmul.f32 %v20561_v53, %v19271_v58  ;;  %v11328_v32 = vmul.f32 %v20562_v0, %v19305_v10  ;;  %v20564_v25 = vunpack.c.l.bf16 %v20563_v38  ;;  %v20565_v21 = vunpack.c.h.bf16 %v20563_v38  ;;  %v20568_v0 = vld [vmem:[#allocation82_spill] sm:$0xff] }
 0x6ff   : > { %v11447_v49 = vadd.f32 %v11446_v30, %v11186_v54  ;;  %v20566_v57 = vunpack.c.h.bf16 %v20556_v37  ;;  %v20567_v61 = vunpack.c.h.bf16 %v20558_v12  ;;  %11723 = vadd.xlane.f32.xlu1 %v11722_v59  ;;  %11483 = vadd.xlane.f32.xlu0 %v11482_v3  ;;  %v11427_v50 = vadd.f32 %v11426_v26, %v11170_v29  ;;  %v19445_v30 = vld [vmem:[%s20062_s4 + $0x78] sm:$0xff]  ;;  %v20572_v29 = vld [vmem:[#allocation85_spill] sm:$0xff] }
 0x700   : > { %v11199_v6 = vmul.f32 %v20564_v25, %v19271_v58  ;;  %v11200_v9 = vmul.f32 %v20565_v21, %v19305_v10  ;;  %v11606_v23 = vadd.f32 %v11605_v40, %v11313_v46  ;;  %v20569_v38 = vunpack.c.l.bf16 %v20568_v0  ;;  %v20570_v21 = vld [vmem:[#allocation84_spill] sm:$0xff] }
 0x701   : > { %v11314_v53 = vmul.f32 %v20566_v57, %v19371_v42  ;;  %v11298_v13 = vmul.f32 %v20567_v61, %v19371_v42  ;;  %v11586_v25 = vadd.f32 %v11585_v2, %v11297_v22  ;;  %v11625_v12 = vadd.f32 %v11328_v32, %v11327_v27  ;;  %v19463_v27 = vpop.f32.mrf.mxu1 }
 0x702   : > { %v11329_v54 = vmul.f32 %v20569_v38, %v19341_v1  ;;  %v20571_v57 = vunpack.c.l.bf16 %v20570_v21  ;;  %v20573_v26 = vunpack.c.l.bf16 %v20572_v29  ;;  %v11465_v40 = vadd.f32 %v11200_v9, %v11199_v6  ;;  %v20575_v38 = vld [vmem:[#allocation87_spill] sm:$0xff]  ;;  %v20579_v9 = vld [vmem:[#allocation89_spill] sm:$0xff] }
 0x703   : > { %v20574_v3 = vunpack.c.h.bf16 %v20572_v29  ;;  %v20576_v24 = vunpack.c.l.bf16 %v20575_v38  ;;  %v20577_v22 = vunpack.c.h.bf16 %v20575_v38  ;;  %v20578_v32 = vunpack.c.h.bf16 %v20568_v0  ;;  %11448 = vadd.xlane.f32.xlu1 %v11447_v49  ;;  %11428 = vadd.xlane.f32.xlu0 %v11427_v50  ;;  %v20583_v0 = vld [vmem:[#allocation91_spill] sm:$0xff]  ;;  %v20585_v49 = vld [vmem:[#allocation86_spill] sm:$0xff]  ;;  %v19496_v16 = vpop.f32.mrf.mxu1 }
 0x704   : > { %v11201_v59 = vmul.f32 %v20571_v57, %v19341_v1  ;;  %v11215_v46 = vmul.f32 %v20573_v26, %v19271_v58  ;;  %v20580_v6 = vunpack.c.l.bf16 %v20579_v9  ;;  %v20581_v29 = vunpack.c.h.bf16 %v20579_v9  ;;  %v19485_v9 = vld [vmem:[%s20062_s4 + $0x370] sm:$0xff] }
 0x705   : > { %v11216_v61 = vmul.f32 %v20574_v3, %v19305_v10  ;;  %v11171_v44 = vmul.f32 %v20576_v24, %v19397_v33  ;;  %v11172_v2 = vmul.f32 %v20577_v22, %v19430_v45  ;;  %v11330_v57 = vmul.f32 %v20578_v32, %v19371_v42 }
 0x706   : > { %v11343_v26 = vmul.f32 %v20580_v6, %v19271_v58  ;;  %v11344_v3 = vmul.f32 %v20581_v29, %v19305_v10  ;;  %v11607_v38 = vadd.f32 %v11606_v23, %v11314_v53  ;;  %v20582_v22 = vunpack.c.h.bf16 %v20570_v21 }
 0x707   : > { %v20584_v32 = vunpack.c.l.bf16 %v20583_v0  ;;  %v11587_v6 = vadd.f32 %v11586_v25, %v11298_v13  ;;  %v11626_v29 = vadd.f32 %v11625_v12, %v11329_v54  ;;  %v20586_v53 = vunpack.c.l.bf16 %v20585_v49  ;;  %v20590_v13 = vld [vmem:[#allocation90_spill] sm:$0xff] }
 0x708   : > { %v11202_v37 = vmul.f32 %v20582_v22, %v19371_v42  ;;  %v20587_v23 = vunpack.c.h.bf16 %v20583_v0  ;;  %v11466_v22 = vadd.f32 %v11465_v40, %v11201_v59  ;;  %v11485_v24 = vadd.f32 %v11216_v61, %v11215_v46  ;;  %11608 = vadd.xlane.f32.xlu1 %v11607_v38  ;;  %v20594_v46 = vld [vmem:[#allocation93_spill] sm:$0xff]  ;;  %v20598_v38 = vld [vmem:[#allocation95_spill] sm:$0xff] }
 0x709   : > { %v11315_v17 = vmul.f32 %v20584_v32, %v19397_v33  ;;  %v11217_v50 = vmul.f32 %v20586_v53, %v19341_v1  ;;  %v20588_v32 = vld [vmem:[#allocation88_spill] sm:$0xff]  ;;  %v11430_v18 = vadd.f32 %v11172_v2, %v11171_v44  ;;  %v20591_v54 = vunpack.c.l.bf16 %v20590_v13  ;;  %11588 = vadd.xlane.f32.xlu0 %v11587_v6 }
 0x70a   : > { %v11316_v21 = vmul.f32 %v20587_v23, %v19430_v45  ;;  %v20589_v11 = vunpack.c.l.bf16 %v20588_v32  ;;  %v11645_v12 = vadd.f32 %v11344_v3, %v11343_v26  ;;  %v20592_v53 = vld [vmem:[#allocation92_spill] sm:$0xff]  ;;  %v20596_v40 = vunpack.c.h.bf16 %v20594_v46  ;;  %v19515_v26 = vld [vmem:[%s20062_s4 + $0x230] sm:$0xff] }
 0x70b   : > { %v11345_v25 = vmul.f32 %v20591_v54, %v19341_v1  ;;  %v20593_v8 = vunpack.c.l.bf16 %v20592_v53  ;;  %v20597_v3 = vunpack.c.h.bf16 %v20585_v49  ;;  %v20599_v6 = vunpack.c.l.bf16 %v20598_v38 }
 0x70c   : > { %v11173_v34 = vmul.f32 %v20589_v11, %v19463_v27  ;;  %v11610_v59 = vadd.f32 %v11316_v21, %v11315_v17  ;;  %v20595_v11 = vunpack.c.l.bf16 %v20594_v46  ;;  %v11232_v61 = vmul.f32 %v20596_v40, %v19305_v10 }
 0x70d   : > { %v11317_v56 = vmul.f32 %v20593_v8, %v19463_v27  ;;  %v11627_v8 = vadd.f32 %v11626_v29, %v11330_v57  ;;  %v11218_v17 = vmul.f32 %v20597_v3, %v19371_v42  ;;  %v11203_v23 = vmul.f32 %v20599_v6, %v19397_v33 }
 0x70e   : > { %v11231_v44 = vmul.f32 %v20595_v11, %v19271_v58  ;;  %v20600_v21 = vunpack.c.h.bf16 %v20598_v38  ;;  %v11467_v46 = vadd.f32 %v11466_v22, %v11202_v37  ;;  %v11486_v11 = vadd.f32 %v11485_v24, %v11217_v50  ;;  %v20604_v24 = vld [vmem:[#allocation94_spill] sm:$0xff] }
 0x70f   : > { %v20601_v40 = vunpack.c.h.bf16 %v20588_v32  ;;  %v11431_v0 = vadd.f32 %v11430_v18, %v11173_v34  ;;  %v20602_v57 = vunpack.c.h.bf16 %v20590_v13  ;;  %v11646_v49 = vadd.f32 %v11645_v12, %v11345_v25  ;;  %11628 = vadd.xlane.f32.xlu1 %v11627_v8  ;;  %v19542_v34 = vld [vmem:[%s20062_s4 + $0x378] sm:$0xff]  ;;  %v20606_v13 = vld [vmem:[#allocation96_spill] sm:$0xff]  ;;  %v20608_v8 = vld [vmem:[#allocation97_spill] sm:$0xff] }
 0x710   : > { %v11204_v54 = vmul.f32 %v20600_v21, %v19430_v45  ;;  %v20603_v3 = vunpack.c.h.bf16 %v20592_v53  ;;  %11468 = vadd.xlane.f32.xlu0 %v11467_v46  ;;  %v11611_v37 = vadd.f32 %v11610_v59, %v11317_v56  ;;  %v20605_v50 = vunpack.c.l.bf16 %v20604_v24  ;;  %v20611_v46 = vld [vmem:[#allocation99_spill] sm:$0xff] }
 0x711   : > { %v11174_v2 = vmul.f32 %v20601_v40, %v19496_v16  ;;  %v11346_v29 = vmul.f32 %v20602_v57, %v19371_v42  ;;  %v11505_v32 = vadd.f32 %v11232_v61, %v11231_v44  ;;  %v20607_v25 = vunpack.c.l.bf16 %v20606_v13 }
 0x712   : > { %v11318_v6 = vmul.f32 %v20603_v3, %v19496_v16  ;;  %v11233_v22 = vmul.f32 %v20605_v50, %v19341_v1  ;;  %v11470_v53 = vadd.f32 %v11204_v54, %v11203_v23  ;;  %v20609_v56 = vunpack.c.l.bf16 %v20608_v8 }
 0x713   : > { %v11205_v12 = vmul.f32 %v20607_v25, %v19463_v27  ;;  %v20610_v38 = vunpack.c.h.bf16 %v20608_v8  ;;  %v11487_v61 = vadd.f32 %v11486_v11, %v11218_v17  ;;  %v11432_v21 = vadd.f32 %v11431_v0, %v11174_v2  ;;  %v20616_v11 = vld [vmem:[#allocation98_spill] sm:$0xff] }
 0x714   : > { %v11359_v59 = vmul.f32 %v20609_v56, %v19271_v58  ;;  %v20612_v40 = vunpack.c.l.bf16 %v20611_v46  ;;  %v20613_v3 = vunpack.c.h.bf16 %v20611_v46  ;;  %v11647_v25 = vadd.f32 %v11646_v49, %v11346_v29  ;;  %v19574_v49 = vld [vmem:[%s20062_s4 + $0x238] sm:$0xff] }
 0x715   : > { %v11360_v44 = vmul.f32 %v20610_v38, %v19305_v10  ;;  %v20614_v23 = vunpack.c.h.bf16 %v20604_v24  ;;  %v20615_v56 = vunpack.c.h.bf16 %v20606_v13  ;;  %11488 = vadd.xlane.f32.xlu1 %v11487_v61  ;;  %11433 = vadd.xlane.f32.xlu0 %v11432_v21  ;;  %v11612_v0 = vadd.f32 %v11611_v37, %v11318_v6  ;;  %v20620_v6 = vld [vmem:[#allocation101_spill] sm:$0xff] }
 0x716   : > { %v11331_v57 = vmul.f32 %v20612_v40, %v19397_v33  ;;  %v11332_v50 = vmul.f32 %v20613_v3, %v19430_v45  ;;  %v11506_v2 = vadd.f32 %v11505_v32, %v11233_v22  ;;  %v20617_v38 = vunpack.c.l.bf16 %v20616_v11  ;;  %v20618_v40 = vld [vmem:[#allocation100_spill] sm:$0xff] }
 0x717   : > { %v11234_v54 = vmul.f32 %v20614_v23, %v19371_v42  ;;  %v11206_v8 = vmul.f32 %v20615_v56, %v19496_v16  ;;  %v11471_v24 = vadd.f32 %v11470_v53, %v11205_v12  ;;  %v11665_v13 = vadd.f32 %v11360_v44, %v11359_v59  ;;  %v20623_v56 = vld [vmem:[#allocation103_spill] sm:$0xff] }
 0x718   : > { %v11361_v46 = vmul.f32 %v20617_v38, %v19341_v1  ;;  %v20619_v3 = vunpack.c.l.bf16 %v20618_v40  ;;  %v20621_v37 = vunpack.c.l.bf16 %v20620_v6  ;;  %v11630_v32 = vadd.f32 %v11332_v50, %v11331_v57 }
 0x719   : > { %v20622_v21 = vunpack.c.h.bf16 %v20620_v6  ;;  %v20624_v38 = vunpack.c.l.bf16 %v20623_v56  ;;  %v20625_v12 = vunpack.c.h.bf16 %v20623_v56  ;;  %v20626_v59 = vunpack.c.h.bf16 %v20616_v11  ;;  %11648 = vadd.xlane.f32.xlu1 %v11647_v25  ;;  %11613 = vadd.xlane.f32.xlu0 %v11612_v0  ;;  %v20630_v56 = vld [vmem:[#allocation107_spill] sm:$0xff]  ;;  %v20634_v0 = vld [vmem:[#allocation102_spill] sm:$0xff] }
 0x71a   : > { %v11333_v61 = vmul.f32 %v20619_v3, %v19463_v27  ;;  %v11247_v22 = vmul.f32 %v20621_v37, %v19271_v58  ;;  %v20627_v3 = vld [vmem:[#allocation105_spill] sm:$0xff]  ;;  %v20632_v11 = vunpack.c.h.bf16 %v20630_v56  ;;  %v20633_v25 = vunpack.c.h.bf16 %v20618_v40 }
 0x71b   : > { %v11248_v23 = vmul.f32 %v20622_v21, %v19305_v10  ;;  %v11219_v29 = vmul.f32 %v20624_v38, %v19397_v33  ;;  %v11220_v53 = vmul.f32 %v20625_v12, %v19430_v45  ;;  %v11362_v44 = vmul.f32 %v20626_v59, %v19371_v42 }
 0x71c   : > { %v20628_v37 = vunpack.c.l.bf16 %v20627_v3  ;;  %v20629_v50 = vunpack.c.h.bf16 %v20627_v3  ;;  %v11507_v38 = vadd.f32 %v11506_v2, %v11234_v54  ;;  %v20631_v12 = vunpack.c.l.bf16 %v20630_v56  ;;  %v19611_v3 = vld [vmem:[%s20062_s4 + $0x1b0] sm:$0xff] }
 0x71d   : > { %v11348_v59 = vmul.f32 %v20632_v11, %v19430_v45  ;;  %v11334_v54 = vmul.f32 %v20633_v25, %v19496_v16  ;;  %v20635_v2 = vunpack.c.l.bf16 %v20634_v0  ;;  %v11631_v21 = vadd.f32 %v11630_v32, %v11333_v61  ;;  %v20636_v11 = vld [vmem:[#allocation104_spill] sm:$0xff] }
 0x71e   : > { %v11375_v57 = vmul.f32 %v20628_v37, %v19271_v58  ;;  %v11376_v6 = vmul.f32 %v20629_v50, %v19305_v10  ;;  %v11347_v18 = vmul.f32 %v20631_v12, %v19397_v33  ;;  %v11472_v37 = vadd.f32 %v11471_v24, %v11206_v8  ;;  %v20640_v24 = vld [vmem:[#allocation108_spill] sm:$0xff]  ;;  %11508 = vadd.xlane.f32.xlu1 %v11507_v38  ;;  %v19653_v38 = vld [vmem:[%s20062_s4 + $0x3b0] sm:$0xff] }
 0x71f   : > { %v11666_v50 = vadd.f32 %v11665_v13, %v11361_v46  ;;  %v11249_v12 = vmul.f32 %v20635_v2, %v19341_v1  ;;  %v11525_v56 = vadd.f32 %v11248_v23, %v11247_v22  ;;  %v20637_v41 = vunpack.c.l.bf16 %v20636_v11 }
 0x720   : > { %v11490_v62 = vadd.f32 %v11220_v53, %v11219_v29  ;;  %v20639_v43 = vunpack.c.l.bf16 %v20638_v60  ;;  %v11685_v46 = vadd.f32 %v11376_v6, %v11375_v57  ;;  %v20641_v13 = vunpack.c.l.bf16 %v20640_v24  ;;  %11473 = vadd.xlane.f32.xlu0 %v11472_v37 }
 0x721   : > { %v11221_v17 = vmul.f32 %v20637_v41, %v19463_v27  ;;  %v11011_v25 = vunpack.c.l.bf16 %v19611_v3  ;;  %v11650_v61 = vadd.f32 %v11348_v59, %v11347_v18  ;;  %v20642_v22 = vunpack.c.l.bf16 %v18858_v51 }
 0x722   : > { %v11377_v8 = vmul.f32 %v20639_v43, %v19341_v1  ;;  %v11349_v40 = vmul.f32 %v20641_v13, %v19463_v27  ;;  %v20643_v41 = vunpack.c.h.bf16 %v18858_v51  ;;  %v19638_v43 = vld [vmem:[%s20062_s4 + $0x1b8] sm:$0xff]  ;;  %v11012_v23 = vunpack.c.h.bf16 %v19611_v3 }
 0x723   : > { %v11263_v32 = vmul.f32 %v20642_v22, %v19271_v58  ;;  %v11667_v53 = vadd.f32 %v11666_v50, %v11362_v44  ;;  %v20644_v57 = vunpack.c.h.bf16 %v20634_v0  ;;  %v11235_v6 = vmul.f32 %v10979_v52, %v19397_v33 }
 0x724   : > { %v11264_v29 = vmul.f32 %v20643_v41, %v19305_v10  ;;  %v11236_v51 = vmul.f32 %v10980_v14, %v19430_v45  ;;  %v11632_v59 = vadd.f32 %v11631_v21, %v11334_v54  ;;  %v11526_v37 = vadd.f32 %v11525_v56, %v11249_v12 }
 0x725   : > { %v11250_v18 = vmul.f32 %v20644_v57, %v19371_v42  ;;  %v20645_v44 = vunpack.c.h.bf16 %v20636_v11  ;;  %v11491_v0 = vadd.f32 %v11490_v62, %v11221_v17  ;;  %v20646_v2 = vunpack.c.h.bf16 %v20638_v60  ;;  %11668 = vadd.xlane.f32.xlu1 %v11667_v53 }
 0x726   : > { %v11686_v13 = vadd.f32 %v11685_v46, %v11377_v8  ;;  %v20647_v55 = vunpack.c.h.bf16 %v20640_v24  ;;  %v11013_v22 = vunpack.c.l.bf16 %v19638_v43  ;;  %11633 = vadd.xlane.f32.xlu0 %v11632_v59  ;;  %v11651_v21 = vadd.f32 %v11650_v61, %v11349_v40  ;;  %v19681_v40 = vld [vmem:[%s20062_s4 + $0x3b8] sm:$0xff] }
 0x727   : > { %v11222_v50 = vmul.f32 %v20645_v44, %v19496_v16  ;;  %v11378_v52 = vmul.f32 %v20646_v2, %v19371_v42  ;;  %v20648_v54 = vunpack.c.l.bf16 %v18884_v15  ;;  %v11545_v56 = vadd.f32 %v11264_v29, %v11263_v32 }
 0x728   : > { %v11350_v14 = vmul.f32 %v20647_v55, %v19496_v16  ;;  %v11139_v62 = vunpack.c.l.bf16 %v19653_v38  ;;  %v11237_v60 = vmul.f32 %v10981_v31, %v19463_v27  ;;  %v11510_v17 = vadd.f32 %v11236_v51, %v11235_v6 }
 0x729   : > { %v11265_v12 = vmul.f32 %v20648_v54, %v19341_v1  ;;  %v20649_v11 = vunpack.c.l.bf16 %v18953_v4  ;;  %v20650_v46 = vunpack.c.h.bf16 %v18953_v4  ;;  %v11527_v61 = vadd.f32 %v11526_v37, %v11250_v18 }
 0x72a   : > { %v11492_v32 = vadd.f32 %v11491_v0, %v11222_v50  ;;  %v20651_v41 = vunpack.c.l.bf16 %v19279_v36  ;;  %v20652_v29 = vunpack.c.h.bf16 %v19279_v36  ;;  %v11687_v57 = vadd.f32 %v11686_v13, %v11378_v52 }
 0x72b   : > { %v11391_v8 = vmul.f32 %v20649_v11, %v19271_v58  ;;  %v11392_v24 = vmul.f32 %v20650_v46, %v19305_v10  ;;  %v20653_v4 = vunpack.c.h.bf16 %v18884_v15  ;;  %v20654_v51 = vunpack.c.h.bf16 %v19076_v5  ;;  %11528 = vadd.xlane.f32.xlu1 %v11527_v61  ;;  %v19703_v15 = vld [vmem:[%s20062_s4 + $0x3f0] sm:$0xff] }
 0x72c   : > { %v11363_v31 = vmul.f32 %v20651_v41, %v19397_v33  ;;  %v11364_v53 = vmul.f32 %v20652_v29, %v19430_v45  ;;  %v11140_v18 = vunpack.c.h.bf16 %v19653_v38  ;;  %11493 = vadd.xlane.f32.xlu0 %v11492_v32  ;;  %v11652_v37 = vadd.f32 %v11651_v21, %v11350_v14 }
 0x72d   : > { %v11266_v6 = vmul.f32 %v20653_v4, %v19371_v42  ;;  %v11238_v59 = vmul.f32 %v20654_v51, %v19496_v16  ;;  %v11546_v44 = vadd.f32 %v11545_v56, %v11265_v12  ;;  %v20655_v50 = vunpack.c.l.bf16 %v19109_v35 }
 0x72e   : > { %v11141_v0 = vunpack.c.l.bf16 %v19681_v40  ;;  %v11511_v2 = vadd.f32 %v11510_v17, %v11237_v60  ;;  %v11705_v5 = vadd.f32 %v11392_v24, %v11391_v8  ;;  %v20656_v52 = vunpack.c.l.bf16 %v19310_v19 }
 0x72f   : > { %v11393_v36 = vmul.f32 %v20655_v50, %v19341_v1  ;;  %v20657_v55 = vunpack.c.l.bf16 %v19014_v63  ;;  %v11670_v21 = vadd.f32 %v11364_v53, %v11363_v31  ;;  %v20658_v54 = vunpack.c.h.bf16 %v19014_v63  ;;  %11688 = vadd.xlane.f32.xlu1 %v11687_v57 }
 0x730   : > { %v11365_v13 = vmul.f32 %v20656_v52, %v19463_v27  ;;  %v20659_v56 = vunpack.c.l.bf16 %v19350_v48  ;;  %v20660_v60 = vunpack.c.h.bf16 %v19350_v48  ;;  %v20661_v8 = vunpack.c.h.bf16 %v19109_v35  ;;  %11653 = vadd.xlane.f32.xlu0 %v11652_v37 }
 0x731   : > { %v11279_v14 = vmul.f32 %v20657_v55, %v19271_v58  ;;  %v11280_v12 = vmul.f32 %v20658_v54, %v19305_v10  ;;  %v20662_v24 = vunpack.c.l.bf16 %v19413_v20  ;;  %v20663_v63 = vunpack.c.h.bf16 %v19413_v20 }
 0x732   : > { %v11251_v11 = vmul.f32 %v20659_v56, %v19397_v33  ;;  %v11252_v17 = vmul.f32 %v20660_v60, %v19430_v45  ;;  %v11394_v46 = vmul.f32 %v20661_v8, %v19371_v42  ;;  %v11155_v41 = vunpack.c.l.bf16 %v19703_v15 }
 0x733   : > { %v11187_v61 = vmul.f32 %v20662_v24, %v19397_v33  ;;  %v11188_v32 = vmul.f32 %v20663_v63, %v19430_v45  ;;  %v11547_v31 = vadd.f32 %v11546_v44, %v11266_v6  ;;  %v20664_v48 = vunpack.c.l.bf16 %v19485_v9 }
 0x734   : > { %v20665_v35 = vunpack.c.h.bf16 %v19485_v9  ;;  %v11156_v4 = vunpack.c.h.bf16 %v19703_v15  ;;  %v11512_v51 = vadd.f32 %v11511_v2, %v11238_v59  ;;  %v11706_v50 = vadd.f32 %v11705_v5, %v11393_v36 }
 0x735   : > { %v11379_v29 = vmul.f32 %v20664_v48, %v19397_v33  ;;  %v20666_v20 = vunpack.c.h.bf16 %v19310_v19  ;;  %v20667_v57 = vunpack.c.l.bf16 %v19165_v7  ;;  %v11671_v37 = vadd.f32 %v11670_v21, %v11365_v13  ;;  %11548 = vadd.xlane.f32.xlu1 %v11547_v31 }
 0x736   : > { %v11380_v53 = vmul.f32 %v20665_v35, %v19430_v45  ;;  %v11565_v44 = vadd.f32 %v11280_v12, %v11279_v14  ;;  %v20668_v55 = vunpack.c.l.bf16 %v19382_v28  ;;  %v11530_v9 = vadd.f32 %v11252_v17, %v11251_v11  ;;  %11513 = vadd.xlane.f32.xlu0 %v11512_v51  ;;  %v10837_v17 = vld [vmem:[%s20062_s4 + $0x1f0] sm:$0xff] }
 0x737   : > { %v11366_v52 = vmul.f32 %v20666_v20, %v19496_v16  ;;  %v11281_v6 = vmul.f32 %v20667_v57, %v19341_v1  ;;  %v20669_v56 = vunpack.c.l.bf16 %v19445_v30  ;;  %v11450_v36 = vadd.f32 %v11188_v32, %v11187_v61 }
 0x738   : > { %v11253_v54 = vmul.f32 %v20668_v55, %v19463_v27  ;;  %v20670_v19 = vunpack.c.l.bf16 %v19542_v34  ;;  %v11014_v5 = vunpack.c.h.bf16 %v19638_v43  ;;  %v11690_v13 = vadd.f32 %v11380_v53, %v11379_v29 }
 0x739   : > { %v11189_v59 = vmul.f32 %v20669_v56, %v19463_v27  ;;  %v20671_v14 = vunpack.c.l.bf16 %v19515_v26  ;;  %v20672_v12 = vunpack.c.h.bf16 %v19515_v26  ;;  %v11142_v60 = vunpack.c.h.bf16 %v19681_v40 }
 0x73a   : > { %v11381_v2 = vmul.f32 %v20670_v19, %v19463_v27  ;;  %v11707_v8 = vadd.f32 %v11706_v50, %v11394_v46  ;;  %v20673_v24 = vunpack.c.h.bf16 %v19165_v7  ;;  %v11267_v63 = vmul.f32 %v11011_v25, %v19397_v33 }
 0x73b   : > { %v11299_v21 = vmul.f32 %v20671_v14, %v19397_v33  ;;  %v11300_v11 = vmul.f32 %v20672_v12, %v19430_v45  ;;  %v11268_v26 = vmul.f32 %v11012_v23, %v19430_v45  ;;  %v11672_v32 = vadd.f32 %v11671_v37, %v11366_v52  ;;  %v10902_v52 = vld [vmem:[%s20062_s4 + $0x3f8] sm:$0xff] }
 0x73c   : > { %v11282_v61 = vmul.f32 %v20673_v24, %v19371_v42  ;;  %v11566_v31 = vadd.f32 %v11565_v44, %v11281_v6  ;;  %v20674_v48 = vunpack.c.h.bf16 %v19382_v28  ;;  %v11531_v35 = vadd.f32 %v11530_v9, %v11253_v54  ;;  %11708 = vadd.xlane.f32.xlu1 %v11707_v8  ;;  %v10838_v54 = vld [vmem:[%s20062_s4 + $0x1f8] sm:$0xff] }
 0x73d   : > { %v20675_v46 = vunpack.c.h.bf16 %v19445_v30  ;;  %v11451_v53 = vadd.f32 %v11450_v36, %v11189_v59  ;;  %v20676_v51 = vunpack.c.h.bf16 %v19542_v34  ;;  %v11027_v50 = vunpack.c.l.bf16 %v10837_v17  ;;  %11673 = vadd.xlane.f32.xlu0 %v11672_v32 }
 0x73e   : > { %v11254_v29 = vmul.f32 %v20674_v48, %v19496_v16  ;;  %v11691_v3 = vadd.f32 %v11690_v13, %v11381_v2  ;;  %v20677_v23 = vunpack.c.l.bf16 %v19574_v49  ;;  %v11590_v28 = vadd.f32 %v11300_v11, %v11299_v21 }
 0x73f   : > { %v11190_v7 = vmul.f32 %v20675_v46, %v19496_v16  ;;  %v11382_v25 = vmul.f32 %v20676_v51, %v19496_v16  ;;  %v11028_v30 = vunpack.c.h.bf16 %v10837_v17  ;;  %v11269_v57 = vmul.f32 %v11013_v22, %v19463_v27  ;;  %v11439_v51 = vpop.xlane.xlu1 %11438 }
 0x740   : > { %v11301_v20 = vmul.f32 %v20677_v23, %v19463_v27  ;;  %v11550_v34 = vadd.f32 %v11268_v26, %v11267_v63  ;;  %v20678_v6 = vunpack.c.l.bf16 %v19198_v47  ;;  %v20679_v44 = vunpack.c.h.bf16 %v19198_v47 }
 0x741   : > { %v11567_v9 = vadd.f32 %v11566_v31, %v11282_v61  ;;  %v11532_v56 = vadd.f32 %v11531_v35, %v11254_v29  ;;  %v11395_v43 = vmul.f32 %v11139_v62, %v19397_v33  ;;  %v11396_v22 = vmul.f32 %v11140_v18, %v19430_v45 }
 0x742   : > { %v11407_v37 = vmul.f32 %v20678_v6, %v19271_v58  ;;  %v11408_v55 = vmul.f32 %v20679_v44, %v19305_v10  ;;  %v11452_v59 = vadd.f32 %v11451_v53, %v11190_v7  ;;  %v20680_v58 = vunpack.c.h.bf16 %v19574_v49 }
 0x743   : > { %v11270_v10 = vmul.f32 %v11014_v5, %v19496_v16  ;;  %v11157_v36 = vunpack.c.l.bf16 %v10902_v52  ;;  %11568 = vadd.xlane.f32.xlu1 %v11567_v9  ;;  %11533 = vadd.xlane.f32.xlu0 %v11532_v56  ;;  %v11692_v19 = vadd.f32 %v11691_v3, %v11382_v25  ;;  %v11591_v2 = vadd.f32 %v11590_v28, %v11301_v20  ;;  %v19838_v25 = vpop.xlane.xlu0 %11418  ;;  %v19844_v23 = vpop.xlane.xlu1 %11478 }
 0x744   : > { %v11302_v47 = vmul.f32 %v20680_v58, %v19496_v16  ;;  %v20681_v13 = vunpack.c.l.bf16 %v19228_v39  ;;  %v11029_v14 = vunpack.c.l.bf16 %v10838_v54  ;;  %v11551_v21 = vadd.f32 %v11550_v34, %v11269_v57 }
 0x745   : > { %v11725_v38 = vadd.f32 %v11408_v55, %v11407_v37  ;;  %v11397_v18 = vmul.f32 %v11141_v0, %v19463_v27  ;;  %v11411_v49 = vmul.f32 %v11155_v41, %v19397_v33  ;;  %v11710_v5 = vadd.f32 %v11396_v22, %v11395_v43 }
 0x746   : > { %v11409_v62 = vmul.f32 %v20681_v13, %v19341_v1  ;;  %v11412_v12 = vmul.f32 %v11156_v4, %v19430_v45  ;;  %v11283_v11 = vmul.f32 %v11027_v50, %v19397_v33  ;;  %v11284_v1 = vmul.f32 %v11028_v30, %v19430_v45 }
 0x747   : > { %11453 = vadd.xlane.f32.xlu1 %v11452_v59  ;;  %11693 = vadd.xlane.f32.xlu0 %v11692_v19  ;;  %v11592_v17 = vadd.f32 %v11591_v2, %v11302_v47  ;;  %v20682_v40 = vunpack.c.h.bf16 %v19228_v39  ;;  %v11158_v8 = vunpack.c.h.bf16 %v10902_v52  ;;  %v11030_v24 = vunpack.c.h.bf16 %v10838_v54  ;;  %v11579_v20 = vpop.xlane.xlu0 %11578  ;;  %v11444_v34 = vpop.xlane.xlu1 %11443 }
 0x748   : > { %v11552_v61 = vadd.f32 %v11551_v21, %v11270_v10  ;;  %v11726_v41 = vadd.f32 %v11725_v38, %v11409_v62  ;;  %v11398_v63 = vmul.f32 %v11142_v60, %v19496_v16  ;;  %v11413_v15 = vmul.f32 %v11157_v36, %v19463_v27 }
 0x749   : > { %v11410_v0 = vmul.f32 %v20682_v40, %v19371_v42  ;;  %v11711_v4 = vadd.f32 %v11710_v5, %v11397_v18  ;;  %v11730_v26 = vadd.f32 %v11412_v12, %v11411_v49  ;;  %v11285_v33 = vmul.f32 %v11029_v14, %v19463_v27  ;;  %v20684_v27 = vld [vmem:[#allocation45_spill] sm:$0xff] }
 0x74a   : > { %v11570_v45 = vadd.f32 %v11284_v1, %v11283_v11  ;;  %v11414_v31 = vmul.f32 %v11158_v8, %v19496_v16  ;;  %v11286_v48 = vmul.f32 %v11030_v24, %v19496_v16  ;;  %v20683_v46 = vlaneseq }
 0x74b   : > { %11593 = vadd.xlane.f32.xlu1 %v11592_v17  ;;  %11553 = vadd.xlane.f32.xlu0 %v11552_v61  ;;  %v11727_v32 = vadd.f32 %v11726_v41, %v11410_v0  ;;  %v11712_v39 = vadd.f32 %v11711_v4, %v11398_v63  ;;  %v11731_v42 = vadd.f32 %v11730_v26, %v11413_v15  ;;  %v11599_v57 = vpop.xlane.xlu0 %11598  ;;  %v11584_v54 = vpop.xlane.xlu1 %11583 }
 0x74c   : > { %v11571_v29 = vadd.f32 %v11570_v45, %v11285_v33  ;;  %v19832_v7 = vand.u32 127, %v20683_v46 }
 0x74d   : > { %v11732_v60 = vadd.f32 %v11731_v42, %v11414_v31 }
 0x74e   : > { %v11572_v35 = vadd.f32 %v11571_v29, %v11286_v48  ;;  %v19836_v53 = vsub.s32 %v19832_v7, %v20684_v27  ;;  %v11805_v3 = vadd.s32 4294967288, %v19832_v7 }
 0x74f   : > { %11728 = vadd.xlane.f32.xlu1 %v11727_v32  ;;  %11713 = vadd.xlane.f32.xlu0 %v11712_v39  ;;  %v11459_v55 = vpop.xlane.xlu0 %11458  ;;  %v11604_v59 = vpop.xlane.xlu1 %11603 }
 0x750   : > { %v11829_v50 = vrot.slane %v11439_v51, %v19836_v53  ;;  %v11804_v16 = vrot.slane %v19838_v25, %v19836_v53  ;;  %v11867_v28 = vrot.slane %v19844_v23, %v19836_v53  ;;  %v11962_v52 = vrot.slane %v11579_v20, %v19836_v53 }
 0x751   : > { %v19850_v30 = vsub.s32 %v11805_v3, %v20684_v27  ;;  %v11981_v6 = vrot.slane %v11599_v57, %v19836_v53  ;;  %v11848_v9 = vrot.slane %v11459_v55, %v19836_v53  ;;  %v11819_v23 = vadd.s32 4294967272, %v19832_v7 }
 0x753   : > { %11733 = vadd.xlane.f32.xlu1 %v11732_v60  ;;  %11573 = vadd.xlane.f32.xlu0 %v11572_v35  ;;  %v11833_v37 = vrot.slane %v11444_v34, %v19850_v30  ;;  %v11966_v56 = vrot.slane %v11584_v54, %v19850_v30  ;;  %v11619_v22 = vpop.xlane.xlu0 %11618  ;;  %v11985_v47 = vrot.slane %v11604_v59, %v19850_v30  ;;  %v11464_v19 = vpop.xlane.xlu1 %11463 }
 0x754   : > { %v12000_v58 = vrot.slane %v11619_v22, %v19836_v53  ;;  %v11852_v13 = vrot.slane %v11464_v19, %v19850_v30  ;;  %v11812_v22 = vadd.s32 4294967280, %v19832_v7 }
 0x755   : > { %v19855_v44 = vsel %vm11810_vm1, %v11833_v37, %v11829_v50  ;;  %v19860_v43 = vsel %vm11810_vm1, %v11966_v56, %v11962_v52  ;;  %v19865_v10 = vsel %vm11810_vm1, %v11985_v47, %v11981_v6 }
 0x756   : > { %v19870_v62 = vsel %vm11810_vm1, %v11852_v13, %v11848_v9  ;;  %v19925_v13 = vsub.s32 %v11812_v22, %v20684_v27 }
 0x757   : > { %v11639_v36 = vpop.xlane.xlu0 %11638  ;;  %v11624_v21 = vpop.xlane.xlu1 %11623 }
 0x758   : > { %v12019_v2 = vrot.slane %v11639_v36, %v19836_v53  ;;  %v12004_v18 = vrot.slane %v11624_v21, %v19850_v30 }
 0x75a   : > { %v19875_v49 = vsel %vm11810_vm1, %v12004_v18, %v12000_v58 }
 0x75b   : > { %v11499_v14 = vpop.xlane.xlu0 %11498  ;;  %v11644_v12 = vpop.xlane.xlu1 %11643 }
 0x75c   : > { %v11886_v38 = vrot.slane %v11499_v14, %v19836_v53  ;;  %v12023_v1 = vrot.slane %v11644_v12, %v19850_v30 }
 0x75e   : > { %v19880_v17 = vsel %vm11810_vm1, %v12023_v1, %v12019_v2 }
 0x75f   : > { %v11659_v5 = vpop.xlane.xlu0 %11658 }
 0x760   : > { %v12038_v11 = vrot.slane %v11659_v5, %v19836_v53 }
 0x761   : > { %v11504_v0 = vpop.xlane.xlu1 %11503 }
 0x762   : > { %v11890_v24 = vrot.slane %v11504_v0, %v19850_v30 }
 0x763   : > { %v11519_v40 = vpop.xlane.xlu0 %11518 }
 0x764   : > { %v11905_v8 = vrot.slane %v11519_v40, %v19836_v53  ;;  %v19885_v61 = vsel %vm11810_vm1, %v11890_v24, %v11886_v38 }
 0x765   : > { %v11664_v63 = vpop.xlane.xlu1 %11663 }
 0x766   : > { %v12042_v4 = vrot.slane %v11664_v63, %v19850_v30 }
 0x767   : > { %v11679_v41 = vpop.xlane.xlu0 %11678 }
 0x768   : > { %v12057_v15 = vrot.slane %v11679_v41, %v19836_v53  ;;  %v19890_v26 = vsel %vm11810_vm1, %v12042_v4, %v12038_v11  ;;  %v19953_v41 = vsub.s32 %v11819_v23, %v20684_v27 }
 0x76a   : > { %v11524_v45 = vpop.xlane.xlu1 %11523 }
 0x76b   : > { %v11539_v33 = vpop.xlane.xlu0 %11538  ;;  %v11909_v31 = vrot.slane %v11524_v45, %v19850_v30 }
 0x76c   : > { %v11924_v32 = vrot.slane %v11539_v33, %v19836_v53 }
 0x76d   : > { %v19895_v39 = vsel %vm11810_vm1, %v11909_v31, %v11905_v8 }
 0x772   : > { %v11699_v42 = vpop.xlane.xlu0 %11698 }
 0x773   : > { %v11684_v48 = vpop.xlane.xlu1 %11683  ;;  %v12076_v29 = vrot.slane %v11699_v42, %v19836_v53 }
 0x774   : > { %v12061_v60 = vrot.slane %v11684_v48, %v19850_v30 }
 0x776   : > { %v19900_v35 = vsel %vm11810_vm1, %v12061_v60, %v12057_v15  ;;  %v11559_v46 = vpop.xlane.xlu0 %11558 }
 0x777   : > { %v11544_v51 = vpop.xlane.xlu1 %11543  ;;  %v11943_v50 = vrot.slane %v11559_v46, %v19836_v53 }
 0x778   : > { %v11928_v3 = vrot.slane %v11544_v51, %v19850_v30 }
 0x77a   : > { %v19905_v20 = vsel %vm11810_vm1, %v11928_v3, %v11924_v32 }
 0x77b   : > { %v11719_v52 = vpop.xlane.xlu0 %11718  ;;  %v11704_v57 = vpop.xlane.xlu1 %11703 }
 0x77c   : > { %v12095_v34 = vrot.slane %v11719_v52, %v19836_v53  ;;  %v12080_v6 = vrot.slane %v11704_v57, %v19850_v30 }
 0x77e   : > { %v19910_v37 = vsel %vm11810_vm1, %v12080_v6, %v12076_v29 }
 0x781   : > { %v11564_v55 = vpop.xlane.xlu1 %11563 }
 0x782   : > { %v11947_v9 = vrot.slane %v11564_v55, %v19850_v30 }
 0x783   : > { %v11424_v54 = vpop.xlane.xlu0 %11423 }
 0x784   : > { %v11809_v56 = vrot.slane %v11424_v54, %v19850_v30  ;;  %v19916_v59 = vsel %vm11810_vm1, %v11947_v9, %v11943_v50 }
 0x786   : > { %v11811_v58 = vsel %vm11810_vm1, %v11809_v56, %v11804_v16 }
 0x788   : > { %v11724_v47 = vpop.xlane.xlu1 %11723  ;;  %v11484_v36 = vpop.xlane.xlu0 %11483 }
 0x789   : > { %v12099_v19 = vrot.slane %v11724_v47, %v19850_v30  ;;  %v11871_v2 = vrot.slane %v11484_v36, %v19850_v30 }
 0x78b   : > { %v19928_v14 = vsel %vm11810_vm1, %v12099_v19, %v12095_v34  ;;  %v11872_v21 = vsel %vm11810_vm1, %v11871_v2, %v11867_v28 }
 0x78c   : > { %v11449_v25 = vpop.xlane.xlu1 %11448  ;;  %v11429_v16 = vpop.xlane.xlu0 %11428 }
 0x78d   : > { %v11838_v38 = vrot.slane %v11449_v25, %v19925_v13  ;;  %v11816_v18 = vrot.slane %v11429_v16, %v19925_v13 }
 0x78f   : > { %v19938_v30 = vsel %vm11817_vm2, %v11838_v38, %v19855_v44  ;;  %v11818_v5 = vsel %vm11817_vm2, %v11816_v18, %v11811_v58 }
 0x791   : > { %v11609_v12 = vpop.xlane.xlu1 %11608 }
 0x792   : > { %v11589_v11 = vpop.xlane.xlu0 %11588  ;;  %v11990_v1 = vrot.slane %v11609_v12, %v19925_v13 }
 0x793   : > { %v11971_v53 = vrot.slane %v11589_v11, %v19925_v13 }
 0x794   : > { %v11991_v28 = vsel %vm11817_vm2, %v11990_v1, %v19865_v10 }
 0x795   : > { %v19948_v40 = vsel %vm11817_vm2, %v11971_v53, %v19860_v43 }
 0x798   : > { %v11629_v0 = vpop.xlane.xlu1 %11628 }
 0x799   : > { %v11469_v44 = vpop.xlane.xlu0 %11468  ;;  %v12009_v8 = vrot.slane %v11629_v0, %v19925_v13 }
 0x79a   : > { %v11857_v24 = vrot.slane %v11469_v44, %v19925_v13 }
 0x79b   : > { %v12010_v63 = vsel %vm11817_vm2, %v12009_v8, %v19875_v49 }
 0x79c   : > { %v11858_v7 = vsel %vm11817_vm2, %v11857_v24, %v19870_v62 }
 0x79e   : > { %v11489_v10 = vpop.xlane.xlu1 %11488  ;;  %v11434_v15 = vpop.xlane.xlu0 %11433 }
 0x79f   : > { %v11876_v43 = vrot.slane %v11489_v10, %v19925_v13  ;;  %v11823_v4 = vrot.slane %v11434_v15, %v19953_v41 }
 0x7a1   : > { %v11877_v33 = vsel %vm11817_vm2, %v11876_v43, %v11872_v21  ;;  %v11825_v45 = vsel %vm11824_vm3, %v11823_v4, %v11818_v5 }
 0x7a2   : > { %v11649_v32 = vpop.xlane.xlu1 %11648  ;;  %v11614_v27 = vpop.xlane.xlu0 %11613 }
 0x7a3   : > { %v12028_v31 = vrot.slane %v11649_v32, %v19925_v13  ;;  %v11995_v49 = vrot.slane %v11614_v27, %v19953_v41 }
 0x7a5   : > { %v12029_v62 = vsel %vm11817_vm2, %v12028_v31, %v19880_v17  ;;  %v19968_v42 = vsel %vm11824_vm3, %v11995_v49, %v11991_v28 }
 0x7a7   : > { %v11509_v48 = vpop.xlane.xlu1 %11508 }
 0x7a8   : > { %v11895_v60 = vrot.slane %v11509_v48, %v19925_v13 }
 0x7a9   : > { %v11474_v29 = vpop.xlane.xlu0 %11473 }
 0x7aa   : > { %v11862_v46 = vrot.slane %v11474_v29, %v19953_v41  ;;  %v11896_v51 = vsel %vm11817_vm2, %v11895_v60, %v19885_v61 }
 0x7ac   : > { %v11863_v50 = vsel %vm11824_vm3, %v11862_v46, %v11858_v7 }
 0x7ae   : > { %v11669_v3 = vpop.xlane.xlu1 %11668 }
 0x7af   : > { %v11634_v52 = vpop.xlane.xlu0 %11633  ;;  %v12047_v57 = vrot.slane %v11669_v3, %v19925_v13 }
 0x7b0   : > { %v12014_v17 = vrot.slane %v11634_v52, %v19953_v41 }
 0x7b1   : > { %v12048_v34 = vsel %vm11817_vm2, %v12047_v57, %v19890_v26 }
 0x7b2   : > { %v12015_v6 = vsel %vm11824_vm3, %v12014_v17, %v12010_v63 }
 0x7b4   : > { %v11529_v55 = vpop.xlane.xlu1 %11528 }
 0x7b5   : > { %v11494_v54 = vpop.xlane.xlu0 %11493  ;;  %v11914_v9 = vrot.slane %v11529_v55, %v19925_v13 }
 0x7b6   : > { %v11881_v56 = vrot.slane %v11494_v54, %v19953_v41 }
 0x7b7   : > { %v11915_v61 = vsel %vm11817_vm2, %v11914_v9, %v19895_v39 }
 0x7b8   : > { %v11882_v22 = vsel %vm11824_vm3, %v11881_v56, %v11877_v33  ;;  %v11689_v58 = vpop.xlane.xlu1 %11688 }
 0x7b9   : > { %v11654_v47 = vpop.xlane.xlu0 %11653  ;;  %v12066_v36 = vrot.slane %v11689_v58, %v19925_v13 }
 0x7ba   : > { %v12033_v19 = vrot.slane %v11654_v47, %v19953_v41 }
 0x7bb   : > { %v12067_v26 = vsel %vm11817_vm2, %v12066_v36, %v19900_v35 }
 0x7bc   : > { %v12034_v2 = vsel %vm11824_vm3, %v12033_v19, %v12029_v62 }
 0x7be   : > { %v11549_v21 = vpop.xlane.xlu1 %11548 }
 0x7bf   : > { %v11514_v25 = vpop.xlane.xlu0 %11513  ;;  %v11933_v16 = vrot.slane %v11549_v21, %v19925_v13 }
 0x7c0   : > { %v11900_v38 = vrot.slane %v11514_v25, %v19953_v41 }
 0x7c1   : > { %v11934_v39 = vsel %vm11817_vm2, %v11933_v16, %v19905_v20 }
 0x7c2   : > { %v11901_v18 = vsel %vm11824_vm3, %v11900_v38, %v11896_v51 }
 0x7c5   : > { %v11709_v5 = vpop.xlane.xlu1 %11708 }
 0x7c6   : > { %v11674_v12 = vpop.xlane.xlu0 %11673  ;;  %v12085_v11 = vrot.slane %v11709_v5, %v19925_v13 }
 0x7c7   : > { %v12052_v1 = vrot.slane %v11674_v12, %v19953_v41 }
 0x7c8   : > { %v12086_v35 = vsel %vm11817_vm2, %v12085_v11, %v19910_v37 }
 0x7c9   : > { %v12053_v53 = vsel %vm11824_vm3, %v12052_v1, %v12048_v34 }
 0x7cc   : > { %v11569_v23 = vpop.xlane.xlu1 %11568  ;;  %v11534_v28 = vpop.xlane.xlu0 %11533 }
 0x7cd   : > { %v11952_v0 = vrot.slane %v11569_v23, %v19925_v13  ;;  %v11919_v44 = vrot.slane %v11534_v28, %v19953_v41 }
 0x7cf   : > { %v11953_v20 = vsel %vm11817_vm2, %v11952_v0, %v19916_v59  ;;  %v11920_v8 = vsel %vm11824_vm3, %v11919_v44, %v11915_v61 }
 0x7d0   : > { %v11454_v24 = vpop.xlane.xlu1 %11453  ;;  %v11694_v63 = vpop.xlane.xlu0 %11693 }
 0x7d1   : > { %v11843_v7 = vrot.slane %v11454_v24, %v19953_v41  ;;  %v12071_v37 = vrot.slane %v11694_v63, %v19953_v41 }
 0x7d3   : > { %v11844_v10 = vsel %vm11824_vm3, %v11843_v7, %v19938_v30  ;;  %v12072_v15 = vsel %vm11824_vm3, %v12071_v37, %v12067_v26 }
 0x7d4   : > { %v12112_v43 = vsel %vm12111_vm4, %v11844_v10, %v11825_v45  ;;  %v11594_v4 = vpop.xlane.xlu1 %11593  ;;  %v11554_v59 = vpop.xlane.xlu0 %11553 }
 0x7d5   : > { %v12114_v33 = vsel %vm12113_vm5, %v11863_v50, %v12112_v43  ;;  %v11976_v32 = vrot.slane %v11594_v4, %v19953_v41  ;;  %v11938_v27 = vrot.slane %v11554_v59, %v19953_v41 }
 0x7d6   : > { %v12116_v31 = vsel %vm12115_vm6, %v11882_v22, %v12114_v33 }
 0x7d7   : > { %v11977_v30 = vsel %vm11824_vm3, %v11976_v32, %v19948_v40  ;;  %v11939_v49 = vsel %vm11824_vm3, %v11938_v27, %v11934_v39  ;;  %v12118_v45 = vsel %vm12117_vm7, %v11901_v18, %v12116_v31 }
 0x7d8   : > { %v12125_v62 = vsel %vm12111_vm4, %v19968_v42, %v11977_v30  ;;  %v11729_v48 = vpop.xlane.xlu1 %11728  ;;  %v11714_v29 = vpop.xlane.xlu0 %11713  ;;  %v12120_v60 = vsel %vm12119_vm8, %v11920_v8, %v12118_v45 }
 0x7d9   : > { %v12126_v46 = vsel %vm12113_vm5, %v12015_v6, %v12125_v62  ;;  %v12104_v51 = vrot.slane %v11729_v48, %v19925_v13  ;;  %v12090_v50 = vrot.slane %v11714_v29, %v19953_v41  ;;  %v12122_v3 = vsel %vm12121_vm9, %v11939_v49, %v12120_v60 }
 0x7da   : > { %v12127_v40 = vsel %vm12115_vm6, %v12034_v2, %v12126_v46 }
 0x7db   : > { %v12105_v52 = vsel %vm11817_vm2, %v12104_v51, %v19928_v14  ;;  %v12091_v57 = vsel %vm11824_vm3, %v12090_v50, %v12086_v35  ;;  %v12128_v42 = vsel %vm12117_vm7, %v12053_v53, %v12127_v40 }
 0x7dc   : > { %v11734_v17 = vpop.xlane.xlu1 %11733  ;;  %v11574_v34 = vpop.xlane.xlu0 %11573  ;;  %v12129_v55 = vsel %vm12119_vm8, %v12072_v15, %v12128_v42 }
 0x7dd   : > { %v12109_v6 = vrot.slane %v11734_v17, %v19953_v41  ;;  %v11957_v13 = vrot.slane %v11574_v34, %v19953_v41  ;;  %v12130_v54 = vsel %vm12121_vm9, %v12091_v57, %v12129_v55 }
 0x7df   : > { %v12110_v9 = vsel %vm11824_vm3, %v12109_v6, %v12105_v52  ;;  %v11958_v14 = vsel %vm11824_vm3, %v11957_v13, %v11953_v20 }
 0x7e0   : > { %v12131_v56 = vsel %vm12123_vm10, %v12110_v9, %v12130_v54  ;;  %v12124_v61 = vsel %vm12123_vm10, %v11958_v14, %v12122_v3 }
 0x7e1   : > { %v12138_v22 = vsel %vm12134_vm11, %v12131_v56, 0.0  ;;  %v12135_v58 = vsel %vm12134_vm11, %v12124_v61, 0.0 }
 0x7e2   : > { %12139 = vadd.xlane.f32.xlu1 %v12138_v22  ;;  %12136 = vadd.xlane.f32.xlu0 %v12135_v58 }
 0x86b   : > { %v12140_v47 = vpop.xlane.xlu1 %12139  ;;  %v12137_v36 = vpop.xlane.xlu0 %12136 }
 0x86c   : > { %12143 = vst.msk [vmem:[%s20063_s5 + $0x8] sm:$0xff] %vm12141_vm12, %v12140_v47  ;;  %12142 = vst.msk [vmem:[%s20063_s5] sm:$0xff] %vm12141_vm12, %v12137_v36 }
 0x86d PF: > { %s15_s22 = sadd.s32 1, %s15620_s22   ;;  %s20685_s18 = smov %s15608_s19 }
 0x86e   : > { %p12_p12 = scmp.ge.s32.totalorder %s15_s22, 5   ;;  %s20686_s19 = smov %s15689_s26 }
 0x86f   : > { %s20687_s20 = smov %s15616_s21  ;;  %s20688_s21 = smov %s20690_s23 }
 0x870   :  { %14 = sbr.rel (!%p12_p12) target bundleno = 3 (0x3), region = 115 }

</bundles_post_ra>
